<compile_context>
chip_gen: v6e
topology: v6e:2x2x1
jax: 0.10.0
libtpu: 0.0.40
codegen_flags: <defaults>
</compile_context>

<pallas_src>
import jax
import jax.numpy as jnp
from jax.experimental import pallas as pl
from jax.experimental.pallas import tpu as pltpu

OUT_DIM = 27
HIDDEN = 79               # LSTM input/hidden size (= pooled time length)
NUM_LSTM_LAYERS = 3

# ---- static problem sizes (T=161 so floor((T-3)/2)=79 = LSTM input size) ----
T_IN = 161
C_IN = 101
K1, PAD1, C1_OUT = 10, 3, 120
K2, PAD2, C2_OUT = 7, 3, 90
L_OUT = T_IN + 2 * PAD1 - K1 + 1      # 158 = conv1 and conv2 output length
L_OUT_PAD = 160                       # rows computed in-kernel (multiple of 8)
X_ROWS = 176                          # >= L_OUT_PAD + K1 - 1 = 169
C1P_ROWS = 168                        # >= L_OUT_PAD + K2 - 1 = 166
LANES = 128                           # padded lane width everywhere
POOLED = L_OUT // 2                   # 79
SEQ = C2_OUT                          # 90 LSTM steps (sequence over conv channels)
SEQ_PAD = 96                          # rows padded to multiple of 8
HP = 128                              # padded hidden width
GATES = 4 * HP                        # 512 — fused [i,f,g,o] gate lanes

_SELU_ALPHA = 1.6732632423543772
_SELU_SCALE = 1.0507009873554805


def _selu(x):
    return _SELU_SCALE * jnp.where(x > 0, x, _SELU_ALPHA * (jnp.exp(x) - 1.0))


# --------------------------- kernel A: conv stack ---------------------------

def _conv_stack_kernel(x_ref, w1_ref, b1_ref, w2_ref, b2_ref, o_ref,
                       acc_scr, c1p_scr):
    # conv1: accumulate the k=10 taps as shifted (160,128)@(128,128) matmuls.
    acc_scr[...] = jnp.zeros_like(acc_scr)
    for j in range(K1):
        acc_scr[...] += jnp.dot(x_ref[pl.ds(j, L_OUT_PAD), :], w1_ref[j],
                                preferred_element_type=jnp.float32)
    c1 = _selu(acc_scr[...] + b1_ref[...])
    # rows >= 158 are over-computed tail; they must act as conv2 zero padding.
    row = jax.lax.broadcasted_iota(jnp.int32, c1.shape, 0)
    c1 = jnp.where(row < L_OUT, c1, 0.0)
    # place conv1 output at row offset PAD2 so conv2's zero padding is built in.
    c1p_scr[...] = jnp.zeros_like(c1p_scr)
    c1p_scr[pl.ds(PAD2, L_OUT_PAD), :] = c1
    # conv2: same shifted-row accumulation over k=7 taps.
    acc_scr[...] = jnp.zeros_like(acc_scr)
    for j in range(K2):
        acc_scr[...] += jnp.dot(c1p_scr[pl.ds(j, L_OUT_PAD), :], w2_ref[j],
                                preferred_element_type=jnp.float32)
    o_ref[...] = _selu(acc_scr[...] + b2_ref[...])


def conv_stack(xpad, w1, b1, w2, b2):
    return pl.pallas_call(
        _conv_stack_kernel,
        out_shape=jax.ShapeDtypeStruct((L_OUT_PAD, LANES), jnp.float32),
        scratch_shapes=[pltpu.VMEM((L_OUT_PAD, LANES), jnp.float32),
                        pltpu.VMEM((C1P_ROWS, LANES), jnp.float32)],
    )(xpad, w1, b1, w2, b2)


# ----------------------- kernel B: LSTM stack + head ------------------------

def _lstm_head_kernel(x_ref, wih_ref, whh_ref, b_ref,
                      w1_ref, b1_ref, w2_ref, b2_ref, w3_ref, b3_ref,
                      o_ref, act_scr, xproj_scr, h_scr, c_scr):
    # act_scr holds the current layer's input, overwritten in place with its
    # output (safe: the input is fully consumed by the xproj precompute).
    act_scr[...] = x_ref[...]

    for layer in range(NUM_LSTM_LAYERS):
        # Precompute x_t @ Wih + b for ALL timesteps: one MXU-friendly GEMM
        # (96,128)@(128,512) instead of 90 tiny GEMVs in the serial loop.
        xproj_scr[...] = (jnp.dot(act_scr[...], wih_ref[layer],
                                  preferred_element_type=jnp.float32)
                          + b_ref[layer])
        h_scr[...] = jnp.zeros_like(h_scr)
        c_scr[...] = jnp.zeros_like(c_scr)

        @pl.loop(0, SEQ)
        def _(t):
            # Single fused-gate matmul per step: (1,128)@(128,512).
            gates = (xproj_scr[pl.ds(t, 1), :]
                     + jnp.dot(h_scr[...], whh_ref[layer],
                               preferred_element_type=jnp.float32))
            i = jax.nn.sigmoid(gates[:, 0 * HP:1 * HP])
            f = jax.nn.sigmoid(gates[:, 1 * HP:2 * HP])
            g = jnp.tanh(gates[:, 2 * HP:3 * HP])
            o = jax.nn.sigmoid(gates[:, 3 * HP:4 * HP])
            c = f * c_scr[...] + i * g
            h_new = o * jnp.tanh(c)
            c_scr[...] = c
            h_scr[...] = h_new
            act_scr[pl.ds(t, 1), :] = h_new          # 128-lane dense store
        # TODO(synk): inter-layer LSTM dropout(0.4) is train-only; identity in eval.

    # hidden0 (Linear+SELU x2, Dropout=identity) + out (Linear+SELU) + log_softmax
    acts = act_scr[...]
    h1 = _selu(jnp.dot(acts, w1_ref[...], preferred_element_type=jnp.float32)
               + b1_ref[...])
    h2 = _selu(jnp.dot(h1, w2_ref[...], preferred_element_type=jnp.float32)
               + b2_ref[...])
    h3 = _selu(jnp.dot(h2, w3_ref[...], preferred_element_type=jnp.float32)
               + b3_ref[...])
    # log_softmax over the 27 real classes only (lanes >= 27 are padding).
    lane = jax.lax.broadcasted_iota(jnp.int32, h3.shape, 1)
    valid = lane < OUT_DIM
    m = jnp.max(jnp.where(valid, h3, -1e30), axis=-1, keepdims=True)
    s = h3 - m
    lse = jnp.log(jnp.sum(jnp.where(valid, jnp.exp(s), 0.0),
                          axis=-1, keepdims=True))
    o_ref[...] = s - lse


def lstm_head(x, wih, whh, b, w1, b1, w2, b2, w3, b3):
    return pl.pallas_call(
        _lstm_head_kernel,
        out_shape=jax.ShapeDtypeStruct((SEQ_PAD, LANES), jnp.float32),
        scratch_shapes=[pltpu.VMEM((SEQ_PAD, LANES), jnp.float32),   # activations
                        pltpu.VMEM((SEQ_PAD, GATES), jnp.float32),   # x-projection
                        pltpu.VMEM((1, HP), jnp.float32),            # h state
                        pltpu.VMEM((1, HP), jnp.float32)],           # c state
    )(x, wih, whh, b, w1, b1, w2, b2, w3, b3)


# ------------------------------ JAX glue ------------------------------------

def simple_nn_forward(params, x, train=False, noise_key=None):
    """x: (1, T, 101) float32 — same layout the PyTorch forward receives."""
    if train:
        # PyTorch train path adds N(0, 1.1) noise to the input (JAX glue).
        x = x + 1.1 * jax.random.normal(noise_key, x.shape, x.dtype)
    xb = x[0]                                                      # (161, 101)

    # conv1's padding=3 plus row/lane zero-padding to TPU-friendly (176, 128).
    xp = jnp.pad(xb, ((PAD1, X_ROWS - T_IN - PAD1), (0, LANES - C_IN)))
    c2 = conv_stack(xp, params['conv1_w'], params['conv1_b'],
                    params['conv2_w'], params['conv2_b'])          # (160, 128)

    # AvgPool1d(2) over time + permute(1,0,2) — tiny, kept in JAX glue.
    y = c2[:L_OUT, :C2_OUT]                                        # (158, 90)
    pooled = 0.5 * (y[0::2] + y[1::2])                             # (79, 90)
    h0 = pooled.T                                                  # (90, 79): seq over conv channels
    h0p = jnp.pad(h0, ((0, SEQ_PAD - SEQ), (0, LANES - HIDDEN)))   # (96, 128)

    outp = lstm_head(h0p,
                     params['lstm_wih'], params['lstm_whh'], params['lstm_b'],
                     params['fc1_w'], params['fc1_b'],
                     params['fc2_w'], params['fc2_b'],
                     params['fc3_w'], params['fc3_b'])             # (96, 128)
    return outp[:SEQ, :OUT_DIM]                                    # (90, 27)


def init_params(key):
    """Generate PyTorch-layout weights, then pre-pack/pad them ONCE for the kernels."""
    ks = jax.random.split(key, 14)

    def u(k, shape, bound):
        return jax.random.uniform(k, shape, jnp.float32, -bound, bound)

    def pad2(a, rows, cols):
        return jnp.zeros((rows, cols), jnp.float32).at[:a.shape[0], :a.shape[1]].set(a)

    h = HIDDEN
    conv1_w = u(ks[0], (C1_OUT, C_IN, K1), 0.03)   # PyTorch (C_out, C_in, K)
    conv1_b = u(ks[1], (C1_OUT,), 0.03)
    conv2_w = u(ks[2], (C2_OUT, C1_OUT, K2), 0.03)
    conv2_b = u(ks[3], (C2_OUT,), 0.03)
    fc1_w = u(ks[8], (90, 79), 0.08)               # PyTorch Linear (out, in)
    fc1_b = u(ks[9], (90,), 0.08)
    fc2_w = u(ks[10], (32, 90), 0.08)
    fc2_b = u(ks[11], (32,), 0.08)
    fc3_w = u(ks[12], (OUT_DIM, 32), 0.15)
    fc3_b = u(ks[13], (OUT_DIM,), 0.15)

    # conv weights -> (K, C_in_pad, C_out_pad) with w[k, ci, co] = torch_w[co, ci, k]
    c1w = jnp.transpose(conv1_w, (2, 1, 0))        # (10, 101, 120)
    c2w = jnp.transpose(conv2_w, (2, 1, 0))        # (7, 120, 90)
    params = {
        'conv1_w': jnp.stack([pad2(c1w[j], LANES, LANES) for j in range(K1)]),
        'conv1_b': pad2(conv1_b.reshape(1, -1), 1, LANES),
        'conv2_w': jnp.stack([pad2(c2w[j], LANES, LANES) for j in range(K2)]),
        'conv2_b': pad2(conv2_b.reshape(1, -1), 1, LANES),
        'fc1_w': pad2(fc1_w.T, LANES, LANES),
        'fc1_b': pad2(fc1_b.reshape(1, -1), 1, LANES),
        'fc2_w': pad2(fc2_w.T, LANES, LANES),
        'fc2_b': pad2(fc2_b.reshape(1, -1), 1, LANES),
        'fc3_w': pad2(fc3_w.T, LANES, LANES),
        'fc3_b': pad2(fc3_b.reshape(1, -1), 1, LANES),
    }

    # LSTM: PyTorch (4H, In)/(4H, H), gate order [i,f,g,o].  Pack gates along the
    # lane dim, each gate padded to its own 128-lane block, so one matmul yields
    # all four gates; pad columns/bias are 0 so padded h/c lanes stay exactly 0.
    bound = 1.0 / (h ** 0.5)
    wih_all, whh_all, b_all = [], [], []
    for layer in range(NUM_LSTM_LAYERS):
        k0, k1, k2, k3 = jax.random.split(ks[4 + layer], 4)
        wih = u(k0, (4 * h, h), bound)
        whh = u(k1, (4 * h, h), bound)
        bih = u(k2, (4 * h,), bound)
        bhh = u(k3, (4 * h,), bound)
        wih_g = wih.reshape(4, h, h)
        whh_g = whh.reshape(4, h, h)
        b_g = (bih + bhh).reshape(4, h)
        wih_p = jnp.zeros((LANES, GATES), jnp.float32)
        whh_p = jnp.zeros((LANES, GATES), jnp.float32)
        b_p = jnp.zeros((1, GATES), jnp.float32)
        for g in range(4):
            wih_p = wih_p.at[:h, g * HP:g * HP + h].set(wih_g[g].T)
            whh_p = whh_p.at[:h, g * HP:g * HP + h].set(whh_g[g].T)
            b_p = b_p.at[0, g * HP:g * HP + h].set(b_g[g])
        wih_all.append(wih_p)
        whh_all.append(whh_p)
        b_all.append(b_p)
    params['lstm_wih'] = jnp.stack(wih_all)        # (3, 128, 512)
    params['lstm_whh'] = jnp.stack(whh_all)        # (3, 128, 512)
    params['lstm_b'] = jnp.stack(b_all)            # (3, 1, 512)
    return params


if __name__ == "__main__":
    key = jax.random.PRNGKey(0)
    pkey, xkey = jax.random.split(key)
    params = init_params(pkey)
    # T=161 so that floor((T-3)/2)=79 matches the LSTM input size; batch=1 for squeeze(1).
    x = jax.random.normal(xkey, (1, T_IN, C_IN), jnp.float32)
    fwd = jax.jit(lambda p, xx: simple_nn_forward(p, xx, train=False))
    out = fwd(params, x)
    out = jax.block_until_ready(out)
    assert out.shape == (SEQ, OUT_DIM), out.shape
    assert bool(jnp.all(jnp.isfinite(out)))
    print("KERNEL_OK")
</pallas_src>

<mosaic_0001>
module attributes {stable_mosaic.version = 11 : i64} {
  func.func @_conv_stack_kernel(%arg0: memref<176x128xf32, #tpu.memory_space<vmem>>, %arg1: memref<10x128x128xf32, #tpu.memory_space<vmem>>, %arg2: memref<1x128xf32, #tpu.memory_space<vmem>>, %arg3: memref<7x128x128xf32, #tpu.memory_space<vmem>>, %arg4: memref<1x128xf32, #tpu.memory_space<vmem>>, %arg5: memref<160x128xf32, #tpu.memory_space<vmem>>, %arg6: memref<160x128xf32, #tpu.memory_space<vmem>>, %arg7: memref<168x128xf32, #tpu.memory_space<vmem>>) attributes {dimension_semantics = [], scalar_prefetch = 0 : i64, scratch_operands = 2 : i64, tpu.core_type = #tpu.core_type<tc>} {
    %cst = arith.constant 0.000000e+00 : f32
    %0 = vector.broadcast %cst : f32 to vector<160x128xf32>
    %c0 = arith.constant 0 : index
    %c0_0 = arith.constant 0 : index
    %1 = vector.load %arg6[%c0, %c0_0] : memref<160x128xf32, #tpu.memory_space<vmem>>, vector<160x128xf32>
    tpu.vector_store %arg6[%c0, %c0_0], %0 {strides = array<i32>} : memref<160x128xf32, #tpu.memory_space<vmem>>, vector<160x128xf32>,
    %c0_1 = arith.constant 0 : index
    %c0_2 = arith.constant 0 : index
    %2 = vector.load %arg6[%c0_1, %c0_2] : memref<160x128xf32, #tpu.memory_space<vmem>>, vector<160x128xf32>
    %c0_3 = arith.constant 0 : index
    %c0_4 = arith.constant 0 : index
    %3 = vector.load %arg0[%c0_3, %c0_4] : memref<176x128xf32, #tpu.memory_space<vmem>>, vector<160x128xf32>
    %c0_5 = arith.constant 0 : index
    %c0_6 = arith.constant 0 : index
    %c0_7 = arith.constant 0 : index
    %4 = vector.load %arg1[%c0_5, %c0_6, %c0_7] : memref<10x128x128xf32, #tpu.memory_space<vmem>>, vector<1x128x128xf32>
    %5 = vector.shape_cast %4 : vector<1x128x128xf32> to vector<128x128xf32>
    %cst_8 = arith.constant dense<0.000000e+00> : vector<160x128xf32>
    %6 = tpu.matmul %3, %5, %cst_8 {dimension_numbers = #tpu.dot_dimension_numbers<[1], [0], [0], [1], [0, 0, 1, 1], [], []>} : vector<160x128xf32>, vector<128x128xf32>, vector<160x128xf32> -> vector<160x128xf32>
    %7 = arith.addf %2, %6 : vector<160x128xf32>
    %c0_9 = arith.constant 0 : index
    %c0_10 = arith.constant 0 : index
    %8 = vector.load %arg6[%c0_9, %c0_10] : memref<160x128xf32, #tpu.memory_space<vmem>>, vector<160x128xf32>
    tpu.vector_store %arg6[%c0_9, %c0_10], %7 {strides = array<i32>} : memref<160x128xf32, #tpu.memory_space<vmem>>, vector<160x128xf32>,
    %c0_11 = arith.constant 0 : index
    %c0_12 = arith.constant 0 : index
    %9 = vector.load %arg6[%c0_11, %c0_12] : memref<160x128xf32, #tpu.memory_space<vmem>>, vector<160x128xf32>
    %c1 = arith.constant 1 : index
    %c0_13 = arith.constant 0 : index
    %10 = vector.load %arg0[%c1, %c0_13] : memref<176x128xf32, #tpu.memory_space<vmem>>, vector<160x128xf32>
    %c1_14 = arith.constant 1 : index
    %c0_15 = arith.constant 0 : index
    %c0_16 = arith.constant 0 : index
    %11 = vector.load %arg1[%c1_14, %c0_15, %c0_16] : memref<10x128x128xf32, #tpu.memory_space<vmem>>, vector<1x128x128xf32>
    %12 = vector.shape_cast %11 : vector<1x128x128xf32> to vector<128x128xf32>
    %cst_17 = arith.constant dense<0.000000e+00> : vector<160x128xf32>
    %13 = tpu.matmul %10, %12, %cst_17 {dimension_numbers = #tpu.dot_dimension_numbers<[1], [0], [0], [1], [0, 0, 1, 1], [], []>} : vector<160x128xf32>, vector<128x128xf32>, vector<160x128xf32> -> vector<160x128xf32>
    %14 = arith.addf %9, %13 : vector<160x128xf32>
    %c0_18 = arith.constant 0 : index
    %c0_19 = arith.constant 0 : index
    %15 = vector.load %arg6[%c0_18, %c0_19] : memref<160x128xf32, #tpu.memory_space<vmem>>, vector<160x128xf32>
    tpu.vector_store %arg6[%c0_18, %c0_19], %14 {strides = array<i32>} : memref<160x128xf32, #tpu.memory_space<vmem>>, vector<160x128xf32>,
    %c0_20 = arith.constant 0 : index
    %c0_21 = arith.constant 0 : index
    %16 = vector.load %arg6[%c0_20, %c0_21] : memref<160x128xf32, #tpu.memory_space<vmem>>, vector<160x128xf32>
    %c2 = arith.constant 2 : index
    %c0_22 = arith.constant 0 : index
    %17 = vector.load %arg0[%c2, %c0_22] : memref<176x128xf32, #tpu.memory_space<vmem>>, vector<160x128xf32>
    %c2_23 = arith.constant 2 : index
    %c0_24 = arith.constant 0 : index
    %c0_25 = arith.constant 0 : index
    %18 = vector.load %arg1[%c2_23, %c0_24, %c0_25] : memref<10x128x128xf32, #tpu.memory_space<vmem>>, vector<1x128x128xf32>
    %19 = vector.shape_cast %18 : vector<1x128x128xf32> to vector<128x128xf32>
    %cst_26 = arith.constant dense<0.000000e+00> : vector<160x128xf32>
    %20 = tpu.matmul %17, %19, %cst_26 {dimension_numbers = #tpu.dot_dimension_numbers<[1], [0], [0], [1], [0, 0, 1, 1], [], []>} : vector<160x128xf32>, vector<128x128xf32>, vector<160x128xf32> -> vector<160x128xf32>
    %21 = arith.addf %16, %20 : vector<160x128xf32>
    %c0_27 = arith.constant 0 : index
    %c0_28 = arith.constant 0 : index
    %22 = vector.load %arg6[%c0_27, %c0_28] : memref<160x128xf32, #tpu.memory_space<vmem>>, vector<160x128xf32>
    tpu.vector_store %arg6[%c0_27, %c0_28], %21 {strides = array<i32>} : memref<160x128xf32, #tpu.memory_space<vmem>>, vector<160x128xf32>,
    %c0_29 = arith.constant 0 : index
    %c0_30 = arith.constant 0 : index
    %23 = vector.load %arg6[%c0_29, %c0_30] : memref<160x128xf32, #tpu.memory_space<vmem>>, vector<160x128xf32>
    %c3 = arith.constant 3 : index
    %c0_31 = arith.constant 0 : index
    %24 = vector.load %arg0[%c3, %c0_31] : memref<176x128xf32, #tpu.memory_space<vmem>>, vector<160x128xf32>
    %c3_32 = arith.constant 3 : index
    %c0_33 = arith.constant 0 : index
    %c0_34 = arith.constant 0 : index
    %25 = vector.load %arg1[%c3_32, %c0_33, %c0_34] : memref<10x128x128xf32, #tpu.memory_space<vmem>>, vector<1x128x128xf32>
    %26 = vector.shape_cast %25 : vector<1x128x128xf32> to vector<128x128xf32>
    %cst_35 = arith.constant dense<0.000000e+00> : vector<160x128xf32>
    %27 = tpu.matmul %24, %26, %cst_35 {dimension_numbers = #tpu.dot_dimension_numbers<[1], [0], [0], [1], [0, 0, 1, 1], [], []>} : vector<160x128xf32>, vector<128x128xf32>, vector<160x128xf32> -> vector<160x128xf32>
    %28 = arith.addf %23, %27 : vector<160x128xf32>
    %c0_36 = arith.constant 0 : index
    %c0_37 = arith.constant 0 : index
    %29 = vector.load %arg6[%c0_36, %c0_37] : memref<160x128xf32, #tpu.memory_space<vmem>>, vector<160x128xf32>
    tpu.vector_store %arg6[%c0_36, %c0_37], %28 {strides = array<i32>} : memref<160x128xf32, #tpu.memory_space<vmem>>, vector<160x128xf32>,
    %c0_38 = arith.constant 0 : index
    %c0_39 = arith.constant 0 : index
    %30 = vector.load %arg6[%c0_38, %c0_39] : memref<160x128xf32, #tpu.memory_space<vmem>>, vector<160x128xf32>
    %c4 = arith.constant 4 : index
    %c0_40 = arith.constant 0 : index
    %31 = vector.load %arg0[%c4, %c0_40] : memref<176x128xf32, #tpu.memory_space<vmem>>, vector<160x128xf32>
    %c4_41 = arith.constant 4 : index
    %c0_42 = arith.constant 0 : index
    %c0_43 = arith.constant 0 : index
    %32 = vector.load %arg1[%c4_41, %c0_42, %c0_43] : memref<10x128x128xf32, #tpu.memory_space<vmem>>, vector<1x128x128xf32>
    %33 = vector.shape_cast %32 : vector<1x128x128xf32> to vector<128x128xf32>
    %cst_44 = arith.constant dense<0.000000e+00> : vector<160x128xf32>
    %34 = tpu.matmul %31, %33, %cst_44 {dimension_numbers = #tpu.dot_dimension_numbers<[1], [0], [0], [1], [0, 0, 1, 1], [], []>} : vector<160x128xf32>, vector<128x128xf32>, vector<160x128xf32> -> vector<160x128xf32>
    %35 = arith.addf %30, %34 : vector<160x128xf32>
    %c0_45 = arith.constant 0 : index
    %c0_46 = arith.constant 0 : index
    %36 = vector.load %arg6[%c0_45, %c0_46] : memref<160x128xf32, #tpu.memory_space<vmem>>, vector<160x128xf32>
    tpu.vector_store %arg6[%c0_45, %c0_46], %35 {strides = array<i32>} : memref<160x128xf32, #tpu.memory_space<vmem>>, vector<160x128xf32>,
    %c0_47 = arith.constant 0 : index
    %c0_48 = arith.constant 0 : index
    %37 = vector.load %arg6[%c0_47, %c0_48] : memref<160x128xf32, #tpu.memory_space<vmem>>, vector<160x128xf32>
    %c5 = arith.constant 5 : index
    %c0_49 = arith.constant 0 : index
    %38 = vector.load %arg0[%c5, %c0_49] : memref<176x128xf32, #tpu.memory_space<vmem>>, vector<160x128xf32>
    %c5_50 = arith.constant 5 : index
    %c0_51 = arith.constant 0 : index
    %c0_52 = arith.constant 0 : index
    %39 = vector.load %arg1[%c5_50, %c0_51, %c0_52] : memref<10x128x128xf32, #tpu.memory_space<vmem>>, vector<1x128x128xf32>
    %40 = vector.shape_cast %39 : vector<1x128x128xf32> to vector<128x128xf32>
    %cst_53 = arith.constant dense<0.000000e+00> : vector<160x128xf32>
    %41 = tpu.matmul %38, %40, %cst_53 {dimension_numbers = #tpu.dot_dimension_numbers<[1], [0], [0], [1], [0, 0, 1, 1], [], []>} : vector<160x128xf32>, vector<128x128xf32>, vector<160x128xf32> -> vector<160x128xf32>
    %42 = arith.addf %37, %41 : vector<160x128xf32>
    %c0_54 = arith.constant 0 : index
    %c0_55 = arith.constant 0 : index
    %43 = vector.load %arg6[%c0_54, %c0_55] : memref<160x128xf32, #tpu.memory_space<vmem>>, vector<160x128xf32>
    tpu.vector_store %arg6[%c0_54, %c0_55], %42 {strides = array<i32>} : memref<160x128xf32, #tpu.memory_space<vmem>>, vector<160x128xf32>,
    %c0_56 = arith.constant 0 : index
    %c0_57 = arith.constant 0 : index
    %44 = vector.load %arg6[%c0_56, %c0_57] : memref<160x128xf32, #tpu.memory_space<vmem>>, vector<160x128xf32>
    %c6 = arith.constant 6 : index
    %c0_58 = arith.constant 0 : index
    %45 = vector.load %arg0[%c6, %c0_58] : memref<176x128xf32, #tpu.memory_space<vmem>>, vector<160x128xf32>
    %c6_59 = arith.constant 6 : index
    %c0_60 = arith.constant 0 : index
    %c0_61 = arith.constant 0 : index
    %46 = vector.load %arg1[%c6_59, %c0_60, %c0_61] : memref<10x128x128xf32, #tpu.memory_space<vmem>>, vector<1x128x128xf32>
    %47 = vector.shape_cast %46 : vector<1x128x128xf32> to vector<128x128xf32>
    %cst_62 = arith.constant dense<0.000000e+00> : vector<160x128xf32>
    %48 = tpu.matmul %45, %47, %cst_62 {dimension_numbers = #tpu.dot_dimension_numbers<[1], [0], [0], [1], [0, 0, 1, 1], [], []>} : vector<160x128xf32>, vector<128x128xf32>, vector<160x128xf32> -> vector<160x128xf32>
    %49 = arith.addf %44, %48 : vector<160x128xf32>
    %c0_63 = arith.constant 0 : index
    %c0_64 = arith.constant 0 : index
    %50 = vector.load %arg6[%c0_63, %c0_64] : memref<160x128xf32, #tpu.memory_space<vmem>>, vector<160x128xf32>
    tpu.vector_store %arg6[%c0_63, %c0_64], %49 {strides = array<i32>} : memref<160x128xf32, #tpu.memory_space<vmem>>, vector<160x128xf32>,
    %c0_65 = arith.constant 0 : index
    %c0_66 = arith.constant 0 : index
    %51 = vector.load %arg6[%c0_65, %c0_66] : memref<160x128xf32, #tpu.memory_space<vmem>>, vector<160x128xf32>
    %c7 = arith.constant 7 : index
    %c0_67 = arith.constant 0 : index
    %52 = vector.load %arg0[%c7, %c0_67] : memref<176x128xf32, #tpu.memory_space<vmem>>, vector<160x128xf32>
    %c7_68 = arith.constant 7 : index
    %c0_69 = arith.constant 0 : index
    %c0_70 = arith.constant 0 : index
    %53 = vector.load %arg1[%c7_68, %c0_69, %c0_70] : memref<10x128x128xf32, #tpu.memory_space<vmem>>, vector<1x128x128xf32>
    %54 = vector.shape_cast %53 : vector<1x128x128xf32> to vector<128x128xf32>
    %cst_71 = arith.constant dense<0.000000e+00> : vector<160x128xf32>
    %55 = tpu.matmul %52, %54, %cst_71 {dimension_numbers = #tpu.dot_dimension_numbers<[1], [0], [0], [1], [0, 0, 1, 1], [], []>} : vector<160x128xf32>, vector<128x128xf32>, vector<160x128xf32> -> vector<160x128xf32>
    %56 = arith.addf %51, %55 : vector<160x128xf32>
    %c0_72 = arith.constant 0 : index
    %c0_73 = arith.constant 0 : index
    %57 = vector.load %arg6[%c0_72, %c0_73] : memref<160x128xf32, #tpu.memory_space<vmem>>, vector<160x128xf32>
    tpu.vector_store %arg6[%c0_72, %c0_73], %56 {strides = array<i32>} : memref<160x128xf32, #tpu.memory_space<vmem>>, vector<160x128xf32>,
    %c0_74 = arith.constant 0 : index
    %c0_75 = arith.constant 0 : index
    %58 = vector.load %arg6[%c0_74, %c0_75] : memref<160x128xf32, #tpu.memory_space<vmem>>, vector<160x128xf32>
    %c8 = arith.constant 8 : index
    %c0_76 = arith.constant 0 : index
    %59 = vector.load %arg0[%c8, %c0_76] : memref<176x128xf32, #tpu.memory_space<vmem>>, vector<160x128xf32>
    %c8_77 = arith.constant 8 : index
    %c0_78 = arith.constant 0 : index
    %c0_79 = arith.constant 0 : index
    %60 = vector.load %arg1[%c8_77, %c0_78, %c0_79] : memref<10x128x128xf32, #tpu.memory_space<vmem>>, vector<1x128x128xf32>
    %61 = vector.shape_cast %60 : vector<1x128x128xf32> to vector<128x128xf32>
    %cst_80 = arith.constant dense<0.000000e+00> : vector<160x128xf32>
    %62 = tpu.matmul %59, %61, %cst_80 {dimension_numbers = #tpu.dot_dimension_numbers<[1], [0], [0], [1], [0, 0, 1, 1], [], []>} : vector<160x128xf32>, vector<128x128xf32>, vector<160x128xf32> -> vector<160x128xf32>
    %63 = arith.addf %58, %62 : vector<160x128xf32>
    %c0_81 = arith.constant 0 : index
    %c0_82 = arith.constant 0 : index
    %64 = vector.load %arg6[%c0_81, %c0_82] : memref<160x128xf32, #tpu.memory_space<vmem>>, vector<160x128xf32>
    tpu.vector_store %arg6[%c0_81, %c0_82], %63 {strides = array<i32>} : memref<160x128xf32, #tpu.memory_space<vmem>>, vector<160x128xf32>,
    %c0_83 = arith.constant 0 : index
    %c0_84 = arith.constant 0 : index
    %65 = vector.load %arg6[%c0_83, %c0_84] : memref<160x128xf32, #tpu.memory_space<vmem>>, vector<160x128xf32>
    %c9 = arith.constant 9 : index
    %c0_85 = arith.constant 0 : index
    %66 = vector.load %arg0[%c9, %c0_85] : memref<176x128xf32, #tpu.memory_space<vmem>>, vector<160x128xf32>
    %c9_86 = arith.constant 9 : index
    %c0_87 = arith.constant 0 : index
    %c0_88 = arith.constant 0 : index
    %67 = vector.load %arg1[%c9_86, %c0_87, %c0_88] : memref<10x128x128xf32, #tpu.memory_space<vmem>>, vector<1x128x128xf32>
    %68 = vector.shape_cast %67 : vector<1x128x128xf32> to vector<128x128xf32>
    %cst_89 = arith.constant dense<0.000000e+00> : vector<160x128xf32>
    %69 = tpu.matmul %66, %68, %cst_89 {dimension_numbers = #tpu.dot_dimension_numbers<[1], [0], [0], [1], [0, 0, 1, 1], [], []>} : vector<160x128xf32>, vector<128x128xf32>, vector<160x128xf32> -> vector<160x128xf32>
    %70 = arith.addf %65, %69 : vector<160x128xf32>
    %c0_90 = arith.constant 0 : index
    %c0_91 = arith.constant 0 : index
    %71 = vector.load %arg6[%c0_90, %c0_91] : memref<160x128xf32, #tpu.memory_space<vmem>>, vector<160x128xf32>
    tpu.vector_store %arg6[%c0_90, %c0_91], %70 {strides = array<i32>} : memref<160x128xf32, #tpu.memory_space<vmem>>, vector<160x128xf32>,
    %c0_92 = arith.constant 0 : index
    %c0_93 = arith.constant 0 : index
    %72 = vector.load %arg6[%c0_92, %c0_93] : memref<160x128xf32, #tpu.memory_space<vmem>>, vector<160x128xf32>
    %c0_94 = arith.constant 0 : index
    %c0_95 = arith.constant 0 : index
    %73 = vector.load %arg2[%c0_94, %c0_95] : memref<1x128xf32, #tpu.memory_space<vmem>>, vector<1x128xf32>
    %74 = vector.broadcast %73 : vector<1x128xf32> to vector<160x128xf32>
    %75 = arith.addf %72, %74 : vector<160x128xf32>
    %cst_96 = arith.constant 0.000000e+00 : f32
    %76 = vector.broadcast %cst_96 : f32 to vector<160x128xf32>
    %77 = arith.cmpf ogt, %75, %76 : vector<160x128xf32>
    %78 = math.exp %75 : vector<160x128xf32>
    %cst_97 = arith.constant 1.000000e+00 : f32
    %79 = vector.broadcast %cst_97 : f32 to vector<160x128xf32>
    %80 = arith.subf %78, %79 : vector<160x128xf32>
    %cst_98 = arith.constant 1.67326319 : f32
    %81 = vector.broadcast %cst_98 : f32 to vector<160x128xf32>
    %82 = arith.mulf %81, %80 : vector<160x128xf32>
    %83 = arith.select %77, %75, %82 : vector<160x128xi1>, vector<160x128xf32>
    %cst_99 = arith.constant 1.05070102 : f32
    %84 = vector.broadcast %cst_99 : f32 to vector<160x128xf32>
    %85 = arith.mulf %84, %83 : vector<160x128xf32>
    %86 = tpu.iota {dimensions = array<i32: 0>} : vector<160x128xi32>
    %c158_i32 = arith.constant 158 : i32
    %87 = vector.broadcast %c158_i32 : i32 to vector<160x128xi32>
    %88 = arith.cmpi slt, %86, %87 : vector<160x128xi32>
    %cst_100 = arith.constant 0.000000e+00 : f32
    %89 = vector.broadcast %cst_100 : f32 to vector<160x128xf32>
    %90 = arith.select %88, %85, %89 : vector<160x128xi1>, vector<160x128xf32>
    %cst_101 = arith.constant 0.000000e+00 : f32
    %91 = vector.broadcast %cst_101 : f32 to vector<168x128xf32>
    %c0_102 = arith.constant 0 : index
    %c0_103 = arith.constant 0 : index
    %92 = vector.load %arg7[%c0_102, %c0_103] : memref<168x128xf32, #tpu.memory_space<vmem>>, vector<168x128xf32>
    tpu.vector_store %arg7[%c0_102, %c0_103], %91 {strides = array<i32>} : memref<168x128xf32, #tpu.memory_space<vmem>>, vector<168x128xf32>,
    %c3_104 = arith.constant 3 : index
    %c0_105 = arith.constant 0 : index
    %93 = vector.load %arg7[%c3_104, %c0_105] : memref<168x128xf32, #tpu.memory_space<vmem>>, vector<160x128xf32>
    tpu.vector_store %arg7[%c3_104, %c0_105], %90 {strides = array<i32>} : memref<168x128xf32, #tpu.memory_space<vmem>>, vector<160x128xf32>,
    %cst_106 = arith.constant 0.000000e+00 : f32
    %94 = vector.broadcast %cst_106 : f32 to vector<160x128xf32>
    %c0_107 = arith.constant 0 : index
    %c0_108 = arith.constant 0 : index
    %95 = vector.load %arg6[%c0_107, %c0_108] : memref<160x128xf32, #tpu.memory_space<vmem>>, vector<160x128xf32>
    tpu.vector_store %arg6[%c0_107, %c0_108], %94 {strides = array<i32>} : memref<160x128xf32, #tpu.memory_space<vmem>>, vector<160x128xf32>,
    %c0_109 = arith.constant 0 : index
    %c0_110 = arith.constant 0 : index
    %96 = vector.load %arg6[%c0_109, %c0_110] : memref<160x128xf32, #tpu.memory_space<vmem>>, vector<160x128xf32>
    %c0_111 = arith.constant 0 : index
    %c0_112 = arith.constant 0 : index
    %97 = vector.load %arg7[%c0_111, %c0_112] : memref<168x128xf32, #tpu.memory_space<vmem>>, vector<160x128xf32>
    %c0_113 = arith.constant 0 : index
    %c0_114 = arith.constant 0 : index
    %c0_115 = arith.constant 0 : index
    %98 = vector.load %arg3[%c0_113, %c0_114, %c0_115] : memref<7x128x128xf32, #tpu.memory_space<vmem>>, vector<1x128x128xf32>
    %99 = vector.shape_cast %98 : vector<1x128x128xf32> to vector<128x128xf32>
    %cst_116 = arith.constant dense<0.000000e+00> : vector<160x128xf32>
    %100 = tpu.matmul %97, %99, %cst_116 {dimension_numbers = #tpu.dot_dimension_numbers<[1], [0], [0], [1], [0, 0, 1, 1], [], []>} : vector<160x128xf32>, vector<128x128xf32>, vector<160x128xf32> -> vector<160x128xf32>
    %101 = arith.addf %96, %100 : vector<160x128xf32>
    %c0_117 = arith.constant 0 : index
    %c0_118 = arith.constant 0 : index
    %102 = vector.load %arg6[%c0_117, %c0_118] : memref<160x128xf32, #tpu.memory_space<vmem>>, vector<160x128xf32>
    tpu.vector_store %arg6[%c0_117, %c0_118], %101 {strides = array<i32>} : memref<160x128xf32, #tpu.memory_space<vmem>>, vector<160x128xf32>,
    %c0_119 = arith.constant 0 : index
    %c0_120 = arith.constant 0 : index
    %103 = vector.load %arg6[%c0_119, %c0_120] : memref<160x128xf32, #tpu.memory_space<vmem>>, vector<160x128xf32>
    %c1_121 = arith.constant 1 : index
    %c0_122 = arith.constant 0 : index
    %104 = vector.load %arg7[%c1_121, %c0_122] : memref<168x128xf32, #tpu.memory_space<vmem>>, vector<160x128xf32>
    %c1_123 = arith.constant 1 : index
    %c0_124 = arith.constant 0 : index
    %c0_125 = arith.constant 0 : index
    %105 = vector.load %arg3[%c1_123, %c0_124, %c0_125] : memref<7x128x128xf32, #tpu.memory_space<vmem>>, vector<1x128x128xf32>
    %106 = vector.shape_cast %105 : vector<1x128x128xf32> to vector<128x128xf32>
    %cst_126 = arith.constant dense<0.000000e+00> : vector<160x128xf32>
    %107 = tpu.matmul %104, %106, %cst_126 {dimension_numbers = #tpu.dot_dimension_numbers<[1], [0], [0], [1], [0, 0, 1, 1], [], []>} : vector<160x128xf32>, vector<128x128xf32>, vector<160x128xf32> -> vector<160x128xf32>
    %108 = arith.addf %103, %107 : vector<160x128xf32>
    %c0_127 = arith.constant 0 : index
    %c0_128 = arith.constant 0 : index
    %109 = vector.load %arg6[%c0_127, %c0_128] : memref<160x128xf32, #tpu.memory_space<vmem>>, vector<160x128xf32>
    tpu.vector_store %arg6[%c0_127, %c0_128], %108 {strides = array<i32>} : memref<160x128xf32, #tpu.memory_space<vmem>>, vector<160x128xf32>,
    %c0_129 = arith.constant 0 : index
    %c0_130 = arith.constant 0 : index
    %110 = vector.load %arg6[%c0_129, %c0_130] : memref<160x128xf32, #tpu.memory_space<vmem>>, vector<160x128xf32>
    %c2_131 = arith.constant 2 : index
    %c0_132 = arith.constant 0 : index
    %111 = vector.load %arg7[%c2_131, %c0_132] : memref<168x128xf32, #tpu.memory_space<vmem>>, vector<160x128xf32>
    %c2_133 = arith.constant 2 : index
    %c0_134 = arith.constant 0 : index
    %c0_135 = arith.constant 0 : index
    %112 = vector.load %arg3[%c2_133, %c0_134, %c0_135] : memref<7x128x128xf32, #tpu.memory_space<vmem>>, vector<1x128x128xf32>
    %113 = vector.shape_cast %112 : vector<1x128x128xf32> to vector<128x128xf32>
    %cst_136 = arith.constant dense<0.000000e+00> : vector<160x128xf32>
    %114 = tpu.matmul %111, %113, %cst_136 {dimension_numbers = #tpu.dot_dimension_numbers<[1], [0], [0], [1], [0, 0, 1, 1], [], []>} : vector<160x128xf32>, vector<128x128xf32>, vector<160x128xf32> -> vector<160x128xf32>
    %115 = arith.addf %110, %114 : vector<160x128xf32>
    %c0_137 = arith.constant 0 : index
    %c0_138 = arith.constant 0 : index
    %116 = vector.load %arg6[%c0_137, %c0_138] : memref<160x128xf32, #tpu.memory_space<vmem>>, vector<160x128xf32>
    tpu.vector_store %arg6[%c0_137, %c0_138], %115 {strides = array<i32>} : memref<160x128xf32, #tpu.memory_space<vmem>>, vector<160x128xf32>,
    %c0_139 = arith.constant 0 : index
    %c0_140 = arith.constant 0 : index
    %117 = vector.load %arg6[%c0_139, %c0_140] : memref<160x128xf32, #tpu.memory_space<vmem>>, vector<160x128xf32>
    %c3_141 = arith.constant 3 : index
    %c0_142 = arith.constant 0 : index
    %118 = vector.load %arg7[%c3_141, %c0_142] : memref<168x128xf32, #tpu.memory_space<vmem>>, vector<160x128xf32>
    %c3_143 = arith.constant 3 : index
    %c0_144 = arith.constant 0 : index
    %c0_145 = arith.constant 0 : index
    %119 = vector.load %arg3[%c3_143, %c0_144, %c0_145] : memref<7x128x128xf32, #tpu.memory_space<vmem>>, vector<1x128x128xf32>
    %120 = vector.shape_cast %119 : vector<1x128x128xf32> to vector<128x128xf32>
    %cst_146 = arith.constant dense<0.000000e+00> : vector<160x128xf32>
    %121 = tpu.matmul %118, %120, %cst_146 {dimension_numbers = #tpu.dot_dimension_numbers<[1], [0], [0], [1], [0, 0, 1, 1], [], []>} : vector<160x128xf32>, vector<128x128xf32>, vector<160x128xf32> -> vector<160x128xf32>
    %122 = arith.addf %117, %121 : vector<160x128xf32>
    %c0_147 = arith.constant 0 : index
    %c0_148 = arith.constant 0 : index
    %123 = vector.load %arg6[%c0_147, %c0_148] : memref<160x128xf32, #tpu.memory_space<vmem>>, vector<160x128xf32>
    tpu.vector_store %arg6[%c0_147, %c0_148], %122 {strides = array<i32>} : memref<160x128xf32, #tpu.memory_space<vmem>>, vector<160x128xf32>,
    %c0_149 = arith.constant 0 : index
    %c0_150 = arith.constant 0 : index
    %124 = vector.load %arg6[%c0_149, %c0_150] : memref<160x128xf32, #tpu.memory_space<vmem>>, vector<160x128xf32>
    %c4_151 = arith.constant 4 : index
    %c0_152 = arith.constant 0 : index
    %125 = vector.load %arg7[%c4_151, %c0_152] : memref<168x128xf32, #tpu.memory_space<vmem>>, vector<160x128xf32>
    %c4_153 = arith.constant 4 : index
    %c0_154 = arith.constant 0 : index
    %c0_155 = arith.constant 0 : index
    %126 = vector.load %arg3[%c4_153, %c0_154, %c0_155] : memref<7x128x128xf32, #tpu.memory_space<vmem>>, vector<1x128x128xf32>
    %127 = vector.shape_cast %126 : vector<1x128x128xf32> to vector<128x128xf32>
    %cst_156 = arith.constant dense<0.000000e+00> : vector<160x128xf32>
    %128 = tpu.matmul %125, %127, %cst_156 {dimension_numbers = #tpu.dot_dimension_numbers<[1], [0], [0], [1], [0, 0, 1, 1], [], []>} : vector<160x128xf32>, vector<128x128xf32>, vector<160x128xf32> -> vector<160x128xf32>
    %129 = arith.addf %124, %128 : vector<160x128xf32>
    %c0_157 = arith.constant 0 : index
    %c0_158 = arith.constant 0 : index
    %130 = vector.load %arg6[%c0_157, %c0_158] : memref<160x128xf32, #tpu.memory_space<vmem>>, vector<160x128xf32>
    tpu.vector_store %arg6[%c0_157, %c0_158], %129 {strides = array<i32>} : memref<160x128xf32, #tpu.memory_space<vmem>>, vector<160x128xf32>,
    %c0_159 = arith.constant 0 : index
    %c0_160 = arith.constant 0 : index
    %131 = vector.load %arg6[%c0_159, %c0_160] : memref<160x128xf32, #tpu.memory_space<vmem>>, vector<160x128xf32>
    %c5_161 = arith.constant 5 : index
    %c0_162 = arith.constant 0 : index
    %132 = vector.load %arg7[%c5_161, %c0_162] : memref<168x128xf32, #tpu.memory_space<vmem>>, vector<160x128xf32>
    %c5_163 = arith.constant 5 : index
    %c0_164 = arith.constant 0 : index
    %c0_165 = arith.constant 0 : index
    %133 = vector.load %arg3[%c5_163, %c0_164, %c0_165] : memref<7x128x128xf32, #tpu.memory_space<vmem>>, vector<1x128x128xf32>
    %134 = vector.shape_cast %133 : vector<1x128x128xf32> to vector<128x128xf32>
    %cst_166 = arith.constant dense<0.000000e+00> : vector<160x128xf32>
    %135 = tpu.matmul %132, %134, %cst_166 {dimension_numbers = #tpu.dot_dimension_numbers<[1], [0], [0], [1], [0, 0, 1, 1], [], []>} : vector<160x128xf32>, vector<128x128xf32>, vector<160x128xf32> -> vector<160x128xf32>
    %136 = arith.addf %131, %135 : vector<160x128xf32>
    %c0_167 = arith.constant 0 : index
    %c0_168 = arith.constant 0 : index
    %137 = vector.load %arg6[%c0_167, %c0_168] : memref<160x128xf32, #tpu.memory_space<vmem>>, vector<160x128xf32>
    tpu.vector_store %arg6[%c0_167, %c0_168], %136 {strides = array<i32>} : memref<160x128xf32, #tpu.memory_space<vmem>>, vector<160x128xf32>,
    %c0_169 = arith.constant 0 : index
    %c0_170 = arith.constant 0 : index
    %138 = vector.load %arg6[%c0_169, %c0_170] : memref<160x128xf32, #tpu.memory_space<vmem>>, vector<160x128xf32>
    %c6_171 = arith.constant 6 : index
    %c0_172 = arith.constant 0 : index
    %139 = vector.load %arg7[%c6_171, %c0_172] : memref<168x128xf32, #tpu.memory_space<vmem>>, vector<160x128xf32>
    %c6_173 = arith.constant 6 : index
    %c0_174 = arith.constant 0 : index
    %c0_175 = arith.constant 0 : index
    %140 = vector.load %arg3[%c6_173, %c0_174, %c0_175] : memref<7x128x128xf32, #tpu.memory_space<vmem>>, vector<1x128x128xf32>
    %141 = vector.shape_cast %140 : vector<1x128x128xf32> to vector<128x128xf32>
    %cst_176 = arith.constant dense<0.000000e+00> : vector<160x128xf32>
    %142 = tpu.matmul %139, %141, %cst_176 {dimension_numbers = #tpu.dot_dimension_numbers<[1], [0], [0], [1], [0, 0, 1, 1], [], []>} : vector<160x128xf32>, vector<128x128xf32>, vector<160x128xf32> -> vector<160x128xf32>
    %143 = arith.addf %138, %142 : vector<160x128xf32>
    %c0_177 = arith.constant 0 : index
    %c0_178 = arith.constant 0 : index
    %144 = vector.load %arg6[%c0_177, %c0_178] : memref<160x128xf32, #tpu.memory_space<vmem>>, vector<160x128xf32>
    tpu.vector_store %arg6[%c0_177, %c0_178], %143 {strides = array<i32>} : memref<160x128xf32, #tpu.memory_space<vmem>>, vector<160x128xf32>,
    %c0_179 = arith.constant 0 : index
    %c0_180 = arith.constant 0 : index
    %145 = vector.load %arg6[%c0_179, %c0_180] : memref<160x128xf32, #tpu.memory_space<vmem>>, vector<160x128xf32>
    %c0_181 = arith.constant 0 : index
    %c0_182 = arith.constant 0 : index
    %146 = vector.load %arg4[%c0_181, %c0_182] : memref<1x128xf32, #tpu.memory_space<vmem>>, vector<1x128xf32>
    %147 = vector.broadcast %146 : vector<1x128xf32> to vector<160x128xf32>
    %148 = arith.addf %145, %147 : vector<160x128xf32>
    %cst_183 = arith.constant 0.000000e+00 : f32
    %149 = vector.broadcast %cst_183 : f32 to vector<160x128xf32>
    %150 = arith.cmpf ogt, %148, %149 : vector<160x128xf32>
    %151 = math.exp %148 : vector<160x128xf32>
    %cst_184 = arith.constant 1.000000e+00 : f32
    %152 = vector.broadcast %cst_184 : f32 to vector<160x128xf32>
    %153 = arith.subf %151, %152 : vector<160x128xf32>
    %cst_185 = arith.constant 1.67326319 : f32
    %154 = vector.broadcast %cst_185 : f32 to vector<160x128xf32>
    %155 = arith.mulf %154, %153 : vector<160x128xf32>
    %156 = arith.select %150, %148, %155 : vector<160x128xi1>, vector<160x128xf32>
    %cst_186 = arith.constant 1.05070102 : f32
    %157 = vector.broadcast %cst_186 : f32 to vector<160x128xf32>
    %158 = arith.mulf %157, %156 : vector<160x128xf32>
    %c0_187 = arith.constant 0 : index
    %c0_188 = arith.constant 0 : index
    %159 = vector.load %arg5[%c0_187, %c0_188] : memref<160x128xf32, #tpu.memory_space<vmem>>, vector<160x128xf32>
    tpu.vector_store %arg5[%c0_187, %c0_188], %158 {strides = array<i32>} : memref<160x128xf32, #tpu.memory_space<vmem>>, vector<160x128xf32>,
    return
  }
}

module attributes {stable_mosaic.version = 11 : i64} {
  func.func @_lstm_head_kernel(%arg0: memref<96x128xf32, #tpu.memory_space<vmem>>, %arg1: memref<3x128x512xf32, #tpu.memory_space<vmem>>, %arg2: memref<3x128x512xf32, #tpu.memory_space<vmem>>, %arg3: memref<3x1x512xf32, #tpu.memory_space<vmem>>, %arg4: memref<128x128xf32, #tpu.memory_space<vmem>>, %arg5: memref<1x128xf32, #tpu.memory_space<vmem>>, %arg6: memref<128x128xf32, #tpu.memory_space<vmem>>, %arg7: memref<1x128xf32, #tpu.memory_space<vmem>>, %arg8: memref<128x128xf32, #tpu.memory_space<vmem>>, %arg9: memref<1x128xf32, #tpu.memory_space<vmem>>, %arg10: memref<96x128xf32, #tpu.memory_space<vmem>>, %arg11: memref<96x128xf32, #tpu.memory_space<vmem>>, %arg12: memref<96x512xf32, #tpu.memory_space<vmem>>, %arg13: memref<1x128xf32, #tpu.memory_space<vmem>>, %arg14: memref<1x128xf32, #tpu.memory_space<vmem>>) attributes {dimension_semantics = [], scalar_prefetch = 0 : i64, scratch_operands = 4 : i64, tpu.core_type = #tpu.core_type<tc>} {
    %c0 = arith.constant 0 : index
    %c0_0 = arith.constant 0 : index
    %0 = vector.load %arg0[%c0, %c0_0] : memref<96x128xf32, #tpu.memory_space<vmem>>, vector<96x128xf32>
    %c0_1 = arith.constant 0 : index
    %c0_2 = arith.constant 0 : index
    %1 = vector.load %arg11[%c0_1, %c0_2] : memref<96x128xf32, #tpu.memory_space<vmem>>, vector<96x128xf32>
    tpu.vector_store %arg11[%c0_1, %c0_2], %0 {strides = array<i32>} : memref<96x128xf32, #tpu.memory_space<vmem>>, vector<96x128xf32>,
    %c0_3 = arith.constant 0 : index
    %c0_4 = arith.constant 0 : index
    %2 = vector.load %arg11[%c0_3, %c0_4] : memref<96x128xf32, #tpu.memory_space<vmem>>, vector<96x128xf32>
    %c0_5 = arith.constant 0 : index
    %c0_6 = arith.constant 0 : index
    %c0_7 = arith.constant 0 : index
    %3 = vector.load %arg1[%c0_5, %c0_6, %c0_7] : memref<3x128x512xf32, #tpu.memory_space<vmem>>, vector<1x128x512xf32>
    %4 = vector.shape_cast %3 : vector<1x128x512xf32> to vector<128x512xf32>
    %cst = arith.constant dense<0.000000e+00> : vector<96x512xf32>
    %5 = tpu.matmul %2, %4, %cst {dimension_numbers = #tpu.dot_dimension_numbers<[1], [0], [0], [1], [0, 0, 1, 1], [], []>} : vector<96x128xf32>, vector<128x512xf32>, vector<96x512xf32> -> vector<96x512xf32>
    %c0_8 = arith.constant 0 : index
    %c0_9 = arith.constant 0 : index
    %c0_10 = arith.constant 0 : index
    %6 = vector.load %arg3[%c0_8, %c0_9, %c0_10] : memref<3x1x512xf32, #tpu.memory_space<vmem>>, vector<1x1x512xf32>
    %7 = vector.shape_cast %6 : vector<1x1x512xf32> to vector<1x512xf32>
    %8 = vector.broadcast %7 : vector<1x512xf32> to vector<96x512xf32>
    %9 = arith.addf %5, %8 : vector<96x512xf32>
    %c0_11 = arith.constant 0 : index
    %c0_12 = arith.constant 0 : index
    %10 = vector.load %arg12[%c0_11, %c0_12] : memref<96x512xf32, #tpu.memory_space<vmem>>, vector<96x512xf32>
    tpu.vector_store %arg12[%c0_11, %c0_12], %9 {strides = array<i32>} : memref<96x512xf32, #tpu.memory_space<vmem>>, vector<96x512xf32>,
    %cst_13 = arith.constant 0.000000e+00 : f32
    %11 = vector.broadcast %cst_13 : f32 to vector<1x128xf32>
    %c0_14 = arith.constant 0 : index
    %c0_15 = arith.constant 0 : index
    %12 = vector.load %arg13[%c0_14, %c0_15] : memref<1x128xf32, #tpu.memory_space<vmem>>, vector<1x128xf32>
    tpu.vector_store %arg13[%c0_14, %c0_15], %11 {strides = array<i32>} : memref<1x128xf32, #tpu.memory_space<vmem>>, vector<1x128xf32>,
    %cst_16 = arith.constant 0.000000e+00 : f32
    %13 = vector.broadcast %cst_16 : f32 to vector<1x128xf32>
    %c0_17 = arith.constant 0 : index
    %c0_18 = arith.constant 0 : index
    %14 = vector.load %arg14[%c0_17, %c0_18] : memref<1x128xf32, #tpu.memory_space<vmem>>, vector<1x128xf32>
    tpu.vector_store %arg14[%c0_17, %c0_18], %13 {strides = array<i32>} : memref<1x128xf32, #tpu.memory_space<vmem>>, vector<1x128xf32>,
    %c0_i32 = arith.constant 0 : i32
    %c90_i32 = arith.constant 90 : i32
    %15 = arith.addi %c0_i32, %c90_i32 : i32
    %c1_i32 = arith.constant 1 : i32
    scf.for %arg15 = %c0_i32 to %15 step %c1_i32  : i32 {
      %c1_i32_95 = arith.constant 1 : i32
      %108 = arith.muli %arg15, %c1_i32_95 : i32
      %c0_i32_96 = arith.constant 0 : i32
      %109 = arith.addi %c0_i32_96, %108 : i32
      %110 = arith.index_cast %109 : i32 to index
      %c0_97 = arith.constant 0 : index
      %111 = vector.load %arg12[%110, %c0_97] : memref<96x512xf32, #tpu.memory_space<vmem>>, vector<1x512xf32>
      %c0_98 = arith.constant 0 : index
      %c0_99 = arith.constant 0 : index
      %112 = vector.load %arg13[%c0_98, %c0_99] : memref<1x128xf32, #tpu.memory_space<vmem>>, vector<1x128xf32>
      %c0_100 = arith.constant 0 : index
      %c0_101 = arith.constant 0 : index
      %c0_102 = arith.constant 0 : index
      %113 = vector.load %arg2[%c0_100, %c0_101, %c0_102] : memref<3x128x512xf32, #tpu.memory_space<vmem>>, vector<1x128x512xf32>
      %114 = vector.shape_cast %113 : vector<1x128x512xf32> to vector<128x512xf32>
      %cst_103 = arith.constant dense<0.000000e+00> : vector<1x512xf32>
      %115 = tpu.matmul %112, %114, %cst_103 {dimension_numbers = #tpu.dot_dimension_numbers<[1], [0], [0], [1], [0, 0, 1, 1], [], []>} : vector<1x128xf32>, vector<128x512xf32>, vector<1x512xf32> -> vector<1x512xf32>
      %116 = arith.addf %111, %115 : vector<1x512xf32>
      %117 = vector.extract_strided_slice %116 {offsets = [0, 0], sizes = [1, 128], strides = [1, 1]} : vector<1x512xf32> to vector<1x128xf32>
      %118 = arith.negf %117 : vector<1x128xf32>
      %119 = math.exp %118 : vector<1x128xf32>
      %cst_104 = arith.constant 1.000000e+00 : f32
      %120 = vector.broadcast %cst_104 : f32 to vector<1x128xf32>
      %121 = arith.addf %120, %119 : vector<1x128xf32>
      %122 = arith.divf %120, %121 : vector<1x128xf32>
      %123 = vector.extract_strided_slice %116 {offsets = [0, 128], sizes = [1, 128], strides = [1, 1]} : vector<1x512xf32> to vector<1x128xf32>
      %124 = arith.negf %123 : vector<1x128xf32>
      %125 = math.exp %124 : vector<1x128xf32>
      %cst_105 = arith.constant 1.000000e+00 : f32
      %126 = vector.broadcast %cst_105 : f32 to vector<1x128xf32>
      %127 = arith.addf %126, %125 : vector<1x128xf32>
      %128 = arith.divf %126, %127 : vector<1x128xf32>
      %129 = vector.extract_strided_slice %116 {offsets = [0, 256], sizes = [1, 128], strides = [1, 1]} : vector<1x512xf32> to vector<1x128xf32>
      %130 = math.tanh %129 : vector<1x128xf32>
      %131 = vector.extract_strided_slice %116 {offsets = [0, 384], sizes = [1, 128], strides = [1, 1]} : vector<1x512xf32> to vector<1x128xf32>
      %132 = arith.negf %131 : vector<1x128xf32>
      %133 = math.exp %132 : vector<1x128xf32>
      %cst_106 = arith.constant 1.000000e+00 : f32
      %134 = vector.broadcast %cst_106 : f32 to vector<1x128xf32>
      %135 = arith.addf %134, %133 : vector<1x128xf32>
      %136 = arith.divf %134, %135 : vector<1x128xf32>
      %c0_107 = arith.constant 0 : index
      %c0_108 = arith.constant 0 : index
      %137 = vector.load %arg14[%c0_107, %c0_108] : memref<1x128xf32, #tpu.memory_space<vmem>>, vector<1x128xf32>
      %138 = arith.mulf %128, %137 : vector<1x128xf32>
      %139 = arith.mulf %122, %130 : vector<1x128xf32>
      %140 = arith.addf %138, %139 : vector<1x128xf32>
      %141 = math.tanh %140 : vector<1x128xf32>
      %142 = arith.mulf %136, %141 : vector<1x128xf32>
      %c0_109 = arith.constant 0 : index
      %c0_110 = arith.constant 0 : index
      %143 = vector.load %arg14[%c0_109, %c0_110] : memref<1x128xf32, #tpu.memory_space<vmem>>, vector<1x128xf32>
      tpu.vector_store %arg14[%c0_109, %c0_110], %140 {strides = array<i32>} : memref<1x128xf32, #tpu.memory_space<vmem>>, vector<1x128xf32>,
      %c0_111 = arith.constant 0 : index
      %c0_112 = arith.constant 0 : index
      %144 = vector.load %arg13[%c0_111, %c0_112] : memref<1x128xf32, #tpu.memory_space<vmem>>, vector<1x128xf32>
      tpu.vector_store %arg13[%c0_111, %c0_112], %142 {strides = array<i32>} : memref<1x128xf32, #tpu.memory_space<vmem>>, vector<1x128xf32>,
      %145 = arith.index_cast %109 : i32 to index
      %c0_113 = arith.constant 0 : index
      %146 = vector.load %arg11[%145, %c0_113] : memref<96x128xf32, #tpu.memory_space<vmem>>, vector<1x128xf32>
      tpu.vector_store %arg11[%145, %c0_113], %142 {strides = array<i32>} : memref<96x128xf32, #tpu.memory_space<vmem>>, vector<1x128xf32>,
    }
    %c90_i32_19 = arith.constant 90 : i32
    %c0_20 = arith.constant 0 : index
    %c0_21 = arith.constant 0 : index
    %16 = vector.load %arg11[%c0_20, %c0_21] : memref<96x128xf32, #tpu.memory_space<vmem>>, vector<96x128xf32>
    %c1 = arith.constant 1 : index
    %c0_22 = arith.constant 0 : index
    %c0_23 = arith.constant 0 : index
    %17 = vector.load %arg1[%c1, %c0_22, %c0_23] : memref<3x128x512xf32, #tpu.memory_space<vmem>>, vector<1x128x512xf32>
    %18 = vector.shape_cast %17 : vector<1x128x512xf32> to vector<128x512xf32>
    %cst_24 = arith.constant dense<0.000000e+00> : vector<96x512xf32>
    %19 = tpu.matmul %16, %18, %cst_24 {dimension_numbers = #tpu.dot_dimension_numbers<[1], [0], [0], [1], [0, 0, 1, 1], [], []>} : vector<96x128xf32>, vector<128x512xf32>, vector<96x512xf32> -> vector<96x512xf32>
    %c1_25 = arith.constant 1 : index
    %c0_26 = arith.constant 0 : index
    %c0_27 = arith.constant 0 : index
    %20 = vector.load %arg3[%c1_25, %c0_26, %c0_27] : memref<3x1x512xf32, #tpu.memory_space<vmem>>, vector<1x1x512xf32>
    %21 = vector.shape_cast %20 : vector<1x1x512xf32> to vector<1x512xf32>
    %22 = vector.broadcast %21 : vector<1x512xf32> to vector<96x512xf32>
    %23 = arith.addf %19, %22 : vector<96x512xf32>
    %c0_28 = arith.constant 0 : index
    %c0_29 = arith.constant 0 : index
    %24 = vector.load %arg12[%c0_28, %c0_29] : memref<96x512xf32, #tpu.memory_space<vmem>>, vector<96x512xf32>
    tpu.vector_store %arg12[%c0_28, %c0_29], %23 {strides = array<i32>} : memref<96x512xf32, #tpu.memory_space<vmem>>, vector<96x512xf32>,
    %cst_30 = arith.constant 0.000000e+00 : f32
    %25 = vector.broadcast %cst_30 : f32 to vector<1x128xf32>
    %c0_31 = arith.constant 0 : index
    %c0_32 = arith.constant 0 : index
    %26 = vector.load %arg13[%c0_31, %c0_32] : memref<1x128xf32, #tpu.memory_space<vmem>>, vector<1x128xf32>
    tpu.vector_store %arg13[%c0_31, %c0_32], %25 {strides = array<i32>} : memref<1x128xf32, #tpu.memory_space<vmem>>, vector<1x128xf32>,
    %cst_33 = arith.constant 0.000000e+00 : f32
    %27 = vector.broadcast %cst_33 : f32 to vector<1x128xf32>
    %c0_34 = arith.constant 0 : index
    %c0_35 = arith.constant 0 : index
    %28 = vector.load %arg14[%c0_34, %c0_35] : memref<1x128xf32, #tpu.memory_space<vmem>>, vector<1x128xf32>
    tpu.vector_store %arg14[%c0_34, %c0_35], %27 {strides = array<i32>} : memref<1x128xf32, #tpu.memory_space<vmem>>, vector<1x128xf32>,
    %c0_i32_36 = arith.constant 0 : i32
    %c90_i32_37 = arith.constant 90 : i32
    %29 = arith.addi %c0_i32_36, %c90_i32_37 : i32
    %c1_i32_38 = arith.constant 1 : i32
    scf.for %arg15 = %c0_i32_36 to %29 step %c1_i32_38  : i32 {
      %c1_i32_95 = arith.constant 1 : i32
      %108 = arith.muli %arg15, %c1_i32_95 : i32
      %c0_i32_96 = arith.constant 0 : i32
      %109 = arith.addi %c0_i32_96, %108 : i32
      %110 = arith.index_cast %109 : i32 to index
      %c0_97 = arith.constant 0 : index
      %111 = vector.load %arg12[%110, %c0_97] : memref<96x512xf32, #tpu.memory_space<vmem>>, vector<1x512xf32>
      %c0_98 = arith.constant 0 : index
      %c0_99 = arith.constant 0 : index
      %112 = vector.load %arg13[%c0_98, %c0_99] : memref<1x128xf32, #tpu.memory_space<vmem>>, vector<1x128xf32>
      %c1_100 = arith.constant 1 : index
      %c0_101 = arith.constant 0 : index
      %c0_102 = arith.constant 0 : index
      %113 = vector.load %arg2[%c1_100, %c0_101, %c0_102] : memref<3x128x512xf32, #tpu.memory_space<vmem>>, vector<1x128x512xf32>
      %114 = vector.shape_cast %113 : vector<1x128x512xf32> to vector<128x512xf32>
      %cst_103 = arith.constant dense<0.000000e+00> : vector<1x512xf32>
      %115 = tpu.matmul %112, %114, %cst_103 {dimension_numbers = #tpu.dot_dimension_numbers<[1], [0], [0], [1], [0, 0, 1, 1], [], []>} : vector<1x128xf32>, vector<128x512xf32>, vector<1x512xf32> -> vector<1x512xf32>
      %116 = arith.addf %111, %115 : vector<1x512xf32>
      %117 = vector.extract_strided_slice %116 {offsets = [0, 0], sizes = [1, 128], strides = [1, 1]} : vector<1x512xf32> to vector<1x128xf32>
      %118 = arith.negf %117 : vector<1x128xf32>
      %119 = math.exp %118 : vector<1x128xf32>
      %cst_104 = arith.constant 1.000000e+00 : f32
      %120 = vector.broadcast %cst_104 : f32 to vector<1x128xf32>
      %121 = arith.addf %120, %119 : vector<1x128xf32>
      %122 = arith.divf %120, %121 : vector<1x128xf32>
      %123 = vector.extract_strided_slice %116 {offsets = [0, 128], sizes = [1, 128], strides = [1, 1]} : vector<1x512xf32> to vector<1x128xf32>
      %124 = arith.negf %123 : vector<1x128xf32>
      %125 = math.exp %124 : vector<1x128xf32>
      %cst_105 = arith.constant 1.000000e+00 : f32
      %126 = vector.broadcast %cst_105 : f32 to vector<1x128xf32>
      %127 = arith.addf %126, %125 : vector<1x128xf32>
      %128 = arith.divf %126, %127 : vector<1x128xf32>
      %129 = vector.extract_strided_slice %116 {offsets = [0, 256], sizes = [1, 128], strides = [1, 1]} : vector<1x512xf32> to vector<1x128xf32>
      %130 = math.tanh %129 : vector<1x128xf32>
      %131 = vector.extract_strided_slice %116 {offsets = [0, 384], sizes = [1, 128], strides = [1, 1]} : vector<1x512xf32> to vector<1x128xf32>
      %132 = arith.negf %131 : vector<1x128xf32>
      %133 = math.exp %132 : vector<1x128xf32>
      %cst_106 = arith.constant 1.000000e+00 : f32
      %134 = vector.broadcast %cst_106 : f32 to vector<1x128xf32>
      %135 = arith.addf %134, %133 : vector<1x128xf32>
      %136 = arith.divf %134, %135 : vector<1x128xf32>
      %c0_107 = arith.constant 0 : index
      %c0_108 = arith.constant 0 : index
      %137 = vector.load %arg14[%c0_107, %c0_108] : memref<1x128xf32, #tpu.memory_space<vmem>>, vector<1x128xf32>
      %138 = arith.mulf %128, %137 : vector<1x128xf32>
      %139 = arith.mulf %122, %130 : vector<1x128xf32>
      %140 = arith.addf %138, %139 : vector<1x128xf32>
      %141 = math.tanh %140 : vector<1x128xf32>
      %142 = arith.mulf %136, %141 : vector<1x128xf32>
      %c0_109 = arith.constant 0 : index
      %c0_110 = arith.constant 0 : index
      %143 = vector.load %arg14[%c0_109, %c0_110] : memref<1x128xf32, #tpu.memory_space<vmem>>, vector<1x128xf32>
      tpu.vector_store %arg14[%c0_109, %c0_110], %140 {strides = array<i32>} : memref<1x128xf32, #tpu.memory_space<vmem>>, vector<1x128xf32>,
      %c0_111 = arith.constant 0 : index
      %c0_112 = arith.constant 0 : index
      %144 = vector.load %arg13[%c0_111, %c0_112] : memref<1x128xf32, #tpu.memory_space<vmem>>, vector<1x128xf32>
      tpu.vector_store %arg13[%c0_111, %c0_112], %142 {strides = array<i32>} : memref<1x128xf32, #tpu.memory_space<vmem>>, vector<1x128xf32>,
      %145 = arith.index_cast %109 : i32 to index
      %c0_113 = arith.constant 0 : index
      %146 = vector.load %arg11[%145, %c0_113] : memref<96x128xf32, #tpu.memory_space<vmem>>, vector<1x128xf32>
      tpu.vector_store %arg11[%145, %c0_113], %142 {strides = array<i32>} : memref<96x128xf32, #tpu.memory_space<vmem>>, vector<1x128xf32>,
    }
    %c90_i32_39 = arith.constant 90 : i32
    %c0_40 = arith.constant 0 : index
    %c0_41 = arith.constant 0 : index
    %30 = vector.load %arg11[%c0_40, %c0_41] : memref<96x128xf32, #tpu.memory_space<vmem>>, vector<96x128xf32>
    %c2 = arith.constant 2 : index
    %c0_42 = arith.constant 0 : index
    %c0_43 = arith.constant 0 : index
    %31 = vector.load %arg1[%c2, %c0_42, %c0_43] : memref<3x128x512xf32, #tpu.memory_space<vmem>>, vector<1x128x512xf32>
    %32 = vector.shape_cast %31 : vector<1x128x512xf32> to vector<128x512xf32>
    %cst_44 = arith.constant dense<0.000000e+00> : vector<96x512xf32>
    %33 = tpu.matmul %30, %32, %cst_44 {dimension_numbers = #tpu.dot_dimension_numbers<[1], [0], [0], [1], [0, 0, 1, 1], [], []>} : vector<96x128xf32>, vector<128x512xf32>, vector<96x512xf32> -> vector<96x512xf32>
    %c2_45 = arith.constant 2 : index
    %c0_46 = arith.constant 0 : index
    %c0_47 = arith.constant 0 : index
    %34 = vector.load %arg3[%c2_45, %c0_46, %c0_47] : memref<3x1x512xf32, #tpu.memory_space<vmem>>, vector<1x1x512xf32>
    %35 = vector.shape_cast %34 : vector<1x1x512xf32> to vector<1x512xf32>
    %36 = vector.broadcast %35 : vector<1x512xf32> to vector<96x512xf32>
    %37 = arith.addf %33, %36 : vector<96x512xf32>
    %c0_48 = arith.constant 0 : index
    %c0_49 = arith.constant 0 : index
    %38 = vector.load %arg12[%c0_48, %c0_49] : memref<96x512xf32, #tpu.memory_space<vmem>>, vector<96x512xf32>
    tpu.vector_store %arg12[%c0_48, %c0_49], %37 {strides = array<i32>} : memref<96x512xf32, #tpu.memory_space<vmem>>, vector<96x512xf32>,
    %cst_50 = arith.constant 0.000000e+00 : f32
    %39 = vector.broadcast %cst_50 : f32 to vector<1x128xf32>
    %c0_51 = arith.constant 0 : index
    %c0_52 = arith.constant 0 : index
    %40 = vector.load %arg13[%c0_51, %c0_52] : memref<1x128xf32, #tpu.memory_space<vmem>>, vector<1x128xf32>
    tpu.vector_store %arg13[%c0_51, %c0_52], %39 {strides = array<i32>} : memref<1x128xf32, #tpu.memory_space<vmem>>, vector<1x128xf32>,
    %cst_53 = arith.constant 0.000000e+00 : f32
    %41 = vector.broadcast %cst_53 : f32 to vector<1x128xf32>
    %c0_54 = arith.constant 0 : index
    %c0_55 = arith.constant 0 : index
    %42 = vector.load %arg14[%c0_54, %c0_55] : memref<1x128xf32, #tpu.memory_space<vmem>>, vector<1x128xf32>
    tpu.vector_store %arg14[%c0_54, %c0_55], %41 {strides = array<i32>} : memref<1x128xf32, #tpu.memory_space<vmem>>, vector<1x128xf32>,
    %c0_i32_56 = arith.constant 0 : i32
    %c90_i32_57 = arith.constant 90 : i32
    %43 = arith.addi %c0_i32_56, %c90_i32_57 : i32
    %c1_i32_58 = arith.constant 1 : i32
    scf.for %arg15 = %c0_i32_56 to %43 step %c1_i32_58  : i32 {
      %c1_i32_95 = arith.constant 1 : i32
      %108 = arith.muli %arg15, %c1_i32_95 : i32
      %c0_i32_96 = arith.constant 0 : i32
      %109 = arith.addi %c0_i32_96, %108 : i32
      %110 = arith.index_cast %109 : i32 to index
      %c0_97 = arith.constant 0 : index
      %111 = vector.load %arg12[%110, %c0_97] : memref<96x512xf32, #tpu.memory_space<vmem>>, vector<1x512xf32>
      %c0_98 = arith.constant 0 : index
      %c0_99 = arith.constant 0 : index
      %112 = vector.load %arg13[%c0_98, %c0_99] : memref<1x128xf32, #tpu.memory_space<vmem>>, vector<1x128xf32>
      %c2_100 = arith.constant 2 : index
      %c0_101 = arith.constant 0 : index
      %c0_102 = arith.constant 0 : index
      %113 = vector.load %arg2[%c2_100, %c0_101, %c0_102] : memref<3x128x512xf32, #tpu.memory_space<vmem>>, vector<1x128x512xf32>
      %114 = vector.shape_cast %113 : vector<1x128x512xf32> to vector<128x512xf32>
      %cst_103 = arith.constant dense<0.000000e+00> : vector<1x512xf32>
      %115 = tpu.matmul %112, %114, %cst_103 {dimension_numbers = #tpu.dot_dimension_numbers<[1], [0], [0], [1], [0, 0, 1, 1], [], []>} : vector<1x128xf32>, vector<128x512xf32>, vector<1x512xf32> -> vector<1x512xf32>
      %116 = arith.addf %111, %115 : vector<1x512xf32>
      %117 = vector.extract_strided_slice %116 {offsets = [0, 0], sizes = [1, 128], strides = [1, 1]} : vector<1x512xf32> to vector<1x128xf32>
      %118 = arith.negf %117 : vector<1x128xf32>
      %119 = math.exp %118 : vector<1x128xf32>
      %cst_104 = arith.constant 1.000000e+00 : f32
      %120 = vector.broadcast %cst_104 : f32 to vector<1x128xf32>
      %121 = arith.addf %120, %119 : vector<1x128xf32>
      %122 = arith.divf %120, %121 : vector<1x128xf32>
      %123 = vector.extract_strided_slice %116 {offsets = [0, 128], sizes = [1, 128], strides = [1, 1]} : vector<1x512xf32> to vector<1x128xf32>
      %124 = arith.negf %123 : vector<1x128xf32>
      %125 = math.exp %124 : vector<1x128xf32>
      %cst_105 = arith.constant 1.000000e+00 : f32
      %126 = vector.broadcast %cst_105 : f32 to vector<1x128xf32>
      %127 = arith.addf %126, %125 : vector<1x128xf32>
      %128 = arith.divf %126, %127 : vector<1x128xf32>
      %129 = vector.extract_strided_slice %116 {offsets = [0, 256], sizes = [1, 128], strides = [1, 1]} : vector<1x512xf32> to vector<1x128xf32>
      %130 = math.tanh %129 : vector<1x128xf32>
      %131 = vector.extract_strided_slice %116 {offsets = [0, 384], sizes = [1, 128], strides = [1, 1]} : vector<1x512xf32> to vector<1x128xf32>
      %132 = arith.negf %131 : vector<1x128xf32>
      %133 = math.exp %132 : vector<1x128xf32>
      %cst_106 = arith.constant 1.000000e+00 : f32
      %134 = vector.broadcast %cst_106 : f32 to vector<1x128xf32>
      %135 = arith.addf %134, %133 : vector<1x128xf32>
      %136 = arith.divf %134, %135 : vector<1x128xf32>
      %c0_107 = arith.constant 0 : index
      %c0_108 = arith.constant 0 : index
      %137 = vector.load %arg14[%c0_107, %c0_108] : memref<1x128xf32, #tpu.memory_space<vmem>>, vector<1x128xf32>
      %138 = arith.mulf %128, %137 : vector<1x128xf32>
      %139 = arith.mulf %122, %130 : vector<1x128xf32>
      %140 = arith.addf %138, %139 : vector<1x128xf32>
      %141 = math.tanh %140 : vector<1x128xf32>
      %142 = arith.mulf %136, %141 : vector<1x128xf32>
      %c0_109 = arith.constant 0 : index
      %c0_110 = arith.constant 0 : index
      %143 = vector.load %arg14[%c0_109, %c0_110] : memref<1x128xf32, #tpu.memory_space<vmem>>, vector<1x128xf32>
      tpu.vector_store %arg14[%c0_109, %c0_110], %140 {strides = array<i32>} : memref<1x128xf32, #tpu.memory_space<vmem>>, vector<1x128xf32>,
      %c0_111 = arith.constant 0 : index
      %c0_112 = arith.constant 0 : index
      %144 = vector.load %arg13[%c0_111, %c0_112] : memref<1x128xf32, #tpu.memory_space<vmem>>, vector<1x128xf32>
      tpu.vector_store %arg13[%c0_111, %c0_112], %142 {strides = array<i32>} : memref<1x128xf32, #tpu.memory_space<vmem>>, vector<1x128xf32>,
      %145 = arith.index_cast %109 : i32 to index
      %c0_113 = arith.constant 0 : index
      %146 = vector.load %arg11[%145, %c0_113] : memref<96x128xf32, #tpu.memory_space<vmem>>, vector<1x128xf32>
      tpu.vector_store %arg11[%145, %c0_113], %142 {strides = array<i32>} : memref<96x128xf32, #tpu.memory_space<vmem>>, vector<1x128xf32>,
    }
    %c90_i32_59 = arith.constant 90 : i32
    %c0_60 = arith.constant 0 : index
    %c0_61 = arith.constant 0 : index
    %44 = vector.load %arg11[%c0_60, %c0_61] : memref<96x128xf32, #tpu.memory_space<vmem>>, vector<96x128xf32>
    %c0_62 = arith.constant 0 : index
    %c0_63 = arith.constant 0 : index
    %45 = vector.load %arg4[%c0_62, %c0_63] : memref<128x128xf32, #tpu.memory_space<vmem>>, vector<128x128xf32>
    %cst_64 = arith.constant dense<0.000000e+00> : vector<96x128xf32>
    %46 = tpu.matmul %44, %45, %cst_64 {dimension_numbers = #tpu.dot_dimension_numbers<[1], [0], [0], [1], [0, 0, 1, 1], [], []>} : vector<96x128xf32>, vector<128x128xf32>, vector<96x128xf32> -> vector<96x128xf32>
    %c0_65 = arith.constant 0 : index
    %c0_66 = arith.constant 0 : index
    %47 = vector.load %arg5[%c0_65, %c0_66] : memref<1x128xf32, #tpu.memory_space<vmem>>, vector<1x128xf32>
    %48 = vector.broadcast %47 : vector<1x128xf32> to vector<96x128xf32>
    %49 = arith.addf %46, %48 : vector<96x128xf32>
    %cst_67 = arith.constant 0.000000e+00 : f32
    %50 = vector.broadcast %cst_67 : f32 to vector<96x128xf32>
    %51 = arith.cmpf ogt, %49, %50 : vector<96x128xf32>
    %52 = math.exp %49 : vector<96x128xf32>
    %cst_68 = arith.constant 1.000000e+00 : f32
    %53 = vector.broadcast %cst_68 : f32 to vector<96x128xf32>
    %54 = arith.subf %52, %53 : vector<96x128xf32>
    %cst_69 = arith.constant 1.67326319 : f32
    %55 = vector.broadcast %cst_69 : f32 to vector<96x128xf32>
    %56 = arith.mulf %55, %54 : vector<96x128xf32>
    %57 = arith.select %51, %49, %56 : vector<96x128xi1>, vector<96x128xf32>
    %cst_70 = arith.constant 1.05070102 : f32
    %58 = vector.broadcast %cst_70 : f32 to vector<96x128xf32>
    %59 = arith.mulf %58, %57 : vector<96x128xf32>
    %c0_71 = arith.constant 0 : index
    %c0_72 = arith.constant 0 : index
    %60 = vector.load %arg6[%c0_71, %c0_72] : memref<128x128xf32, #tpu.memory_space<vmem>>, vector<128x128xf32>
    %cst_73 = arith.constant dense<0.000000e+00> : vector<96x128xf32>
    %61 = tpu.matmul %59, %60, %cst_73 {dimension_numbers = #tpu.dot_dimension_numbers<[1], [0], [0], [1], [0, 0, 1, 1], [], []>} : vector<96x128xf32>, vector<128x128xf32>, vector<96x128xf32> -> vector<96x128xf32>
    %c0_74 = arith.constant 0 : index
    %c0_75 = arith.constant 0 : index
    %62 = vector.load %arg7[%c0_74, %c0_75] : memref<1x128xf32, #tpu.memory_space<vmem>>, vector<1x128xf32>
    %63 = vector.broadcast %62 : vector<1x128xf32> to vector<96x128xf32>
    %64 = arith.addf %61, %63 : vector<96x128xf32>
    %cst_76 = arith.constant 0.000000e+00 : f32
    %65 = vector.broadcast %cst_76 : f32 to vector<96x128xf32>
    %66 = arith.cmpf ogt, %64, %65 : vector<96x128xf32>
    %67 = math.exp %64 : vector<96x128xf32>
    %cst_77 = arith.constant 1.000000e+00 : f32
    %68 = vector.broadcast %cst_77 : f32 to vector<96x128xf32>
    %69 = arith.subf %67, %68 : vector<96x128xf32>
    %cst_78 = arith.constant 1.67326319 : f32
    %70 = vector.broadcast %cst_78 : f32 to vector<96x128xf32>
    %71 = arith.mulf %70, %69 : vector<96x128xf32>
    %72 = arith.select %66, %64, %71 : vector<96x128xi1>, vector<96x128xf32>
    %cst_79 = arith.constant 1.05070102 : f32
    %73 = vector.broadcast %cst_79 : f32 to vector<96x128xf32>
    %74 = arith.mulf %73, %72 : vector<96x128xf32>
    %c0_80 = arith.constant 0 : index
    %c0_81 = arith.constant 0 : index
    %75 = vector.load %arg8[%c0_80, %c0_81] : memref<128x128xf32, #tpu.memory_space<vmem>>, vector<128x128xf32>
    %cst_82 = arith.constant dense<0.000000e+00> : vector<96x128xf32>
    %76 = tpu.matmul %74, %75, %cst_82 {dimension_numbers = #tpu.dot_dimension_numbers<[1], [0], [0], [1], [0, 0, 1, 1], [], []>} : vector<96x128xf32>, vector<128x128xf32>, vector<96x128xf32> -> vector<96x128xf32>
    %c0_83 = arith.constant 0 : index
    %c0_84 = arith.constant 0 : index
    %77 = vector.load %arg9[%c0_83, %c0_84] : memref<1x128xf32, #tpu.memory_space<vmem>>, vector<1x128xf32>
    %78 = vector.broadcast %77 : vector<1x128xf32> to vector<96x128xf32>
    %79 = arith.addf %76, %78 : vector<96x128xf32>
    %cst_85 = arith.constant 0.000000e+00 : f32
    %80 = vector.broadcast %cst_85 : f32 to vector<96x128xf32>
    %81 = arith.cmpf ogt, %79, %80 : vector<96x128xf32>
    %82 = math.exp %79 : vector<96x128xf32>
    %cst_86 = arith.constant 1.000000e+00 : f32
    %83 = vector.broadcast %cst_86 : f32 to vector<96x128xf32>
    %84 = arith.subf %82, %83 : vector<96x128xf32>
    %cst_87 = arith.constant 1.67326319 : f32
    %85 = vector.broadcast %cst_87 : f32 to vector<96x128xf32>
    %86 = arith.mulf %85, %84 : vector<96x128xf32>
    %87 = arith.select %81, %79, %86 : vector<96x128xi1>, vector<96x128xf32>
    %cst_88 = arith.constant 1.05070102 : f32
    %88 = vector.broadcast %cst_88 : f32 to vector<96x128xf32>
    %89 = arith.mulf %88, %87 : vector<96x128xf32>
    %90 = tpu.iota {dimensions = array<i32: 1>} : vector<96x128xi32>
    %c27_i32 = arith.constant 27 : i32
    %91 = vector.broadcast %c27_i32 : i32 to vector<96x128xi32>
    %92 = arith.cmpi slt, %90, %91 : vector<96x128xi32>
    %cst_89 = arith.constant -1.000000e+30 : f32
    %93 = vector.broadcast %cst_89 : f32 to vector<96x128xf32>
    %94 = arith.select %92, %89, %93 : vector<96x128xi1>, vector<96x128xf32>
    %cst_90 = arith.constant dense<0xFF800000> : vector<96xf32>
    %95 = vector.multi_reduction <maximumf>, %94, %cst_90 [1] : vector<96x128xf32> to vector<96xf32>
    %96 = vector.shape_cast %95 : vector<96xf32> to vector<96x1xf32>
    %97 = vector.broadcast %96 : vector<96x1xf32> to vector<96x128xf32>
    %98 = arith.subf %89, %97 : vector<96x128xf32>
    %99 = math.exp %98 : vector<96x128xf32>
    %cst_91 = arith.constant 0.000000e+00 : f32
    %100 = vector.broadcast %cst_91 : f32 to vector<96x128xf32>
    %101 = arith.select %92, %99, %100 : vector<96x128xi1>, vector<96x128xf32>
    %cst_92 = arith.constant dense<0.000000e+00> : vector<96xf32>
    %102 = vector.multi_reduction <add>, %101, %cst_92 [1] : vector<96x128xf32> to vector<96xf32>
    %103 = vector.shape_cast %102 : vector<96xf32> to vector<96x1xf32>
    %104 = math.log %103 : vector<96x1xf32>
    %105 = vector.broadcast %104 : vector<96x1xf32> to vector<96x128xf32>
    %106 = arith.subf %98, %105 : vector<96x128xf32>
    %c0_93 = arith.constant 0 : index
    %c0_94 = arith.constant 0 : index
    %107 = vector.load %arg10[%c0_93, %c0_94] : memref<96x128xf32, #tpu.memory_space<vmem>>, vector<96x128xf32>
    tpu.vector_store %arg10[%c0_93, %c0_94], %106 {strides = array<i32>} : memref<96x128xf32, #tpu.memory_space<vmem>>, vector<96x128xf32>,
    return
  }
}

</mosaic_0001>

<bundles_post_ra>
// kernel: _lambda_.3
= control target key start
LH: loop header
LB: loop body
LE: loop exit
PB: predicated region body
PF: predicated region fallthrough
CT: control target
= control target key end

     0   :  { %v3895_v3 = vmov 0.0   ;;  %s4322_s26 = smov 0   ;;  %s5975_s1 = inlined_call_operand.vmem [shape: f32[3,128,512], index: 1, kind: input, shape index: {}]   ;;  %s5976_s2 = inlined_call_operand.vmem [shape: f32[3,128,512], index: 2, kind: input, shape index: {}]   ;;  %s5977_s4 = inlined_call_operand.vmem [shape: f32[128,128], index: 4, kind: input, shape index: {}]   ;;  %s5978_s5 = inlined_call_operand.vmem [shape: f32[1,128], index: 5, kind: input, shape index: {}]   ;;  %s5979_s6 = inlined_call_operand.vmem [shape: f32[128,128], index: 6, kind: input, shape index: {}]   ;;  %s5980_s7 = inlined_call_operand.vmem [shape: f32[1,128], index: 7, kind: input, shape index: {}]   ;;  %s5981_s8 = inlined_call_operand.vmem [shape: f32[128,128], index: 8, kind: input, shape index: {}]   ;;  %s5982_s9 = inlined_call_operand.vmem [shape: f32[1,128], index: 9, kind: input, shape index: {}]   ;;  %s5983_s10 = inlined_call_operand.vmem [shape: f32[96,128], index: 10, kind: output, shape index: {}]   ;;  %s5984_s0 = inlined_call_operand.vmem [shape: f32[96,128], index: 0, kind: input, shape index: {}]   ;;  %s5985_s3 = inlined_call_operand.vmem [shape: f32[3,1,512], index: 3, kind: input, shape index: {}]  }
   0x1   :  { %v132_v0 = vld [vmem:[%s5975_s1 + $0x1e8] sm:$0xff]  ;;  %v134_v1 = vld [vmem:[%s5975_s1 + $0x1f8] sm:$0xff]  ;;  %v131_v2 = vld [vmem:[%s5975_s1 + $0x1e0] sm:$0xff]  ;;  %221 = vmatprep.mubr.f32.mxu0 %v3895_v3  ;;  %479 = vst [vmem:[#allocation4] sm:$0x1] %v3895_v3  ;;  %358 = vmatprep.mubr.f32.mxu1 %v3895_v3 }
   0x2   :  { %480 = vst [vmem:[#allocation5] sm:$0x1] %v3895_v3  ;;  %157 = vmatprep.subr.mxu0 %v132_v0  ;;  %294 = vmatprep.subr.mxu1 %v134_v1  ;;  %v133_v4 = vld [vmem:[%s5975_s1 + $0x1f0] sm:$0xff]  ;;  %v128_v5 = vld [vmem:[%s5975_s1 + $0x1c8] sm:$0xff]  ;;  %v130_v6 = vld [vmem:[%s5975_s1 + $0x1d8] sm:$0xff] }
   0x3   :  { %158 = vmatpush1.msra.mxu0 %v131_v2  ;;  %295 = vmatpush1.msra.mxu1 %v133_v4  ;;  %v127_v7 = vld [vmem:[%s5975_s1 + $0x1c0] sm:$0xff]  ;;  %v129_v8 = vld [vmem:[%s5975_s1 + $0x1d0] sm:$0xff]  ;;  %v124_v9 = vld [vmem:[%s5975_s1 + $0x1a8] sm:$0xff] }
   0x4   :  { %159 = vmatprep.subr.mxu0 %v128_v5  ;;  %296 = vmatprep.subr.mxu1 %v130_v6  ;;  %v126_v10 = vld [vmem:[%s5975_s1 + $0x1b8] sm:$0xff]  ;;  %v123_v11 = vld [vmem:[%s5975_s1 + $0x1a0] sm:$0xff]  ;;  %v125_v12 = vld [vmem:[%s5975_s1 + $0x1b0] sm:$0xff] }
   0x5   :  { %160 = vmatpush1.msra.mxu0 %v127_v7  ;;  %297 = vmatpush1.msra.mxu1 %v129_v8  ;;  %v120_v13 = vld [vmem:[%s5975_s1 + $0x188] sm:$0xff]  ;;  %v122_v14 = vld [vmem:[%s5975_s1 + $0x198] sm:$0xff]  ;;  %v119_v15 = vld [vmem:[%s5975_s1 + $0x180] sm:$0xff] }
   0x6   :  { %161 = vmatprep.subr.mxu0 %v124_v9  ;;  %298 = vmatprep.subr.mxu1 %v126_v10  ;;  %v121_v16 = vld [vmem:[%s5975_s1 + $0x190] sm:$0xff]  ;;  %v116_v17 = vld [vmem:[%s5975_s1 + $0x168] sm:$0xff]  ;;  %v118_v18 = vld [vmem:[%s5975_s1 + $0x178] sm:$0xff] }
   0x7   :  { %162 = vmatpush1.msra.mxu0 %v123_v11  ;;  %299 = vmatpush1.msra.mxu1 %v125_v12  ;;  %v115_v19 = vld [vmem:[%s5975_s1 + $0x160] sm:$0xff]  ;;  %v117_v20 = vld [vmem:[%s5975_s1 + $0x170] sm:$0xff]  ;;  %v112_v21 = vld [vmem:[%s5975_s1 + $0x148] sm:$0xff] }
   0x8   :  { %163 = vmatprep.subr.mxu0 %v120_v13  ;;  %300 = vmatprep.subr.mxu1 %v122_v14  ;;  %v114_v22 = vld [vmem:[%s5975_s1 + $0x158] sm:$0xff]  ;;  %v111_v23 = vld [vmem:[%s5975_s1 + $0x140] sm:$0xff]  ;;  %v113_v24 = vld [vmem:[%s5975_s1 + $0x150] sm:$0xff]  ;;  %v137_v14 = vlaneseq }
   0x9   :  { %164 = vmatpush1.msra.mxu0 %v119_v15  ;;  %301 = vmatpush1.msra.mxu1 %v121_v16  ;;  %v108_v25 = vld [vmem:[%s5975_s1 + $0x128] sm:$0xff]  ;;  %v110_v26 = vld [vmem:[%s5975_s1 + $0x138] sm:$0xff]  ;;  %v107_v27 = vld [vmem:[%s5975_s1 + $0x120] sm:$0xff] }
   0xa   :  { %165 = vmatprep.subr.mxu0 %v116_v17  ;;  %302 = vmatprep.subr.mxu1 %v118_v18  ;;  %v109_v28 = vld [vmem:[%s5975_s1 + $0x130] sm:$0xff]  ;;  %v104_v29 = vld [vmem:[%s5975_s1 + $0x108] sm:$0xff]  ;;  %v106_v30 = vld [vmem:[%s5975_s1 + $0x118] sm:$0xff]  ;;  %v4245_v15 = vshrl.u32 %v137_v14, 7 }
   0xb   :  { %166 = vmatpush1.msra.mxu0 %v115_v19  ;;  %303 = vmatpush1.msra.mxu1 %v117_v20  ;;  %v103_v31 = vld [vmem:[%s5975_s1 + $0x100] sm:$0xff]  ;;  %v105_v32 = vld [vmem:[%s5975_s1 + $0x110] sm:$0xff]  ;;  %v100_v33 = vld [vmem:[%s5975_s1 + $0xe8] sm:$0xff] }
   0xc   :  { %167 = vmatprep.subr.mxu0 %v112_v21  ;;  %304 = vmatprep.subr.mxu1 %v114_v22  ;;  %v102_v34 = vld [vmem:[%s5975_s1 + $0xf8] sm:$0xff]  ;;  %v99_v35 = vld [vmem:[%s5975_s1 + $0xe0] sm:$0xff]  ;;  %v101_v36 = vld [vmem:[%s5975_s1 + $0xf0] sm:$0xff]  ;;  %v4248_v16 = vsub.s32 0, %v4245_v15  ;;  %v4251_v17 = vsub.s32 2, %v4245_v15  ;;  %v4257_v19 = vsub.s32 1, %v4245_v15 }
   0xd   :  { %168 = vmatpush1.msra.mxu0 %v111_v23  ;;  %305 = vmatpush1.msra.mxu1 %v113_v24  ;;  %v96_v37 = vld [vmem:[%s5975_s1 + $0xc8] sm:$0xff]  ;;  %v98_v38 = vld [vmem:[%s5975_s1 + $0xd8] sm:$0xff]  ;;  %v95_v39 = vld [vmem:[%s5975_s1 + $0xc0] sm:$0xff]  ;;  %v4260_v20 = vsub.s32 3, %v4245_v15 }
   0xe   :  { %169 = vmatprep.subr.mxu0 %v108_v25  ;;  %306 = vmatprep.subr.mxu1 %v110_v26  ;;  %v97_v40 = vld [vmem:[%s5975_s1 + $0xd0] sm:$0xff]  ;;  %v92_v41 = vld [vmem:[%s5975_s1 + $0xa8] sm:$0xff]  ;;  %v94_v42 = vld [vmem:[%s5975_s1 + $0xb8] sm:$0xff] }
   0xf   :  { %170 = vmatpush1.msra.mxu0 %v107_v27  ;;  %307 = vmatpush1.msra.mxu1 %v109_v28  ;;  %v91_v43 = vld [vmem:[%s5975_s1 + $0xa0] sm:$0xff]  ;;  %v93_v44 = vld [vmem:[%s5975_s1 + $0xb0] sm:$0xff]  ;;  %v88_v45 = vld [vmem:[%s5975_s1 + $0x88] sm:$0xff] }
  0x10   :  { %171 = vmatprep.subr.mxu0 %v104_v29  ;;  %308 = vmatprep.subr.mxu1 %v106_v30  ;;  %v90_v46 = vld [vmem:[%s5975_s1 + $0x98] sm:$0xff]  ;;  %v87_v47 = vld [vmem:[%s5975_s1 + $0x80] sm:$0xff]  ;;  %v89_v48 = vld [vmem:[%s5975_s1 + $0x90] sm:$0xff] }
  0x11   :  { %172 = vmatpush1.msra.mxu0 %v103_v31  ;;  %309 = vmatpush1.msra.mxu1 %v105_v32  ;;  %v84_v49 = vld [vmem:[%s5975_s1 + $0x68] sm:$0xff]  ;;  %v86_v50 = vld [vmem:[%s5975_s1 + $0x78] sm:$0xff]  ;;  %v83_v51 = vld [vmem:[%s5975_s1 + $0x60] sm:$0xff] }
  0x12   :  { %173 = vmatprep.subr.mxu0 %v100_v33  ;;  %310 = vmatprep.subr.mxu1 %v102_v34  ;;  %v85_v52 = vld [vmem:[%s5975_s1 + $0x70] sm:$0xff]  ;;  %v35_v53 = vld [vmem:[%s5984_s0] sm:$0xff]  ;;  %v36_v54 = vld [vmem:[%s5984_s0 + $0x8] sm:$0xff] }
  0x13   :  { %174 = vmatpush1.msra.mxu0 %v99_v35  ;;  %311 = vmatpush1.msra.mxu1 %v101_v36  ;;  %v80_v55 = vld [vmem:[%s5975_s1 + $0x48] sm:$0xff]  ;;  %v82_v56 = vld [vmem:[%s5975_s1 + $0x58] sm:$0xff]  ;;  %47 = vst [vmem:[#allocation2] sm:$0xff] %v35_v53  ;;  %48 = vst [vmem:[#allocation2 + $0x8] sm:$0xff] %v36_v54 }
  0x14   :  { %175 = vmatprep.subr.mxu0 %v96_v37  ;;  %312 = vmatprep.subr.mxu1 %v98_v38  ;;  %v37_v57 = vld [vmem:[%s5984_s0 + $0x10] sm:$0xff]  ;;  %v38_v58 = vld [vmem:[%s5984_s0 + $0x18] sm:$0xff]  ;;  %v4136_v59 = vld [vmem:[%s5984_s0 + $0x20] sm:$0xff] }
  0x15   :  { %176 = vmatpush1.msra.mxu0 %v95_v39  ;;  %313 = vmatpush1.msra.mxu1 %v97_v40  ;;  %49 = vst [vmem:[#allocation2 + $0x10] sm:$0xff] %v37_v57  ;;  %50 = vst [vmem:[#allocation2 + $0x18] sm:$0xff] %v38_v58  ;;  %v40_v60 = vld [vmem:[%s5984_s0 + $0x28] sm:$0xff]  ;;  %v4145_v61 = vld [vmem:[%s5984_s0 + $0x30] sm:$0xff] }
  0x16   :  { %177 = vmatprep.subr.mxu0 %v92_v41  ;;  %314 = vmatprep.subr.mxu1 %v94_v42  ;;  %51 = vst [vmem:[#allocation2 + $0x20] sm:$0xff] %v4136_v59  ;;  %v4150_v62 = vld [vmem:[%s5984_s0 + $0x38] sm:$0xff]  ;;  %52 = vst [vmem:[#allocation2 + $0x28] sm:$0xff] %v40_v60  ;;  %v4157_v63 = vld [vmem:[%s5984_s0 + $0x40] sm:$0xff] }
  0x17   :  { %178 = vmatpush1.msra.mxu0 %v91_v43  ;;  %315 = vmatpush1.msra.mxu1 %v93_v44  ;;  %53 = vst [vmem:[#allocation2 + $0x30] sm:$0xff] %v4145_v61  ;;  %54 = vst [vmem:[#allocation2 + $0x38] sm:$0xff] %v4150_v62  ;;  %v4162_v0 = vld [vmem:[%s5984_s0 + $0x48] sm:$0xff]  ;;  %v4167_v1 = vld [vmem:[%s5984_s0 + $0x50] sm:$0xff] }
  0x18   :  { %179 = vmatprep.subr.mxu0 %v88_v45  ;;  %316 = vmatprep.subr.mxu1 %v90_v46  ;;  %v79_v2 = vld [vmem:[%s5975_s1 + $0x40] sm:$0xff]  ;;  %v81_v4 = vld [vmem:[%s5975_s1 + $0x50] sm:$0xff]  ;;  %55 = vst [vmem:[#allocation2 + $0x40] sm:$0xff] %v4157_v63  ;;  %56 = vst [vmem:[#allocation2 + $0x48] sm:$0xff] %v4162_v0 }
  0x19   :  { %180 = vmatpush1.msra.mxu0 %v87_v47  ;;  %317 = vmatpush1.msra.mxu1 %v89_v48  ;;  %57 = vst [vmem:[#allocation2 + $0x50] sm:$0xff] %v4167_v1  ;;  %v4181_v5 = vld [vmem:[%s5984_s0 + $0x58] sm:$0xff]  ;;  %v76_v6 = vld [vmem:[%s5975_s1 + $0x28] sm:$0xff]  ;;  %v75_v8 = vld [vmem:[%s5975_s1 + $0x20] sm:$0xff] }
  0x1a   :  { %181 = vmatprep.subr.mxu0 %v84_v49  ;;  %318 = vmatprep.subr.mxu1 %v86_v50  ;;  %v78_v7 = vld [vmem:[%s5975_s1 + $0x38] sm:$0xff]  ;;  %58 = vst [vmem:[#allocation2 + $0x58] sm:$0xff] %v4181_v5  ;;  %v77_v9 = vld [vmem:[%s5975_s1 + $0x30] sm:$0xff]  ;;  %v72_v10 = vld [vmem:[%s5975_s1 + $0x8] sm:$0xff] }
  0x1b   :  { %182 = vmatpush1.msra.mxu0 %v83_v51  ;;  %319 = vmatpush1.msra.mxu1 %v85_v52  ;;  %v74_v11 = vld [vmem:[%s5975_s1 + $0x18] sm:$0xff]  ;;  %v71_v12 = vld [vmem:[%s5975_s1] sm:$0xff]  ;;  %v73_v13 = vld [vmem:[%s5975_s1 + $0x10] sm:$0xff] }
  0x1c   :  { %183 = vmatprep.subr.mxu0 %v80_v55  ;;  %320 = vmatprep.subr.mxu1 %v82_v56  ;;  %v135_v18 = vld [vmem:[%s5985_s3] sm:$0xf] }
  0x1d   :  { %184 = vmatpush1.msra.mxu0 %v79_v2  ;;  %321 = vmatpush1.msra.mxu1 %v81_v4  ;;  %v4263_v21 = vrot.slane %v135_v18, %v4248_v16  ;;  %v4266_v22 = vrot.slane %v135_v18, %v4251_v17  ;;  %v4269_v23 = vrot.slane %v135_v18, %v4257_v19 }
  0x1e   :  { %185 = vmatprep.subr.mxu0 %v76_v6  ;;  %322 = vmatprep.subr.mxu1 %v78_v7  ;;  %v4272_v24 = vrot.slane %v135_v18, %v4260_v20 }
  0x1f   :  { %186 = vmatpush1.msra.mxu0 %v75_v8  ;;  %323 = vmatpush1.msra.mxu1 %v77_v9 }
  0x20   :  { %187 = vmatprep.subr.mxu0 %v72_v10  ;;  %324 = vmatprep.subr.mxu1 %v74_v11 }
  0x21   :  { %188 = vmatpush1.msra.mxu0 %v71_v12  ;;  %325 = vmatpush1.msra.mxu1 %v73_v13 }
  0x22   :  { %222 = vmatmul.mubr.f32.vlgmr.msra.gmra.mxu0 %v35_v53  ;;  %359 = vmatmul.mubr.f32.vlgmr.msra.gmra.mxu1 %v35_v53 }
  0x23   :  { %227 = vmatprep.mubr.f32.mxu0 %v3895_v3  ;;  %364 = vmatprep.mubr.f32.mxu1 %v3895_v3 }
  0x26   :  { %228 = vmatmul.mubr.f32.gmra.mxu0 %v36_v54  ;;  %365 = vmatmul.mubr.f32.gmra.mxu1 %v36_v54 }
  0x27   :  { %233 = vmatprep.mubr.f32.mxu0 %v3895_v3  ;;  %370 = vmatprep.mubr.f32.mxu1 %v3895_v3 }
  0x2a   :  { %234 = vmatmul.mubr.f32.gmra.mxu0 %v37_v57  ;;  %371 = vmatmul.mubr.f32.gmra.mxu1 %v37_v57 }
  0x2b   :  { %239 = vmatprep.mubr.f32.mxu0 %v3895_v3  ;;  %376 = vmatprep.mubr.f32.mxu1 %v3895_v3 }
  0x2e   :  { %240 = vmatmul.mubr.f32.gmra.mxu0 %v38_v58  ;;  %377 = vmatmul.mubr.f32.gmra.mxu1 %v38_v58 }
  0x2f   :  { %245 = vmatprep.mubr.f32.mxu0 %v3895_v3  ;;  %382 = vmatprep.mubr.f32.mxu1 %v3895_v3 }
  0x32   :  { %246 = vmatmul.mubr.f32.gmra.mxu0 %v4136_v59  ;;  %383 = vmatmul.mubr.f32.gmra.mxu1 %v4136_v59 }
  0x33   :  { %251 = vmatprep.mubr.f32.mxu0 %v3895_v3  ;;  %388 = vmatprep.mubr.f32.mxu1 %v3895_v3 }
  0x36   :  { %252 = vmatmul.mubr.f32.gmra.mxu0 %v40_v60  ;;  %389 = vmatmul.mubr.f32.gmra.mxu1 %v40_v60 }
  0x37   :  { %257 = vmatprep.mubr.f32.mxu0 %v3895_v3  ;;  %394 = vmatprep.mubr.f32.mxu1 %v3895_v3 }
  0x3a   :  { %258 = vmatmul.mubr.f32.gmra.mxu0 %v4145_v61  ;;  %395 = vmatmul.mubr.f32.gmra.mxu1 %v4145_v61 }
  0x3b   :  { %263 = vmatprep.mubr.f32.mxu0 %v3895_v3  ;;  %400 = vmatprep.mubr.f32.mxu1 %v3895_v3 }
  0x3e   :  { %264 = vmatmul.mubr.f32.gmra.mxu0 %v4150_v62  ;;  %401 = vmatmul.mubr.f32.gmra.mxu1 %v4150_v62 }
  0x3f   :  { %269 = vmatprep.mubr.f32.mxu0 %v3895_v3  ;;  %406 = vmatprep.mubr.f32.mxu1 %v3895_v3 }
  0x42   :  { %270 = vmatmul.mubr.f32.gmra.mxu0 %v4157_v63  ;;  %407 = vmatmul.mubr.f32.gmra.mxu1 %v4157_v63 }
  0x43   :  { %275 = vmatprep.mubr.f32.mxu0 %v3895_v3  ;;  %412 = vmatprep.mubr.f32.mxu1 %v3895_v3 }
  0x46   :  { %276 = vmatmul.mubr.f32.gmra.mxu0 %v4162_v0  ;;  %413 = vmatmul.mubr.f32.gmra.mxu1 %v4162_v0 }
  0x47   :  { %281 = vmatprep.mubr.f32.mxu0 %v3895_v3  ;;  %418 = vmatprep.mubr.f32.mxu1 %v3895_v3 }
  0x4a   :  { %282 = vmatmul.mubr.f32.gmra.mxu0 %v4167_v1  ;;  %419 = vmatmul.mubr.f32.gmra.mxu1 %v4167_v1 }
  0x4b   :  { %287 = vmatprep.mubr.f32.mxu0 %v3895_v3  ;;  %424 = vmatprep.mubr.f32.mxu1 %v3895_v3 }
  0x4e   :  { %288 = vmatmul.mubr.f32.gmra.mxu0 %v4181_v5  ;;  %425 = vmatmul.mubr.f32.gmra.mxu1 %v4181_v5 }
  0xe2   :  { %v223_v25 = vpop.f32.mrf.mxu0  ;;  %v360_v26 = vpop.f32.mrf.mxu1 }
  0xe3   :  { %v224_v27 = vadd.f32 %v223_v25, %v4263_v21  ;;  %v361_v28 = vadd.f32 %v360_v26, %v4266_v22 }
  0xe4   :  { %v225_v29 = vpop.f32.mrf.mxu0  ;;  %v362_v30 = vpop.f32.mrf.mxu1 }
  0xe5   :  { %431 = vst [vmem:[#allocation3] sm:$0xff] %v224_v27  ;;  %433 = vst [vmem:[#allocation3 + $0x10] sm:$0xff] %v361_v28  ;;  %v226_v31 = vadd.f32 %v225_v29, %v4269_v23  ;;  %v363_v32 = vadd.f32 %v362_v30, %v4272_v24 }
  0xe6   :  { %v229_v33 = vpop.f32.mrf.mxu0  ;;  %v366_v34 = vpop.f32.mrf.mxu1 }
  0xe7   :  { %432 = vst [vmem:[#allocation3 + $0x8] sm:$0xff] %v226_v31  ;;  %434 = vst [vmem:[#allocation3 + $0x18] sm:$0xff] %v363_v32  ;;  %v230_v35 = vadd.f32 %v229_v33, %v4263_v21  ;;  %v367_v36 = vadd.f32 %v366_v34, %v4266_v22 }
  0xe8   :  { %v231_v37 = vpop.f32.mrf.mxu0  ;;  %v368_v38 = vpop.f32.mrf.mxu1 }
  0xe9   :  { %435 = vst [vmem:[#allocation3 + $0x20] sm:$0xff] %v230_v35  ;;  %437 = vst [vmem:[#allocation3 + $0x30] sm:$0xff] %v367_v36  ;;  %v232_v39 = vadd.f32 %v231_v37, %v4269_v23  ;;  %v369_v40 = vadd.f32 %v368_v38, %v4272_v24 }
  0xea   :  { %v235_v41 = vpop.f32.mrf.mxu0  ;;  %v372_v42 = vpop.f32.mrf.mxu1 }
  0xeb   :  { %436 = vst [vmem:[#allocation3 + $0x28] sm:$0xff] %v232_v39  ;;  %438 = vst [vmem:[#allocation3 + $0x38] sm:$0xff] %v369_v40  ;;  %v236_v43 = vadd.f32 %v235_v41, %v4263_v21  ;;  %v373_v44 = vadd.f32 %v372_v42, %v4266_v22 }
  0xec   :  { %v237_v45 = vpop.f32.mrf.mxu0  ;;  %v374_v46 = vpop.f32.mrf.mxu1 }
  0xed   :  { %439 = vst [vmem:[#allocation3 + $0x40] sm:$0xff] %v236_v43  ;;  %441 = vst [vmem:[#allocation3 + $0x50] sm:$0xff] %v373_v44  ;;  %v238_v47 = vadd.f32 %v237_v45, %v4269_v23  ;;  %v375_v48 = vadd.f32 %v374_v46, %v4272_v24 }
  0xee   :  { %v241_v49 = vpop.f32.mrf.mxu0  ;;  %v378_v50 = vpop.f32.mrf.mxu1 }
  0xef   :  { %440 = vst [vmem:[#allocation3 + $0x48] sm:$0xff] %v238_v47  ;;  %442 = vst [vmem:[#allocation3 + $0x58] sm:$0xff] %v375_v48  ;;  %v242_v51 = vadd.f32 %v241_v49, %v4263_v21  ;;  %v379_v52 = vadd.f32 %v378_v50, %v4266_v22 }
  0xf0   :  { %v243_v53 = vpop.f32.mrf.mxu0  ;;  %v380_v54 = vpop.f32.mrf.mxu1 }
  0xf1   :  { %443 = vst [vmem:[#allocation3 + $0x60] sm:$0xff] %v242_v51  ;;  %445 = vst [vmem:[#allocation3 + $0x70] sm:$0xff] %v379_v52  ;;  %v244_v55 = vadd.f32 %v243_v53, %v4269_v23  ;;  %v381_v56 = vadd.f32 %v380_v54, %v4272_v24 }
  0xf2   :  { %v247_v57 = vpop.f32.mrf.mxu0  ;;  %v384_v58 = vpop.f32.mrf.mxu1 }
  0xf3   :  { %444 = vst [vmem:[#allocation3 + $0x68] sm:$0xff] %v244_v55  ;;  %446 = vst [vmem:[#allocation3 + $0x78] sm:$0xff] %v381_v56  ;;  %v248_v59 = vadd.f32 %v247_v57, %v4263_v21  ;;  %v385_v60 = vadd.f32 %v384_v58, %v4266_v22 }
  0xf4   :  { %v249_v61 = vpop.f32.mrf.mxu0  ;;  %v386_v62 = vpop.f32.mrf.mxu1 }
  0xf5   :  { %447 = vst [vmem:[#allocation3 + $0x80] sm:$0xff] %v248_v59  ;;  %449 = vst [vmem:[#allocation3 + $0x90] sm:$0xff] %v385_v60  ;;  %v250_v63 = vadd.f32 %v249_v61, %v4269_v23  ;;  %v387_v0 = vadd.f32 %v386_v62, %v4272_v24 }
  0xf6   :  { %v253_v1 = vpop.f32.mrf.mxu0  ;;  %v390_v2 = vpop.f32.mrf.mxu1 }
  0xf7   :  { %448 = vst [vmem:[#allocation3 + $0x88] sm:$0xff] %v250_v63  ;;  %450 = vst [vmem:[#allocation3 + $0x98] sm:$0xff] %v387_v0  ;;  %v254_v4 = vadd.f32 %v253_v1, %v4263_v21  ;;  %v391_v5 = vadd.f32 %v390_v2, %v4266_v22 }
  0xf8   :  { %v255_v6 = vpop.f32.mrf.mxu0  ;;  %v392_v7 = vpop.f32.mrf.mxu1 }
  0xf9   :  { %451 = vst [vmem:[#allocation3 + $0xa0] sm:$0xff] %v254_v4  ;;  %453 = vst [vmem:[#allocation3 + $0xb0] sm:$0xff] %v391_v5  ;;  %v256_v8 = vadd.f32 %v255_v6, %v4269_v23  ;;  %v393_v9 = vadd.f32 %v392_v7, %v4272_v24 }
  0xfa   :  { %v259_v10 = vpop.f32.mrf.mxu0  ;;  %v396_v11 = vpop.f32.mrf.mxu1 }
  0xfb   :  { %452 = vst [vmem:[#allocation3 + $0xa8] sm:$0xff] %v256_v8  ;;  %454 = vst [vmem:[#allocation3 + $0xb8] sm:$0xff] %v393_v9  ;;  %v260_v12 = vadd.f32 %v259_v10, %v4263_v21  ;;  %v397_v13 = vadd.f32 %v396_v11, %v4266_v22 }
  0xfc   :  { %v261_v18 = vpop.f32.mrf.mxu0  ;;  %v398_v25 = vpop.f32.mrf.mxu1 }
  0xfd   :  { %455 = vst [vmem:[#allocation3 + $0xc0] sm:$0xff] %v260_v12  ;;  %457 = vst [vmem:[#allocation3 + $0xd0] sm:$0xff] %v397_v13  ;;  %v262_v26 = vadd.f32 %v261_v18, %v4269_v23  ;;  %v399_v27 = vadd.f32 %v398_v25, %v4272_v24 }
  0xfe   :  { %v265_v28 = vpop.f32.mrf.mxu0  ;;  %v402_v29 = vpop.f32.mrf.mxu1 }
  0xff   :  { %456 = vst [vmem:[#allocation3 + $0xc8] sm:$0xff] %v262_v26  ;;  %458 = vst [vmem:[#allocation3 + $0xd8] sm:$0xff] %v399_v27  ;;  %v266_v30 = vadd.f32 %v265_v28, %v4263_v21  ;;  %v403_v31 = vadd.f32 %v402_v29, %v4266_v22 }
 0x100   :  { %v267_v32 = vpop.f32.mrf.mxu0  ;;  %v404_v33 = vpop.f32.mrf.mxu1 }
 0x101   :  { %459 = vst [vmem:[#allocation3 + $0xe0] sm:$0xff] %v266_v30  ;;  %461 = vst [vmem:[#allocation3 + $0xf0] sm:$0xff] %v403_v31  ;;  %v268_v34 = vadd.f32 %v267_v32, %v4269_v23  ;;  %v405_v35 = vadd.f32 %v404_v33, %v4272_v24 }
 0x102   :  { %v271_v36 = vpop.f32.mrf.mxu0  ;;  %v408_v37 = vpop.f32.mrf.mxu1 }
 0x103   :  { %460 = vst [vmem:[#allocation3 + $0xe8] sm:$0xff] %v268_v34  ;;  %462 = vst [vmem:[#allocation3 + $0xf8] sm:$0xff] %v405_v35  ;;  %v272_v38 = vadd.f32 %v271_v36, %v4263_v21  ;;  %v409_v39 = vadd.f32 %v408_v37, %v4266_v22 }
 0x104   :  { %v273_v40 = vpop.f32.mrf.mxu0  ;;  %v410_v41 = vpop.f32.mrf.mxu1 }
 0x105   :  { %463 = vst [vmem:[#allocation3 + $0x100] sm:$0xff] %v272_v38  ;;  %465 = vst [vmem:[#allocation3 + $0x110] sm:$0xff] %v409_v39  ;;  %v274_v42 = vadd.f32 %v273_v40, %v4269_v23  ;;  %v411_v43 = vadd.f32 %v410_v41, %v4272_v24 }
 0x106   :  { %v277_v44 = vpop.f32.mrf.mxu0  ;;  %v414_v45 = vpop.f32.mrf.mxu1 }
 0x107   :  { %464 = vst [vmem:[#allocation3 + $0x108] sm:$0xff] %v274_v42  ;;  %466 = vst [vmem:[#allocation3 + $0x118] sm:$0xff] %v411_v43  ;;  %v278_v46 = vadd.f32 %v277_v44, %v4263_v21  ;;  %v415_v47 = vadd.f32 %v414_v45, %v4266_v22 }
 0x108   :  { %v279_v48 = vpop.f32.mrf.mxu0  ;;  %v416_v49 = vpop.f32.mrf.mxu1 }
 0x109   :  { %467 = vst [vmem:[#allocation3 + $0x120] sm:$0xff] %v278_v46  ;;  %469 = vst [vmem:[#allocation3 + $0x130] sm:$0xff] %v415_v47  ;;  %v280_v50 = vadd.f32 %v279_v48, %v4269_v23  ;;  %v417_v51 = vadd.f32 %v416_v49, %v4272_v24 }
 0x10a   :  { %v283_v52 = vpop.f32.mrf.mxu0  ;;  %v420_v53 = vpop.f32.mrf.mxu1 }
 0x10b   :  { %468 = vst [vmem:[#allocation3 + $0x128] sm:$0xff] %v280_v50  ;;  %470 = vst [vmem:[#allocation3 + $0x138] sm:$0xff] %v417_v51  ;;  %v284_v54 = vadd.f32 %v283_v52, %v4263_v21  ;;  %v421_v55 = vadd.f32 %v420_v53, %v4266_v22 }
 0x10c   :  { %v285_v56 = vpop.f32.mrf.mxu0  ;;  %v422_v57 = vpop.f32.mrf.mxu1 }
 0x10d   :  { %471 = vst [vmem:[#allocation3 + $0x140] sm:$0xff] %v284_v54  ;;  %473 = vst [vmem:[#allocation3 + $0x150] sm:$0xff] %v421_v55  ;;  %v286_v58 = vadd.f32 %v285_v56, %v4269_v23  ;;  %v423_v59 = vadd.f32 %v422_v57, %v4272_v24 }
 0x10e   :  { %v289_v60 = vpop.f32.mrf.mxu0  ;;  %v426_v61 = vpop.f32.mrf.mxu1 }
 0x10f   :  { %472 = vst [vmem:[#allocation3 + $0x148] sm:$0xff] %v286_v58  ;;  %474 = vst [vmem:[#allocation3 + $0x158] sm:$0xff] %v423_v59  ;;  %v290_v62 = vadd.f32 %v289_v60, %v4263_v21  ;;  %v427_v63 = vadd.f32 %v426_v61, %v4266_v22 }
 0x110   :  { %v291_v0 = vpop.f32.mrf.mxu0  ;;  %v428_v1 = vpop.f32.mrf.mxu1 }
 0x111   :  { %475 = vst [vmem:[#allocation3 + $0x160] sm:$0xff] %v290_v62  ;;  %477 = vst [vmem:[#allocation3 + $0x170] sm:$0xff] %v427_v63  ;;  %v292_v2 = vadd.f32 %v291_v0, %v4269_v23  ;;  %v429_v4 = vadd.f32 %v428_v1, %v4272_v24 }
 0x113   :  { %476 = vst [vmem:[#allocation3 + $0x168] sm:$0xff] %v292_v2  ;;  %478 = vst [vmem:[#allocation3 + $0x178] sm:$0xff] %v429_v4 }
 0x114 LB: > { %v558_v21 = vld [vmem:[%s5976_s2 + $0x1e8] sm:$0xff]  ;;  %v560_v22 = vld [vmem:[%s5976_s2 + $0x1f8] sm:$0xff]  ;;  %v557_v23 = vld [vmem:[%s5976_s2 + $0x1e0] sm:$0xff]  ;;  %s487_s0 = sshra.s32 %s3885_s26, 3  ;;  %s490_s15 = sand.u32 7, %s3885_s26  ;;  %s3885_s26 = sphi %s4322_s26, %s486_s26  }
 0x115   : > { %561 = vmatprep.subr.mxu0 %v558_v21  ;;  %632 = vmatprep.subr.mxu1 %v560_v22  ;;  %v559_v24 = vld [vmem:[%s5976_s2 + $0x1f0] sm:$0xff]  ;;  %v554_v5 = vld [vmem:[%s5976_s2 + $0x1c8] sm:$0xff]  ;;  %v556_v6 = vld [vmem:[%s5976_s2 + $0x1d8] sm:$0xff]  ;;  %s3405_s16 = sshll.u32 %s487_s0, 5  ;;  %s767_s19 = scalar_lea.vmem [#allocation2], %s3885_s26 }
 0x116   : > { %562 = vmatpush1.msra.mxu0 %v557_v23  ;;  %633 = vmatpush1.msra.mxu1 %v559_v24  ;;  %v553_v7 = vld [vmem:[%s5976_s2 + $0x1c0] sm:$0xff]  ;;  %v555_v8 = vld [vmem:[%s5976_s2 + $0x1d0] sm:$0xff]  ;;  %v550_v9 = vld [vmem:[%s5976_s2 + $0x1a8] sm:$0xff]  ;;  %s493_s17 = sadd.s32 %s3405_s16, %s490_s15  ;;  %s486_s26 = sadd.s32 1, %s3885_s26  }
 0x117   : > { %563 = vmatprep.subr.mxu0 %v554_v5  ;;  %634 = vmatprep.subr.mxu1 %v556_v6  ;;  %v552_v10 = vld [vmem:[%s5976_s2 + $0x1b8] sm:$0xff]  ;;  %v549_v11 = vld [vmem:[%s5976_s2 + $0x1a0] sm:$0xff]  ;;  %v551_v12 = vld [vmem:[%s5976_s2 + $0x1b0] sm:$0xff]  ;;  %s494_s18 = scalar_lea.vmem [#allocation3], %s493_s17  ;;  %p483_p0 = scmp.ge.s32.totalorder %s486_s26, 90  }
 0x118   : > { %564 = vmatpush1.msra.mxu0 %v553_v7  ;;  %635 = vmatpush1.msra.mxu1 %v555_v8  ;;  %v546_v13 = vld [vmem:[%s5976_s2 + $0x188] sm:$0xff]  ;;  %v548_v18 = vld [vmem:[%s5976_s2 + $0x198] sm:$0xff]  ;;  %v545_v25 = vld [vmem:[%s5976_s2 + $0x180] sm:$0xff]  ;;  %s4812_s24 = smov (%p483_p0), 0  }
 0x119   : > { %565 = vmatprep.subr.mxu0 %v550_v9  ;;  %636 = vmatprep.subr.mxu1 %v552_v10  ;;  %v547_v26 = vld [vmem:[%s5976_s2 + $0x190] sm:$0xff]  ;;  %v542_v27 = vld [vmem:[%s5976_s2 + $0x168] sm:$0xff]  ;;  %v544_v28 = vld [vmem:[%s5976_s2 + $0x178] sm:$0xff]  ;;  %v3896_v9 = vmov 0.0   ;;  %v3897_v10 = vmov 1966171168  }
 0x11a   : > { %566 = vmatpush1.msra.mxu0 %v549_v11  ;;  %637 = vmatpush1.msra.mxu1 %v551_v12  ;;  %v541_v29 = vld [vmem:[%s5976_s2 + $0x160] sm:$0xff]  ;;  %v543_v30 = vld [vmem:[%s5976_s2 + $0x170] sm:$0xff]  ;;  %v538_v31 = vld [vmem:[%s5976_s2 + $0x148] sm:$0xff]  ;;  %v710_v11 = vunpack.c.l.s4 %v3897_v10 }
 0x11b   : > { %567 = vmatprep.subr.mxu0 %v546_v13  ;;  %638 = vmatprep.subr.mxu1 %v548_v18  ;;  %v540_v32 = vld [vmem:[%s5976_s2 + $0x158] sm:$0xff]  ;;  %v537_v33 = vld [vmem:[%s5976_s2 + $0x140] sm:$0xff]  ;;  %v539_v34 = vld [vmem:[%s5976_s2 + $0x150] sm:$0xff] }
 0x11c   : > { %568 = vmatpush1.msra.mxu0 %v545_v25  ;;  %639 = vmatpush1.msra.mxu1 %v547_v26  ;;  %v534_v35 = vld [vmem:[%s5976_s2 + $0x128] sm:$0xff]  ;;  %v536_v36 = vld [vmem:[%s5976_s2 + $0x138] sm:$0xff]  ;;  %v533_v37 = vld [vmem:[%s5976_s2 + $0x120] sm:$0xff]  ;;  %v711_v12 = vunpack.c.0.s8 %v710_v11 }
 0x11d   : > { %569 = vmatprep.subr.mxu0 %v542_v27  ;;  %640 = vmatprep.subr.mxu1 %v544_v28  ;;  %v535_v38 = vld [vmem:[%s5976_s2 + $0x130] sm:$0xff]  ;;  %v530_v39 = vld [vmem:[%s5976_s2 + $0x108] sm:$0xff]  ;;  %v532_v40 = vld [vmem:[%s5976_s2 + $0x118] sm:$0xff] }
 0x11e   : > { %570 = vmatpush1.msra.mxu0 %v541_v29  ;;  %641 = vmatpush1.msra.mxu1 %v543_v30  ;;  %v529_v41 = vld [vmem:[%s5976_s2 + $0x100] sm:$0xff]  ;;  %v531_v42 = vld [vmem:[%s5976_s2 + $0x110] sm:$0xff]  ;;  %v526_v43 = vld [vmem:[%s5976_s2 + $0xe8] sm:$0xff]  ;;  %v4522_v25 = vsub.s32 %v711_v12, %v4245_v15 }
 0x11f   : > { %571 = vmatprep.subr.mxu0 %v538_v31  ;;  %642 = vmatprep.subr.mxu1 %v540_v32  ;;  %v528_v44 = vld [vmem:[%s5976_s2 + $0xf8] sm:$0xff]  ;;  %v525_v45 = vld [vmem:[%s5976_s2 + $0xe0] sm:$0xff]  ;;  %v527_v46 = vld [vmem:[%s5976_s2 + $0xf0] sm:$0xff] }
 0x120   : > { %572 = vmatpush1.msra.mxu0 %v537_v33  ;;  %643 = vmatpush1.msra.mxu1 %v539_v34  ;;  %v522_v47 = vld [vmem:[%s5976_s2 + $0xc8] sm:$0xff]  ;;  %v524_v48 = vld [vmem:[%s5976_s2 + $0xd8] sm:$0xff]  ;;  %v521_v49 = vld [vmem:[%s5976_s2 + $0xc0] sm:$0xff] }
 0x121   : > { %573 = vmatprep.subr.mxu0 %v534_v35  ;;  %644 = vmatprep.subr.mxu1 %v536_v36  ;;  %v523_v50 = vld [vmem:[%s5976_s2 + $0xd0] sm:$0xff]  ;;  %v518_v51 = vld [vmem:[%s5976_s2 + $0xa8] sm:$0xff]  ;;  %v520_v52 = vld [vmem:[%s5976_s2 + $0xb8] sm:$0xff] }
 0x122   : > { %574 = vmatpush1.msra.mxu0 %v533_v37  ;;  %645 = vmatpush1.msra.mxu1 %v535_v38  ;;  %v517_v53 = vld [vmem:[%s5976_s2 + $0xa0] sm:$0xff]  ;;  %v519_v54 = vld [vmem:[%s5976_s2 + $0xb0] sm:$0xff]  ;;  %v514_v55 = vld [vmem:[%s5976_s2 + $0x88] sm:$0xff] }
 0x123   : > { %575 = vmatprep.subr.mxu0 %v530_v39  ;;  %646 = vmatprep.subr.mxu1 %v532_v40  ;;  %v516_v56 = vld [vmem:[%s5976_s2 + $0x98] sm:$0xff]  ;;  %v513_v57 = vld [vmem:[%s5976_s2 + $0x80] sm:$0xff]  ;;  %v515_v58 = vld [vmem:[%s5976_s2 + $0x90] sm:$0xff] }
 0x124   : > { %576 = vmatpush1.msra.mxu0 %v529_v41  ;;  %647 = vmatpush1.msra.mxu1 %v531_v42  ;;  %v510_v59 = vld [vmem:[%s5976_s2 + $0x68] sm:$0xff]  ;;  %v512_v60 = vld [vmem:[%s5976_s2 + $0x78] sm:$0xff]  ;;  %v509_v61 = vld [vmem:[%s5976_s2 + $0x60] sm:$0xff] }
 0x125   : > { %577 = vmatprep.subr.mxu0 %v526_v43  ;;  %648 = vmatprep.subr.mxu1 %v528_v44  ;;  %v511_v62 = vld [vmem:[%s5976_s2 + $0x70] sm:$0xff]  ;;  %v506_v63 = vld [vmem:[%s5976_s2 + $0x48] sm:$0xff]  ;;  %v508_v0 = vld [vmem:[%s5976_s2 + $0x58] sm:$0xff] }
 0x126   : > { %578 = vmatpush1.msra.mxu0 %v525_v45  ;;  %649 = vmatpush1.msra.mxu1 %v527_v46  ;;  %v505_v1 = vld [vmem:[%s5976_s2 + $0x40] sm:$0xff]  ;;  %v507_v2 = vld [vmem:[%s5976_s2 + $0x50] sm:$0xff]  ;;  %v502_v4 = vld [vmem:[%s5976_s2 + $0x28] sm:$0xff] }
 0x127   : > { %579 = vmatprep.subr.mxu0 %v522_v47  ;;  %650 = vmatprep.subr.mxu1 %v524_v48  ;;  %v504_v21 = vld [vmem:[%s5976_s2 + $0x38] sm:$0xff]  ;;  %v501_v22 = vld [vmem:[%s5976_s2 + $0x20] sm:$0xff]  ;;  %v503_v23 = vld [vmem:[%s5976_s2 + $0x30] sm:$0xff] }
 0x128   : > { %580 = vmatpush1.msra.mxu0 %v521_v49  ;;  %651 = vmatpush1.msra.mxu1 %v523_v50  ;;  %v498_v24 = vld [vmem:[%s5976_s2 + $0x8] sm:$0xff]  ;;  %v500_v5 = vld [vmem:[%s5976_s2 + $0x18] sm:$0xff]  ;;  %v497_v6 = vld [vmem:[%s5976_s2] sm:$0xff] }
 0x129   : > { %581 = vmatprep.subr.mxu0 %v518_v51  ;;  %652 = vmatprep.subr.mxu1 %v520_v52  ;;  %v499_v7 = vld [vmem:[%s5976_s2 + $0x10] sm:$0xff]  ;;  %v496_v8 = vld [vmem:[#allocation4] sm:$0x1]  ;;  %v759_v48 = vld [vmem:[#allocation5] sm:$0x1] }
 0x12a   : > { %582 = vmatpush1.msra.mxu0 %v517_v53  ;;  %653 = vmatpush1.msra.mxu1 %v519_v54  ;;  %v495_v33 = vld [vmem:[%s494_s18] ss:$8 sm:$0xf] }
 0x12b   : > { %583 = vmatprep.subr.mxu0 %v514_v55  ;;  %654 = vmatprep.subr.mxu1 %v516_v56  ;;  %v3160_v15 = vld [vmem:[%s5975_s1 + $0x3f0] sm:$0xff] (%p483_p0)  ;;  %v3139_v10 = vld [vmem:[%s5975_s1 + $0x348] sm:$0xff] (%p483_p0)  ;;  %v3141_v11 = vld [vmem:[%s5975_s1 + $0x358] sm:$0xff] (%p483_p0) }
 0x12c   : > { %584 = vmatpush1.msra.mxu0 %v513_v57  ;;  %655 = vmatpush1.msra.mxu1 %v515_v58  ;;  %v3159_v58 = vld [vmem:[%s5975_s1 + $0x3e8] sm:$0xff] (%p483_p0)  ;;  %v3138_v12 = vld [vmem:[%s5975_s1 + $0x340] sm:$0xff] (%p483_p0) }
 0x12d   : > { %585 = vmatprep.subr.mxu0 %v510_v59  ;;  %656 = vmatprep.subr.mxu1 %v512_v60  ;;  %v3161_v59 = vld [vmem:[%s5975_s1 + $0x3f8] sm:$0xff] (%p483_p0)  ;;  %v3158_v60 = vld [vmem:[%s5975_s1 + $0x3e0] sm:$0xff] (%p483_p0) }
 0x12e   : > { %586 = vmatpush1.msra.mxu0 %v509_v61  ;;  %657 = vmatpush1.msra.mxu1 %v511_v62  ;;  %v3155_v61 = vld [vmem:[%s5975_s1 + $0x3c8] sm:$0xff] (%p483_p0)  ;;  %v3157_v62 = vld [vmem:[%s5975_s1 + $0x3d8] sm:$0xff] (%p483_p0) }
 0x12f   : > { %587 = vmatprep.subr.mxu0 %v506_v63  ;;  %658 = vmatprep.subr.mxu1 %v508_v0  ;;  %v3154_v63 = vld [vmem:[%s5975_s1 + $0x3c0] sm:$0xff] (%p483_p0)  ;;  %v3156_v0 = vld [vmem:[%s5975_s1 + $0x3d0] sm:$0xff] (%p483_p0) }
 0x130   : > { %588 = vmatpush1.msra.mxu0 %v505_v1  ;;  %659 = vmatpush1.msra.mxu1 %v507_v2  ;;  %v3151_v1 = vld [vmem:[%s5975_s1 + $0x3a8] sm:$0xff] (%p483_p0)  ;;  %v3153_v2 = vld [vmem:[%s5975_s1 + $0x3b8] sm:$0xff] (%p483_p0) }
 0x131   : > { %589 = vmatprep.subr.mxu0 %v502_v4  ;;  %660 = vmatprep.subr.mxu1 %v504_v21  ;;  %v3150_v4 = vld [vmem:[%s5975_s1 + $0x3a0] sm:$0xff] (%p483_p0)  ;;  %v3152_v21 = vld [vmem:[%s5975_s1 + $0x3b0] sm:$0xff] (%p483_p0) }
 0x132   : > { %590 = vmatpush1.msra.mxu0 %v501_v22  ;;  %661 = vmatpush1.msra.mxu1 %v503_v23  ;;  %v3147_v22 = vld [vmem:[%s5975_s1 + $0x388] sm:$0xff] (%p483_p0)  ;;  %v3149_v23 = vld [vmem:[%s5975_s1 + $0x398] sm:$0xff] (%p483_p0) }
 0x133   : > { %591 = vmatprep.subr.mxu0 %v498_v24  ;;  %662 = vmatprep.subr.mxu1 %v500_v5  ;;  %v3146_v24 = vld [vmem:[%s5975_s1 + $0x380] sm:$0xff] (%p483_p0)  ;;  %v3148_v5 = vld [vmem:[%s5975_s1 + $0x390] sm:$0xff] (%p483_p0) }
 0x134   : > { %592 = vmatpush1.msra.mxu0 %v497_v6  ;;  %625 = vmatprep.mubr.f32.mxu0 %v3896_v9  ;;  %v3143_v6 = vld [vmem:[%s5975_s1 + $0x368] sm:$0xff] (%p483_p0) }
 0x135   : > { %663 = vmatpush1.msra.mxu1 %v499_v7  ;;  %696 = vmatprep.mubr.f32.mxu1 %v3896_v9  ;;  %v3145_v7 = vld [vmem:[%s5975_s1 + $0x378] sm:$0xff] (%p483_p0)  ;;  %v3144_v9 = vld [vmem:[%s5975_s1 + $0x370] sm:$0xff] (%p483_p0) }
 0x136   : > { %626 = vmatmul.mubr.f32.vlgmr.msra.gmra.mxu0 %v496_v8  ;;  %697 = vmatmul.mubr.f32.vlgmr.msra.gmra.mxu1 %v496_v8  ;;  %v3142_v8 = vld [vmem:[%s5975_s1 + $0x360] sm:$0xff] (%p483_p0) }
 0x137   :  { %933 = vmatprep.mubr.f32.mxu0 (%p483_p0), %v3895_v3  ;;  %1070 = vmatprep.mubr.f32.mxu1 (%p483_p0), %v3895_v3 }
 0x138   :  { %869 = vmatprep.subr.mxu0 (%p483_p0), %v3159_v58  ;;  %1006 = vmatprep.subr.mxu1 (%p483_p0), %v3161_v59  ;;  %v3105_v58 = vld [vmem:[%s5975_s1 + $0x238] sm:$0xff] (%p483_p0)  ;;  %v3102_v59 = vld [vmem:[%s5975_s1 + $0x220] sm:$0xff] (%p483_p0) }
 0x139   :  { %870 = vmatpush1.msra.mxu0 (%p483_p0), %v3158_v60  ;;  %1007 = vmatpush1.msra.mxu1 (%p483_p0), %v3160_v15  ;;  %v3104_v60 = vld [vmem:[%s5975_s1 + $0x230] sm:$0xff] (%p483_p0)  ;;  %v3099_v15 = vld [vmem:[%s5975_s1 + $0x208] sm:$0xff] (%p483_p0) }
 0x13a   :  { %871 = vmatprep.subr.mxu0 (%p483_p0), %v3155_v61  ;;  %1008 = vmatprep.subr.mxu1 (%p483_p0), %v3157_v62  ;;  %v3101_v61 = vld [vmem:[%s5975_s1 + $0x218] sm:$0xff] (%p483_p0)  ;;  %v3098_v62 = vld [vmem:[%s5975_s1 + $0x200] sm:$0xff] (%p483_p0) }
 0x13b   :  { %872 = vmatpush1.msra.mxu0 (%p483_p0), %v3154_v63  ;;  %1009 = vmatpush1.msra.mxu1 (%p483_p0), %v3156_v0  ;;  %v3100_v63 = vld [vmem:[%s5975_s1 + $0x210] sm:$0xff] (%p483_p0) }
 0x13c   :  { %873 = vmatprep.subr.mxu0 (%p483_p0), %v3151_v1  ;;  %1010 = vmatprep.subr.mxu1 (%p483_p0), %v3153_v2 }
 0x13d   :  { %874 = vmatpush1.msra.mxu0 (%p483_p0), %v3150_v4  ;;  %1011 = vmatpush1.msra.mxu1 (%p483_p0), %v3152_v21 }
 0x13e   :  { %875 = vmatprep.subr.mxu0 (%p483_p0), %v3147_v22  ;;  %1012 = vmatprep.subr.mxu1 (%p483_p0), %v3149_v23 }
 0x13f   :  { %876 = vmatpush1.msra.mxu0 (%p483_p0), %v3146_v24  ;;  %1013 = vmatpush1.msra.mxu1 (%p483_p0), %v3148_v5 }
 0x140   :  { %877 = vmatprep.subr.mxu0 (%p483_p0), %v3143_v6  ;;  %1014 = vmatprep.subr.mxu1 (%p483_p0), %v3145_v7 }
 0x141   :  { %878 = vmatpush1.msra.mxu0 (%p483_p0), %v3142_v8  ;;  %1015 = vmatpush1.msra.mxu1 (%p483_p0), %v3144_v9  ;;  %v3162_v9 = vld [vmem:[%s5985_s3 + $0x4] sm:$0xf] (%p483_p0) }
 0x142   :  { %879 = vmatprep.subr.mxu0 (%p483_p0), %v3139_v10  ;;  %1016 = vmatprep.subr.mxu1 (%p483_p0), %v3141_v11  ;;  %v4753_v10 = vrot.slane (%p483_p0), %v3162_v9, %v4248_v16  ;;  %v4756_v11 = vrot.slane (%p483_p0), %v3162_v9, %v4251_v17 }
 0x143   :  { %880 = vmatpush1.msra.mxu0 (%p483_p0), %v3138_v12  ;;  %v4759_v12 = vrot.slane (%p483_p0), %v3162_v9, %v4257_v19 }
 0x1f6   : > { %v627_v13 = vpop.f32.mrf.mxu0  ;;  %v698_v18 = vpop.f32.mrf.mxu1 }
 0x1f8   : > { %v629_v26 = vpop.f32.mrf.mxu0  ;;  %v700_v27 = vpop.f32.mrf.mxu1 }
 0x1f9   : > { %v707_v28 = vcombine.low %v627_v13, %v629_v26  ;;  %v708_v29 = vcombine.low %v698_v18, %v700_v27  ;;  %v3140_v13 = vld [vmem:[%s5975_s1 + $0x350] sm:$0xff] (%p483_p0)  ;;  %v3135_v18 = vld [vmem:[%s5975_s1 + $0x328] sm:$0xff] (%p483_p0)  ;;  %v3137_v26 = vld [vmem:[%s5975_s1 + $0x338] sm:$0xff] (%p483_p0) }
 0x1fa   :  { %v3134_v27 = vld [vmem:[%s5975_s1 + $0x320] sm:$0xff] (%p483_p0)  ;;  %1017 = vmatpush1.msra.mxu1 (%p483_p0), %v3140_v13  ;;  %881 = vmatprep.subr.mxu0 (%p483_p0), %v3135_v18  ;;  %v4762_v13 = vrot.slane (%p483_p0), %v3162_v9, %v4260_v20 }
 0x1fb   : > { %v715_v30 = vrot.slane %v707_v28, %v4522_v25  ;;  %v722_v31 = vrot.slane %v708_v29, %v4522_v25  ;;  %v3136_v28 = vld [vmem:[%s5975_s1 + $0x330] sm:$0xff] (%p483_p0)  ;;  %v3131_v29 = vld [vmem:[%s5975_s1 + $0x308] sm:$0xff] (%p483_p0)  ;;  %1018 = vmatprep.subr.mxu1 (%p483_p0), %v3137_v26  ;;  %882 = vmatpush1.msra.mxu0 (%p483_p0), %v3134_v27 }
 0x1fc   :  { %1019 = vmatpush1.msra.mxu1 (%p483_p0), %v3136_v28  ;;  %883 = vmatprep.subr.mxu0 (%p483_p0), %v3131_v29 }
 0x1fd   : > { %v723_v32 = vcombine.low %v715_v30, %v722_v31  ;;  %v3133_v30 = vld [vmem:[%s5975_s1 + $0x318] sm:$0xff] (%p483_p0)  ;;  %v3130_v31 = vld [vmem:[%s5975_s1 + $0x300] sm:$0xff] (%p483_p0) }
 0x1fe   :  { %1020 = vmatprep.subr.mxu1 (%p483_p0), %v3133_v30  ;;  %884 = vmatpush1.msra.mxu0 (%p483_p0), %v3130_v31 }
 0x1ff   : > { %v730_v34 = vrot.slane %v723_v32, %v4522_v25  ;;  %v3132_v32 = vld [vmem:[%s5975_s1 + $0x310] sm:$0xff] (%p483_p0) }
 0x200   :  { %1021 = vmatpush1.msra.mxu1 (%p483_p0), %v3132_v32 }
 0x201   : > { %v732_v35 = vadd.f32 %v730_v34, %v495_v33  ;;  %v3127_v33 = vld [vmem:[%s5975_s1 + $0x2e8] sm:$0xff] (%p483_p0)  ;;  %v3129_v34 = vld [vmem:[%s5975_s1 + $0x2f8] sm:$0xff] (%p483_p0) }
 0x202   :  { %885 = vmatprep.subr.mxu0 (%p483_p0), %v3127_v33  ;;  %1022 = vmatprep.subr.mxu1 (%p483_p0), %v3129_v34 }
 0x203   : > { %v3095_v36 = vmul.f32 -1.442695, %v732_v35  ;;  %v740_v37 = vrot.slane %v732_v35, 1  ;;  %v751_v39 = vrot.slane %v732_v35, 3  ;;  %v748_v42 = vrot.slane %v732_v35, 2  ;;  %v3126_v35 = vld [vmem:[%s5975_s1 + $0x2e0] sm:$0xff] (%p483_p0) }
 0x204   :  { %886 = vmatpush1.msra.mxu0 (%p483_p0), %v3126_v35 }
 0x205   : > { %3703 = vpow2.f32 %v3095_v36  ;;  %v3096_v38 = vmul.f32 -1.442695, %v740_v37  ;;  %v3097_v40 = vmul.f32 -1.442695, %v751_v39  ;;  %v3128_v36 = vld [vmem:[%s5975_s1 + $0x2f0] sm:$0xff] (%p483_p0)  ;;  %v3123_v37 = vld [vmem:[%s5975_s1 + $0x2c8] sm:$0xff] (%p483_p0) }
 0x206   :  { %v3122_v39 = vld [vmem:[%s5975_s1 + $0x2c0] sm:$0xff] (%p483_p0)  ;;  %1023 = vmatpush1.msra.mxu1 (%p483_p0), %v3128_v36  ;;  %887 = vmatprep.subr.mxu0 (%p483_p0), %v3123_v37 }
 0x207   : > { %3705 = vpow2.f32 %v3096_v38  ;;  %v3125_v38 = vld [vmem:[%s5975_s1 + $0x2d8] sm:$0xff] (%p483_p0)  ;;  %888 = vmatpush1.msra.mxu0 (%p483_p0), %v3122_v39 }
 0x208   : > { %3707 = vpow2.f32 %v3097_v40  ;;  %v3124_v40 = vld [vmem:[%s5975_s1 + $0x2d0] sm:$0xff] (%p483_p0)  ;;  %1024 = vmatprep.subr.mxu1 (%p483_p0), %v3125_v38 }
 0x209   :  { %1025 = vmatpush1.msra.mxu1 (%p483_p0), %v3124_v40 }
 0x212   : > { %v3704_v41 = vpop.eup %3703 }
 0x213   : > { %v736_v43 = vadd.f32 1.0, %v3704_v41  ;;  %v3119_v41 = vld [vmem:[%s5975_s1 + $0x2a8] sm:$0xff] (%p483_p0) }
 0x214   : > { %v3706_v44 = vpop.eup %3705  ;;  %889 = vmatprep.subr.mxu0 (%p483_p0), %v3119_v41 }
 0x215   : > { %3709 = vrcp.f32 %v736_v43  ;;  %v745_v45 = vadd.f32 1.0, %v3706_v44  ;;  %v3708_v46 = vpop.eup %3707  ;;  %v3118_v43 = vld [vmem:[%s5975_s1 + $0x2a0] sm:$0xff] (%p483_p0)  ;;  %v3120_v44 = vld [vmem:[%s5975_s1 + $0x2b0] sm:$0xff] (%p483_p0) }
 0x216   : > { %3711 = vtanh.f32 %v748_v42  ;;  %v756_v51 = vadd.f32 1.0, %v3708_v46  ;;  %v3121_v42 = vld [vmem:[%s5975_s1 + $0x2b8] sm:$0xff] (%p483_p0)  ;;  %890 = vmatpush1.msra.mxu0 (%p483_p0), %v3118_v43 }
 0x217   : > { %3713 = vrcp.f32 %v745_v45  ;;  %v3115_v45 = vld [vmem:[%s5975_s1 + $0x288] sm:$0xff] (%p483_p0)  ;;  %v3117_v46 = vld [vmem:[%s5975_s1 + $0x298] sm:$0xff] (%p483_p0)  ;;  %1026 = vmatprep.subr.mxu1 (%p483_p0), %v3121_v42 }
 0x218   : > { %3715 = vrcp.f32 %v756_v51  ;;  %1027 = vmatpush1.msra.mxu1 (%p483_p0), %v3120_v44  ;;  %891 = vmatprep.subr.mxu0 (%p483_p0), %v3115_v45  ;;  %v3110_v51 = vld [vmem:[%s5975_s1 + $0x260] sm:$0xff] (%p483_p0) }
 0x219   :  { %1028 = vmatprep.subr.mxu1 (%p483_p0), %v3117_v46 }
 0x222   : > { %v3710_v47 = vpop.eup %3709 }
 0x223   : > { %v3712_v49 = vpop.eup %3711 }
 0x224   : > { %v3714_v50 = vpop.eup %3713  ;;  %v761_v53 = vmul.f32 %v3712_v49, %v3710_v47  ;;  %v3114_v47 = vld [vmem:[%s5975_s1 + $0x280] sm:$0xff] (%p483_p0)  ;;  %v3111_v49 = vld [vmem:[%s5975_s1 + $0x268] sm:$0xff] (%p483_p0) }
 0x225   : > { %v760_v52 = vmul.f32 %v3714_v50, %v759_v48  ;;  %v3716_v55 = vpop.eup %3715  ;;  %v3116_v48 = vld [vmem:[%s5975_s1 + $0x290] sm:$0xff] (%p483_p0)  ;;  %v3113_v50 = vld [vmem:[%s5975_s1 + $0x278] sm:$0xff] (%p483_p0)  ;;  %892 = vmatpush1.msra.mxu0 (%p483_p0), %v3114_v47 }
 0x226   :  { %1029 = vmatpush1.msra.mxu1 (%p483_p0), %v3116_v48  ;;  %893 = vmatprep.subr.mxu0 (%p483_p0), %v3111_v49 }
 0x227   : > { %v762_v54 = vadd.f32 %v761_v53, %v760_v52  ;;  %v3112_v52 = vld [vmem:[%s5975_s1 + $0x270] sm:$0xff] (%p483_p0)  ;;  %v3107_v53 = vld [vmem:[%s5975_s1 + $0x248] sm:$0xff] (%p483_p0)  ;;  %1030 = vmatprep.subr.mxu1 (%p483_p0), %v3113_v50  ;;  %894 = vmatpush1.msra.mxu0 (%p483_p0), %v3110_v51 }
 0x228   :  { %1031 = vmatpush1.msra.mxu1 (%p483_p0), %v3112_v52  ;;  %895 = vmatprep.subr.mxu0 (%p483_p0), %v3107_v53 }
 0x229   : > { %3717 = vtanh.f32 %v762_v54  ;;  %765 = vst [vmem:[#allocation5] sm:$0x1] %v762_v54  ;;  %v3109_v54 = vld [vmem:[%s5975_s1 + $0x258] sm:$0xff] (%p483_p0) }
 0x22a   :  { %1192 = vst [vmem:[#allocation5] sm:$0x1] (%p483_p0), %v3895_v3  ;;  %1032 = vmatprep.subr.mxu1 (%p483_p0), %v3109_v54 }
 0x235   :  { %485 = sbr.rel (!%p483_p0) target bundleno = 276 (0x114), region = 93 }
 0x236   : > { %v3718_v56 = vpop.eup %3717 }
 0x237   : > { %v764_v57 = vmul.f32 %v3718_v56, %v3716_v55  ;;  %v3106_v55 = vld [vmem:[%s5975_s1 + $0x240] sm:$0xff] (%p483_p0)  ;;  %v3108_v56 = vld [vmem:[%s5975_s1 + $0x250] sm:$0xff] (%p483_p0) }
 0x238   :  { %896 = vmatpush1.msra.mxu0 (%p483_p0), %v3106_v55  ;;  %1033 = vmatpush1.msra.mxu1 (%p483_p0), %v3108_v56 }
 0x239   : > { %766 = vst [vmem:[#allocation4] sm:$0x1] %v764_v57  ;;  %768 = vst [vmem:[%s767_s19] sm:$0x1] %v764_v57  ;;  %v3103_v57 = vld [vmem:[%s5975_s1 + $0x228] sm:$0xff] (%p483_p0)  ;;  %1034 = vmatprep.subr.mxu1 (%p483_p0), %v3105_v58 }
 0x23a   :  { %1191 = vst [vmem:[#allocation4] sm:$0x1] %v3895_v3  ;;  %897 = vmatprep.subr.mxu0 %v3103_v57  ;;  %1035 = vmatpush1.msra.mxu1 %v3104_v60 }
 0x23b   :  { %898 = vmatpush1.msra.mxu0 %v3102_v59  ;;  %1036 = vmatprep.subr.mxu1 %v3101_v61 }
 0x23c   :  { %899 = vmatprep.subr.mxu0 %v3099_v15  ;;  %1037 = vmatpush1.msra.mxu1 %v3100_v63 }
 0x23d   :  { %900 = vmatpush1.msra.mxu0 %v3098_v62 }
 0x240   :  { %v769_v0 = vld [vmem:[#allocation2] sm:$0xff]  ;;  %v770_v1 = vld [vmem:[#allocation2 + $0x8] sm:$0xff]  ;;  %v771_v2 = vld [vmem:[#allocation2 + $0x10] sm:$0xff] }
 0x241   :  { %934 = vmatmul.mubr.f32.vlgmr.msra.gmra.mxu0 %v769_v0  ;;  %1071 = vmatmul.mubr.f32.vlgmr.msra.gmra.mxu1 %v769_v0  ;;  %v772_v4 = vld [vmem:[#allocation2 + $0x18] sm:$0xff]  ;;  %v773_v21 = vld [vmem:[#allocation2 + $0x20] sm:$0xff]  ;;  %v774_v22 = vld [vmem:[#allocation2 + $0x28] sm:$0xff] }
 0x242   :  { %939 = vmatprep.mubr.f32.mxu0 %v3895_v3  ;;  %1076 = vmatprep.mubr.f32.mxu1 %v3895_v3  ;;  %v775_v23 = vld [vmem:[#allocation2 + $0x30] sm:$0xff]  ;;  %v776_v24 = vld [vmem:[#allocation2 + $0x38] sm:$0xff]  ;;  %v777_v5 = vld [vmem:[#allocation2 + $0x40] sm:$0xff] }
 0x243   :  { %v778_v6 = vld [vmem:[#allocation2 + $0x48] sm:$0xff]  ;;  %v779_v7 = vld [vmem:[#allocation2 + $0x50] sm:$0xff]  ;;  %v780_v8 = vld [vmem:[#allocation2 + $0x58] sm:$0xff] }
 0x245   :  { %940 = vmatmul.mubr.f32.gmra.mxu0 %v770_v1  ;;  %1077 = vmatmul.mubr.f32.gmra.mxu1 %v770_v1 }
 0x246   :  { %945 = vmatprep.mubr.f32.mxu0 %v3895_v3  ;;  %1082 = vmatprep.mubr.f32.mxu1 %v3895_v3 }
 0x249   :  { %946 = vmatmul.mubr.f32.gmra.mxu0 %v771_v2  ;;  %1083 = vmatmul.mubr.f32.gmra.mxu1 %v771_v2 }
 0x24a   :  { %951 = vmatprep.mubr.f32.mxu0 %v3895_v3  ;;  %1088 = vmatprep.mubr.f32.mxu1 %v3895_v3 }
 0x24d   :  { %952 = vmatmul.mubr.f32.gmra.mxu0 %v772_v4  ;;  %1089 = vmatmul.mubr.f32.gmra.mxu1 %v772_v4 }
 0x24e   :  { %957 = vmatprep.mubr.f32.mxu0 %v3895_v3  ;;  %1094 = vmatprep.mubr.f32.mxu1 %v3895_v3 }
 0x251   :  { %958 = vmatmul.mubr.f32.gmra.mxu0 %v773_v21  ;;  %1095 = vmatmul.mubr.f32.gmra.mxu1 %v773_v21 }
 0x252   :  { %963 = vmatprep.mubr.f32.mxu0 %v3895_v3  ;;  %1100 = vmatprep.mubr.f32.mxu1 %v3895_v3 }
 0x255   :  { %964 = vmatmul.mubr.f32.gmra.mxu0 %v774_v22  ;;  %1101 = vmatmul.mubr.f32.gmra.mxu1 %v774_v22 }
 0x256   :  { %969 = vmatprep.mubr.f32.mxu0 %v3895_v3  ;;  %1106 = vmatprep.mubr.f32.mxu1 %v3895_v3 }
 0x259   :  { %970 = vmatmul.mubr.f32.gmra.mxu0 %v775_v23  ;;  %1107 = vmatmul.mubr.f32.gmra.mxu1 %v775_v23 }
 0x25a   :  { %975 = vmatprep.mubr.f32.mxu0 %v3895_v3  ;;  %1112 = vmatprep.mubr.f32.mxu1 %v3895_v3 }
 0x25d   :  { %976 = vmatmul.mubr.f32.gmra.mxu0 %v776_v24  ;;  %1113 = vmatmul.mubr.f32.gmra.mxu1 %v776_v24 }
 0x25e   :  { %981 = vmatprep.mubr.f32.mxu0 %v3895_v3  ;;  %1118 = vmatprep.mubr.f32.mxu1 %v3895_v3 }
 0x261   :  { %982 = vmatmul.mubr.f32.gmra.mxu0 %v777_v5  ;;  %1119 = vmatmul.mubr.f32.gmra.mxu1 %v777_v5 }
 0x262   :  { %987 = vmatprep.mubr.f32.mxu0 %v3895_v3  ;;  %1124 = vmatprep.mubr.f32.mxu1 %v3895_v3 }
 0x265   :  { %988 = vmatmul.mubr.f32.gmra.mxu0 %v778_v6  ;;  %1125 = vmatmul.mubr.f32.gmra.mxu1 %v778_v6 }
 0x266   :  { %993 = vmatprep.mubr.f32.mxu0 %v3895_v3  ;;  %1130 = vmatprep.mubr.f32.mxu1 %v3895_v3 }
 0x269   :  { %994 = vmatmul.mubr.f32.gmra.mxu0 %v779_v7  ;;  %1131 = vmatmul.mubr.f32.gmra.mxu1 %v779_v7 }
 0x26a   :  { %999 = vmatprep.mubr.f32.mxu0 %v3895_v3  ;;  %1136 = vmatprep.mubr.f32.mxu1 %v3895_v3 }
 0x26d   :  { %1000 = vmatmul.mubr.f32.gmra.mxu0 %v780_v8  ;;  %1137 = vmatmul.mubr.f32.gmra.mxu1 %v780_v8 }
 0x301   :  { %v935_v18 = vpop.f32.mrf.mxu0  ;;  %v1072_v26 = vpop.f32.mrf.mxu1 }
 0x302   :  { %v936_v27 = vadd.f32 %v935_v18, %v4753_v10  ;;  %v1073_v28 = vadd.f32 %v1072_v26, %v4756_v11 }
 0x303   :  { %v937_v29 = vpop.f32.mrf.mxu0  ;;  %v1074_v30 = vpop.f32.mrf.mxu1 }
 0x304   :  { %1143 = vst [vmem:[#allocation3] sm:$0xff] %v936_v27  ;;  %1145 = vst [vmem:[#allocation3 + $0x10] sm:$0xff] %v1073_v28  ;;  %v938_v31 = vadd.f32 %v937_v29, %v4759_v12  ;;  %v1075_v32 = vadd.f32 %v1074_v30, %v4762_v13 }
 0x305   :  { %v941_v33 = vpop.f32.mrf.mxu0  ;;  %v1078_v34 = vpop.f32.mrf.mxu1 }
 0x306   :  { %1144 = vst [vmem:[#allocation3 + $0x8] sm:$0xff] %v938_v31  ;;  %1146 = vst [vmem:[#allocation3 + $0x18] sm:$0xff] %v1075_v32  ;;  %v942_v35 = vadd.f32 %v941_v33, %v4753_v10  ;;  %v1079_v36 = vadd.f32 %v1078_v34, %v4756_v11 }
 0x307   :  { %v943_v37 = vpop.f32.mrf.mxu0  ;;  %v1080_v38 = vpop.f32.mrf.mxu1 }
 0x308   :  { %1147 = vst [vmem:[#allocation3 + $0x20] sm:$0xff] %v942_v35  ;;  %1149 = vst [vmem:[#allocation3 + $0x30] sm:$0xff] %v1079_v36  ;;  %v944_v39 = vadd.f32 %v943_v37, %v4759_v12  ;;  %v1081_v40 = vadd.f32 %v1080_v38, %v4762_v13 }
 0x309   :  { %v947_v41 = vpop.f32.mrf.mxu0  ;;  %v1084_v42 = vpop.f32.mrf.mxu1 }
 0x30a   :  { %1148 = vst [vmem:[#allocation3 + $0x28] sm:$0xff] %v944_v39  ;;  %1150 = vst [vmem:[#allocation3 + $0x38] sm:$0xff] %v1081_v40  ;;  %v948_v43 = vadd.f32 %v947_v41, %v4753_v10  ;;  %v1085_v44 = vadd.f32 %v1084_v42, %v4756_v11 }
 0x30b   :  { %v949_v45 = vpop.f32.mrf.mxu0  ;;  %v1086_v46 = vpop.f32.mrf.mxu1 }
 0x30c   :  { %1151 = vst [vmem:[#allocation3 + $0x40] sm:$0xff] %v948_v43  ;;  %1153 = vst [vmem:[#allocation3 + $0x50] sm:$0xff] %v1085_v44  ;;  %v950_v47 = vadd.f32 %v949_v45, %v4759_v12  ;;  %v1087_v48 = vadd.f32 %v1086_v46, %v4762_v13 }
 0x30d   :  { %v953_v49 = vpop.f32.mrf.mxu0  ;;  %v1090_v50 = vpop.f32.mrf.mxu1 }
 0x30e   :  { %1152 = vst [vmem:[#allocation3 + $0x48] sm:$0xff] %v950_v47  ;;  %1154 = vst [vmem:[#allocation3 + $0x58] sm:$0xff] %v1087_v48  ;;  %v954_v51 = vadd.f32 %v953_v49, %v4753_v10  ;;  %v1091_v52 = vadd.f32 %v1090_v50, %v4756_v11 }
 0x30f   :  { %v955_v53 = vpop.f32.mrf.mxu0  ;;  %v1092_v54 = vpop.f32.mrf.mxu1 }
 0x310   :  { %1155 = vst [vmem:[#allocation3 + $0x60] sm:$0xff] %v954_v51  ;;  %1157 = vst [vmem:[#allocation3 + $0x70] sm:$0xff] %v1091_v52  ;;  %v956_v55 = vadd.f32 %v955_v53, %v4759_v12  ;;  %v1093_v56 = vadd.f32 %v1092_v54, %v4762_v13 }
 0x311   :  { %v959_v57 = vpop.f32.mrf.mxu0  ;;  %v1096_v58 = vpop.f32.mrf.mxu1 }
 0x312   :  { %1156 = vst [vmem:[#allocation3 + $0x68] sm:$0xff] %v956_v55  ;;  %1158 = vst [vmem:[#allocation3 + $0x78] sm:$0xff] %v1093_v56  ;;  %v960_v59 = vadd.f32 %v959_v57, %v4753_v10  ;;  %v1097_v60 = vadd.f32 %v1096_v58, %v4756_v11 }
 0x313   :  { %v961_v15 = vpop.f32.mrf.mxu0  ;;  %v1098_v61 = vpop.f32.mrf.mxu1 }
 0x314   :  { %1159 = vst [vmem:[#allocation3 + $0x80] sm:$0xff] %v960_v59  ;;  %1161 = vst [vmem:[#allocation3 + $0x90] sm:$0xff] %v1097_v60  ;;  %v962_v62 = vadd.f32 %v961_v15, %v4759_v12  ;;  %v1099_v63 = vadd.f32 %v1098_v61, %v4762_v13 }
 0x315   :  { %v965_v0 = vpop.f32.mrf.mxu0  ;;  %v1102_v1 = vpop.f32.mrf.mxu1 }
 0x316   :  { %1160 = vst [vmem:[#allocation3 + $0x88] sm:$0xff] %v962_v62  ;;  %1162 = vst [vmem:[#allocation3 + $0x98] sm:$0xff] %v1099_v63  ;;  %v966_v2 = vadd.f32 %v965_v0, %v4753_v10  ;;  %v1103_v4 = vadd.f32 %v1102_v1, %v4756_v11 }
 0x317   :  { %v967_v21 = vpop.f32.mrf.mxu0  ;;  %v1104_v22 = vpop.f32.mrf.mxu1 }
 0x318   :  { %1163 = vst [vmem:[#allocation3 + $0xa0] sm:$0xff] %v966_v2  ;;  %1165 = vst [vmem:[#allocation3 + $0xb0] sm:$0xff] %v1103_v4  ;;  %v968_v23 = vadd.f32 %v967_v21, %v4759_v12  ;;  %v1105_v24 = vadd.f32 %v1104_v22, %v4762_v13 }
 0x319   :  { %v971_v5 = vpop.f32.mrf.mxu0  ;;  %v1108_v6 = vpop.f32.mrf.mxu1 }
 0x31a   :  { %1164 = vst [vmem:[#allocation3 + $0xa8] sm:$0xff] %v968_v23  ;;  %1166 = vst [vmem:[#allocation3 + $0xb8] sm:$0xff] %v1105_v24  ;;  %v972_v7 = vadd.f32 %v971_v5, %v4753_v10  ;;  %v1109_v8 = vadd.f32 %v1108_v6, %v4756_v11 }
 0x31b   :  { %v973_v9 = vpop.f32.mrf.mxu0  ;;  %v1110_v18 = vpop.f32.mrf.mxu1 }
 0x31c   :  { %1167 = vst [vmem:[#allocation3 + $0xc0] sm:$0xff] %v972_v7  ;;  %1169 = vst [vmem:[#allocation3 + $0xd0] sm:$0xff] %v1109_v8  ;;  %v974_v26 = vadd.f32 %v973_v9, %v4759_v12  ;;  %v1111_v27 = vadd.f32 %v1110_v18, %v4762_v13 }
 0x31d   :  { %v977_v28 = vpop.f32.mrf.mxu0  ;;  %v1114_v29 = vpop.f32.mrf.mxu1 }
 0x31e   :  { %1168 = vst [vmem:[#allocation3 + $0xc8] sm:$0xff] %v974_v26  ;;  %1170 = vst [vmem:[#allocation3 + $0xd8] sm:$0xff] %v1111_v27  ;;  %v978_v30 = vadd.f32 %v977_v28, %v4753_v10  ;;  %v1115_v31 = vadd.f32 %v1114_v29, %v4756_v11 }
 0x31f   :  { %v979_v32 = vpop.f32.mrf.mxu0  ;;  %v1116_v33 = vpop.f32.mrf.mxu1 }
 0x320   :  { %1171 = vst [vmem:[#allocation3 + $0xe0] sm:$0xff] %v978_v30  ;;  %1173 = vst [vmem:[#allocation3 + $0xf0] sm:$0xff] %v1115_v31  ;;  %v980_v34 = vadd.f32 %v979_v32, %v4759_v12  ;;  %v1117_v35 = vadd.f32 %v1116_v33, %v4762_v13 }
 0x321   :  { %v983_v36 = vpop.f32.mrf.mxu0  ;;  %v1120_v37 = vpop.f32.mrf.mxu1 }
 0x322   :  { %1172 = vst [vmem:[#allocation3 + $0xe8] sm:$0xff] %v980_v34  ;;  %1174 = vst [vmem:[#allocation3 + $0xf8] sm:$0xff] %v1117_v35  ;;  %v984_v38 = vadd.f32 %v983_v36, %v4753_v10  ;;  %v1121_v39 = vadd.f32 %v1120_v37, %v4756_v11 }
 0x323   :  { %v985_v40 = vpop.f32.mrf.mxu0  ;;  %v1122_v41 = vpop.f32.mrf.mxu1 }
 0x324   :  { %1175 = vst [vmem:[#allocation3 + $0x100] sm:$0xff] %v984_v38  ;;  %1177 = vst [vmem:[#allocation3 + $0x110] sm:$0xff] %v1121_v39  ;;  %v986_v42 = vadd.f32 %v985_v40, %v4759_v12  ;;  %v1123_v43 = vadd.f32 %v1122_v41, %v4762_v13 }
 0x325   :  { %v989_v44 = vpop.f32.mrf.mxu0  ;;  %v1126_v45 = vpop.f32.mrf.mxu1 }
 0x326   :  { %1176 = vst [vmem:[#allocation3 + $0x108] sm:$0xff] %v986_v42  ;;  %1178 = vst [vmem:[#allocation3 + $0x118] sm:$0xff] %v1123_v43  ;;  %v990_v46 = vadd.f32 %v989_v44, %v4753_v10  ;;  %v1127_v47 = vadd.f32 %v1126_v45, %v4756_v11 }
 0x327   :  { %v991_v48 = vpop.f32.mrf.mxu0  ;;  %v1128_v49 = vpop.f32.mrf.mxu1 }
 0x328   :  { %1179 = vst [vmem:[#allocation3 + $0x120] sm:$0xff] %v990_v46  ;;  %1181 = vst [vmem:[#allocation3 + $0x130] sm:$0xff] %v1127_v47  ;;  %v992_v50 = vadd.f32 %v991_v48, %v4759_v12  ;;  %v1129_v51 = vadd.f32 %v1128_v49, %v4762_v13 }
 0x329   :  { %v995_v52 = vpop.f32.mrf.mxu0  ;;  %v1132_v53 = vpop.f32.mrf.mxu1 }
 0x32a   :  { %1180 = vst [vmem:[#allocation3 + $0x128] sm:$0xff] %v992_v50  ;;  %1182 = vst [vmem:[#allocation3 + $0x138] sm:$0xff] %v1129_v51  ;;  %v996_v54 = vadd.f32 %v995_v52, %v4753_v10  ;;  %v1133_v55 = vadd.f32 %v1132_v53, %v4756_v11 }
 0x32b   :  { %v997_v56 = vpop.f32.mrf.mxu0  ;;  %v1134_v57 = vpop.f32.mrf.mxu1 }
 0x32c   :  { %1183 = vst [vmem:[#allocation3 + $0x140] sm:$0xff] %v996_v54  ;;  %1185 = vst [vmem:[#allocation3 + $0x150] sm:$0xff] %v1133_v55  ;;  %v998_v58 = vadd.f32 %v997_v56, %v4759_v12  ;;  %v1135_v59 = vadd.f32 %v1134_v57, %v4762_v13 }
 0x32d   :  { %v1001_v60 = vpop.f32.mrf.mxu0  ;;  %v1138_v15 = vpop.f32.mrf.mxu1 }
 0x32e   :  { %1184 = vst [vmem:[#allocation3 + $0x148] sm:$0xff] %v998_v58  ;;  %1186 = vst [vmem:[#allocation3 + $0x158] sm:$0xff] %v1135_v59  ;;  %v1002_v61 = vadd.f32 %v1001_v60, %v4753_v10  ;;  %v1139_v62 = vadd.f32 %v1138_v15, %v4756_v11 }
 0x32f   :  { %v1003_v63 = vpop.f32.mrf.mxu0  ;;  %v1140_v0 = vpop.f32.mrf.mxu1 }
 0x330   :  { %1187 = vst [vmem:[#allocation3 + $0x160] sm:$0xff] %v1002_v61  ;;  %1189 = vst [vmem:[#allocation3 + $0x170] sm:$0xff] %v1139_v62  ;;  %v1004_v1 = vadd.f32 %v1003_v63, %v4759_v12  ;;  %v1141_v2 = vadd.f32 %v1140_v0, %v4762_v13 }
 0x332   :  { %1188 = vst [vmem:[#allocation3 + $0x168] sm:$0xff] %v1004_v1  ;;  %1190 = vst [vmem:[#allocation3 + $0x178] sm:$0xff] %v1141_v2 }
 0x333 LB: > { %v3226_v10 = vld [vmem:[%s5976_s2 + $0x3e8] sm:$0xff]  ;;  %v3228_v11 = vld [vmem:[%s5976_s2 + $0x3f8] sm:$0xff]  ;;  %v3225_v12 = vld [vmem:[%s5976_s2 + $0x3e0] sm:$0xff]  ;;  %s1199_s13 = sshra.s32 %s3889_s24, 3  ;;  %s1202_s14 = sand.u32 7, %s3889_s24  ;;  %s3889_s24 = sphi %s4812_s24, %s1198_s24  }
 0x334   : > { %1274 = vmatprep.subr.mxu0 %v3226_v10  ;;  %1345 = vmatprep.subr.mxu1 %v3228_v11  ;;  %v3227_v13 = vld [vmem:[%s5976_s2 + $0x3f0] sm:$0xff]  ;;  %v3222_v4 = vld [vmem:[%s5976_s2 + $0x3c8] sm:$0xff]  ;;  %v3224_v21 = vld [vmem:[%s5976_s2 + $0x3d8] sm:$0xff]  ;;  %s3406_s0 = sshll.u32 %s1199_s13, 5  ;;  %s1480_s17 = scalar_lea.vmem [#allocation2], %s3889_s24 }
 0x335   : > { %1275 = vmatpush1.msra.mxu0 %v3225_v12  ;;  %1346 = vmatpush1.msra.mxu1 %v3227_v13  ;;  %v3221_v22 = vld [vmem:[%s5976_s2 + $0x3c0] sm:$0xff]  ;;  %v3223_v23 = vld [vmem:[%s5976_s2 + $0x3d0] sm:$0xff]  ;;  %v3218_v24 = vld [vmem:[%s5976_s2 + $0x3a8] sm:$0xff]  ;;  %s1205_s15 = sadd.s32 %s3406_s0, %s1202_s14  ;;  %s1198_s24 = sadd.s32 1, %s3889_s24  }
 0x336   : > { %1276 = vmatprep.subr.mxu0 %v3222_v4  ;;  %1347 = vmatprep.subr.mxu1 %v3224_v21  ;;  %v3220_v5 = vld [vmem:[%s5976_s2 + $0x3b8] sm:$0xff]  ;;  %v3217_v6 = vld [vmem:[%s5976_s2 + $0x3a0] sm:$0xff]  ;;  %v3219_v7 = vld [vmem:[%s5976_s2 + $0x3b0] sm:$0xff]  ;;  %s1206_s16 = scalar_lea.vmem [#allocation3], %s1205_s15  ;;  %p1195_p1 = scmp.ge.s32.totalorder %s1198_s24, 90  }
 0x337   : > { %1277 = vmatpush1.msra.mxu0 %v3221_v22  ;;  %1348 = vmatpush1.msra.mxu1 %v3223_v23  ;;  %v3214_v8 = vld [vmem:[%s5976_s2 + $0x388] sm:$0xff]  ;;  %v3216_v9 = vld [vmem:[%s5976_s2 + $0x398] sm:$0xff]  ;;  %v3213_v18 = vld [vmem:[%s5976_s2 + $0x380] sm:$0xff] }
 0x338   : > { %1278 = vmatprep.subr.mxu0 %v3218_v24  ;;  %1349 = vmatprep.subr.mxu1 %v3220_v5  ;;  %v3215_v26 = vld [vmem:[%s5976_s2 + $0x390] sm:$0xff]  ;;  %v3210_v27 = vld [vmem:[%s5976_s2 + $0x368] sm:$0xff]  ;;  %v3212_v28 = vld [vmem:[%s5976_s2 + $0x378] sm:$0xff]  ;;  %v3898_v24 = vmov 0.0  }
 0x339   : > { %1279 = vmatpush1.msra.mxu0 %v3217_v6  ;;  %1350 = vmatpush1.msra.mxu1 %v3219_v7  ;;  %v3209_v29 = vld [vmem:[%s5976_s2 + $0x360] sm:$0xff]  ;;  %v3211_v30 = vld [vmem:[%s5976_s2 + $0x370] sm:$0xff]  ;;  %v3206_v31 = vld [vmem:[%s5976_s2 + $0x348] sm:$0xff] }
 0x33a   : > { %1280 = vmatprep.subr.mxu0 %v3214_v8  ;;  %1351 = vmatprep.subr.mxu1 %v3216_v9  ;;  %v3208_v32 = vld [vmem:[%s5976_s2 + $0x358] sm:$0xff]  ;;  %v3205_v33 = vld [vmem:[%s5976_s2 + $0x340] sm:$0xff]  ;;  %v3207_v34 = vld [vmem:[%s5976_s2 + $0x350] sm:$0xff] }
 0x33b   : > { %1281 = vmatpush1.msra.mxu0 %v3213_v18  ;;  %1352 = vmatpush1.msra.mxu1 %v3215_v26  ;;  %v3202_v35 = vld [vmem:[%s5976_s2 + $0x328] sm:$0xff]  ;;  %v3204_v36 = vld [vmem:[%s5976_s2 + $0x338] sm:$0xff]  ;;  %v3201_v37 = vld [vmem:[%s5976_s2 + $0x320] sm:$0xff] }
 0x33c   : > { %1282 = vmatprep.subr.mxu0 %v3210_v27  ;;  %1353 = vmatprep.subr.mxu1 %v3212_v28  ;;  %v3203_v38 = vld [vmem:[%s5976_s2 + $0x330] sm:$0xff]  ;;  %v3198_v39 = vld [vmem:[%s5976_s2 + $0x308] sm:$0xff]  ;;  %v3200_v40 = vld [vmem:[%s5976_s2 + $0x318] sm:$0xff] }
 0x33d   : > { %1283 = vmatpush1.msra.mxu0 %v3209_v29  ;;  %1354 = vmatpush1.msra.mxu1 %v3211_v30  ;;  %v3197_v41 = vld [vmem:[%s5976_s2 + $0x300] sm:$0xff]  ;;  %v3199_v42 = vld [vmem:[%s5976_s2 + $0x310] sm:$0xff]  ;;  %v3194_v43 = vld [vmem:[%s5976_s2 + $0x2e8] sm:$0xff] }
 0x33e   : > { %1284 = vmatprep.subr.mxu0 %v3206_v31  ;;  %1355 = vmatprep.subr.mxu1 %v3208_v32  ;;  %v3196_v44 = vld [vmem:[%s5976_s2 + $0x2f8] sm:$0xff]  ;;  %v3193_v45 = vld [vmem:[%s5976_s2 + $0x2e0] sm:$0xff]  ;;  %v3195_v46 = vld [vmem:[%s5976_s2 + $0x2f0] sm:$0xff] }
 0x33f   : > { %1285 = vmatpush1.msra.mxu0 %v3205_v33  ;;  %1356 = vmatpush1.msra.mxu1 %v3207_v34  ;;  %v3190_v47 = vld [vmem:[%s5976_s2 + $0x2c8] sm:$0xff]  ;;  %v3192_v48 = vld [vmem:[%s5976_s2 + $0x2d8] sm:$0xff]  ;;  %v3189_v49 = vld [vmem:[%s5976_s2 + $0x2c0] sm:$0xff] }
 0x340   : > { %1286 = vmatprep.subr.mxu0 %v3202_v35  ;;  %1357 = vmatprep.subr.mxu1 %v3204_v36  ;;  %v3191_v50 = vld [vmem:[%s5976_s2 + $0x2d0] sm:$0xff]  ;;  %v3186_v51 = vld [vmem:[%s5976_s2 + $0x2a8] sm:$0xff]  ;;  %v3188_v52 = vld [vmem:[%s5976_s2 + $0x2b8] sm:$0xff] }
 0x341   : > { %1287 = vmatpush1.msra.mxu0 %v3201_v37  ;;  %1358 = vmatpush1.msra.mxu1 %v3203_v38  ;;  %v3185_v53 = vld [vmem:[%s5976_s2 + $0x2a0] sm:$0xff]  ;;  %v3187_v54 = vld [vmem:[%s5976_s2 + $0x2b0] sm:$0xff]  ;;  %v3182_v55 = vld [vmem:[%s5976_s2 + $0x288] sm:$0xff] }
 0x342   : > { %1288 = vmatprep.subr.mxu0 %v3198_v39  ;;  %1359 = vmatprep.subr.mxu1 %v3200_v40  ;;  %v3184_v56 = vld [vmem:[%s5976_s2 + $0x298] sm:$0xff]  ;;  %v3181_v57 = vld [vmem:[%s5976_s2 + $0x280] sm:$0xff]  ;;  %v3183_v58 = vld [vmem:[%s5976_s2 + $0x290] sm:$0xff] }
 0x343   : > { %1289 = vmatpush1.msra.mxu0 %v3197_v41  ;;  %1360 = vmatpush1.msra.mxu1 %v3199_v42  ;;  %v3178_v59 = vld [vmem:[%s5976_s2 + $0x268] sm:$0xff]  ;;  %v3180_v60 = vld [vmem:[%s5976_s2 + $0x278] sm:$0xff]  ;;  %v3177_v15 = vld [vmem:[%s5976_s2 + $0x260] sm:$0xff] }
 0x344   : > { %1290 = vmatprep.subr.mxu0 %v3194_v43  ;;  %1361 = vmatprep.subr.mxu1 %v3196_v44  ;;  %v3179_v61 = vld [vmem:[%s5976_s2 + $0x270] sm:$0xff]  ;;  %v3174_v62 = vld [vmem:[%s5976_s2 + $0x248] sm:$0xff]  ;;  %v3176_v63 = vld [vmem:[%s5976_s2 + $0x258] sm:$0xff] }
 0x345   : > { %1291 = vmatpush1.msra.mxu0 %v3193_v45  ;;  %1362 = vmatpush1.msra.mxu1 %v3195_v46  ;;  %v3173_v0 = vld [vmem:[%s5976_s2 + $0x240] sm:$0xff]  ;;  %v3175_v1 = vld [vmem:[%s5976_s2 + $0x250] sm:$0xff]  ;;  %v3170_v2 = vld [vmem:[%s5976_s2 + $0x228] sm:$0xff] }
 0x346   : > { %1292 = vmatprep.subr.mxu0 %v3190_v47  ;;  %1363 = vmatprep.subr.mxu1 %v3192_v48  ;;  %v3172_v10 = vld [vmem:[%s5976_s2 + $0x238] sm:$0xff]  ;;  %v3169_v11 = vld [vmem:[%s5976_s2 + $0x220] sm:$0xff]  ;;  %v3171_v12 = vld [vmem:[%s5976_s2 + $0x230] sm:$0xff] }
 0x347   : > { %1293 = vmatpush1.msra.mxu0 %v3189_v49  ;;  %1364 = vmatpush1.msra.mxu1 %v3191_v50  ;;  %v3166_v13 = vld [vmem:[%s5976_s2 + $0x208] sm:$0xff]  ;;  %v3168_v4 = vld [vmem:[%s5976_s2 + $0x218] sm:$0xff]  ;;  %v3165_v21 = vld [vmem:[%s5976_s2 + $0x200] sm:$0xff] }
 0x348   : > { %1294 = vmatprep.subr.mxu0 %v3186_v51  ;;  %1365 = vmatprep.subr.mxu1 %v3188_v52  ;;  %v3167_v22 = vld [vmem:[%s5976_s2 + $0x210] sm:$0xff]  ;;  %v1208_v23 = vld [vmem:[#allocation4] sm:$0x1]  ;;  %v1472_v44 = vld [vmem:[#allocation5] sm:$0x1] }
 0x349   : > { %1295 = vmatpush1.msra.mxu0 %v3185_v53  ;;  %1366 = vmatpush1.msra.mxu1 %v3187_v54  ;;  %v1207_v29 = vld [vmem:[%s1206_s16] ss:$8 sm:$0xf] }
 0x34a   : > { %1296 = vmatprep.subr.mxu0 %v3182_v55  ;;  %1367 = vmatprep.subr.mxu1 %v3184_v56  ;;  %v3293_v54 = vld [vmem:[%s5975_s1 + $0x5e8] sm:$0xff] (%p1195_p1)  ;;  %v3295_v55 = vld [vmem:[%s5975_s1 + $0x5f8] sm:$0xff] (%p1195_p1)  ;;  %v3292_v56 = vld [vmem:[%s5975_s1 + $0x5e0] sm:$0xff] (%p1195_p1) }
 0x34b   : > { %1297 = vmatpush1.msra.mxu0 %v3181_v57  ;;  %1368 = vmatpush1.msra.mxu1 %v3183_v58  ;;  %v3294_v57 = vld [vmem:[%s5975_s1 + $0x5f0] sm:$0xff] (%p1195_p1)  ;;  %v3289_v58 = vld [vmem:[%s5975_s1 + $0x5c8] sm:$0xff] (%p1195_p1) }
 0x34c   : > { %1298 = vmatprep.subr.mxu0 %v3178_v59  ;;  %1369 = vmatprep.subr.mxu1 %v3180_v60  ;;  %v3291_v59 = vld [vmem:[%s5975_s1 + $0x5d8] sm:$0xff] (%p1195_p1)  ;;  %v3288_v60 = vld [vmem:[%s5975_s1 + $0x5c0] sm:$0xff] (%p1195_p1) }
 0x34d   : > { %1299 = vmatpush1.msra.mxu0 %v3177_v15  ;;  %1370 = vmatpush1.msra.mxu1 %v3179_v61  ;;  %v3290_v15 = vld [vmem:[%s5975_s1 + $0x5d0] sm:$0xff] (%p1195_p1)  ;;  %v3285_v61 = vld [vmem:[%s5975_s1 + $0x5a8] sm:$0xff] (%p1195_p1) }
 0x34e   : > { %1300 = vmatprep.subr.mxu0 %v3174_v62  ;;  %1371 = vmatprep.subr.mxu1 %v3176_v63  ;;  %v3287_v62 = vld [vmem:[%s5975_s1 + $0x5b8] sm:$0xff] (%p1195_p1)  ;;  %v3284_v63 = vld [vmem:[%s5975_s1 + $0x5a0] sm:$0xff] (%p1195_p1) }
 0x34f   : > { %1301 = vmatpush1.msra.mxu0 %v3173_v0  ;;  %1372 = vmatpush1.msra.mxu1 %v3175_v1  ;;  %v3286_v0 = vld [vmem:[%s5975_s1 + $0x5b0] sm:$0xff] (%p1195_p1)  ;;  %v3281_v1 = vld [vmem:[%s5975_s1 + $0x588] sm:$0xff] (%p1195_p1) }
 0x350   : > { %1302 = vmatprep.subr.mxu0 %v3170_v2  ;;  %1373 = vmatprep.subr.mxu1 %v3172_v10  ;;  %v3283_v2 = vld [vmem:[%s5975_s1 + $0x598] sm:$0xff] (%p1195_p1)  ;;  %v3280_v10 = vld [vmem:[%s5975_s1 + $0x580] sm:$0xff] (%p1195_p1) }
 0x351   : > { %1303 = vmatpush1.msra.mxu0 %v3169_v11  ;;  %1374 = vmatpush1.msra.mxu1 %v3171_v12  ;;  %v3282_v11 = vld [vmem:[%s5975_s1 + $0x590] sm:$0xff] (%p1195_p1)  ;;  %v3277_v12 = vld [vmem:[%s5975_s1 + $0x568] sm:$0xff] (%p1195_p1) }
 0x352   : > { %1304 = vmatprep.subr.mxu0 %v3166_v13  ;;  %1375 = vmatprep.subr.mxu1 %v3168_v4  ;;  %v3279_v13 = vld [vmem:[%s5975_s1 + $0x578] sm:$0xff] (%p1195_p1)  ;;  %v3276_v4 = vld [vmem:[%s5975_s1 + $0x560] sm:$0xff] (%p1195_p1) }
 0x353   : > { %1305 = vmatpush1.msra.mxu0 %v3165_v21  ;;  %1338 = vmatprep.mubr.f32.mxu0 %v3898_v24  ;;  %v3278_v21 = vld [vmem:[%s5975_s1 + $0x570] sm:$0xff] (%p1195_p1) }
 0x354   : > { %1376 = vmatpush1.msra.mxu1 %v3167_v22  ;;  %1409 = vmatprep.mubr.f32.mxu1 %v3898_v24  ;;  %v3273_v22 = vld [vmem:[%s5975_s1 + $0x548] sm:$0xff] (%p1195_p1)  ;;  %v3272_v24 = vld [vmem:[%s5975_s1 + $0x540] sm:$0xff] (%p1195_p1) }
 0x355   : > { %1339 = vmatmul.mubr.f32.vlgmr.msra.gmra.mxu0 %v1208_v23  ;;  %1410 = vmatmul.mubr.f32.vlgmr.msra.gmra.mxu1 %v1208_v23  ;;  %v3275_v23 = vld [vmem:[%s5975_s1 + $0x558] sm:$0xff] (%p1195_p1) }
 0x356   :  { %1646 = vmatprep.mubr.f32.mxu0 (%p1195_p1), %v3895_v3  ;;  %1783 = vmatprep.mubr.f32.mxu1 (%p1195_p1), %v3895_v3 }
 0x357   :  { %1582 = vmatprep.subr.mxu0 (%p1195_p1), %v3293_v54  ;;  %1719 = vmatprep.subr.mxu1 (%p1195_p1), %v3295_v55  ;;  %v3239_v54 = vld [vmem:[%s5975_s1 + $0x438] sm:$0xff] (%p1195_p1)  ;;  %v3236_v55 = vld [vmem:[%s5975_s1 + $0x420] sm:$0xff] (%p1195_p1) }
 0x358   :  { %1583 = vmatpush1.msra.mxu0 (%p1195_p1), %v3292_v56  ;;  %1720 = vmatpush1.msra.mxu1 (%p1195_p1), %v3294_v57  ;;  %v3238_v56 = vld [vmem:[%s5975_s1 + $0x430] sm:$0xff] (%p1195_p1)  ;;  %v3233_v57 = vld [vmem:[%s5975_s1 + $0x408] sm:$0xff] (%p1195_p1) }
 0x359   :  { %1584 = vmatprep.subr.mxu0 (%p1195_p1), %v3289_v58  ;;  %1721 = vmatprep.subr.mxu1 (%p1195_p1), %v3291_v59  ;;  %v3235_v58 = vld [vmem:[%s5975_s1 + $0x418] sm:$0xff] (%p1195_p1)  ;;  %v3232_v59 = vld [vmem:[%s5975_s1 + $0x400] sm:$0xff] (%p1195_p1) }
 0x35a   :  { %1585 = vmatpush1.msra.mxu0 (%p1195_p1), %v3288_v60  ;;  %1722 = vmatpush1.msra.mxu1 (%p1195_p1), %v3290_v15  ;;  %v3234_v60 = vld [vmem:[%s5975_s1 + $0x410] sm:$0xff] (%p1195_p1) }
 0x35b   :  { %1586 = vmatprep.subr.mxu0 (%p1195_p1), %v3285_v61  ;;  %1723 = vmatprep.subr.mxu1 (%p1195_p1), %v3287_v62 }
 0x35c   :  { %1587 = vmatpush1.msra.mxu0 (%p1195_p1), %v3284_v63  ;;  %1724 = vmatpush1.msra.mxu1 (%p1195_p1), %v3286_v0 }
 0x35d   :  { %1588 = vmatprep.subr.mxu0 (%p1195_p1), %v3281_v1  ;;  %1725 = vmatprep.subr.mxu1 (%p1195_p1), %v3283_v2 }
 0x35e   :  { %1589 = vmatpush1.msra.mxu0 (%p1195_p1), %v3280_v10  ;;  %1726 = vmatpush1.msra.mxu1 (%p1195_p1), %v3282_v11 }
 0x35f   :  { %1590 = vmatprep.subr.mxu0 (%p1195_p1), %v3277_v12  ;;  %1727 = vmatprep.subr.mxu1 (%p1195_p1), %v3279_v13 }
 0x360   :  { %1591 = vmatpush1.msra.mxu0 (%p1195_p1), %v3276_v4  ;;  %1728 = vmatpush1.msra.mxu1 (%p1195_p1), %v3278_v21  ;;  %v3296_v21 = vld [vmem:[%s5985_s3 + $0x8] sm:$0xf] (%p1195_p1)  ;;  %s5299_s3 = smov (%p1195_p1), 0  }
 0x361   :  { %1592 = vmatprep.subr.mxu0 (%p1195_p1), %v3273_v22  ;;  %1729 = vmatprep.subr.mxu1 (%p1195_p1), %v3275_v23  ;;  %v5240_v22 = vrot.slane (%p1195_p1), %v3296_v21, %v4248_v16  ;;  %v5243_v23 = vrot.slane (%p1195_p1), %v3296_v21, %v4251_v17 }
 0x362   :  { %1593 = vmatpush1.msra.mxu0 (%p1195_p1), %v3272_v24  ;;  %v5246_v24 = vrot.slane (%p1195_p1), %v3296_v21, %v4257_v19 }
 0x415   : > { %v1340_v5 = vpop.f32.mrf.mxu0  ;;  %v1411_v6 = vpop.f32.mrf.mxu1 }
 0x417   : > { %v1342_v7 = vpop.f32.mrf.mxu0  ;;  %v1413_v8 = vpop.f32.mrf.mxu1 }
 0x418   : > { %v1420_v9 = vcombine.low %v1340_v5, %v1342_v7  ;;  %v1421_v18 = vcombine.low %v1411_v6, %v1413_v8  ;;  %v3274_v5 = vld [vmem:[%s5975_s1 + $0x550] sm:$0xff] (%p1195_p1)  ;;  %v3269_v6 = vld [vmem:[%s5975_s1 + $0x528] sm:$0xff] (%p1195_p1)  ;;  %v3271_v7 = vld [vmem:[%s5975_s1 + $0x538] sm:$0xff] (%p1195_p1) }
 0x419   :  { %v3268_v8 = vld [vmem:[%s5975_s1 + $0x520] sm:$0xff] (%p1195_p1)  ;;  %1730 = vmatpush1.msra.mxu1 (%p1195_p1), %v3274_v5  ;;  %1594 = vmatprep.subr.mxu0 (%p1195_p1), %v3269_v6  ;;  %v5249_v5 = vrot.slane (%p1195_p1), %v3296_v21, %v4260_v20 }
 0x41a   : > { %v1428_v26 = vrot.slane %v1420_v9, %v4522_v25  ;;  %v1435_v27 = vrot.slane %v1421_v18, %v4522_v25  ;;  %v3270_v9 = vld [vmem:[%s5975_s1 + $0x530] sm:$0xff] (%p1195_p1)  ;;  %v3265_v18 = vld [vmem:[%s5975_s1 + $0x508] sm:$0xff] (%p1195_p1)  ;;  %1731 = vmatprep.subr.mxu1 (%p1195_p1), %v3271_v7  ;;  %1595 = vmatpush1.msra.mxu0 (%p1195_p1), %v3268_v8 }
 0x41b   :  { %1732 = vmatpush1.msra.mxu1 (%p1195_p1), %v3270_v9  ;;  %1596 = vmatprep.subr.mxu0 (%p1195_p1), %v3265_v18 }
 0x41c   : > { %v1436_v28 = vcombine.low %v1428_v26, %v1435_v27  ;;  %v3267_v26 = vld [vmem:[%s5975_s1 + $0x518] sm:$0xff] (%p1195_p1)  ;;  %v3264_v27 = vld [vmem:[%s5975_s1 + $0x500] sm:$0xff] (%p1195_p1) }
 0x41d   :  { %1733 = vmatprep.subr.mxu1 (%p1195_p1), %v3267_v26  ;;  %1597 = vmatpush1.msra.mxu0 (%p1195_p1), %v3264_v27 }
 0x41e   : > { %v1443_v30 = vrot.slane %v1436_v28, %v4522_v25  ;;  %v3266_v28 = vld [vmem:[%s5975_s1 + $0x510] sm:$0xff] (%p1195_p1) }
 0x41f   :  { %1734 = vmatpush1.msra.mxu1 (%p1195_p1), %v3266_v28 }
 0x420   : > { %v1445_v31 = vadd.f32 %v1443_v30, %v1207_v29  ;;  %v3261_v29 = vld [vmem:[%s5975_s1 + $0x4e8] sm:$0xff] (%p1195_p1)  ;;  %v3263_v30 = vld [vmem:[%s5975_s1 + $0x4f8] sm:$0xff] (%p1195_p1) }
 0x421   :  { %1598 = vmatprep.subr.mxu0 (%p1195_p1), %v3261_v29  ;;  %1735 = vmatprep.subr.mxu1 (%p1195_p1), %v3263_v30 }
 0x422   : > { %v3229_v32 = vmul.f32 -1.442695, %v1445_v31  ;;  %v1453_v33 = vrot.slane %v1445_v31, 1  ;;  %v1464_v35 = vrot.slane %v1445_v31, 3  ;;  %v1461_v38 = vrot.slane %v1445_v31, 2  ;;  %v3260_v31 = vld [vmem:[%s5975_s1 + $0x4e0] sm:$0xff] (%p1195_p1) }
 0x423   :  { %1599 = vmatpush1.msra.mxu0 (%p1195_p1), %v3260_v31 }
 0x424   : > { %3719 = vpow2.f32 %v3229_v32  ;;  %v3230_v34 = vmul.f32 -1.442695, %v1453_v33  ;;  %v3231_v36 = vmul.f32 -1.442695, %v1464_v35  ;;  %v3262_v32 = vld [vmem:[%s5975_s1 + $0x4f0] sm:$0xff] (%p1195_p1)  ;;  %v3257_v33 = vld [vmem:[%s5975_s1 + $0x4c8] sm:$0xff] (%p1195_p1) }
 0x425   :  { %v3256_v35 = vld [vmem:[%s5975_s1 + $0x4c0] sm:$0xff] (%p1195_p1)  ;;  %1736 = vmatpush1.msra.mxu1 (%p1195_p1), %v3262_v32  ;;  %1600 = vmatprep.subr.mxu0 (%p1195_p1), %v3257_v33 }
 0x426   : > { %3721 = vpow2.f32 %v3230_v34  ;;  %v3259_v34 = vld [vmem:[%s5975_s1 + $0x4d8] sm:$0xff] (%p1195_p1)  ;;  %1601 = vmatpush1.msra.mxu0 (%p1195_p1), %v3256_v35 }
 0x427   : > { %3723 = vpow2.f32 %v3231_v36  ;;  %v3258_v36 = vld [vmem:[%s5975_s1 + $0x4d0] sm:$0xff] (%p1195_p1)  ;;  %1737 = vmatprep.subr.mxu1 (%p1195_p1), %v3259_v34 }
 0x428   :  { %1738 = vmatpush1.msra.mxu1 (%p1195_p1), %v3258_v36 }
 0x431   : > { %v3720_v37 = vpop.eup %3719 }
 0x432   : > { %v1449_v39 = vadd.f32 1.0, %v3720_v37  ;;  %v3253_v37 = vld [vmem:[%s5975_s1 + $0x4a8] sm:$0xff] (%p1195_p1) }
 0x433   : > { %v3722_v40 = vpop.eup %3721  ;;  %1602 = vmatprep.subr.mxu0 (%p1195_p1), %v3253_v37 }
 0x434   : > { %3725 = vrcp.f32 %v1449_v39  ;;  %v1458_v41 = vadd.f32 1.0, %v3722_v40  ;;  %v3724_v42 = vpop.eup %3723  ;;  %v3252_v39 = vld [vmem:[%s5975_s1 + $0x4a0] sm:$0xff] (%p1195_p1)  ;;  %v3254_v40 = vld [vmem:[%s5975_s1 + $0x4b0] sm:$0xff] (%p1195_p1) }
 0x435   : > { %3727 = vtanh.f32 %v1461_v38  ;;  %v1469_v47 = vadd.f32 1.0, %v3724_v42  ;;  %v3255_v38 = vld [vmem:[%s5975_s1 + $0x4b8] sm:$0xff] (%p1195_p1)  ;;  %1603 = vmatpush1.msra.mxu0 (%p1195_p1), %v3252_v39 }
 0x436   : > { %3729 = vrcp.f32 %v1458_v41  ;;  %v3249_v41 = vld [vmem:[%s5975_s1 + $0x488] sm:$0xff] (%p1195_p1)  ;;  %v3251_v42 = vld [vmem:[%s5975_s1 + $0x498] sm:$0xff] (%p1195_p1)  ;;  %1739 = vmatprep.subr.mxu1 (%p1195_p1), %v3255_v38 }
 0x437   : > { %3731 = vrcp.f32 %v1469_v47  ;;  %1740 = vmatpush1.msra.mxu1 (%p1195_p1), %v3254_v40  ;;  %1604 = vmatprep.subr.mxu0 (%p1195_p1), %v3249_v41  ;;  %v3244_v47 = vld [vmem:[%s5975_s1 + $0x460] sm:$0xff] (%p1195_p1) }
 0x438   :  { %1741 = vmatprep.subr.mxu1 (%p1195_p1), %v3251_v42 }
 0x441   : > { %v3726_v43 = vpop.eup %3725 }
 0x442   : > { %v3728_v45 = vpop.eup %3727 }
 0x443   : > { %v3730_v46 = vpop.eup %3729  ;;  %v1474_v49 = vmul.f32 %v3728_v45, %v3726_v43  ;;  %v3248_v43 = vld [vmem:[%s5975_s1 + $0x480] sm:$0xff] (%p1195_p1)  ;;  %v3245_v45 = vld [vmem:[%s5975_s1 + $0x468] sm:$0xff] (%p1195_p1) }
 0x444   : > { %v1473_v48 = vmul.f32 %v3730_v46, %v1472_v44  ;;  %v3732_v51 = vpop.eup %3731  ;;  %v3250_v44 = vld [vmem:[%s5975_s1 + $0x490] sm:$0xff] (%p1195_p1)  ;;  %v3247_v46 = vld [vmem:[%s5975_s1 + $0x478] sm:$0xff] (%p1195_p1)  ;;  %1605 = vmatpush1.msra.mxu0 (%p1195_p1), %v3248_v43 }
 0x445   :  { %1742 = vmatpush1.msra.mxu1 (%p1195_p1), %v3250_v44  ;;  %1606 = vmatprep.subr.mxu0 (%p1195_p1), %v3245_v45 }
 0x446   : > { %v1475_v50 = vadd.f32 %v1474_v49, %v1473_v48  ;;  %v3246_v48 = vld [vmem:[%s5975_s1 + $0x470] sm:$0xff] (%p1195_p1)  ;;  %v3241_v49 = vld [vmem:[%s5975_s1 + $0x448] sm:$0xff] (%p1195_p1)  ;;  %1743 = vmatprep.subr.mxu1 (%p1195_p1), %v3247_v46  ;;  %1607 = vmatpush1.msra.mxu0 (%p1195_p1), %v3244_v47 }
 0x447   :  { %1744 = vmatpush1.msra.mxu1 (%p1195_p1), %v3246_v48  ;;  %1608 = vmatprep.subr.mxu0 (%p1195_p1), %v3241_v49 }
 0x448   : > { %3733 = vtanh.f32 %v1475_v50  ;;  %1478 = vst [vmem:[#allocation5] sm:$0x1] %v1475_v50  ;;  %v3243_v50 = vld [vmem:[%s5975_s1 + $0x458] sm:$0xff] (%p1195_p1) }
 0x449   :  { %1905 = vst [vmem:[#allocation5] sm:$0x1] (%p1195_p1), %v3895_v3  ;;  %1745 = vmatprep.subr.mxu1 (%p1195_p1), %v3243_v50 }
 0x454   :  { %1197 = sbr.rel (!%p1195_p1) target bundleno = 819 (0x333), region = 104 }
 0x455   : > { %v3734_v52 = vpop.eup %3733 }
 0x456   : > { %v1477_v53 = vmul.f32 %v3734_v52, %v3732_v51  ;;  %v3240_v51 = vld [vmem:[%s5975_s1 + $0x440] sm:$0xff] (%p1195_p1)  ;;  %v3242_v52 = vld [vmem:[%s5975_s1 + $0x450] sm:$0xff] (%p1195_p1) }
 0x457   :  { %1609 = vmatpush1.msra.mxu0 (%p1195_p1), %v3240_v51  ;;  %1746 = vmatpush1.msra.mxu1 (%p1195_p1), %v3242_v52 }
 0x458   : > { %1479 = vst [vmem:[#allocation4] sm:$0x1] %v1477_v53  ;;  %1481 = vst [vmem:[%s1480_s17] sm:$0x1] %v1477_v53  ;;  %v3237_v53 = vld [vmem:[%s5975_s1 + $0x428] sm:$0xff] (%p1195_p1)  ;;  %1747 = vmatprep.subr.mxu1 (%p1195_p1), %v3239_v54 }
 0x459   :  { %1904 = vst [vmem:[#allocation4] sm:$0x1] %v3895_v3  ;;  %1610 = vmatprep.subr.mxu0 %v3237_v53  ;;  %1748 = vmatpush1.msra.mxu1 %v3238_v56 }
 0x45a   :  { %1611 = vmatpush1.msra.mxu0 %v3236_v55  ;;  %1749 = vmatprep.subr.mxu1 %v3235_v58 }
 0x45b   :  { %1612 = vmatprep.subr.mxu0 %v3233_v57  ;;  %1750 = vmatpush1.msra.mxu1 %v3234_v60 }
 0x45c   :  { %1613 = vmatpush1.msra.mxu0 %v3232_v59 }
 0x45f   :  { %v1482_v15 = vld [vmem:[#allocation2] sm:$0xff]  ;;  %v1483_v61 = vld [vmem:[#allocation2 + $0x8] sm:$0xff]  ;;  %v1484_v62 = vld [vmem:[#allocation2 + $0x10] sm:$0xff] }
 0x460   :  { %1647 = vmatmul.mubr.f32.vlgmr.msra.gmra.mxu0 %v1482_v15  ;;  %1784 = vmatmul.mubr.f32.vlgmr.msra.gmra.mxu1 %v1482_v15  ;;  %v1485_v63 = vld [vmem:[#allocation2 + $0x18] sm:$0xff]  ;;  %v1486_v0 = vld [vmem:[#allocation2 + $0x20] sm:$0xff]  ;;  %v1487_v1 = vld [vmem:[#allocation2 + $0x28] sm:$0xff] }
 0x461   :  { %1652 = vmatprep.mubr.f32.mxu0 %v3895_v3  ;;  %1789 = vmatprep.mubr.f32.mxu1 %v3895_v3  ;;  %v1488_v2 = vld [vmem:[#allocation2 + $0x30] sm:$0xff]  ;;  %v1489_v10 = vld [vmem:[#allocation2 + $0x38] sm:$0xff]  ;;  %v1490_v11 = vld [vmem:[#allocation2 + $0x40] sm:$0xff] }
 0x462   :  { %v1491_v12 = vld [vmem:[#allocation2 + $0x48] sm:$0xff]  ;;  %v1492_v13 = vld [vmem:[#allocation2 + $0x50] sm:$0xff]  ;;  %v1493_v4 = vld [vmem:[#allocation2 + $0x58] sm:$0xff] }
 0x464   :  { %1653 = vmatmul.mubr.f32.gmra.mxu0 %v1483_v61  ;;  %1790 = vmatmul.mubr.f32.gmra.mxu1 %v1483_v61 }
 0x465   :  { %1658 = vmatprep.mubr.f32.mxu0 %v3895_v3  ;;  %1795 = vmatprep.mubr.f32.mxu1 %v3895_v3 }
 0x468   :  { %1659 = vmatmul.mubr.f32.gmra.mxu0 %v1484_v62  ;;  %1796 = vmatmul.mubr.f32.gmra.mxu1 %v1484_v62 }
 0x469   :  { %1664 = vmatprep.mubr.f32.mxu0 %v3895_v3  ;;  %1801 = vmatprep.mubr.f32.mxu1 %v3895_v3 }
 0x46c   :  { %1665 = vmatmul.mubr.f32.gmra.mxu0 %v1485_v63  ;;  %1802 = vmatmul.mubr.f32.gmra.mxu1 %v1485_v63 }
 0x46d   :  { %1670 = vmatprep.mubr.f32.mxu0 %v3895_v3  ;;  %1807 = vmatprep.mubr.f32.mxu1 %v3895_v3 }
 0x470   :  { %1671 = vmatmul.mubr.f32.gmra.mxu0 %v1486_v0  ;;  %1808 = vmatmul.mubr.f32.gmra.mxu1 %v1486_v0 }
 0x471   :  { %1676 = vmatprep.mubr.f32.mxu0 %v3895_v3  ;;  %1813 = vmatprep.mubr.f32.mxu1 %v3895_v3 }
 0x474   :  { %1677 = vmatmul.mubr.f32.gmra.mxu0 %v1487_v1  ;;  %1814 = vmatmul.mubr.f32.gmra.mxu1 %v1487_v1 }
 0x475   :  { %1682 = vmatprep.mubr.f32.mxu0 %v3895_v3  ;;  %1819 = vmatprep.mubr.f32.mxu1 %v3895_v3 }
 0x478   :  { %1683 = vmatmul.mubr.f32.gmra.mxu0 %v1488_v2  ;;  %1820 = vmatmul.mubr.f32.gmra.mxu1 %v1488_v2 }
 0x479   :  { %1688 = vmatprep.mubr.f32.mxu0 %v3895_v3  ;;  %1825 = vmatprep.mubr.f32.mxu1 %v3895_v3 }
 0x47c   :  { %1689 = vmatmul.mubr.f32.gmra.mxu0 %v1489_v10  ;;  %1826 = vmatmul.mubr.f32.gmra.mxu1 %v1489_v10 }
 0x47d   :  { %1694 = vmatprep.mubr.f32.mxu0 %v3895_v3  ;;  %1831 = vmatprep.mubr.f32.mxu1 %v3895_v3 }
 0x480   :  { %1695 = vmatmul.mubr.f32.gmra.mxu0 %v1490_v11  ;;  %1832 = vmatmul.mubr.f32.gmra.mxu1 %v1490_v11 }
 0x481   :  { %1700 = vmatprep.mubr.f32.mxu0 %v3895_v3  ;;  %1837 = vmatprep.mubr.f32.mxu1 %v3895_v3 }
 0x484   :  { %1701 = vmatmul.mubr.f32.gmra.mxu0 %v1491_v12  ;;  %1838 = vmatmul.mubr.f32.gmra.mxu1 %v1491_v12 }
 0x485   :  { %1706 = vmatprep.mubr.f32.mxu0 %v3895_v3  ;;  %1843 = vmatprep.mubr.f32.mxu1 %v3895_v3 }
 0x488   :  { %1707 = vmatmul.mubr.f32.gmra.mxu0 %v1492_v13  ;;  %1844 = vmatmul.mubr.f32.gmra.mxu1 %v1492_v13 }
 0x489   :  { %1712 = vmatprep.mubr.f32.mxu0 %v3895_v3  ;;  %1849 = vmatprep.mubr.f32.mxu1 %v3895_v3 }
 0x48c   :  { %1713 = vmatmul.mubr.f32.gmra.mxu0 %v1493_v4  ;;  %1850 = vmatmul.mubr.f32.gmra.mxu1 %v1493_v4 }
 0x520   :  { %v1648_v3 = vpop.f32.mrf.mxu0  ;;  %v1785_v6 = vpop.f32.mrf.mxu1 }
 0x521   :  { %v1649_v7 = vadd.f32 %v1648_v3, %v5240_v22  ;;  %v1786_v8 = vadd.f32 %v1785_v6, %v5243_v23 }
 0x522   :  { %v1650_v9 = vpop.f32.mrf.mxu0  ;;  %v1787_v18 = vpop.f32.mrf.mxu1 }
 0x523   :  { %1856 = vst [vmem:[#allocation3] sm:$0xff] %v1649_v7  ;;  %1858 = vst [vmem:[#allocation3 + $0x10] sm:$0xff] %v1786_v8  ;;  %v1651_v16 = vadd.f32 %v1650_v9, %v5246_v24  ;;  %v1788_v17 = vadd.f32 %v1787_v18, %v5249_v5 }
 0x524   :  { %v1654_v26 = vpop.f32.mrf.mxu0  ;;  %v1791_v19 = vpop.f32.mrf.mxu1 }
 0x525   :  { %1857 = vst [vmem:[#allocation3 + $0x8] sm:$0xff] %v1651_v16  ;;  %1859 = vst [vmem:[#allocation3 + $0x18] sm:$0xff] %v1788_v17  ;;  %v1655_v20 = vadd.f32 %v1654_v26, %v5240_v22  ;;  %v1792_v27 = vadd.f32 %v1791_v19, %v5243_v23 }
 0x526   :  { %v1656_v28 = vpop.f32.mrf.mxu0  ;;  %v1793_v29 = vpop.f32.mrf.mxu1 }
 0x527   :  { %1860 = vst [vmem:[#allocation3 + $0x20] sm:$0xff] %v1655_v20  ;;  %1862 = vst [vmem:[#allocation3 + $0x30] sm:$0xff] %v1792_v27  ;;  %v1657_v30 = vadd.f32 %v1656_v28, %v5246_v24  ;;  %v1794_v31 = vadd.f32 %v1793_v29, %v5249_v5 }
 0x528   :  { %v1660_v32 = vpop.f32.mrf.mxu0  ;;  %v1797_v33 = vpop.f32.mrf.mxu1 }
 0x529   :  { %1861 = vst [vmem:[#allocation3 + $0x28] sm:$0xff] %v1657_v30  ;;  %1863 = vst [vmem:[#allocation3 + $0x38] sm:$0xff] %v1794_v31  ;;  %v1661_v34 = vadd.f32 %v1660_v32, %v5240_v22  ;;  %v1798_v35 = vadd.f32 %v1797_v33, %v5243_v23 }
 0x52a   :  { %v1662_v36 = vpop.f32.mrf.mxu0  ;;  %v1799_v37 = vpop.f32.mrf.mxu1 }
 0x52b   :  { %1864 = vst [vmem:[#allocation3 + $0x40] sm:$0xff] %v1661_v34  ;;  %1866 = vst [vmem:[#allocation3 + $0x50] sm:$0xff] %v1798_v35  ;;  %v1663_v38 = vadd.f32 %v1662_v36, %v5246_v24  ;;  %v1800_v39 = vadd.f32 %v1799_v37, %v5249_v5 }
 0x52c   :  { %v1666_v40 = vpop.f32.mrf.mxu0  ;;  %v1803_v41 = vpop.f32.mrf.mxu1 }
 0x52d   :  { %1865 = vst [vmem:[#allocation3 + $0x48] sm:$0xff] %v1663_v38  ;;  %1867 = vst [vmem:[#allocation3 + $0x58] sm:$0xff] %v1800_v39  ;;  %v1667_v42 = vadd.f32 %v1666_v40, %v5240_v22  ;;  %v1804_v43 = vadd.f32 %v1803_v41, %v5243_v23 }
 0x52e   :  { %v1668_v44 = vpop.f32.mrf.mxu0  ;;  %v1805_v45 = vpop.f32.mrf.mxu1 }
 0x52f   :  { %1868 = vst [vmem:[#allocation3 + $0x60] sm:$0xff] %v1667_v42  ;;  %1870 = vst [vmem:[#allocation3 + $0x70] sm:$0xff] %v1804_v43  ;;  %v1669_v46 = vadd.f32 %v1668_v44, %v5246_v24  ;;  %v1806_v47 = vadd.f32 %v1805_v45, %v5249_v5 }
 0x530   :  { %v1672_v48 = vpop.f32.mrf.mxu0  ;;  %v1809_v49 = vpop.f32.mrf.mxu1 }
 0x531   :  { %1869 = vst [vmem:[#allocation3 + $0x68] sm:$0xff] %v1669_v46  ;;  %1871 = vst [vmem:[#allocation3 + $0x78] sm:$0xff] %v1806_v47  ;;  %v1673_v50 = vadd.f32 %v1672_v48, %v5240_v22  ;;  %v1810_v51 = vadd.f32 %v1809_v49, %v5243_v23 }
 0x532   :  { %v1674_v52 = vpop.f32.mrf.mxu0  ;;  %v1811_v53 = vpop.f32.mrf.mxu1 }
 0x533   :  { %1872 = vst [vmem:[#allocation3 + $0x80] sm:$0xff] %v1673_v50  ;;  %1874 = vst [vmem:[#allocation3 + $0x90] sm:$0xff] %v1810_v51  ;;  %v1675_v54 = vadd.f32 %v1674_v52, %v5246_v24  ;;  %v1812_v55 = vadd.f32 %v1811_v53, %v5249_v5 }
 0x534   :  { %v1678_v56 = vpop.f32.mrf.mxu0  ;;  %v1815_v57 = vpop.f32.mrf.mxu1 }
 0x535   :  { %1873 = vst [vmem:[#allocation3 + $0x88] sm:$0xff] %v1675_v54  ;;  %1875 = vst [vmem:[#allocation3 + $0x98] sm:$0xff] %v1812_v55  ;;  %v1679_v58 = vadd.f32 %v1678_v56, %v5240_v22  ;;  %v1816_v59 = vadd.f32 %v1815_v57, %v5243_v23 }
 0x536   :  { %v1680_v60 = vpop.f32.mrf.mxu0  ;;  %v1817_v15 = vpop.f32.mrf.mxu1 }
 0x537   :  { %1876 = vst [vmem:[#allocation3 + $0xa0] sm:$0xff] %v1679_v58  ;;  %1878 = vst [vmem:[#allocation3 + $0xb0] sm:$0xff] %v1816_v59  ;;  %v1681_v61 = vadd.f32 %v1680_v60, %v5246_v24  ;;  %v1818_v62 = vadd.f32 %v1817_v15, %v5249_v5 }
 0x538   :  { %v1684_v63 = vpop.f32.mrf.mxu0  ;;  %v1821_v0 = vpop.f32.mrf.mxu1 }
 0x539   :  { %1877 = vst [vmem:[#allocation3 + $0xa8] sm:$0xff] %v1681_v61  ;;  %1879 = vst [vmem:[#allocation3 + $0xb8] sm:$0xff] %v1818_v62  ;;  %v1685_v1 = vadd.f32 %v1684_v63, %v5240_v22  ;;  %v1822_v2 = vadd.f32 %v1821_v0, %v5243_v23 }
 0x53a   :  { %v1686_v10 = vpop.f32.mrf.mxu0  ;;  %v1823_v11 = vpop.f32.mrf.mxu1 }
 0x53b   :  { %1880 = vst [vmem:[#allocation3 + $0xc0] sm:$0xff] %v1685_v1  ;;  %1882 = vst [vmem:[#allocation3 + $0xd0] sm:$0xff] %v1822_v2  ;;  %v1687_v12 = vadd.f32 %v1686_v10, %v5246_v24  ;;  %v1824_v13 = vadd.f32 %v1823_v11, %v5249_v5 }
 0x53c   :  { %v1690_v4 = vpop.f32.mrf.mxu0  ;;  %v1827_v21 = vpop.f32.mrf.mxu1 }
 0x53d   :  { %1881 = vst [vmem:[#allocation3 + $0xc8] sm:$0xff] %v1687_v12  ;;  %1883 = vst [vmem:[#allocation3 + $0xd8] sm:$0xff] %v1824_v13  ;;  %v1691_v3 = vadd.f32 %v1690_v4, %v5240_v22  ;;  %v1828_v6 = vadd.f32 %v1827_v21, %v5243_v23 }
 0x53e   :  { %v1692_v7 = vpop.f32.mrf.mxu0  ;;  %v1829_v8 = vpop.f32.mrf.mxu1 }
 0x53f   :  { %1884 = vst [vmem:[#allocation3 + $0xe0] sm:$0xff] %v1691_v3  ;;  %1886 = vst [vmem:[#allocation3 + $0xf0] sm:$0xff] %v1828_v6  ;;  %v1693_v9 = vadd.f32 %v1692_v7, %v5246_v24  ;;  %v1830_v18 = vadd.f32 %v1829_v8, %v5249_v5 }
 0x540   :  { %v1696_v16 = vpop.f32.mrf.mxu0  ;;  %v1833_v17 = vpop.f32.mrf.mxu1 }
 0x541   :  { %1885 = vst [vmem:[#allocation3 + $0xe8] sm:$0xff] %v1693_v9  ;;  %1887 = vst [vmem:[#allocation3 + $0xf8] sm:$0xff] %v1830_v18  ;;  %v1697_v26 = vadd.f32 %v1696_v16, %v5240_v22  ;;  %v1834_v19 = vadd.f32 %v1833_v17, %v5243_v23 }
 0x542   :  { %v1698_v20 = vpop.f32.mrf.mxu0  ;;  %v1835_v27 = vpop.f32.mrf.mxu1 }
 0x543   :  { %1888 = vst [vmem:[#allocation3 + $0x100] sm:$0xff] %v1697_v26  ;;  %1890 = vst [vmem:[#allocation3 + $0x110] sm:$0xff] %v1834_v19  ;;  %v1699_v28 = vadd.f32 %v1698_v20, %v5246_v24  ;;  %v1836_v29 = vadd.f32 %v1835_v27, %v5249_v5 }
 0x544   :  { %v1702_v30 = vpop.f32.mrf.mxu0  ;;  %v1839_v31 = vpop.f32.mrf.mxu1 }
 0x545   :  { %1889 = vst [vmem:[#allocation3 + $0x108] sm:$0xff] %v1699_v28  ;;  %1891 = vst [vmem:[#allocation3 + $0x118] sm:$0xff] %v1836_v29  ;;  %v1703_v32 = vadd.f32 %v1702_v30, %v5240_v22  ;;  %v1840_v33 = vadd.f32 %v1839_v31, %v5243_v23 }
 0x546   :  { %v1704_v34 = vpop.f32.mrf.mxu0  ;;  %v1841_v35 = vpop.f32.mrf.mxu1 }
 0x547   :  { %1892 = vst [vmem:[#allocation3 + $0x120] sm:$0xff] %v1703_v32  ;;  %1894 = vst [vmem:[#allocation3 + $0x130] sm:$0xff] %v1840_v33  ;;  %v1705_v36 = vadd.f32 %v1704_v34, %v5246_v24  ;;  %v1842_v37 = vadd.f32 %v1841_v35, %v5249_v5 }
 0x548   :  { %v1708_v38 = vpop.f32.mrf.mxu0  ;;  %v1845_v39 = vpop.f32.mrf.mxu1 }
 0x549   :  { %1893 = vst [vmem:[#allocation3 + $0x128] sm:$0xff] %v1705_v36  ;;  %1895 = vst [vmem:[#allocation3 + $0x138] sm:$0xff] %v1842_v37  ;;  %v1709_v40 = vadd.f32 %v1708_v38, %v5240_v22  ;;  %v1846_v41 = vadd.f32 %v1845_v39, %v5243_v23 }
 0x54a   :  { %v1710_v42 = vpop.f32.mrf.mxu0  ;;  %v1847_v43 = vpop.f32.mrf.mxu1 }
 0x54b   :  { %1896 = vst [vmem:[#allocation3 + $0x140] sm:$0xff] %v1709_v40  ;;  %1898 = vst [vmem:[#allocation3 + $0x150] sm:$0xff] %v1846_v41  ;;  %v1711_v44 = vadd.f32 %v1710_v42, %v5246_v24  ;;  %v1848_v45 = vadd.f32 %v1847_v43, %v5249_v5 }
 0x54c   :  { %v1714_v46 = vpop.f32.mrf.mxu0  ;;  %v1851_v47 = vpop.f32.mrf.mxu1 }
 0x54d   :  { %1897 = vst [vmem:[#allocation3 + $0x148] sm:$0xff] %v1711_v44  ;;  %1899 = vst [vmem:[#allocation3 + $0x158] sm:$0xff] %v1848_v45  ;;  %v1715_v48 = vadd.f32 %v1714_v46, %v5240_v22  ;;  %v1852_v49 = vadd.f32 %v1851_v47, %v5243_v23 }
 0x54e   :  { %v1716_v50 = vpop.f32.mrf.mxu0  ;;  %v1853_v51 = vpop.f32.mrf.mxu1 }
 0x54f   :  { %1900 = vst [vmem:[#allocation3 + $0x160] sm:$0xff] %v1715_v48  ;;  %1902 = vst [vmem:[#allocation3 + $0x170] sm:$0xff] %v1852_v49  ;;  %v1717_v52 = vadd.f32 %v1716_v50, %v5246_v24  ;;  %v1854_v53 = vadd.f32 %v1853_v51, %v5249_v5 }
 0x551   :  { %1901 = vst [vmem:[#allocation3 + $0x168] sm:$0xff] %v1717_v52  ;;  %1903 = vst [vmem:[#allocation3 + $0x178] sm:$0xff] %v1854_v53 }
 0x552 LB: > { %v3360_v22 = vld [vmem:[%s5976_s2 + $0x5e8] sm:$0xff]  ;;  %v3362_v23 = vld [vmem:[%s5976_s2 + $0x5f8] sm:$0xff]  ;;  %v3359_v24 = vld [vmem:[%s5976_s2 + $0x5e0] sm:$0xff]  ;;  %s1912_s18 = sshra.s32 %s3893_s3, 3  ;;  %s1915_s19 = sand.u32 7, %s3893_s3  ;;  %s3893_s3 = sphi %s5299_s3, %s1911_s3  }
 0x553   : > { %1987 = vmatprep.subr.mxu0 %v3360_v22  ;;  %2058 = vmatprep.subr.mxu1 %v3362_v23  ;;  %v3361_v5 = vld [vmem:[%s5976_s2 + $0x5f0] sm:$0xff]  ;;  %v3356_v54 = vld [vmem:[%s5976_s2 + $0x5c8] sm:$0xff]  ;;  %v3358_v55 = vld [vmem:[%s5976_s2 + $0x5d8] sm:$0xff]  ;;  %s3407_s1 = sshll.u32 %s1912_s18, 5  ;;  %s2193_s22 = scalar_lea.vmem [#allocation2], %s3893_s3 }
 0x554   : > { %1988 = vmatpush1.msra.mxu0 %v3359_v24  ;;  %2059 = vmatpush1.msra.mxu1 %v3361_v5  ;;  %v3355_v56 = vld [vmem:[%s5976_s2 + $0x5c0] sm:$0xff]  ;;  %v3357_v57 = vld [vmem:[%s5976_s2 + $0x5d0] sm:$0xff]  ;;  %v3352_v58 = vld [vmem:[%s5976_s2 + $0x5a8] sm:$0xff]  ;;  %v3899_v5 = vmov 0.0   ;;  %s1918_s20 = sadd.s32 %s3407_s1, %s1915_s19  ;;  %s1911_s3 = sadd.s32 1, %s3893_s3  }
 0x555   : > { %1989 = vmatprep.subr.mxu0 %v3356_v54  ;;  %2060 = vmatprep.subr.mxu1 %v3358_v55  ;;  %v3354_v59 = vld [vmem:[%s5976_s2 + $0x5b8] sm:$0xff]  ;;  %v3351_v60 = vld [vmem:[%s5976_s2 + $0x5a0] sm:$0xff]  ;;  %v3353_v15 = vld [vmem:[%s5976_s2 + $0x5b0] sm:$0xff]  ;;  %s1919_s21 = scalar_lea.vmem [#allocation3], %s1918_s20  ;;  %p1908_p2 = scmp.ge.s32.totalorder %s1911_s3, 90  }
 0x556   : > { %1990 = vmatpush1.msra.mxu0 %v3355_v56  ;;  %2061 = vmatpush1.msra.mxu1 %v3357_v57  ;;  %v3348_v61 = vld [vmem:[%s5976_s2 + $0x588] sm:$0xff]  ;;  %v3350_v62 = vld [vmem:[%s5976_s2 + $0x598] sm:$0xff]  ;;  %v3347_v63 = vld [vmem:[%s5976_s2 + $0x580] sm:$0xff] }
 0x557   : > { %1991 = vmatprep.subr.mxu0 %v3352_v58  ;;  %2062 = vmatprep.subr.mxu1 %v3354_v59  ;;  %v3349_v0 = vld [vmem:[%s5976_s2 + $0x590] sm:$0xff]  ;;  %v3344_v1 = vld [vmem:[%s5976_s2 + $0x568] sm:$0xff]  ;;  %v3346_v2 = vld [vmem:[%s5976_s2 + $0x578] sm:$0xff] }
 0x558   : > { %1992 = vmatpush1.msra.mxu0 %v3351_v60  ;;  %2063 = vmatpush1.msra.mxu1 %v3353_v15  ;;  %v3343_v10 = vld [vmem:[%s5976_s2 + $0x560] sm:$0xff]  ;;  %v3345_v11 = vld [vmem:[%s5976_s2 + $0x570] sm:$0xff]  ;;  %v3340_v12 = vld [vmem:[%s5976_s2 + $0x548] sm:$0xff] }
 0x559   : > { %1993 = vmatprep.subr.mxu0 %v3348_v61  ;;  %2064 = vmatprep.subr.mxu1 %v3350_v62  ;;  %v3342_v13 = vld [vmem:[%s5976_s2 + $0x558] sm:$0xff]  ;;  %v3339_v4 = vld [vmem:[%s5976_s2 + $0x540] sm:$0xff]  ;;  %v3341_v21 = vld [vmem:[%s5976_s2 + $0x550] sm:$0xff] }
 0x55a   : > { %1994 = vmatpush1.msra.mxu0 %v3347_v63  ;;  %2065 = vmatpush1.msra.mxu1 %v3349_v0  ;;  %v3336_v3 = vld [vmem:[%s5976_s2 + $0x528] sm:$0xff]  ;;  %v3338_v6 = vld [vmem:[%s5976_s2 + $0x538] sm:$0xff]  ;;  %v3335_v7 = vld [vmem:[%s5976_s2 + $0x520] sm:$0xff] }
 0x55b   : > { %1995 = vmatprep.subr.mxu0 %v3344_v1  ;;  %2066 = vmatprep.subr.mxu1 %v3346_v2  ;;  %v3337_v8 = vld [vmem:[%s5976_s2 + $0x530] sm:$0xff]  ;;  %v3332_v9 = vld [vmem:[%s5976_s2 + $0x508] sm:$0xff]  ;;  %v3334_v18 = vld [vmem:[%s5976_s2 + $0x518] sm:$0xff] }
 0x55c   : > { %1996 = vmatpush1.msra.mxu0 %v3343_v10  ;;  %2067 = vmatpush1.msra.mxu1 %v3345_v11  ;;  %v3331_v16 = vld [vmem:[%s5976_s2 + $0x500] sm:$0xff]  ;;  %v3333_v17 = vld [vmem:[%s5976_s2 + $0x510] sm:$0xff]  ;;  %v3328_v26 = vld [vmem:[%s5976_s2 + $0x4e8] sm:$0xff] }
 0x55d   : > { %1997 = vmatprep.subr.mxu0 %v3340_v12  ;;  %2068 = vmatprep.subr.mxu1 %v3342_v13  ;;  %v3330_v19 = vld [vmem:[%s5976_s2 + $0x4f8] sm:$0xff]  ;;  %v3327_v20 = vld [vmem:[%s5976_s2 + $0x4e0] sm:$0xff]  ;;  %v3329_v27 = vld [vmem:[%s5976_s2 + $0x4f0] sm:$0xff] }
 0x55e   : > { %1998 = vmatpush1.msra.mxu0 %v3339_v4  ;;  %2069 = vmatpush1.msra.mxu1 %v3341_v21  ;;  %v3324_v28 = vld [vmem:[%s5976_s2 + $0x4c8] sm:$0xff]  ;;  %v3326_v29 = vld [vmem:[%s5976_s2 + $0x4d8] sm:$0xff]  ;;  %v3323_v30 = vld [vmem:[%s5976_s2 + $0x4c0] sm:$0xff] }
 0x55f   : > { %1999 = vmatprep.subr.mxu0 %v3336_v3  ;;  %2070 = vmatprep.subr.mxu1 %v3338_v6  ;;  %v3325_v31 = vld [vmem:[%s5976_s2 + $0x4d0] sm:$0xff]  ;;  %v3320_v32 = vld [vmem:[%s5976_s2 + $0x4a8] sm:$0xff]  ;;  %v3322_v33 = vld [vmem:[%s5976_s2 + $0x4b8] sm:$0xff] }
 0x560   : > { %2000 = vmatpush1.msra.mxu0 %v3335_v7  ;;  %2071 = vmatpush1.msra.mxu1 %v3337_v8  ;;  %v3319_v34 = vld [vmem:[%s5976_s2 + $0x4a0] sm:$0xff]  ;;  %v3321_v35 = vld [vmem:[%s5976_s2 + $0x4b0] sm:$0xff]  ;;  %v3316_v36 = vld [vmem:[%s5976_s2 + $0x488] sm:$0xff] }
 0x561   : > { %2001 = vmatprep.subr.mxu0 %v3332_v9  ;;  %2072 = vmatprep.subr.mxu1 %v3334_v18  ;;  %v3318_v37 = vld [vmem:[%s5976_s2 + $0x498] sm:$0xff]  ;;  %v3315_v38 = vld [vmem:[%s5976_s2 + $0x480] sm:$0xff]  ;;  %v3317_v39 = vld [vmem:[%s5976_s2 + $0x490] sm:$0xff] }
 0x562   : > { %2002 = vmatpush1.msra.mxu0 %v3331_v16  ;;  %2073 = vmatpush1.msra.mxu1 %v3333_v17  ;;  %v3312_v40 = vld [vmem:[%s5976_s2 + $0x468] sm:$0xff]  ;;  %v3314_v41 = vld [vmem:[%s5976_s2 + $0x478] sm:$0xff]  ;;  %v3311_v42 = vld [vmem:[%s5976_s2 + $0x460] sm:$0xff] }
 0x563   : > { %2003 = vmatprep.subr.mxu0 %v3328_v26  ;;  %2074 = vmatprep.subr.mxu1 %v3330_v19  ;;  %v3313_v43 = vld [vmem:[%s5976_s2 + $0x470] sm:$0xff]  ;;  %v3308_v44 = vld [vmem:[%s5976_s2 + $0x448] sm:$0xff]  ;;  %v3310_v45 = vld [vmem:[%s5976_s2 + $0x458] sm:$0xff] }
 0x564   : > { %2004 = vmatpush1.msra.mxu0 %v3327_v20  ;;  %2075 = vmatpush1.msra.mxu1 %v3329_v27  ;;  %v3307_v46 = vld [vmem:[%s5976_s2 + $0x440] sm:$0xff]  ;;  %v3309_v47 = vld [vmem:[%s5976_s2 + $0x450] sm:$0xff]  ;;  %v3304_v48 = vld [vmem:[%s5976_s2 + $0x428] sm:$0xff] }
 0x565   : > { %2005 = vmatprep.subr.mxu0 %v3324_v28  ;;  %2076 = vmatprep.subr.mxu1 %v3326_v29  ;;  %v3306_v49 = vld [vmem:[%s5976_s2 + $0x438] sm:$0xff]  ;;  %v3303_v50 = vld [vmem:[%s5976_s2 + $0x420] sm:$0xff]  ;;  %v3305_v51 = vld [vmem:[%s5976_s2 + $0x430] sm:$0xff] }
 0x566   : > { %2006 = vmatpush1.msra.mxu0 %v3323_v30  ;;  %2077 = vmatpush1.msra.mxu1 %v3325_v31  ;;  %v3300_v52 = vld [vmem:[%s5976_s2 + $0x408] sm:$0xff]  ;;  %v3302_v53 = vld [vmem:[%s5976_s2 + $0x418] sm:$0xff]  ;;  %v3299_v22 = vld [vmem:[%s5976_s2 + $0x400] sm:$0xff] }
 0x567   : > { %2007 = vmatprep.subr.mxu0 %v3320_v32  ;;  %2078 = vmatprep.subr.mxu1 %v3322_v33  ;;  %v3301_v23 = vld [vmem:[%s5976_s2 + $0x410] sm:$0xff]  ;;  %v1921_v24 = vld [vmem:[#allocation4] sm:$0x1]  ;;  %v2185_v9 = vld [vmem:[#allocation5] sm:$0x1] }
 0x568   : > { %2008 = vmatpush1.msra.mxu0 %v3319_v34  ;;  %2079 = vmatpush1.msra.mxu1 %v3321_v35  ;;  %v1920_v62 = vld [vmem:[%s1919_s21] ss:$8 sm:$0xf] }
 0x569   : > { %2009 = vmatprep.subr.mxu0 %v3316_v36  ;;  %2080 = vmatprep.subr.mxu1 %v3318_v37  ;;  %v2222_v30 = vld [vmem:[%s5977_s4 + $0x78] sm:$0xff] (%p1908_p2)  ;;  %v2221_v31 = vld [vmem:[%s5977_s4 + $0x70] sm:$0xff] (%p1908_p2)  ;;  %v2220_v32 = vld [vmem:[%s5977_s4 + $0x68] sm:$0xff] (%p1908_p2) }
 0x56a   : > { %2010 = vmatpush1.msra.mxu0 %v3315_v38  ;;  %2081 = vmatpush1.msra.mxu1 %v3317_v39  ;;  %v2219_v33 = vld [vmem:[%s5977_s4 + $0x60] sm:$0xff] (%p1908_p2)  ;;  %v2218_v34 = vld [vmem:[%s5977_s4 + $0x58] sm:$0xff] (%p1908_p2)  ;;  %v2217_v35 = vld [vmem:[%s5977_s4 + $0x50] sm:$0xff] (%p1908_p2) }
 0x56b   : > { %2011 = vmatprep.subr.mxu0 %v3312_v40  ;;  %2082 = vmatprep.subr.mxu1 %v3314_v41  ;;  %v2454_v36 = vld [vmem:[%s5979_s6 + $0x78] sm:$0xff] (%p1908_p2)  ;;  %v2453_v37 = vld [vmem:[%s5979_s6 + $0x70] sm:$0xff] (%p1908_p2)  ;;  %v2216_v38 = vld [vmem:[%s5977_s4 + $0x48] sm:$0xff] (%p1908_p2) }
 0x56c   : > { %2012 = vmatpush1.msra.mxu0 %v3311_v42  ;;  %2083 = vmatpush1.msra.mxu1 %v3313_v43  ;;  %v2215_v39 = vld [vmem:[%s5977_s4 + $0x40] sm:$0xff] (%p1908_p2)  ;;  %v2214_v40 = vld [vmem:[%s5977_s4 + $0x38] sm:$0xff] (%p1908_p2)  ;;  %v2213_v41 = vld [vmem:[%s5977_s4 + $0x30] sm:$0xff] (%p1908_p2) }
 0x56d   : > { %2013 = vmatprep.subr.mxu0 %v3308_v44  ;;  %2084 = vmatprep.subr.mxu1 %v3310_v45  ;;  %v2212_v42 = vld [vmem:[%s5977_s4 + $0x28] sm:$0xff] (%p1908_p2)  ;;  %v2211_v43 = vld [vmem:[%s5977_s4 + $0x20] sm:$0xff] (%p1908_p2)  ;;  %v2210_v44 = vld [vmem:[%s5977_s4 + $0x18] sm:$0xff] (%p1908_p2) }
 0x56e   : > { %2014 = vmatpush1.msra.mxu0 %v3307_v46  ;;  %2085 = vmatpush1.msra.mxu1 %v3309_v47  ;;  %v2209_v45 = vld [vmem:[%s5977_s4 + $0x10] sm:$0xff] (%p1908_p2)  ;;  %v2208_v46 = vld [vmem:[%s5977_s4 + $0x8] sm:$0xff] (%p1908_p2)  ;;  %v2207_v47 = vld [vmem:[%s5977_s4] sm:$0xff] (%p1908_p2) }
 0x56f   : > { %2015 = vmatprep.subr.mxu0 %v3304_v48  ;;  %2086 = vmatprep.subr.mxu1 %v3306_v49 }
 0x570   : > { %2016 = vmatpush1.msra.mxu0 %v3303_v50  ;;  %2087 = vmatpush1.msra.mxu1 %v3305_v51 }
 0x571   : > { %2017 = vmatprep.subr.mxu0 %v3300_v52  ;;  %2088 = vmatprep.subr.mxu1 %v3302_v53 }
 0x572   : > { %2018 = vmatpush1.msra.mxu0 %v3299_v22  ;;  %2051 = vmatprep.mubr.f32.mxu0 %v3899_v5 }
 0x573   : > { %2089 = vmatpush1.msra.mxu1 %v3301_v23  ;;  %2122 = vmatprep.mubr.f32.mxu1 %v3899_v5 }
 0x574   : > { %2052 = vmatmul.mubr.f32.vlgmr.msra.gmra.mxu0 %v1921_v24  ;;  %2123 = vmatmul.mubr.f32.vlgmr.msra.gmra.mxu1 %v1921_v24 }
 0x575   :  { %3492 = vmatprep.subr.mxu0 (%p1908_p2), %v2222_v30  ;;  %3542 = vmatprep.subr.mxu1 (%p1908_p2), %v2454_v36 }
 0x576   :  { %3493 = vmatpush3.msra.mxu0 (%p1908_p2), %v2222_v30  ;;  %3543 = vmatpush3.msra.mxu1 (%p1908_p2), %v2454_v36 }
 0x577   :  { %3494 = vmatprep.subr.mxu0 (%p1908_p2), %v2221_v31  ;;  %3544 = vmatprep.subr.mxu1 (%p1908_p2), %v2453_v37 }
 0x578   :  { %3495 = vmatpush3.msra.mxu0 (%p1908_p2), %v2221_v31  ;;  %3545 = vmatpush3.msra.mxu1 (%p1908_p2), %v2453_v37 }
 0x579   :  { %3496 = vmatprep.subr.mxu0 (%p1908_p2), %v2220_v32 }
 0x57a   :  { %3497 = vmatpush3.msra.mxu0 (%p1908_p2), %v2220_v32 }
 0x57b   :  { %3498 = vmatprep.subr.mxu0 (%p1908_p2), %v2219_v33 }
 0x57c   :  { %3499 = vmatpush3.msra.mxu0 (%p1908_p2), %v2219_v33 }
 0x57d   :  { %3500 = vmatprep.subr.mxu0 (%p1908_p2), %v2218_v34 }
 0x57e   :  { %3501 = vmatpush3.msra.mxu0 (%p1908_p2), %v2218_v34 }
 0x57f   :  { %3502 = vmatprep.subr.mxu0 (%p1908_p2), %v2217_v35 }
 0x580   :  { %3503 = vmatpush3.msra.mxu0 (%p1908_p2), %v2217_v35 }
 0x581   :  { %3504 = vmatprep.subr.mxu0 (%p1908_p2), %v2216_v38 }
 0x582   :  { %3505 = vmatpush3.msra.mxu0 (%p1908_p2), %v2216_v38 }
 0x583   :  { %3506 = vmatprep.subr.mxu0 (%p1908_p2), %v2215_v39 }
 0x584   :  { %3507 = vmatpush3.msra.mxu0 (%p1908_p2), %v2215_v39 }
 0x585   :  { %3508 = vmatprep.subr.mxu0 (%p1908_p2), %v2214_v40 }
 0x586   :  { %3509 = vmatpush3.msra.mxu0 (%p1908_p2), %v2214_v40 }
 0x587   :  { %3510 = vmatprep.subr.mxu0 (%p1908_p2), %v2213_v41 }
 0x588   :  { %3511 = vmatpush3.msra.mxu0 (%p1908_p2), %v2213_v41 }
 0x589   :  { %3512 = vmatprep.subr.mxu0 (%p1908_p2), %v2212_v42 }
 0x58a   :  { %3513 = vmatpush3.msra.mxu0 (%p1908_p2), %v2212_v42 }
 0x58b   :  { %3514 = vmatprep.subr.mxu0 (%p1908_p2), %v2211_v43 }
 0x58c   :  { %3515 = vmatpush3.msra.mxu0 (%p1908_p2), %v2211_v43 }
 0x58d   :  { %3516 = vmatprep.subr.mxu0 (%p1908_p2), %v2210_v44 }
 0x58e   :  { %3517 = vmatpush3.msra.mxu0 (%p1908_p2), %v2210_v44 }
 0x58f   :  { %3518 = vmatprep.subr.mxu0 (%p1908_p2), %v2209_v45 }
 0x590   :  { %3519 = vmatpush3.msra.mxu0 (%p1908_p2), %v2209_v45 }
 0x591   :  { %3520 = vmatprep.subr.mxu0 (%p1908_p2), %v2208_v46 }
 0x592   :  { %3521 = vmatpush3.msra.mxu0 (%p1908_p2), %v2208_v46 }
 0x593   :  { %3522 = vmatprep.subr.mxu0 (%p1908_p2), %v2207_v47 }
 0x594   :  { %3523 = vmatpush3.msra.mxu0 (%p1908_p2), %v2207_v47 }
 0x634   : > { %v2053_v54 = vpop.f32.mrf.mxu0  ;;  %v2124_v55 = vpop.f32.mrf.mxu1 }
 0x636   : > { %v2055_v56 = vpop.f32.mrf.mxu0  ;;  %v2126_v57 = vpop.f32.mrf.mxu1 }
 0x637   : > { %v2133_v58 = vcombine.low %v2053_v54, %v2055_v56  ;;  %v2134_v59 = vcombine.low %v2124_v55, %v2126_v57  ;;  %v2452_v55 = vld [vmem:[%s5979_s6 + $0x68] sm:$0xff] (%p1908_p2)  ;;  %v2451_v56 = vld [vmem:[%s5979_s6 + $0x60] sm:$0xff] (%p1908_p2)  ;;  %v2450_v57 = vld [vmem:[%s5979_s6 + $0x58] sm:$0xff] (%p1908_p2) }
 0x638   :  { %3546 = vmatprep.subr.mxu1 (%p1908_p2), %v2452_v55 }
 0x639   : > { %v2141_v60 = vrot.slane %v2133_v58, %v4522_v25  ;;  %v2148_v15 = vrot.slane %v2134_v59, %v4522_v25  ;;  %3547 = vmatpush3.msra.mxu1 (%p1908_p2), %v2452_v55  ;;  %v2449_v58 = vld [vmem:[%s5979_s6 + $0x50] sm:$0xff] (%p1908_p2)  ;;  %v2448_v59 = vld [vmem:[%s5979_s6 + $0x48] sm:$0xff] (%p1908_p2) }
 0x63a   :  { %3548 = vmatprep.subr.mxu1 (%p1908_p2), %v2451_v56 }
 0x63b   : > { %v2149_v61 = vcombine.low %v2141_v60, %v2148_v15  ;;  %3549 = vmatpush3.msra.mxu1 (%p1908_p2), %v2451_v56  ;;  %v2447_v60 = vld [vmem:[%s5979_s6 + $0x40] sm:$0xff] (%p1908_p2)  ;;  %v2446_v15 = vld [vmem:[%s5979_s6 + $0x38] sm:$0xff] (%p1908_p2) }
 0x63c   :  { %3550 = vmatprep.subr.mxu1 (%p1908_p2), %v2450_v57 }
 0x63d   : > { %v2156_v63 = vrot.slane %v2149_v61, %v4522_v25  ;;  %3551 = vmatpush3.msra.mxu1 (%p1908_p2), %v2450_v57  ;;  %v2445_v61 = vld [vmem:[%s5979_s6 + $0x30] sm:$0xff] (%p1908_p2) }
 0x63e   :  { %3552 = vmatprep.subr.mxu1 (%p1908_p2), %v2449_v58 }
 0x63f   : > { %v2158_v0 = vadd.f32 %v2156_v63, %v1920_v62  ;;  %3553 = vmatpush3.msra.mxu1 (%p1908_p2), %v2449_v58  ;;  %v2444_v62 = vld [vmem:[%s5979_s6 + $0x28] sm:$0xff] (%p1908_p2)  ;;  %v2443_v63 = vld [vmem:[%s5979_s6 + $0x20] sm:$0xff] (%p1908_p2) }
 0x640   :  { %3554 = vmatprep.subr.mxu1 (%p1908_p2), %v2448_v59 }
 0x641   : > { %v3363_v1 = vmul.f32 -1.442695, %v2158_v0  ;;  %v2166_v2 = vrot.slane %v2158_v0, 1  ;;  %v2177_v11 = vrot.slane %v2158_v0, 3  ;;  %v2174_v4 = vrot.slane %v2158_v0, 2  ;;  %3555 = vmatpush3.msra.mxu1 (%p1908_p2), %v2448_v59  ;;  %v2442_v0 = vld [vmem:[%s5979_s6 + $0x18] sm:$0xff] (%p1908_p2) }
 0x642   :  { %3556 = vmatprep.subr.mxu1 (%p1908_p2), %v2447_v60 }
 0x643   : > { %3735 = vpow2.f32 %v3363_v1  ;;  %v3364_v10 = vmul.f32 -1.442695, %v2166_v2  ;;  %v3365_v12 = vmul.f32 -1.442695, %v2177_v11  ;;  %3557 = vmatpush3.msra.mxu1 (%p1908_p2), %v2447_v60  ;;  %v2441_v1 = vld [vmem:[%s5979_s6 + $0x10] sm:$0xff] (%p1908_p2)  ;;  %v2440_v2 = vld [vmem:[%s5979_s6 + $0x8] sm:$0xff] (%p1908_p2) }
 0x644   :  { %3558 = vmatprep.subr.mxu1 (%p1908_p2), %v2446_v15  ;;  %v5604_v11 = vld [vmem:[%s5981_s8 + $0x78] sm:$0xff] (%p1908_p2) }
 0x645   : > { %3737 = vpow2.f32 %v3364_v10  ;;  %3559 = vmatpush3.msra.mxu1 (%p1908_p2), %v2446_v15  ;;  %v2439_v10 = vld [vmem:[%s5979_s6] sm:$0xff] (%p1908_p2)  ;;  %3592 = vmatprep.subr.mxu0 (%p1908_p2), %v5604_v11 }
 0x646   : > { %3739 = vpow2.f32 %v3365_v12  ;;  %3560 = vmatprep.subr.mxu1 (%p1908_p2), %v2445_v61  ;;  %v5609_v12 = vld [vmem:[%s5981_s8 + $0x70] sm:$0xff] (%p1908_p2) }
 0x647   :  { %3561 = vmatpush3.msra.mxu1 (%p1908_p2), %v2445_v61 }
 0x648   :  { %3562 = vmatprep.subr.mxu1 (%p1908_p2), %v2444_v62 }
 0x649   :  { %3563 = vmatpush3.msra.mxu1 (%p1908_p2), %v2444_v62 }
 0x64a   :  { %3564 = vmatprep.subr.mxu1 (%p1908_p2), %v2443_v63 }
 0x64b   :  { %3565 = vmatpush3.msra.mxu1 (%p1908_p2), %v2443_v63 }
 0x64c   :  { %3566 = vmatprep.subr.mxu1 (%p1908_p2), %v2442_v0 }
 0x64d   :  { %3567 = vmatpush3.msra.mxu1 (%p1908_p2), %v2442_v0 }
 0x64e   :  { %3568 = vmatprep.subr.mxu1 (%p1908_p2), %v2441_v1 }
 0x64f   :  { %3569 = vmatpush3.msra.mxu1 (%p1908_p2), %v2441_v1 }
 0x650   : > { %v3736_v13 = vpop.eup %3735  ;;  %3570 = vmatprep.subr.mxu1 (%p1908_p2), %v2440_v2 }
 0x651   : > { %v2162_v21 = vadd.f32 1.0, %v3736_v13  ;;  %3571 = vmatpush3.msra.mxu1 (%p1908_p2), %v2440_v2  ;;  %v3366_v13 = vld [vmem:[%s5978_s5] ss:$0 sm:$0xff] (%p1908_p2) }
 0x652   : > { %v3738_v3 = vpop.eup %3737  ;;  %3572 = vmatprep.subr.mxu1 (%p1908_p2), %v2439_v10 }
 0x653   : > { %3741 = vrcp.f32 %v2162_v21  ;;  %v2171_v6 = vadd.f32 1.0, %v3738_v3  ;;  %v3740_v7 = vpop.eup %3739  ;;  %3573 = vmatpush3.msra.mxu1 (%p1908_p2), %v2439_v10 }
 0x654   : > { %3743 = vtanh.f32 %v2174_v4  ;;  %v2182_v17 = vadd.f32 1.0, %v3740_v7  ;;  %3642 = vmatprep.subr.mxu1 (%p1908_p2), %v5604_v11 }
 0x655   : > { %3745 = vrcp.f32 %v2171_v6 }
 0x656   : > { %3747 = vrcp.f32 %v2182_v17 }
 0x660   : > { %v3742_v8 = vpop.eup %3741 }
 0x661   : > { %v3744_v18 = vpop.eup %3743 }
 0x662   : > { %v3746_v16 = vpop.eup %3745  ;;  %v2187_v19 = vmul.f32 %v3744_v18, %v3742_v8 }
 0x663   : > { %v2186_v26 = vmul.f32 %v3746_v16, %v2185_v9  ;;  %v3748_v27 = vpop.eup %3747 }
 0x665   : > { %v2188_v20 = vadd.f32 %v2187_v19, %v2186_v26 }
 0x667   : > { %3749 = vtanh.f32 %v2188_v20  ;;  %2191 = vst [vmem:[#allocation5] sm:$0x1] %v2188_v20 }
 0x673   :  { %1910 = sbr.rel (!%p1908_p2) target bundleno = 1362 (0x552), region = 115 }
 0x674   : > { %v3750_v28 = vpop.eup %3749 }
 0x675   : > { %v2190_v29 = vmul.f32 %v3750_v28, %v3748_v27 }
 0x677   : > { %2192 = vst [vmem:[#allocation4] sm:$0x1] %v2190_v29  ;;  %2194 = vst [vmem:[%s2193_s22] sm:$0x1] %v2190_v29 }
 0x67e   :  { %v2195_v25 = vld [vmem:[#allocation2] sm:$0xff]  ;;  %v2196_v48 = vld [vmem:[#allocation2 + $0x8] sm:$0xff]  ;;  %v2197_v49 = vld [vmem:[#allocation2 + $0x10] sm:$0xff] }
 0x67f   :  { %3524 = vmatprep.mubr.f32.mxu0 %v2195_v25  ;;  %v2198_v50 = vld [vmem:[#allocation2 + $0x18] sm:$0xff]  ;;  %v2199_v51 = vld [vmem:[#allocation2 + $0x20] sm:$0xff]  ;;  %v2200_v52 = vld [vmem:[#allocation2 + $0x28] sm:$0xff] }
 0x680   :  { %3525 = vmatmul.mubr.f32.vlgmr.msra.gmra.mxu0 %v2196_v48  ;;  %v2201_v53 = vld [vmem:[#allocation2 + $0x30] sm:$0xff]  ;;  %v2202_v22 = vld [vmem:[#allocation2 + $0x38] sm:$0xff]  ;;  %v2203_v23 = vld [vmem:[#allocation2 + $0x40] sm:$0xff] }
 0x681   :  { %3527 = vmatprep.mubr.f32.mxu0 %v2197_v49  ;;  %v2204_v24 = vld [vmem:[#allocation2 + $0x48] sm:$0xff]  ;;  %v2205_v5 = vld [vmem:[#allocation2 + $0x50] sm:$0xff]  ;;  %v2206_v54 = vld [vmem:[#allocation2 + $0x58] sm:$0xff]  ;;  %3593 = vmatpush3.msra.mxu0 %v5604_v11 }
 0x682   :  { %3594 = vmatprep.subr.mxu0 %v5609_v12 }
 0x683   :  { %3595 = vmatpush3.msra.mxu0 %v5609_v12 }
 0x684   :  { %3528 = vmatmul.mubr.f32.gmra.mxu0 %v2198_v50 }
 0x685   :  { %3530 = vmatprep.mubr.f32.mxu0 %v2199_v51 }
 0x688   :  { %3531 = vmatmul.mubr.f32.gmra.mxu0 %v2200_v52 }
 0x689   :  { %3533 = vmatprep.mubr.f32.mxu0 %v2201_v53 }
 0x68c   :  { %3534 = vmatmul.mubr.f32.gmra.mxu0 %v2202_v22 }
 0x68d   :  { %3536 = vmatprep.mubr.f32.mxu0 %v2203_v23 }
 0x690   :  { %3537 = vmatmul.mubr.f32.gmra.mxu0 %v2204_v24 }
 0x691   :  { %3539 = vmatprep.mubr.f32.mxu0 %v2205_v5 }
 0x694   :  { %3540 = vmatmul.mubr.f32.gmra.mxu0 %v2206_v54 }
 0x740   :  { %v3526_v4 = vpop.f32.mrf.mxu0 }
 0x741   :  { %v2302_v21 = vadd.f32 %v3526_v4, %v3366_v13 }
 0x742   :  { %v2296_v3 = vpop.f32.mrf.mxu0 }
 0x743   :  { %v2369_v6 = vmul.f32 1.442695, %v2302_v21  ;;  %v2297_v7 = vadd.f32 %v3366_v13, %v2296_v3  ;;  %vm2356_vm0 = vcmp.gt.f32.partialorder %v2302_v21, 0.0 }
 0x744   :  { %v3529_v8 = vpop.f32.mrf.mxu0 }
 0x745   :  { %3751 = vpow2.f32 %v2369_v6  ;;  %v2367_v9 = vmul.f32 1.442695, %v2297_v7  ;;  %v5619_v18 = vadd.f32 %v3529_v8, %v3366_v13  ;;  %vm2355_vm1 = vcmp.gt.f32.partialorder %v2297_v7, 0.0 }
 0x746   :  { %v2306_v16 = vpop.f32.mrf.mxu0 }
 0x747   :  { %3753 = vpow2.f32 %v2367_v9  ;;  %v2373_v17 = vmul.f32 1.442695, %v5619_v18  ;;  %v2307_v26 = vadd.f32 %v3366_v13, %v2306_v16  ;;  %vm2358_vm2 = vcmp.gt.f32.partialorder %v5619_v18, 0.0 }
 0x748   :  { %v3532_v19 = vpop.f32.mrf.mxu0 }
 0x749   :  { %3755 = vpow2.f32 %v2373_v17  ;;  %v2371_v20 = vmul.f32 1.442695, %v2307_v26  ;;  %v5622_v27 = vadd.f32 %v3532_v19, %v3366_v13  ;;  %vm2357_vm3 = vcmp.gt.f32.partialorder %v2307_v26, 0.0 }
 0x74a   :  { %v2316_v28 = vpop.f32.mrf.mxu0 }
 0x74b   :  { %3757 = vpow2.f32 %v2371_v20  ;;  %v2377_v29 = vmul.f32 1.442695, %v5622_v27  ;;  %v5625_v30 = vadd.f32 %v3366_v13, %v2316_v28  ;;  %vm2360_vm4 = vcmp.gt.f32.partialorder %v5622_v27, 0.0 }
 0x74c   :  { %v3535_v31 = vpop.f32.mrf.mxu0 }
 0x74d   :  { %3759 = vpow2.f32 %v2377_v29  ;;  %v2375_v32 = vmul.f32 1.442695, %v5625_v30  ;;  %v5628_v33 = vadd.f32 %v3535_v31, %v3366_v13  ;;  %vm2359_vm5 = vcmp.gt.f32.partialorder %v5625_v30, 0.0 }
 0x74e   :  { %v2326_v25 = vpop.f32.mrf.mxu0 }
 0x74f   :  { %3761 = vpow2.f32 %v2375_v32  ;;  %v2381_v34 = vmul.f32 1.442695, %v5628_v33  ;;  %v5631_v35 = vadd.f32 %v3366_v13, %v2326_v25  ;;  %vm2362_vm6 = vcmp.gt.f32.partialorder %v5628_v33, 0.0 }
 0x750   :  { %v3538_v36 = vpop.f32.mrf.mxu0 }
 0x751   :  { %3763 = vpow2.f32 %v2381_v34  ;;  %v2379_v37 = vmul.f32 1.442695, %v5631_v35  ;;  %v5634_v38 = vadd.f32 %v3538_v36, %v3366_v13  ;;  %vm2361_vm7 = vcmp.gt.f32.partialorder %v5631_v35, 0.0 }
 0x752   :  { %v3752_v39 = vpop.eup %3751  ;;  %v2336_v40 = vpop.f32.mrf.mxu0 }
 0x753   :  { %v3368_v41 = vadd.f32 -1.0, %v3752_v39  ;;  %3765 = vpow2.f32 %v2379_v37  ;;  %v2385_v42 = vmul.f32 1.442695, %v5634_v38  ;;  %v5637_v44 = vadd.f32 %v3366_v13, %v2336_v40 }
 0x754   :  { %v3754_v43 = vpop.eup %3753  ;;  %v3541_v45 = vpop.f32.mrf.mxu0  ;;  %vm2364_vm8 = vcmp.gt.f32.partialorder %v5634_v38, 0.0 }
 0x755   :  { %3767 = vpow2.f32 %v2385_v42  ;;  %v5639_v46 = vadd.f32 %v3541_v45, %v3366_v13  ;;  %v3367_v47 = vadd.f32 -1.0, %v3754_v43  ;;  %v2404_v48 = vmul.f32 1.6732632, %v3368_v41 }
 0x756   :  { %v3756_v49 = vpop.eup %3755  ;;  %v2383_v50 = vmul.f32 1.442695, %v5637_v44  ;;  %v2346_v51 = vpop.f32.mrf.mxu0  ;;  %vm2363_vm9 = vcmp.gt.f32.partialorder %v5637_v44, 0.0 }
 0x757   :  { %v3370_v52 = vadd.f32 -1.0, %v3756_v49  ;;  %v2389_v53 = vmul.f32 1.442695, %v5639_v46  ;;  %v5643_v22 = vadd.f32 %v3366_v13, %v2346_v51  ;;  %v2403_v24 = vmul.f32 1.6732632, %v3367_v47  ;;  %v2681_v49 = vld [vmem:[%s5981_s8 + $0x50] sm:$0xff] }
 0x758   :  { %v3758_v23 = vpop.eup %3757  ;;  %3769 = vpow2.f32 %v2383_v50  ;;  %v2416_v55 = vsel %vm2356_vm0, %v2302_v21, %v2404_v48  ;;  %vm2366_vm10 = vcmp.gt.f32.partialorder %v5639_v46, 0.0  ;;  %v2683_v48 = vld [vmem:[%s5981_s8 + $0x60] sm:$0xff]  ;;  %v2680_v50 = vld [vmem:[%s5981_s8 + $0x48] sm:$0xff] }
 0x759   :  { %v3369_v5 = vadd.f32 -1.0, %v3758_v23  ;;  %3771 = vpow2.f32 %v2389_v53  ;;  %v2387_v54 = vmul.f32 1.442695, %v5643_v22  ;;  %v2415_v57 = vsel %vm2355_vm1, %v2297_v7, %v2403_v24  ;;  %v2679_v51 = vld [vmem:[%s5981_s8 + $0x40] sm:$0xff]  ;;  %v2677_v53 = vld [vmem:[%s5981_s8 + $0x30] sm:$0xff]  ;;  %v2674_v24 = vld [vmem:[%s5981_s8 + $0x18] sm:$0xff] }
 0x75a   :  { %v3760_v56 = vpop.eup %3759  ;;  %v2406_v58 = vmul.f32 1.6732632, %v3370_v52  ;;  %v2427_v60 = vmul.f32 1.050701, %v2415_v57  ;;  %v2428_v62 = vmul.f32 1.050701, %v2416_v55 }
 0x75b   :  { %v3372_v59 = vadd.f32 -1.0, %v3760_v56  ;;  %3773 = vpow2.f32 %v2387_v54  ;;  %v2405_v15 = vmul.f32 1.6732632, %v3369_v5  ;;  %vm2365_vm11 = vcmp.gt.f32.partialorder %v5643_v22, 0.0  ;;  %v2678_v52 = vld [vmem:[%s5981_s8 + $0x38] sm:$0xff]  ;;  %v2675_v23 = vld [vmem:[%s5981_s8 + $0x20] sm:$0xff] }
 0x75c   :  { %v3762_v61 = vpop.eup %3761  ;;  %3574 = vmatprep.mubr.f32.mxu1 %v2427_v60  ;;  %v2418_v1 = vsel %vm2358_vm2, %v5619_v18, %v2406_v58  ;;  %v2673_v5 = vld [vmem:[%s5981_s8 + $0x10] sm:$0xff]  ;;  %v2672_v54 = vld [vmem:[%s5981_s8 + $0x8] sm:$0xff]  ;;  %v2671_v55 = vld [vmem:[%s5981_s8] sm:$0xff] }
 0x75d   :  { %v3371_v63 = vadd.f32 -1.0, %v3762_v61  ;;  %v2417_v0 = vsel %vm2357_vm3, %v2307_v26, %v2405_v15  ;;  %v2408_v2 = vmul.f32 1.6732632, %v3372_v59  ;;  %3575 = vmatmul.mubr.f32.vlgmr.msra.gmra.mxu1 %v2428_v62  ;;  %v2430_v6 = vmul.f32 1.050701, %v2418_v1 }
 0x75e   :  { %v3764_v10 = vpop.eup %3763  ;;  %v2429_v13 = vmul.f32 1.050701, %v2417_v0  ;;  %3658 = vmatpush3.msra.mxu1 %v5604_v11  ;;  %v3379_v56 = vld [vmem:[%s5980_s7] ss:$0 sm:$0xff] }
 0x75f   :  { %v3374_v4 = vadd.f32 -1.0, %v3764_v10  ;;  %v2407_v21 = vmul.f32 1.6732632, %v3371_v63  ;;  %3643 = vmatprep.subr.mxu1 %v5609_v12  ;;  %v2420_v9 = vsel %vm2360_vm4, %v5622_v27, %v2408_v2 }
 0x760   :  { %v3766_v3 = vpop.eup %3765  ;;  %3577 = vmatprep.mubr.f32.mxu1 %v2429_v13  ;;  %3659 = vmatpush3.msra.mxu1 %v5609_v12  ;;  %v2432_v19 = vmul.f32 1.050701, %v2420_v9 }
 0x761   :  { %v3373_v7 = vadd.f32 -1.0, %v3766_v3  ;;  %v2419_v8 = vsel %vm2359_vm5, %v5625_v30, %v2407_v21  ;;  %v2410_v18 = vmul.f32 1.6732632, %v3374_v4  ;;  %3578 = vmatmul.mubr.f32.gmra.mxu1 %v2430_v6 }
 0x762   :  { %v3768_v16 = vpop.eup %3767  ;;  %v2431_v11 = vmul.f32 1.050701, %v2419_v8 }
 0x763   :  { %v3376_v17 = vadd.f32 -1.0, %v3768_v16  ;;  %v2409_v26 = vmul.f32 1.6732632, %v3373_v7  ;;  %v2422_v29 = vsel %vm2362_vm6, %v5628_v33, %v2410_v18 }
 0x764   :  { %3580 = vmatprep.mubr.f32.mxu1 %v2431_v11  ;;  %v2434_v34 = vmul.f32 1.050701, %v2422_v29 }
 0x765   :  { %v3770_v20 = vpop.eup %3769  ;;  %v2421_v28 = vsel %vm2361_vm7, %v5631_v35, %v2409_v26  ;;  %v2412_v27 = vmul.f32 1.6732632, %v3376_v17  ;;  %3581 = vmatmul.mubr.f32.gmra.mxu1 %v2432_v19 }
 0x766   :  { %v3772_v30 = vpop.eup %3771  ;;  %v3375_v31 = vadd.f32 -1.0, %v3770_v20  ;;  %v2433_v12 = vmul.f32 1.050701, %v2421_v28 }
 0x767   :  { %v3378_v32 = vadd.f32 -1.0, %v3772_v30  ;;  %v2424_v39 = vsel %vm2364_vm8, %v5634_v38, %v2412_v27 }
 0x768   :  { %v3774_v25 = vpop.eup %3773  ;;  %3583 = vmatprep.mubr.f32.mxu1 %v2433_v12  ;;  %v2411_v36 = vmul.f32 1.6732632, %v3375_v31  ;;  %v2436_v42 = vmul.f32 1.050701, %v2424_v39 }
 0x769   :  { %v3377_v37 = vadd.f32 -1.0, %v3774_v25  ;;  %v2414_v35 = vmul.f32 1.6732632, %v3378_v32  ;;  %3584 = vmatmul.mubr.f32.gmra.mxu1 %v2434_v34 }
 0x76a   :  { %v2423_v33 = vsel %vm2363_vm9, %v5637_v44, %v2411_v36  ;;  %v2684_v44 = vld [vmem:[%s5981_s8 + $0x68] sm:$0xff] }
 0x76b   :  { %v2435_v40 = vmul.f32 1.050701, %v2423_v33  ;;  %v2413_v41 = vmul.f32 1.6732632, %v3377_v37  ;;  %v2426_v45 = vsel %vm2366_vm10, %v5639_v46, %v2414_v35  ;;  %3596 = vmatprep.subr.mxu0 %v2684_v44  ;;  %3644 = vmatprep.subr.mxu1 %v2684_v44  ;;  %v2682_v46 = vld [vmem:[%s5981_s8 + $0x58] sm:$0xff] }
 0x76c   :  { %v2438_v38 = vmul.f32 1.050701, %v2426_v45  ;;  %3597 = vmatpush3.msra.mxu0 %v2684_v44  ;;  %3660 = vmatpush3.msra.mxu1 %v2684_v44 }
 0x76d   :  { %3586 = vmatprep.mubr.f32.mxu1 %v2435_v40  ;;  %v2425_v43 = vsel %vm2365_vm11, %v5643_v22, %v2413_v41  ;;  %3598 = vmatprep.subr.mxu0 %v2683_v48  ;;  %v2676_v22 = vld [vmem:[%s5981_s8 + $0x28] sm:$0xff] }
 0x76e   :  { %3587 = vmatmul.mubr.f32.gmra.mxu1 %v2436_v42  ;;  %v2437_v47 = vmul.f32 1.050701, %v2425_v43  ;;  %3645 = vmatprep.subr.mxu1 %v2683_v48 }
 0x76f   :  { %3599 = vmatpush3.msra.mxu0 %v2683_v48  ;;  %3661 = vmatpush3.msra.mxu1 %v2683_v48 }
 0x770   :  { %3589 = vmatprep.mubr.f32.mxu1 %v2437_v47  ;;  %3600 = vmatprep.subr.mxu0 %v2682_v46 }
 0x771   :  { %3646 = vmatprep.subr.mxu1 %v2682_v46  ;;  %3601 = vmatpush3.msra.mxu0 %v2682_v46 }
 0x772   :  { %3590 = vmatmul.mubr.f32.gmra.mxu1 %v2438_v38  ;;  %3602 = vmatprep.subr.mxu0 %v2681_v49 }
 0x773   :  { %3662 = vmatpush3.msra.mxu1 %v2682_v46  ;;  %3603 = vmatpush3.msra.mxu0 %v2681_v49 }
 0x774   :  { %3647 = vmatprep.subr.mxu1 %v2681_v49  ;;  %3604 = vmatprep.subr.mxu0 %v2680_v50 }
 0x775   :  { %3663 = vmatpush3.msra.mxu1 %v2681_v49  ;;  %3605 = vmatpush3.msra.mxu0 %v2680_v50 }
 0x776   :  { %3648 = vmatprep.subr.mxu1 %v2680_v50  ;;  %3606 = vmatprep.subr.mxu0 %v2679_v51 }
 0x777   :  { %3664 = vmatpush3.msra.mxu1 %v2680_v50  ;;  %3607 = vmatpush3.msra.mxu0 %v2679_v51 }
 0x778   :  { %3649 = vmatprep.subr.mxu1 %v2679_v51  ;;  %3608 = vmatprep.subr.mxu0 %v2678_v52 }
 0x779   :  { %3665 = vmatpush3.msra.mxu1 %v2679_v51  ;;  %3609 = vmatpush3.msra.mxu0 %v2678_v52 }
 0x77a   :  { %3650 = vmatprep.subr.mxu1 %v2678_v52  ;;  %3610 = vmatprep.subr.mxu0 %v2677_v53 }
 0x77b   :  { %3666 = vmatpush3.msra.mxu1 %v2678_v52  ;;  %3611 = vmatpush3.msra.mxu0 %v2677_v53 }
 0x77c   :  { %3651 = vmatprep.subr.mxu1 %v2677_v53  ;;  %3612 = vmatprep.subr.mxu0 %v2676_v22 }
 0x77d   :  { %3667 = vmatpush3.msra.mxu1 %v2677_v53  ;;  %3613 = vmatpush3.msra.mxu0 %v2676_v22 }
 0x77e   :  { %3652 = vmatprep.subr.mxu1 %v2676_v22  ;;  %3614 = vmatprep.subr.mxu0 %v2675_v23 }
 0x77f   :  { %3668 = vmatpush3.msra.mxu1 %v2676_v22  ;;  %3615 = vmatpush3.msra.mxu0 %v2675_v23 }
 0x780   :  { %3653 = vmatprep.subr.mxu1 %v2675_v23  ;;  %3616 = vmatprep.subr.mxu0 %v2674_v24 }
 0x781   :  { %3669 = vmatpush3.msra.mxu1 %v2675_v23  ;;  %3617 = vmatpush3.msra.mxu0 %v2674_v24 }
 0x782   :  { %3654 = vmatprep.subr.mxu1 %v2674_v24  ;;  %3618 = vmatprep.subr.mxu0 %v2673_v5 }
 0x783   :  { %3670 = vmatpush3.msra.mxu1 %v2674_v24  ;;  %3619 = vmatpush3.msra.mxu0 %v2673_v5 }
 0x784   :  { %3655 = vmatprep.subr.mxu1 %v2673_v5  ;;  %3620 = vmatprep.subr.mxu0 %v2672_v54 }
 0x785   :  { %3671 = vmatpush3.msra.mxu1 %v2673_v5  ;;  %3621 = vmatpush3.msra.mxu0 %v2672_v54 }
 0x786   :  { %3656 = vmatprep.subr.mxu1 %v2672_v54  ;;  %3622 = vmatprep.subr.mxu0 %v2671_v55 }
 0x787   :  { %3672 = vmatpush3.msra.mxu1 %v2672_v54  ;;  %3623 = vmatpush3.msra.mxu0 %v2671_v55 }
 0x788   :  { %3657 = vmatprep.subr.mxu1 %v2671_v55 }
 0x789   :  { %3673 = vmatpush3.msra.mxu1 %v2671_v55 }
 0x81d   :  { %v3576_v57 = vpop.f32.mrf.mxu1 }
 0x81e   :  { %v2534_v58 = vadd.f32 %v3576_v57, %v3379_v56 }
 0x81f   :  { %v2528_v59 = vpop.f32.mrf.mxu1 }
 0x820   :  { %v2601_v60 = vmul.f32 1.442695, %v2534_v58  ;;  %v2529_v15 = vadd.f32 %v3379_v56, %v2528_v59  ;;  %vm2588_vm12 = vcmp.gt.f32.partialorder %v2534_v58, 0.0 }
 0x821   :  { %v3579_v61 = vpop.f32.mrf.mxu1 }
 0x822   :  { %3775 = vpow2.f32 %v2601_v60  ;;  %v2599_v62 = vmul.f32 1.442695, %v2529_v15  ;;  %v5712_v63 = vadd.f32 %v3579_v61, %v3379_v56  ;;  %vm2587_vm13 = vcmp.gt.f32.partialorder %v2529_v15, 0.0 }
 0x823   :  { %v2538_v0 = vpop.f32.mrf.mxu1 }
 0x824   :  { %3777 = vpow2.f32 %v2599_v62  ;;  %v2605_v1 = vmul.f32 1.442695, %v5712_v63  ;;  %v2539_v2 = vadd.f32 %v3379_v56, %v2538_v0  ;;  %vm2590_vm14 = vcmp.gt.f32.partialorder %v5712_v63, 0.0 }
 0x825   :  { %v3582_v10 = vpop.f32.mrf.mxu1 }
 0x826   :  { %3779 = vpow2.f32 %v2605_v1  ;;  %v2603_v13 = vmul.f32 1.442695, %v2539_v2  ;;  %v5715_v4 = vadd.f32 %v3582_v10, %v3379_v56  ;;  %vm2589_vm15 = vcmp.gt.f32.partialorder %v2539_v2, 0.0 }
 0x827   :  { %v2548_v21 = vpop.f32.mrf.mxu1 }
 0x828   :  { %3781 = vpow2.f32 %v2603_v13  ;;  %v2609_v3 = vmul.f32 1.442695, %v5715_v4  ;;  %v5718_v6 = vadd.f32 %v3379_v56, %v2548_v21  ;;  %vm2592_vm0 = vcmp.gt.f32.partialorder %v5715_v4, 0.0 }
 0x829   :  { %v3585_v7 = vpop.f32.mrf.mxu1 }
 0x82a   :  { %3783 = vpow2.f32 %v2609_v3  ;;  %v2607_v8 = vmul.f32 1.442695, %v5718_v6  ;;  %v5721_v9 = vadd.f32 %v3585_v7, %v3379_v56  ;;  %vm2591_vm1 = vcmp.gt.f32.partialorder %v5718_v6, 0.0 }
 0x82b   :  { %v2558_v18 = vpop.f32.mrf.mxu1 }
 0x82c   :  { %3785 = vpow2.f32 %v2607_v8  ;;  %v2613_v16 = vmul.f32 1.442695, %v5721_v9  ;;  %v5724_v11 = vadd.f32 %v3379_v56, %v2558_v18  ;;  %vm2594_vm2 = vcmp.gt.f32.partialorder %v5721_v9, 0.0 }
 0x82e   :  { %v3588_v17 = vpop.f32.mrf.mxu1  ;;  %3787 = vpow2.f32 %v2613_v16  ;;  %v2611_v26 = vmul.f32 1.442695, %v5724_v11  ;;  %vm2593_vm3 = vcmp.gt.f32.partialorder %v5724_v11, 0.0 }
 0x82f   :  { %v5727_v19 = vadd.f32 %v3588_v17, %v3379_v56  ;;  %v3776_v20 = vpop.eup %3775 }
 0x830   :  { %v2568_v28 = vpop.f32.mrf.mxu1  ;;  %v3381_v29 = vadd.f32 -1.0, %v3776_v20  ;;  %3789 = vpow2.f32 %v2611_v26 }
 0x831   :  { %v2617_v27 = vmul.f32 1.442695, %v5727_v19  ;;  %v3778_v30 = vpop.eup %3777  ;;  %v5730_v31 = vadd.f32 %v3379_v56, %v2568_v28  ;;  %vm2596_vm4 = vcmp.gt.f32.partialorder %v5727_v19, 0.0 }
 0x832   :  { %v3591_v12 = vpop.f32.mrf.mxu1  ;;  %v2636_v32 = vmul.f32 1.6732632, %v3381_v29  ;;  %v3380_v25 = vadd.f32 -1.0, %v3778_v30 }
 0x833   :  { %3791 = vpow2.f32 %v2617_v27  ;;  %v5732_v34 = vadd.f32 %v3591_v12, %v3379_v56  ;;  %v3780_v36 = vpop.eup %3779  ;;  %v2615_v37 = vmul.f32 1.442695, %v5730_v31  ;;  %vm2595_vm5 = vcmp.gt.f32.partialorder %v5730_v31, 0.0 }
 0x834   :  { %v2578_v39 = vpop.f32.mrf.mxu1  ;;  %v3383_v35 = vadd.f32 -1.0, %v3780_v36  ;;  %v2635_v42 = vmul.f32 1.6732632, %v3380_v25  ;;  %v2648_v43 = vsel %vm2588_vm12, %v2534_v58, %v2636_v32 }
 0x835   :  { %v2621_v33 = vmul.f32 1.442695, %v5732_v34  ;;  %v3782_v40 = vpop.eup %3781  ;;  %3793 = vpow2.f32 %v2615_v37  ;;  %v5736_v41 = vadd.f32 %v3379_v56, %v2578_v39  ;;  %v2660_v52 = vmul.f32 1.050701, %v2648_v43 }
 0x836   :  { %v3382_v45 = vadd.f32 -1.0, %v3782_v40  ;;  %v2638_v47 = vmul.f32 1.6732632, %v3383_v35  ;;  %v2647_v48 = vsel %vm2587_vm13, %v2529_v15, %v2635_v42  ;;  %vm2598_vm6 = vcmp.gt.f32.partialorder %v5732_v34, 0.0 }
 0x837   :  { %3795 = vpow2.f32 %v2621_v33  ;;  %v3784_v38 = vpop.eup %3783  ;;  %v2619_v44 = vmul.f32 1.442695, %v5736_v41  ;;  %v2659_v49 = vmul.f32 1.050701, %v2647_v48  ;;  %vm2597_vm7 = vcmp.gt.f32.partialorder %v5736_v41, 0.0 }
 0x838   :  { %v3385_v46 = vadd.f32 -1.0, %v3784_v38  ;;  %v2637_v50 = vmul.f32 1.6732632, %v3382_v45  ;;  %v2650_v23 = vsel %vm2590_vm14, %v5712_v63, %v2638_v47 }
 0x839   :  { %v3786_v51 = vpop.eup %3785  ;;  %3797 = vpow2.f32 %v2619_v44  ;;  %3624 = vmatprep.mubr.f32.mxu0 %v2659_v49  ;;  %v2662_v58 = vmul.f32 1.050701, %v2650_v23 }
 0x83a   :  { %v3384_v53 = vadd.f32 -1.0, %v3786_v51  ;;  %v2649_v22 = vsel %vm2589_vm15, %v2539_v2, %v2637_v50  ;;  %v2640_v24 = vmul.f32 1.6732632, %v3385_v46  ;;  %3625 = vmatmul.mubr.f32.vlgmr.msra.gmra.mxu0 %v2660_v52 }
 0x83b   :  { %v3788_v5 = vpop.eup %3787  ;;  %v2661_v54 = vmul.f32 1.050701, %v2649_v22 }
 0x83c   :  { %v3387_v55 = vadd.f32 -1.0, %v3788_v5  ;;  %v2639_v56 = vmul.f32 1.6732632, %v3384_v53  ;;  %v2652_v61 = vsel %vm2592_vm0, %v5715_v4, %v2640_v24 }
 0x83d   :  { %v3790_v57 = vpop.eup %3789  ;;  %3627 = vmatprep.mubr.f32.mxu0 %v2661_v54  ;;  %v2664_v10 = vmul.f32 1.050701, %v2652_v61 }
 0x83e   :  { %v2642_v59 = vmul.f32 1.6732632, %v3387_v55  ;;  %v3386_v60 = vadd.f32 -1.0, %v3790_v57  ;;  %v2651_v15 = vsel %vm2591_vm1, %v5718_v6, %v2639_v56  ;;  %3628 = vmatmul.mubr.f32.gmra.mxu0 %v2662_v58  ;;  %v5784_v56 = vand.u32 127, %v137_v14 }
 0x83f   :  { %v2663_v63 = vmul.f32 1.050701, %v2651_v15 }
 0x840   :  { %v3792_v62 = vpop.eup %3791  ;;  %v2641_v1 = vmul.f32 1.6732632, %v3386_v60  ;;  %v2654_v2 = vsel %vm2594_vm2, %v5721_v9, %v2642_v59  ;;  %vm2905_vm9 = vcmp.lt.s32.totalorder %v5784_v56, 27 }
 0x841   :  { %v3389_v0 = vadd.f32 -1.0, %v3792_v62  ;;  %3630 = vmatprep.mubr.f32.mxu0 %v2663_v63  ;;  %v2666_v8 = vmul.f32 1.050701, %v2654_v2 }
 0x842   :  { %v3794_v13 = vpop.eup %3793  ;;  %v2653_v21 = vsel %vm2593_vm3, %v5724_v11, %v2641_v1  ;;  %3631 = vmatmul.mubr.f32.gmra.mxu0 %v2664_v10 }
 0x843   :  { %v2644_v3 = vmul.f32 1.6732632, %v3389_v0  ;;  %v3388_v7 = vadd.f32 -1.0, %v3794_v13  ;;  %v2665_v4 = vmul.f32 1.050701, %v2653_v21 }
 0x844   :  { %v3796_v6 = vpop.eup %3795 }
 0x845   :  { %v3391_v18 = vadd.f32 -1.0, %v3796_v6  ;;  %3633 = vmatprep.mubr.f32.mxu1 %v2665_v4  ;;  %v2643_v16 = vmul.f32 1.6732632, %v3388_v7  ;;  %v2656_v9 = vsel %vm2596_vm4, %v5727_v19, %v2644_v3  ;;  %v3392_v19 = vld [vmem:[%s5982_s9] ss:$0 sm:$0xff] }
 0x846   :  { %v3798_v17 = vpop.eup %3797  ;;  %3634 = vmatmul.mubr.f32.vlgmr.msra.gmra.mxu1 %v2666_v8  ;;  %v2668_v29 = vmul.f32 1.050701, %v2656_v9 }
 0x847   :  { %v2646_v26 = vmul.f32 1.6732632, %v3391_v18  ;;  %v3390_v20 = vadd.f32 -1.0, %v3798_v17  ;;  %v2655_v11 = vsel %vm2595_vm5, %v5730_v31, %v2643_v16 }
 0x848   :  { %v2667_v28 = vmul.f32 1.050701, %v2655_v11 }
 0x849   :  { %v2645_v27 = vmul.f32 1.6732632, %v3390_v20  ;;  %v2658_v30 = vsel %vm2598_vm6, %v5732_v34, %v2646_v26 }
 0x84a   :  { %3636 = vmatprep.mubr.f32.mxu1 %v2667_v28  ;;  %v2670_v25 = vmul.f32 1.050701, %v2658_v30 }
 0x84b   :  { %3637 = vmatmul.mubr.f32.gmra.mxu1 %v2668_v29  ;;  %v2657_v12 = vsel %vm2597_vm7, %v5736_v41, %v2645_v27 }
 0x84c   :  { %v2669_v32 = vmul.f32 1.050701, %v2657_v12 }
 0x84e   :  { %3639 = vmatprep.mubr.f32.mxu1 %v2669_v32 }
 0x84f   :  { %3640 = vmatmul.mubr.f32.gmra.mxu1 %v2670_v25 }
 0x8fa   :  { %v3626_v31 = vpop.f32.mrf.mxu0 }
 0x8fb   :  { %v2766_v36 = vadd.f32 %v3626_v31, %v3392_v19 }
 0x8fc   :  { %v2760_v37 = vpop.f32.mrf.mxu0 }
 0x8fd   :  { %v2833_v39 = vmul.f32 1.442695, %v2766_v36  ;;  %v5760_v35 = vadd.f32 %v3392_v19, %v2760_v37  ;;  %vm2820_vm8 = vcmp.gt.f32.partialorder %v2766_v36, 0.0 }
 0x8fe   :  { %v3629_v33 = vpop.f32.mrf.mxu0 }
 0x8ff   :  { %3799 = vpow2.f32 %v2833_v39  ;;  %v2831_v34 = vmul.f32 1.442695, %v5760_v35  ;;  %v5763_v40 = vadd.f32 %v3629_v33, %v3392_v19  ;;  %vm2819_vm10 = vcmp.gt.f32.partialorder %v5760_v35, 0.0 }
 0x900   :  { %v2770_v41 = vpop.f32.mrf.mxu0 }
 0x901   :  { %3801 = vpow2.f32 %v2831_v34  ;;  %v2837_v42 = vmul.f32 1.442695, %v5763_v40  ;;  %v5766_v43 = vadd.f32 %v3392_v19, %v2770_v41  ;;  %vm2822_vm11 = vcmp.gt.f32.partialorder %v5763_v40, 0.0 }
 0x902   :  { %v3632_v45 = vpop.f32.mrf.mxu0 }
 0x903   :  { %3803 = vpow2.f32 %v2837_v42  ;;  %v2835_v47 = vmul.f32 1.442695, %v5766_v43  ;;  %v5769_v38 = vadd.f32 %v3632_v45, %v3392_v19  ;;  %vm2821_vm12 = vcmp.gt.f32.partialorder %v5766_v43, 0.0 }
 0x904   :  { %v2780_v44 = vpop.f32.mrf.mxu0 }
 0x905   :  { %3805 = vpow2.f32 %v2835_v47  ;;  %v2841_v48 = vmul.f32 1.442695, %v5769_v38  ;;  %v5772_v46 = vadd.f32 %v3392_v19, %v2780_v44  ;;  %vm2824_vm13 = vcmp.gt.f32.partialorder %v5769_v38, 0.0 }
 0x906   :  { %v3635_v49 = vpop.f32.mrf.mxu1 }
 0x907   :  { %v5774_v50 = vadd.f32 %v3635_v49, %v3392_v19  ;;  %3807 = vpow2.f32 %v2841_v48  ;;  %v2839_v51 = vmul.f32 1.442695, %v5772_v46  ;;  %vm2823_vm14 = vcmp.gt.f32.partialorder %v5772_v46, 0.0 }
 0x908   :  { %v2790_v52 = vpop.f32.mrf.mxu1 }
 0x909   :  { %v2845_v53 = vmul.f32 1.442695, %v5774_v50  ;;  %v5778_v22 = vadd.f32 %v3392_v19, %v2790_v52  ;;  %3809 = vpow2.f32 %v2839_v51  ;;  %vm2826_vm15 = vcmp.gt.f32.partialorder %v5774_v50, 0.0 }
 0x90b   :  { %3811 = vpow2.f32 %v2845_v53  ;;  %v2843_v23 = vmul.f32 1.442695, %v5778_v22  ;;  %v3638_v24 = vpop.f32.mrf.mxu1  ;;  %vm2825_vm0 = vcmp.gt.f32.partialorder %v5778_v22, 0.0 }
 0x90c   :  { %v5781_v5 = vadd.f32 %v3638_v24, %v3392_v19  ;;  %v3800_v54 = vpop.eup %3799 }
 0x90d   :  { %3813 = vpow2.f32 %v2843_v23  ;;  %v2800_v55 = vpop.f32.mrf.mxu1  ;;  %v3394_v59 = vadd.f32 -1.0, %v3800_v54 }
 0x90e   :  { %v2849_v57 = vmul.f32 1.442695, %v5781_v5  ;;  %v5787_v58 = vadd.f32 %v3392_v19, %v2800_v55  ;;  %v3802_v60 = vpop.eup %3801  ;;  %vm2828_vm1 = vcmp.gt.f32.partialorder %v5781_v5, 0.0 }
 0x90f   :  { %v3641_v15 = vpop.f32.mrf.mxu1  ;;  %v2868_v63 = vmul.f32 1.6732632, %v3394_v59  ;;  %v3393_v14 = vadd.f32 -1.0, %v3802_v60 }
 0x910   :  { %3815 = vpow2.f32 %v2849_v57  ;;  %v2847_v61 = vmul.f32 1.442695, %v5787_v58  ;;  %v5790_v62 = vadd.f32 %v3641_v15, %v3392_v19  ;;  %v3804_v0 = vpop.eup %3803  ;;  %vm2827_vm2 = vcmp.gt.f32.partialorder %v5787_v58, 0.0 }
 0x911   :  { %v2810_v1 = vpop.f32.mrf.mxu1  ;;  %v2880_v13 = vsel %vm2820_vm8, %v2766_v36, %v2868_v63  ;;  %v3396_v6 = vadd.f32 -1.0, %v3804_v0  ;;  %v2867_v7 = vmul.f32 1.6732632, %v3393_v14 }
 0x912   :  { %3817 = vpow2.f32 %v2847_v61  ;;  %v2853_v2 = vmul.f32 1.442695, %v5790_v62  ;;  %v5794_v10 = vadd.f32 %v3392_v19, %v2810_v1  ;;  %v3806_v21 = vpop.eup %3805  ;;  %v5796_v3 = vmul.f32 1.050701, %v2880_v13 }
 0x913   :  { %v3395_v8 = vadd.f32 -1.0, %v3806_v21  ;;  %v2870_v17 = vmul.f32 1.6732632, %v3396_v6  ;;  %v2879_v9 = vsel %vm2819_vm10, %v5760_v35, %v2867_v7  ;;  %vm2830_vm3 = vcmp.gt.f32.partialorder %v5790_v62, 0.0 }
 0x914   :  { %3819 = vpow2.f32 %v2853_v2  ;;  %v2851_v4 = vmul.f32 1.442695, %v5794_v10  ;;  %v3808_v18 = vpop.eup %3807  ;;  %v2907_v16 = vsel %vm2905_vm9, %v5796_v3, -1e+30  ;;  %v5805_v26 = vmul.f32 1.050701, %v2879_v9 }
 0x915   :  { %2920 = vmax.xlane.f32.xlu0 %v2907_v16  ;;  %v2869_v20 = vmul.f32 1.6732632, %v3395_v8  ;;  %v3398_v11 = vadd.f32 -1.0, %v3808_v18  ;;  %v2882_v29 = vsel %vm2822_vm11, %v5763_v40, %v2870_v17  ;;  %vm2829_vm4 = vcmp.gt.f32.partialorder %v5794_v10, 0.0 }
 0x916   :  { %3821 = vpow2.f32 %v2851_v4  ;;  %v3810_v28 = vpop.eup %3809  ;;  %v5809_v30 = vmul.f32 1.050701, %v2882_v29  ;;  %v2906_v25 = vsel %vm2905_vm9, %v5805_v26, -1e+30 }
 0x917   :  { %v2881_v12 = vsel %vm2821_vm12, %v5766_v43, %v2869_v20  ;;  %v3397_v32 = vadd.f32 -1.0, %v3810_v28  ;;  %v2872_v19 = vmul.f32 1.6732632, %v3398_v11 }
 0x918   :  { %v3812_v27 = vpop.eup %3811  ;;  %v2909_v37 = vsel %vm2905_vm9, %v5809_v30, -1e+30  ;;  %v5819_v39 = vmul.f32 1.050701, %v2881_v12 }
 0x919   :  { %v3400_v31 = vadd.f32 -1.0, %v3812_v27  ;;  %2918 = vmax.xlane.f32.xlu0 %v2906_v25  ;;  %v2871_v35 = vmul.f32 1.6732632, %v3397_v32  ;;  %2924 = vmax.xlane.f32.xlu1 %v2909_v37  ;;  %v2884_v33 = vsel %vm2824_vm13, %v5769_v38, %v2872_v19 }
 0x91a   :  { %v3814_v36 = vpop.eup %3813  ;;  %v5827_v45 = vmul.f32 1.050701, %v2884_v33  ;;  %v2908_v44 = vsel %vm2905_vm9, %v5819_v39, -1e+30 }
 0x91b   :  { %v3399_v34 = vadd.f32 -1.0, %v3814_v36  ;;  %v2874_v40 = vmul.f32 1.6732632, %v3400_v31  ;;  %v2883_v41 = vsel %vm2823_vm14, %v5772_v46, %v2871_v35 }
 0x91c   :  { %v5825_v43 = vmul.f32 1.050701, %v2883_v41  ;;  %v2911_v24 = vsel %vm2905_vm9, %v5827_v45, -1e+30 }
 0x91d   :  { %v3816_v42 = vpop.eup %3815  ;;  %v2873_v47 = vmul.f32 1.6732632, %v3399_v34  ;;  %v2886_v38 = vsel %vm2826_vm15, %v5774_v50, %v2874_v40  ;;  %2922 = vmax.xlane.f32.xlu1 %v2908_v44 }
 0x91e   :  { %v3402_v48 = vadd.f32 -1.0, %v3816_v42  ;;  %v2910_v46 = vsel %vm2905_vm9, %v5825_v43, -1e+30  ;;  %v2898_v54 = vmul.f32 1.050701, %v2886_v38 }
 0x91f   :  { %v3818_v49 = vpop.eup %3817  ;;  %v2885_v51 = vsel %vm2825_vm0, %v5778_v22, %v2873_v47  ;;  %2926 = vmax.xlane.f32.xlu0 %v2910_v46 }
 0x920   :  { %v2897_v52 = vmul.f32 1.050701, %v2885_v51  ;;  %v3401_v53 = vadd.f32 -1.0, %v3818_v49  ;;  %v2876_v55 = vmul.f32 1.6732632, %v3402_v48 }
 0x921   :  { %v3820_v23 = vpop.eup %3819  ;;  %2928 = vmax.xlane.f32.xlu1 %v2911_v24  ;;  %v2913_v1 = vsel %vm2905_vm9, %v2898_v54, -1e+30 }
 0x922   :  { %v2912_v50 = vsel %vm2905_vm9, %v2897_v52, -1e+30  ;;  %v2875_v57 = vmul.f32 1.6732632, %v3401_v53  ;;  %v3404_v59 = vadd.f32 -1.0, %v3820_v23  ;;  %v2888_v22 = vsel %vm2828_vm1, %v5781_v5, %v2876_v55 }
 0x923   :  { %v3822_v60 = vpop.eup %3821  ;;  %2930 = vmax.xlane.f32.xlu0 %v2912_v50  ;;  %v2900_v14 = vmul.f32 1.050701, %v2888_v22 }
 0x924   :  { %v2887_v15 = vsel %vm2827_vm2, %v5787_v58, %v2875_v57  ;;  %v3403_v61 = vadd.f32 -1.0, %v3822_v60  ;;  %v2878_v63 = vmul.f32 1.6732632, %v3404_v59 }
 0x925   :  { %v2899_v0 = vmul.f32 1.050701, %v2887_v15  ;;  %2932 = vmax.xlane.f32.xlu1 %v2913_v1  ;;  %v2915_v6 = vsel %vm2905_vm9, %v2900_v14, -1e+30 }
 0x926   :  { %v2877_v2 = vmul.f32 1.6732632, %v3403_v61  ;;  %v2890_v5 = vsel %vm2830_vm3, %v5790_v62, %v2878_v63 }
 0x927   :  { %v2914_v13 = vsel %vm2905_vm9, %v2899_v0, -1e+30  ;;  %v2902_v7 = vmul.f32 1.050701, %v2890_v5 }
 0x928   :  { %2934 = vmax.xlane.f32.xlu0 %v2914_v13  ;;  %v2889_v58 = vsel %vm2829_vm4, %v5794_v10, %v2877_v2 }
 0x929   :  { %v2901_v21 = vmul.f32 1.050701, %v2889_v58  ;;  %2936 = vmax.xlane.f32.xlu1 %v2915_v6  ;;  %v2917_v8 = vsel %vm2905_vm9, %v2902_v7, -1e+30 }
 0x92b   :  { %v2916_v4 = vsel %vm2905_vm9, %v2901_v21, -1e+30 }
 0x92c   :  { %2938 = vmax.xlane.f32.xlu0 %v2916_v4 }
 0x92d   :  { %2940 = vmax.xlane.f32.xlu1 %v2917_v8 }
 0x99e   :  { %v2921_v18 = vpop.xlane.xlu0 %2920 }
 0x99f   :  { %v5862_v62 = vsub.f32 %v5796_v3, %v2921_v18 }
 0x9a1   :  { %v2956_v10 = vmul.f32 1.442695, %v5862_v62 }
 0x9a2   :  { %v2919_v16 = vpop.xlane.xlu0 %2918  ;;  %v2925_v17 = vpop.xlane.xlu1 %2924 }
 0x9a3   :  { %3823 = vpow2.f32 %v2956_v10  ;;  %v5866_v9 = vsub.f32 %v5805_v26, %v2919_v16  ;;  %v5869_v20 = vsub.f32 %v5809_v30, %v2925_v17 }
 0x9a5   :  { %v2954_v11 = vmul.f32 1.442695, %v5866_v9  ;;  %v2960_v28 = vmul.f32 1.442695, %v5869_v20 }
 0x9a6   :  { %v2923_v29 = vpop.xlane.xlu1 %2922 }
 0x9a7   :  { %3825 = vpow2.f32 %v2954_v11  ;;  %v5874_v3 = vsub.f32 %v5819_v39, %v2923_v29 }
 0x9a8   :  { %3827 = vpow2.f32 %v2960_v28  ;;  %v2927_v27 = vpop.xlane.xlu0 %2926 }
 0x9a9   :  { %v5877_v12 = vsub.f32 %v5825_v43, %v2927_v27  ;;  %v2958_v26 = vmul.f32 1.442695, %v5874_v3 }
 0x9aa   :  { %v2929_v30 = vpop.xlane.xlu1 %2928 }
 0x9ab   :  { %v2962_v32 = vmul.f32 1.442695, %v5877_v12  ;;  %3829 = vpow2.f32 %v2958_v26  ;;  %v5882_v25 = vsub.f32 %v5827_v45, %v2929_v30 }
 0x9ac   :  { %v2931_v19 = vpop.xlane.xlu0 %2930 }
 0x9ad   :  { %v5884_v31 = vsub.f32 %v2897_v52, %v2931_v19  ;;  %3831 = vpow2.f32 %v2962_v32  ;;  %v2964_v36 = vmul.f32 1.442695, %v5882_v25 }
 0x9ae   :  { %v2933_v39 = vpop.xlane.xlu1 %2932 }
 0x9af   :  { %v2966_v37 = vmul.f32 1.442695, %v5884_v31  ;;  %3833 = vpow2.f32 %v2964_v36  ;;  %v5888_v33 = vsub.f32 %v2898_v54, %v2933_v39 }
 0x9b0   :  { %v3824_v35 = vpop.eup %3823 }
 0x9b1   :  { %v2935_v34 = vpop.xlane.xlu0 %2934  ;;  %v2979_v41 = vsel %vm2905_vm9, %v3824_v35, 0.0  ;;  %3835 = vpow2.f32 %v2966_v37  ;;  %v2968_v42 = vmul.f32 1.442695, %v5888_v33 }
 0x9b2   :  { %v5890_v40 = vsub.f32 %v2899_v0, %v2935_v34  ;;  %2992 = vadd.xlane.f32.xlu1 %v2979_v41  ;;  %v2937_v45 = vpop.xlane.xlu1 %2936 }
 0x9b3   :  { %3837 = vpow2.f32 %v2968_v42  ;;  %v5896_v44 = vsub.f32 %v2900_v14, %v2937_v45 }
 0x9b4   :  { %v2970_v43 = vmul.f32 1.442695, %v5890_v40  ;;  %v3826_v47 = vpop.eup %3825 }
 0x9b5   :  { %v2939_v38 = vpop.xlane.xlu0 %2938  ;;  %v3828_v48 = vpop.eup %3827  ;;  %v2978_v46 = vsel %vm2905_vm9, %v3826_v47, 0.0  ;;  %v2972_v51 = vmul.f32 1.442695, %v5896_v44 }
 0x9b6   :  { %v5898_v49 = vsub.f32 %v2901_v21, %v2939_v38  ;;  %3839 = vpow2.f32 %v2970_v43  ;;  %v2981_v52 = vsel %vm2905_vm9, %v3828_v48, 0.0  ;;  %2990 = vadd.xlane.f32.xlu0 %v2978_v46  ;;  %v2941_v23 = vpop.xlane.xlu1 %2940 }
 0x9b7   :  { %2996 = vadd.xlane.f32.xlu1 %v2981_v52  ;;  %3841 = vpow2.f32 %v2972_v51  ;;  %v5906_v24 = vsub.f32 %v2902_v7, %v2941_v23 }
 0x9b8   :  { %v2974_v53 = vmul.f32 1.442695, %v5898_v49  ;;  %v3830_v54 = vpop.eup %3829 }
 0x9b9   :  { %v2976_v55 = vmul.f32 1.442695, %v5906_v24  ;;  %v2980_v50 = vsel %vm2905_vm9, %v3830_v54, 0.0 }
 0x9ba   :  { %3843 = vpow2.f32 %v2974_v53  ;;  %v3832_v57 = vpop.eup %3831  ;;  %2994 = vadd.xlane.f32.xlu0 %v2980_v50 }
 0x9bb   :  { %3845 = vpow2.f32 %v2976_v55  ;;  %v2982_v22 = vsel %vm2905_vm9, %v3832_v57, 0.0 }
 0x9bc   :  { %v3834_v59 = vpop.eup %3833 }
 0x9bd   :  { %v2983_v60 = vsel %vm2905_vm9, %v3834_v59, 0.0 }
 0x9be   :  { %v3836_v15 = vpop.eup %3835  ;;  %3000 = vadd.xlane.f32.xlu1 %v2983_v60  ;;  %2998 = vadd.xlane.f32.xlu0 %v2982_v22 }
 0x9bf   :  { %v2984_v0 = vsel %vm2905_vm9, %v3836_v15, 0.0 }
 0x9c0   :  { %v3838_v61 = vpop.eup %3837 }
 0x9c1   :  { %v2985_v63 = vsel %vm2905_vm9, %v3838_v61, 0.0 }
 0x9c2   :  { %3004 = vadd.xlane.f32.xlu1 %v2985_v63  ;;  %3002 = vadd.xlane.f32.xlu0 %v2984_v0 }
 0x9c3   :  { %v3840_v1 = vpop.eup %3839 }
 0x9c4   :  { %v3842_v14 = vpop.eup %3841  ;;  %v2986_v13 = vsel %vm2905_vm9, %v3840_v1, 0.0 }
 0x9c5   :  { %v2987_v2 = vsel %vm2905_vm9, %v3842_v14, 0.0 }
 0x9c6   :  { %3008 = vadd.xlane.f32.xlu1 %v2987_v2  ;;  %3006 = vadd.xlane.f32.xlu0 %v2986_v13 }
 0x9c7   :  { %v3844_v5 = vpop.eup %3843 }
 0x9c8   :  { %v3846_v58 = vpop.eup %3845  ;;  %v2988_v6 = vsel %vm2905_vm9, %v3844_v5, 0.0 }
 0x9c9   :  { %v2989_v21 = vsel %vm2905_vm9, %v3846_v58, 0.0 }
 0x9ca   :  { %3012 = vadd.xlane.f32.xlu1 %v2989_v21  ;;  %3010 = vadd.xlane.f32.xlu0 %v2988_v6 }
 0xa3b   :  { %v2993_v7 = vpop.xlane.xlu1 %2992 }
 0xa3c   :  { %3847 = vlog2.f32 %v2993_v7 }
 0xa3f   :  { %v2991_v4 = vpop.xlane.xlu0 %2990 }
 0xa40   :  { %v2997_v8 = vpop.xlane.xlu1 %2996  ;;  %3849 = vlog2.f32 %v2991_v4 }
 0xa41   :  { %3851 = vlog2.f32 %v2997_v8 }
 0xa43   :  { %v2995_v18 = vpop.xlane.xlu0 %2994 }
 0xa44   :  { %3853 = vlog2.f32 %v2995_v18 }
 0xa47   :  { %v3001_v10 = vpop.xlane.xlu1 %3000  ;;  %v2999_v16 = vpop.xlane.xlu0 %2998 }
 0xa48   :  { %3855 = vlog2.f32 %v3001_v10 }
 0xa49   :  { %v3848_v17 = vpop.eup %3847  ;;  %3857 = vlog2.f32 %v2999_v16 }
 0xa4a   :  { %v3017_v11 = vmul.f32 0.6931472, %v3848_v17 }
 0xa4b   :  { %v3005_v56 = vpop.xlane.xlu1 %3004  ;;  %v3003_v29 = vpop.xlane.xlu0 %3002 }
 0xa4c   :  { %v3039_v28 = vsub.f32 %v5862_v62, %v3017_v11  ;;  %3859 = vlog2.f32 %v3005_v56 }
 0xa4d   :  { %v3850_v27 = vpop.eup %3849  ;;  %3861 = vlog2.f32 %v3003_v29 }
 0xa4e   :  { %v3852_v26 = vpop.eup %3851  ;;  %3051 = vst [vmem:[%s5983_s10 + $0x8] sm:$0xff] %v3039_v28  ;;  %v3015_v32 = vmul.f32 0.6931472, %v3850_v27 }
 0xa4f   :  { %v3021_v30 = vmul.f32 0.6931472, %v3852_v26  ;;  %v3009_v36 = vpop.xlane.xlu1 %3008  ;;  %v3007_v37 = vpop.xlane.xlu0 %3006 }
 0xa50   :  { %v3038_v19 = vsub.f32 %v5866_v9, %v3015_v32  ;;  %3863 = vlog2.f32 %v3009_v36 }
 0xa51   :  { %v3041_v39 = vsub.f32 %v5869_v20, %v3021_v30  ;;  %v3854_v62 = vpop.eup %3853  ;;  %3865 = vlog2.f32 %v3007_v37 }
 0xa52   :  { %3050 = vst [vmem:[%s5983_s10] sm:$0xff] %v3038_v19  ;;  %v3019_v35 = vmul.f32 0.6931472, %v3854_v62 }
 0xa53   :  { %3053 = vst [vmem:[%s5983_s10 + $0x18] sm:$0xff] %v3041_v39  ;;  %v3013_v34 = vpop.xlane.xlu1 %3012  ;;  %v3011_v41 = vpop.xlane.xlu0 %3010 }
 0xa54   :  { %v3040_v9 = vsub.f32 %v5874_v3, %v3019_v35  ;;  %3867 = vlog2.f32 %v3013_v34 }
 0xa55   :  { %v3856_v42 = vpop.eup %3855  ;;  %3869 = vlog2.f32 %v3011_v41 }
 0xa56   :  { %v3858_v20 = vpop.eup %3857  ;;  %3052 = vst [vmem:[%s5983_s10 + $0x10] sm:$0xff] %v3040_v9  ;;  %v3025_v43 = vmul.f32 0.6931472, %v3856_v42 }
 0xa57   :  { %v3023_v45 = vmul.f32 0.6931472, %v3858_v20 }
 0xa58   :  { %v3043_v47 = vsub.f32 %v5882_v25, %v3025_v43 }
 0xa59   :  { %v3860_v38 = vpop.eup %3859  ;;  %v3042_v48 = vsub.f32 %v5877_v12, %v3023_v45 }
 0xa5a   :  { %v3862_v46 = vpop.eup %3861  ;;  %3055 = vst [vmem:[%s5983_s10 + $0x28] sm:$0xff] %v3043_v47  ;;  %v3029_v3 = vmul.f32 0.6931472, %v3860_v38 }
 0xa5b   :  { %3054 = vst [vmem:[%s5983_s10 + $0x20] sm:$0xff] %v3042_v48  ;;  %v3027_v51 = vmul.f32 0.6931472, %v3862_v46 }
 0xa5c   :  { %v3045_v52 = vsub.f32 %v5888_v33, %v3029_v3 }
 0xa5d   :  { %v3864_v53 = vpop.eup %3863  ;;  %v3044_v23 = vsub.f32 %v5884_v31, %v3027_v51 }
 0xa5e   :  { %v3866_v25 = vpop.eup %3865  ;;  %3057 = vst [vmem:[%s5983_s10 + $0x38] sm:$0xff] %v3045_v52  ;;  %v3033_v12 = vmul.f32 0.6931472, %v3864_v53 }
 0xa5f   :  { %3056 = vst [vmem:[%s5983_s10 + $0x30] sm:$0xff] %v3044_v23  ;;  %v3031_v54 = vmul.f32 0.6931472, %v3866_v25 }
 0xa60   :  { %v3047_v55 = vsub.f32 %v5896_v44, %v3033_v12 }
 0xa61   :  { %v3868_v50 = vpop.eup %3867  ;;  %v3046_v57 = vsub.f32 %v5890_v40, %v3031_v54 }
 0xa62   :  { %v3870_v33 = vpop.eup %3869  ;;  %3059 = vst [vmem:[%s5983_s10 + $0x48] sm:$0xff] %v3047_v55  ;;  %v3037_v31 = vmul.f32 0.6931472, %v3868_v50 }
 0xa63   :  { %3058 = vst [vmem:[%s5983_s10 + $0x40] sm:$0xff] %v3046_v57  ;;  %v3035_v59 = vmul.f32 0.6931472, %v3870_v33 }
 0xa64   :  { %v3049_v60 = vsub.f32 %v5906_v24, %v3037_v31 }
 0xa65   :  { %v3048_v22 = vsub.f32 %v5898_v49, %v3035_v59 }
 0xa66   :  { %3061 = vst [vmem:[%s5983_s10 + $0x58] sm:$0xff] %v3049_v60 }
 0xa67   :  { %3060 = vst [vmem:[%s5983_s10 + $0x50] sm:$0xff] %v3048_v22 }

// kernel: _lambda_.2
= control target key start
LH: loop header
LB: loop body
LE: loop exit
PB: predicated region body
PF: predicated region fallthrough
CT: control target
= control target key end

     0   :  { %10 = vsyncpa [#allocation5], 0  ;;  %s8567_s0 = inlined_call_operand.vmem [shape: f32[176,128], index: 0, kind: input, shape index: {}]   ;;  %s8568_s1 = inlined_call_operand.hbm [shape: f32[10,128,128], index: 1, kind: input, shape index: {}]   ;;  %s8569_s2 = inlined_call_operand.vmem [shape: f32[1,128], index: 2, kind: input, shape index: {}]   ;;  %s8570_s3 = inlined_call_operand.hbm [shape: f32[7,128,128], index: 3, kind: input, shape index: {}]   ;;  %s8571_s4 = inlined_call_operand.vmem [shape: f32[1,128], index: 4, kind: input, shape index: {}]   ;;  %s8572_s5 = inlined_call_operand.vmem [shape: f32[160,128], index: 5, kind: output, shape index: {}]  }
   0x1   :  { %11 = vsyncpa [#allocation7], 0  ;;  %s6912_s18 = smov [#allocation4]  }
   0x2   :  { %s19_s19 = sshll.u32 %s6912_s18, 4  ;;  %s20_s19 = int_to_ptr.vmem [resolvable:$true] %s19_s19 }
   0x3   :  { %s6876_s20 = scalar_lea.vmem %s20_s19, 20480  ;;  %p6881_p1 = scmp.lt.s32.totalorder %s20_s19, %s20_s19 }
   0x4   :  { %p6877_p0 = scmp.ne.s32.totalorder %s20_s19, %s6876_s20  ;;  %p6882_p2 = scmp.lt.s32.totalorder %s6876_s20, %s6876_s20 }
   0x6   :  { %p6883_p3 = por %p6882_p2, %p6881_p1 }
   0x8   :  { %p6884_p4 = pnand %p6883_p3, %p6877_p0 }
   0xa   :  { %6887 = shalt.err (!%p6884_p4)
}
   0xb   :  { %s6913_s21 = smov 128   ;;  %s6914_s22 = smov 8  }
   0xc   :  { %25 = dma.hbm_to_vmem [thread:$0]  %s8568_s1, 20480, %s20_s19, [#allocation5], %s6913_s21, %s6913_s21, %s6914_s22  }
   0xd   :  { %s6915_s25 = smov [#allocation6]  }
   0xe   :  { %s33_s26 = sshll.u32 %s6915_s25, 4  ;;  %s34_s26 = int_to_ptr.vmem [resolvable:$true] %s33_s26 }
   0xf   :  { %s6896_s27 = scalar_lea.vmem %s34_s26, 14336  ;;  %p6901_p6 = scmp.lt.s32.totalorder %s34_s26, %s34_s26 }
  0x10   :  { %p6897_p5 = scmp.ne.s32.totalorder %s34_s26, %s6896_s27  ;;  %p6902_p7 = scmp.lt.s32.totalorder %s6896_s27, %s6896_s27 }
  0x12   :  { %p6903_p8 = por %p6902_p7, %p6901_p6 }
  0x14   :  { %p6904_p9 = pnand %p6903_p8, %p6897_p5 }
  0x16   :  { %6907 = shalt.err (!%p6904_p9)
}
  0x17   :  { %39 = dma.hbm_to_vmem [thread:$0]  %s8570_s3, 14336, %s34_s26, [#allocation7], %s6913_s21, %s6913_s21, %s6914_s22  }
  0x18   :  { %6908 = dma.done.wait [#allocation5], 20480  }
  0x19   :  { %6909 = vsyncadd [#allocation5], 4294946816 }
  0x1a   :  { %6910 = dma.done.wait [#allocation7], 14336  }
  0x1b   :  { %6911 = vsyncadd [#allocation7], 4294952960  ;;  %v123_v0 = vld [vmem:[#allocation4 + $0x78] sm:$0xff]  ;;  %v122_v2 = vld [vmem:[#allocation4 + $0x70] sm:$0xff] }
  0x1c   :  { %v385_v1 = vld [vmem:[#allocation4 + $0xf8] sm:$0xff]  ;;  %5696 = vmatprep.subr.mxu0 %v123_v0  ;;  %v384_v3 = vld [vmem:[#allocation4 + $0xf0] sm:$0xff]  ;;  %v121_v4 = vld [vmem:[#allocation4 + $0x68] sm:$0xff] }
  0x1d   :  { %5758 = vmatprep.subr.mxu1 %v385_v1  ;;  %5697 = vmatpush3.msra.mxu0 %v123_v0  ;;  %v383_v5 = vld [vmem:[#allocation4 + $0xe8] sm:$0xff]  ;;  %v120_v6 = vld [vmem:[#allocation4 + $0x60] sm:$0xff]  ;;  %v119_v8 = vld [vmem:[#allocation4 + $0x58] sm:$0xff] }
  0x1e   :  { %5759 = vmatpush3.msra.mxu1 %v385_v1  ;;  %5698 = vmatprep.subr.mxu0 %v122_v2  ;;  %v382_v7 = vld [vmem:[#allocation4 + $0xe0] sm:$0xff]  ;;  %v381_v9 = vld [vmem:[#allocation4 + $0xd8] sm:$0xff]  ;;  %v118_v10 = vld [vmem:[#allocation4 + $0x50] sm:$0xff] }
  0x1f   :  { %5760 = vmatprep.subr.mxu1 %v384_v3  ;;  %5699 = vmatpush3.msra.mxu0 %v122_v2  ;;  %v380_v11 = vld [vmem:[#allocation4 + $0xd0] sm:$0xff]  ;;  %v117_v12 = vld [vmem:[#allocation4 + $0x48] sm:$0xff]  ;;  %v116_v14 = vld [vmem:[#allocation4 + $0x40] sm:$0xff] }
  0x20   :  { %5761 = vmatpush3.msra.mxu1 %v384_v3  ;;  %5700 = vmatprep.subr.mxu0 %v121_v4  ;;  %v379_v13 = vld [vmem:[#allocation4 + $0xc8] sm:$0xff]  ;;  %v378_v15 = vld [vmem:[#allocation4 + $0xc0] sm:$0xff]  ;;  %v115_v16 = vld [vmem:[#allocation4 + $0x38] sm:$0xff] }
  0x21   :  { %5762 = vmatprep.subr.mxu1 %v383_v5  ;;  %5701 = vmatpush3.msra.mxu0 %v121_v4  ;;  %v377_v17 = vld [vmem:[#allocation4 + $0xb8] sm:$0xff]  ;;  %v114_v18 = vld [vmem:[#allocation4 + $0x30] sm:$0xff]  ;;  %v113_v20 = vld [vmem:[#allocation4 + $0x28] sm:$0xff] }
  0x22   :  { %5763 = vmatpush3.msra.mxu1 %v383_v5  ;;  %5702 = vmatprep.subr.mxu0 %v120_v6  ;;  %v376_v19 = vld [vmem:[#allocation4 + $0xb0] sm:$0xff]  ;;  %v375_v21 = vld [vmem:[#allocation4 + $0xa8] sm:$0xff]  ;;  %v112_v22 = vld [vmem:[#allocation4 + $0x20] sm:$0xff] }
  0x23   :  { %5764 = vmatprep.subr.mxu1 %v382_v7  ;;  %5703 = vmatpush3.msra.mxu0 %v120_v6  ;;  %v374_v23 = vld [vmem:[#allocation4 + $0xa0] sm:$0xff]  ;;  %v111_v24 = vld [vmem:[#allocation4 + $0x18] sm:$0xff]  ;;  %v110_v26 = vld [vmem:[#allocation4 + $0x10] sm:$0xff] }
  0x24   :  { %5765 = vmatpush3.msra.mxu1 %v382_v7  ;;  %5704 = vmatprep.subr.mxu0 %v119_v8  ;;  %v373_v25 = vld [vmem:[#allocation4 + $0x98] sm:$0xff]  ;;  %v372_v27 = vld [vmem:[#allocation4 + $0x90] sm:$0xff]  ;;  %v109_v28 = vld [vmem:[#allocation4 + $0x8] sm:$0xff] }
  0x25   :  { %5766 = vmatprep.subr.mxu1 %v381_v9  ;;  %5705 = vmatpush3.msra.mxu0 %v119_v8  ;;  %v371_v29 = vld [vmem:[#allocation4 + $0x88] sm:$0xff]  ;;  %v108_v30 = vld [vmem:[#allocation4] sm:$0xff]  ;;  %v88_v32 = vld [vmem:[%s8567_s0] sm:$0xff] }
  0x26   :  { %5767 = vmatpush3.msra.mxu1 %v381_v9  ;;  %5706 = vmatprep.subr.mxu0 %v118_v10  ;;  %v370_v31 = vld [vmem:[#allocation4 + $0x80] sm:$0xff]  ;;  %v647_v36 = vld [vmem:[#allocation4 + $0x178] sm:$0xff]  ;;  %v90_v38 = vld [vmem:[%s8567_s0 + $0x10] sm:$0xff] }
  0x27   :  { %5768 = vmatprep.subr.mxu1 %v380_v11  ;;  %5707 = vmatpush3.msra.mxu0 %v118_v10  ;;  %v349_v33 = vld [vmem:[%s8567_s0 + $0x1] sm:$0xff]  ;;  %v350_v35 = vld [vmem:[%s8567_s0 + $0x9] sm:$0xff]  ;;  %v351_v39 = vld [vmem:[%s8567_s0 + $0x11] sm:$0xff] }
  0x28   :  { %5769 = vmatpush3.msra.mxu1 %v380_v11  ;;  %5708 = vmatprep.subr.mxu0 %v117_v12  ;;  %v89_v34 = vld [vmem:[%s8567_s0 + $0x8] sm:$0xff]  ;;  %v909_v37 = vld [vmem:[#allocation4 + $0x1f8] sm:$0xff]  ;;  %v646_v40 = vld [vmem:[#allocation4 + $0x170] sm:$0xff] }
  0x29   :  { %5770 = vmatprep.subr.mxu1 %v379_v13  ;;  %5709 = vmatpush3.msra.mxu0 %v117_v12  ;;  %v91_v41 = vld [vmem:[%s8567_s0 + $0x18] sm:$0xff]  ;;  %v645_v43 = vld [vmem:[#allocation4 + $0x168] sm:$0xff]  ;;  %v92_v45 = vld [vmem:[%s8567_s0 + $0x20] sm:$0xff] }
  0x2a   :  { %5771 = vmatpush3.msra.mxu1 %v379_v13  ;;  %5710 = vmatprep.subr.mxu0 %v116_v14  ;;  %v352_v42 = vld [vmem:[%s8567_s0 + $0x19] sm:$0xff]  ;;  %v353_v46 = vld [vmem:[%s8567_s0 + $0x21] sm:$0xff]  ;;  %v907_v47 = vld [vmem:[#allocation4 + $0x1e8] sm:$0xff] }
  0x2b   :  { %5772 = vmatprep.subr.mxu1 %v378_v15  ;;  %5711 = vmatpush3.msra.mxu0 %v116_v14  ;;  %v908_v44 = vld [vmem:[#allocation4 + $0x1f0] sm:$0xff]  ;;  %v93_v48 = vld [vmem:[%s8567_s0 + $0x28] sm:$0xff]  ;;  %v643_v51 = vld [vmem:[#allocation4 + $0x158] sm:$0xff] }
  0x2c   :  { %5773 = vmatpush3.msra.mxu1 %v378_v15  ;;  %5712 = vmatprep.subr.mxu0 %v115_v16  ;;  %v354_v49 = vld [vmem:[%s8567_s0 + $0x29] sm:$0xff]  ;;  %v355_v54 = vld [vmem:[%s8567_s0 + $0x31] sm:$0xff]  ;;  %v356_v56 = vld [vmem:[%s8567_s0 + $0x39] sm:$0xff] }
  0x2d   :  { %5774 = vmatprep.subr.mxu1 %v377_v17  ;;  %5713 = vmatpush3.msra.mxu0 %v115_v16  ;;  %v644_v50 = vld [vmem:[#allocation4 + $0x160] sm:$0xff]  ;;  %v94_v53 = vld [vmem:[%s8567_s0 + $0x30] sm:$0xff]  ;;  %v95_v55 = vld [vmem:[%s8567_s0 + $0x38] sm:$0xff] }
  0x2e   :  { %5775 = vmatpush3.msra.mxu1 %v377_v17  ;;  %5714 = vmatprep.subr.mxu0 %v114_v18  ;;  %v906_v52 = vld [vmem:[#allocation4 + $0x1e0] sm:$0xff]  ;;  %v905_v57 = vld [vmem:[#allocation4 + $0x1d8] sm:$0xff]  ;;  %v642_v58 = vld [vmem:[#allocation4 + $0x150] sm:$0xff] }
  0x2f   :  { %5776 = vmatprep.subr.mxu1 %v376_v19  ;;  %5715 = vmatpush3.msra.mxu0 %v114_v18  ;;  %v96_v59 = vld [vmem:[%s8567_s0 + $0x40] sm:$0xff]  ;;  %v641_v61 = vld [vmem:[#allocation4 + $0x148] sm:$0xff]  ;;  %v904_v62 = vld [vmem:[#allocation4 + $0x1d0] sm:$0xff] }
  0x30   :  { %5777 = vmatpush3.msra.mxu1 %v376_v19  ;;  %5716 = vmatprep.subr.mxu0 %v113_v20  ;;  %v357_v60 = vld [vmem:[%s8567_s0 + $0x41] sm:$0xff]  ;;  %v358_v0 = vld [vmem:[%s8567_s0 + $0x49] sm:$0xff]  ;;  %v359_v4 = vld [vmem:[%s8567_s0 + $0x51] sm:$0xff] }
  0x31   :  { %5778 = vmatprep.subr.mxu1 %v375_v21  ;;  %5717 = vmatpush3.msra.mxu0 %v113_v20  ;;  %v97_v63 = vld [vmem:[%s8567_s0 + $0x48] sm:$0xff]  ;;  %v903_v1 = vld [vmem:[#allocation4 + $0x1c8] sm:$0xff]  ;;  %v99_v5 = vld [vmem:[%s8567_s0 + $0x58] sm:$0xff] }
  0x32   :  { %5779 = vmatpush3.msra.mxu1 %v375_v21  ;;  %5718 = vmatprep.subr.mxu0 %v112_v22  ;;  %v640_v2 = vld [vmem:[#allocation4 + $0x140] sm:$0xff]  ;;  %v98_v3 = vld [vmem:[%s8567_s0 + $0x50] sm:$0xff]  ;;  %v360_v6 = vld [vmem:[%s8567_s0 + $0x59] sm:$0xff] }
  0x33   :  { %5780 = vmatprep.subr.mxu1 %v374_v23  ;;  %5719 = vmatpush3.msra.mxu0 %v112_v22  ;;  %v639_v7 = vld [vmem:[#allocation4 + $0x138] sm:$0xff]  ;;  %v902_v8 = vld [vmem:[#allocation4 + $0x1c0] sm:$0xff]  ;;  %v638_v12 = vld [vmem:[#allocation4 + $0x130] sm:$0xff] }
  0x34   :  { %5781 = vmatpush3.msra.mxu1 %v374_v23  ;;  %5720 = vmatprep.subr.mxu0 %v111_v24  ;;  %v901_v9 = vld [vmem:[#allocation4 + $0x1b8] sm:$0xff]  ;;  %v101_v13 = vld [vmem:[%s8567_s0 + $0x68] sm:$0xff]  ;;  %v637_v15 = vld [vmem:[#allocation4 + $0x128] sm:$0xff] }
  0x35   :  { %5782 = vmatprep.subr.mxu1 %v373_v25  ;;  %5721 = vmatpush3.msra.mxu0 %v111_v24  ;;  %v100_v10 = vld [vmem:[%s8567_s0 + $0x60] sm:$0xff]  ;;  %v362_v14 = vld [vmem:[%s8567_s0 + $0x69] sm:$0xff]  ;;  %v900_v16 = vld [vmem:[#allocation4 + $0x1b0] sm:$0xff] }
  0x36   :  { %5783 = vmatpush3.msra.mxu1 %v373_v25  ;;  %5722 = vmatprep.subr.mxu0 %v110_v26  ;;  %v361_v11 = vld [vmem:[%s8567_s0 + $0x61] sm:$0xff]  ;;  %v102_v17 = vld [vmem:[%s8567_s0 + $0x70] sm:$0xff]  ;;  %v103_v20 = vld [vmem:[%s8567_s0 + $0x78] sm:$0xff] }
  0x37   :  { %5784 = vmatprep.subr.mxu1 %v372_v27  ;;  %5723 = vmatpush3.msra.mxu0 %v110_v26  ;;  %v363_v18 = vld [vmem:[%s8567_s0 + $0x71] sm:$0xff]  ;;  %v364_v21 = vld [vmem:[%s8567_s0 + $0x79] sm:$0xff]  ;;  %v636_v22 = vld [vmem:[#allocation4 + $0x120] sm:$0xff] }
  0x38   :  { %5785 = vmatpush3.msra.mxu1 %v372_v27  ;;  %5724 = vmatprep.subr.mxu0 %v109_v28  ;;  %v899_v19 = vld [vmem:[#allocation4 + $0x1a8] sm:$0xff]  ;;  %v635_v23 = vld [vmem:[#allocation4 + $0x118] sm:$0xff]  ;;  %v898_v24 = vld [vmem:[#allocation4 + $0x1a0] sm:$0xff] }
  0x39   :  { %5786 = vmatprep.subr.mxu1 %v371_v29  ;;  %5725 = vmatpush3.msra.mxu0 %v109_v28  ;;  %v104_v25 = vld [vmem:[%s8567_s0 + $0x80] sm:$0xff]  ;;  %v105_v27 = vld [vmem:[%s8567_s0 + $0x88] sm:$0xff] }
  0x3a   :  { %5787 = vmatpush3.msra.mxu1 %v371_v29  ;;  %5726 = vmatprep.subr.mxu0 %v108_v30  ;;  %v365_v26 = vld [vmem:[%s8567_s0 + $0x81] sm:$0xff]  ;;  %v366_v28 = vld [vmem:[%s8567_s0 + $0x89] sm:$0xff] }
  0x3b   :  { %5788 = vmatprep.subr.mxu1 %v370_v31  ;;  %5727 = vmatpush3.msra.mxu0 %v108_v30  ;;  %v897_v29 = vld [vmem:[#allocation4 + $0x198] sm:$0xff]  ;;  %v634_v30 = vld [vmem:[#allocation4 + $0x110] sm:$0xff] }
  0x3c   :  { %5728 = vmatprep.mubr.f32.mxu0 %v88_v32  ;;  %5789 = vmatpush3.msra.mxu1 %v370_v31  ;;  %v106_v31 = vld [vmem:[%s8567_s0 + $0x90] sm:$0xff] }
  0x3d   :  { %5790 = vmatprep.mubr.f32.mxu1 %v349_v33  ;;  %5729 = vmatmul.mubr.f32.vlgmr.msra.gmra.mxu0 %v89_v34  ;;  %v367_v32 = vld [vmem:[%s8567_s0 + $0x91] sm:$0xff] }
  0x3e   :  { %5791 = vmatmul.mubr.f32.vlgmr.msra.gmra.mxu1 %v350_v35  ;;  %5820 = vmatprep.subr.mxu0 %v647_v36  ;;  %v633_v33 = vld [vmem:[#allocation4 + $0x108] sm:$0xff]  ;;  %v896_v34 = vld [vmem:[#allocation4 + $0x190] sm:$0xff] }
  0x3f   :  { %5882 = vmatprep.subr.mxu1 %v909_v37  ;;  %5821 = vmatpush3.msra.mxu0 %v647_v36  ;;  %v107_v35 = vld [vmem:[%s8567_s0 + $0x98] sm:$0xff] }
  0x40   :  { %5731 = vmatprep.mubr.f32.mxu0 %v90_v38  ;;  %5793 = vmatprep.mubr.f32.mxu1 %v351_v39  ;;  %v368_v36 = vld [vmem:[%s8567_s0 + $0x99] sm:$0xff]  ;;  %v632_v38 = vld [vmem:[#allocation4 + $0x100] sm:$0xff] }
  0x41   :  { %5822 = vmatprep.subr.mxu0 %v646_v40  ;;  %5883 = vmatpush3.msra.mxu1 %v909_v37  ;;  %v895_v37 = vld [vmem:[#allocation4 + $0x188] sm:$0xff]  ;;  %v611_v39 = vld [vmem:[%s8567_s0 + $0x2] sm:$0xff] }
  0x42   :  { %5732 = vmatmul.mubr.f32.gmra.mxu0 %v91_v41  ;;  %5794 = vmatmul.mubr.f32.gmra.mxu1 %v352_v42  ;;  %v612_v41 = vld [vmem:[%s8567_s0 + $0xa] sm:$0xff] }
  0x43   :  { %5823 = vmatpush3.msra.mxu0 %v646_v40  ;;  %5884 = vmatprep.subr.mxu1 %v908_v44  ;;  %v894_v40 = vld [vmem:[#allocation4 + $0x180] sm:$0xff] }
  0x44   :  { %5824 = vmatprep.subr.mxu0 %v645_v43  ;;  %5885 = vmatpush3.msra.mxu1 %v908_v44  ;;  %v873_v42 = vld [vmem:[%s8567_s0 + $0x3] sm:$0xff]  ;;  %v874_v44 = vld [vmem:[%s8567_s0 + $0xb] sm:$0xff] }
  0x45   :  { %5825 = vmatpush3.msra.mxu0 %v645_v43  ;;  %5734 = vmatprep.mubr.f32.mxu0 %v92_v45  ;;  %v1171_v43 = vld [vmem:[#allocation4 + $0x278] sm:$0xff] }
  0x46   :  { %5796 = vmatprep.mubr.f32.mxu1 %v353_v46  ;;  %5886 = vmatprep.subr.mxu1 %v907_v47  ;;  %v1433_v45 = vld [vmem:[#allocation4 + $0x2f8] sm:$0xff]  ;;  %v613_v46 = vld [vmem:[%s8567_s0 + $0x12] sm:$0xff] }
  0x47   :  { %5735 = vmatmul.mubr.f32.gmra.mxu0 %v93_v48  ;;  %5797 = vmatmul.mubr.f32.gmra.mxu1 %v354_v49  ;;  %v614_v48 = vld [vmem:[%s8567_s0 + $0x1a] sm:$0xff] }
  0x48   :  { %5826 = vmatprep.subr.mxu0 %v644_v50  ;;  %5887 = vmatpush3.msra.mxu1 %v907_v47  ;;  %v1170_v47 = vld [vmem:[#allocation4 + $0x270] sm:$0xff] }
  0x49   :  { %5827 = vmatpush3.msra.mxu0 %v644_v50  ;;  %5888 = vmatprep.subr.mxu1 %v906_v52  ;;  %v875_v49 = vld [vmem:[%s8567_s0 + $0x13] sm:$0xff]  ;;  %v876_v50 = vld [vmem:[%s8567_s0 + $0x1b] sm:$0xff] }
  0x4a   :  { %5828 = vmatprep.subr.mxu0 %v643_v51  ;;  %5737 = vmatprep.mubr.f32.mxu0 %v94_v53  ;;  %v615_v53 = vld [vmem:[%s8567_s0 + $0x22] sm:$0xff] }
  0x4b   :  { %5799 = vmatprep.mubr.f32.mxu1 %v355_v54  ;;  %5829 = vmatpush3.msra.mxu0 %v643_v51  ;;  %v1169_v51 = vld [vmem:[#allocation4 + $0x268] sm:$0xff] }
  0x4c   :  { %5889 = vmatpush3.msra.mxu1 %v906_v52  ;;  %5738 = vmatmul.mubr.f32.gmra.mxu0 %v95_v55  ;;  %v1432_v52 = vld [vmem:[#allocation4 + $0x2f0] sm:$0xff]  ;;  %v1431_v54 = vld [vmem:[#allocation4 + $0x2e8] sm:$0xff] }
  0x4d   :  { %5800 = vmatmul.mubr.f32.gmra.mxu1 %v356_v56  ;;  %5890 = vmatprep.subr.mxu1 %v905_v57  ;;  %v616_v55 = vld [vmem:[%s8567_s0 + $0x2a] sm:$0xff] }
  0x4e   :  { %5830 = vmatprep.subr.mxu0 %v642_v58  ;;  %5891 = vmatpush3.msra.mxu1 %v905_v57  ;;  %v877_v56 = vld [vmem:[%s8567_s0 + $0x23] sm:$0xff] }
  0x4f   :  { %5831 = vmatpush3.msra.mxu0 %v642_v58  ;;  %5740 = vmatprep.mubr.f32.mxu0 %v96_v59  ;;  %v1168_v57 = vld [vmem:[#allocation4 + $0x260] sm:$0xff]  ;;  %v1167_v59 = vld [vmem:[#allocation4 + $0x258] sm:$0xff] }
  0x50   :  { %5802 = vmatprep.mubr.f32.mxu1 %v357_v60  ;;  %5832 = vmatprep.subr.mxu0 %v641_v61  ;;  %v878_v58 = vld [vmem:[%s8567_s0 + $0x2b] sm:$0xff] }
  0x51   :  { %5892 = vmatprep.subr.mxu1 %v904_v62  ;;  %5741 = vmatmul.mubr.f32.gmra.mxu0 %v97_v63  ;;  %v1430_v60 = vld [vmem:[#allocation4 + $0x2e0] sm:$0xff]  ;;  %v879_v63 = vld [vmem:[%s8567_s0 + $0x33] sm:$0xff] }
  0x52   :  { %5803 = vmatmul.mubr.f32.gmra.mxu1 %v358_v0  ;;  %5833 = vmatpush3.msra.mxu0 %v641_v61  ;;  %v617_v61 = vld [vmem:[%s8567_s0 + $0x32] sm:$0xff]  ;;  %v1429_v0 = vld [vmem:[#allocation4 + $0x2d8] sm:$0xff] }
  0x53   :  { %5893 = vmatpush3.msra.mxu1 %v904_v62  ;;  %5834 = vmatprep.subr.mxu0 %v640_v2  ;;  %v618_v62 = vld [vmem:[%s8567_s0 + $0x3a] sm:$0xff] }
  0x54   :  { %5894 = vmatprep.subr.mxu1 %v903_v1  ;;  %5743 = vmatprep.mubr.f32.mxu0 %v98_v3  ;;  %v619_v3 = vld [vmem:[%s8567_s0 + $0x42] sm:$0xff] }
  0x55   :  { %5895 = vmatpush3.msra.mxu1 %v903_v1  ;;  %5805 = vmatprep.mubr.f32.mxu1 %v359_v4  ;;  %v880_v1 = vld [vmem:[%s8567_s0 + $0x3b] sm:$0xff]  ;;  %v1165_v4 = vld [vmem:[#allocation4 + $0x248] sm:$0xff] }
  0x56   :  { %5835 = vmatpush3.msra.mxu0 %v640_v2  ;;  %5806 = vmatmul.mubr.f32.gmra.mxu1 %v360_v6  ;;  %v1166_v2 = vld [vmem:[#allocation4 + $0x250] sm:$0xff]  ;;  %v620_v6 = vld [vmem:[%s8567_s0 + $0x4a] sm:$0xff] }
  0x57   :  { %5744 = vmatmul.mubr.f32.gmra.mxu0 %v99_v5  ;;  %5836 = vmatprep.subr.mxu0 %v639_v7  ;;  %v1428_v5 = vld [vmem:[#allocation4 + $0x2d0] sm:$0xff] }
  0x58   :  { %5896 = vmatprep.subr.mxu1 %v902_v8  ;;  %5837 = vmatpush3.msra.mxu0 %v639_v7  ;;  %v881_v7 = vld [vmem:[%s8567_s0 + $0x43] sm:$0xff] }
  0x59   :  { %5897 = vmatpush3.msra.mxu1 %v902_v8  ;;  %5746 = vmatprep.mubr.f32.mxu0 %v100_v10  ;;  %v1164_v8 = vld [vmem:[#allocation4 + $0x240] sm:$0xff]  ;;  %v1427_v10 = vld [vmem:[#allocation4 + $0x2c8] sm:$0xff] }
  0x5a   :  { %5898 = vmatprep.subr.mxu1 %v901_v9  ;;  %5808 = vmatprep.mubr.f32.mxu1 %v361_v11  ;;  %v621_v11 = vld [vmem:[%s8567_s0 + $0x52] sm:$0xff] }
  0x5b   :  { %5838 = vmatprep.subr.mxu0 %v638_v12  ;;  %5899 = vmatpush3.msra.mxu1 %v901_v9  ;;  %v882_v9 = vld [vmem:[%s8567_s0 + $0x4b] sm:$0xff] }
  0x5c   :  { %5747 = vmatmul.mubr.f32.gmra.mxu0 %v101_v13  ;;  %5809 = vmatmul.mubr.f32.gmra.mxu1 %v362_v14  ;;  %v622_v13 = vld [vmem:[%s8567_s0 + $0x5a] sm:$0xff] }
  0x5d   :  { %5839 = vmatpush3.msra.mxu0 %v638_v12  ;;  %5900 = vmatprep.subr.mxu1 %v900_v16  ;;  %v883_v12 = vld [vmem:[%s8567_s0 + $0x53] sm:$0xff]  ;;  %v1163_v14 = vld [vmem:[#allocation4 + $0x238] sm:$0xff] }
  0x5e   :  { %5840 = vmatprep.subr.mxu0 %v637_v15  ;;  %5901 = vmatpush3.msra.mxu1 %v900_v16  ;;  %v884_v16 = vld [vmem:[%s8567_s0 + $0x5b] sm:$0xff] }
  0x5f   :  { %5841 = vmatpush3.msra.mxu0 %v637_v15  ;;  %5749 = vmatprep.mubr.f32.mxu0 %v102_v17  ;;  %v1426_v15 = vld [vmem:[#allocation4 + $0x2c0] sm:$0xff]  ;;  %v1425_v17 = vld [vmem:[#allocation4 + $0x2b8] sm:$0xff] }
  0x60   :  { %5811 = vmatprep.mubr.f32.mxu1 %v363_v18  ;;  %5902 = vmatprep.subr.mxu1 %v899_v19  ;;  %v623_v18 = vld [vmem:[%s8567_s0 + $0x62] sm:$0xff] }
  0x61   :  { %5750 = vmatmul.mubr.f32.gmra.mxu0 %v103_v20  ;;  %5812 = vmatmul.mubr.f32.gmra.mxu1 %v364_v21  ;;  %v624_v20 = vld [vmem:[%s8567_s0 + $0x6a] sm:$0xff] }
  0x62   :  { %5842 = vmatprep.subr.mxu0 %v636_v22  ;;  %5903 = vmatpush3.msra.mxu1 %v899_v19  ;;  %v1162_v19 = vld [vmem:[#allocation4 + $0x230] sm:$0xff]  ;;  %v885_v21 = vld [vmem:[%s8567_s0 + $0x63] sm:$0xff] }
  0x63   :  { %5843 = vmatpush3.msra.mxu0 %v636_v22  ;;  %5904 = vmatprep.subr.mxu1 %v898_v24  ;;  %v886_v22 = vld [vmem:[%s8567_s0 + $0x6b] sm:$0xff] }
  0x64   :  { %5844 = vmatprep.subr.mxu0 %v635_v23  ;;  %5752 = vmatprep.mubr.f32.mxu0 %v104_v25  ;;  %v625_v25 = vld [vmem:[%s8567_s0 + $0x72] sm:$0xff] }
  0x65   :  { %5814 = vmatprep.mubr.f32.mxu1 %v365_v26  ;;  %5845 = vmatpush3.msra.mxu0 %v635_v23  ;;  %v1161_v23 = vld [vmem:[#allocation4 + $0x228] sm:$0xff] }
  0x66   :  { %5905 = vmatpush3.msra.mxu1 %v898_v24  ;;  %5753 = vmatmul.mubr.f32.gmra.mxu0 %v105_v27  ;;  %v1424_v24 = vld [vmem:[#allocation4 + $0x2b0] sm:$0xff]  ;;  %v1423_v26 = vld [vmem:[#allocation4 + $0x2a8] sm:$0xff] }
  0x67   :  { %5815 = vmatmul.mubr.f32.gmra.mxu1 %v366_v28  ;;  %5906 = vmatprep.subr.mxu1 %v897_v29  ;;  %v626_v27 = vld [vmem:[%s8567_s0 + $0x7a] sm:$0xff] }
  0x68   :  { %5846 = vmatprep.subr.mxu0 %v634_v30  ;;  %5907 = vmatpush3.msra.mxu1 %v897_v29  ;;  %v887_v28 = vld [vmem:[%s8567_s0 + $0x73] sm:$0xff]  ;;  %v1160_v29 = vld [vmem:[#allocation4 + $0x220] sm:$0xff] }
  0x69   :  { %5847 = vmatpush3.msra.mxu0 %v634_v30  ;;  %5755 = vmatprep.mubr.f32.mxu0 %v106_v31  ;;  %v888_v30 = vld [vmem:[%s8567_s0 + $0x7b] sm:$0xff] }
  0x6a   :  { %5817 = vmatprep.mubr.f32.mxu1 %v367_v32  ;;  %5848 = vmatprep.subr.mxu0 %v633_v33  ;;  %v1159_v31 = vld [vmem:[#allocation4 + $0x218] sm:$0xff]  ;;  %v1422_v32 = vld [vmem:[#allocation4 + $0x2a0] sm:$0xff] }
  0x6b   :  { %5908 = vmatprep.subr.mxu1 %v896_v34  ;;  %5756 = vmatmul.mubr.f32.gmra.mxu0 %v107_v35  ;;  %v889_v35 = vld [vmem:[%s8567_s0 + $0x83] sm:$0xff] }
  0x6c   :  { %5818 = vmatmul.mubr.f32.gmra.mxu1 %v368_v36  ;;  %5849 = vmatpush3.msra.mxu0 %v633_v33  ;;  %v627_v33 = vld [vmem:[%s8567_s0 + $0x82] sm:$0xff] }
  0x6d   :  { %5909 = vmatpush3.msra.mxu1 %v896_v34  ;;  %5850 = vmatprep.subr.mxu0 %v632_v38  ;;  %v628_v34 = vld [vmem:[%s8567_s0 + $0x8a] sm:$0xff]  ;;  %v1421_v36 = vld [vmem:[#allocation4 + $0x298] sm:$0xff] }
  0x6e   :  { %5910 = vmatprep.subr.mxu1 %v895_v37  ;;  %5851 = vmatpush3.msra.mxu0 %v632_v38  ;;  %v1158_v38 = vld [vmem:[#allocation4 + $0x210] sm:$0xff] }
  0x6f   :  { %5911 = vmatpush3.msra.mxu1 %v895_v37  ;;  %5852 = vmatprep.mubr.f32.mxu0 %v611_v39  ;;  %v890_v37 = vld [vmem:[%s8567_s0 + $0x8b] sm:$0xff] }
  0x70   :  { %5912 = vmatprep.subr.mxu1 %v894_v40  ;;  %5853 = vmatmul.mubr.f32.vlgmr.msra.gmra.mxu0 %v612_v41  ;;  %v629_v39 = vld [vmem:[%s8567_s0 + $0x92] sm:$0xff] }
  0x71   :  { %5913 = vmatpush3.msra.mxu1 %v894_v40  ;;  %5914 = vmatprep.mubr.f32.mxu1 %v873_v42  ;;  %v1157_v40 = vld [vmem:[#allocation4 + $0x208] sm:$0xff]  ;;  %v1420_v41 = vld [vmem:[#allocation4 + $0x290] sm:$0xff] }
  0x72   :  { %5944 = vmatprep.subr.mxu0 %v1171_v43  ;;  %5915 = vmatmul.mubr.f32.vlgmr.msra.gmra.mxu1 %v874_v44  ;;  %v630_v42 = vld [vmem:[%s8567_s0 + $0x9a] sm:$0xff]  ;;  %v1156_v44 = vld [vmem:[#allocation4 + $0x200] sm:$0xff] }
  0x73   :  { %5945 = vmatpush3.msra.mxu0 %v1171_v43  ;;  %6006 = vmatprep.subr.mxu1 %v1433_v45  ;;  %v891_v43 = vld [vmem:[%s8567_s0 + $0x93] sm:$0xff] }
  0x74   :  { %5855 = vmatprep.mubr.f32.mxu0 %v613_v46  ;;  %5946 = vmatprep.subr.mxu0 %v1170_v47  ;;  %v1419_v46 = vld [vmem:[#allocation4 + $0x288] sm:$0xff] }
  0x75   :  { %6007 = vmatpush3.msra.mxu1 %v1433_v45  ;;  %5856 = vmatmul.mubr.f32.gmra.mxu0 %v614_v48  ;;  %v892_v45 = vld [vmem:[%s8567_s0 + $0x9b] sm:$0xff]  ;;  %v1418_v48 = vld [vmem:[#allocation4 + $0x280] sm:$0xff] }
  0x76   :  { %5917 = vmatprep.mubr.f32.mxu1 %v875_v49  ;;  %5947 = vmatpush3.msra.mxu0 %v1170_v47  ;;  %v1135_v47 = vld [vmem:[%s8567_s0 + $0x4] sm:$0xff]  ;;  %v1136_v49 = vld [vmem:[%s8567_s0 + $0xc] sm:$0xff] }
  0x77   :  { %5918 = vmatmul.mubr.f32.gmra.mxu1 %v876_v50  ;;  %5948 = vmatprep.subr.mxu0 %v1169_v51  ;;  %v1397_v50 = vld [vmem:[%s8567_s0 + $0x5] sm:$0xff] }
  0x78   :  { %6008 = vmatprep.subr.mxu1 %v1432_v52  ;;  %5949 = vmatpush3.msra.mxu0 %v1169_v51  ;;  %v1695_v51 = vld [vmem:[#allocation4 + $0x378] sm:$0xff] }
  0x79   :  { %6009 = vmatpush3.msra.mxu1 %v1432_v52  ;;  %5858 = vmatprep.mubr.f32.mxu0 %v615_v53  ;;  %v1398_v52 = vld [vmem:[%s8567_s0 + $0xd] sm:$0xff]  ;;  %v1957_v53 = vld [vmem:[#allocation4 + $0x3f8] sm:$0xff] }
  0x7a   :  { %6010 = vmatprep.subr.mxu1 %v1431_v54  ;;  %5859 = vmatmul.mubr.f32.gmra.mxu0 %v616_v55  ;;  %v1694_v55 = vld [vmem:[#allocation4 + $0x370] sm:$0xff] }
  0x7b   :  { %5920 = vmatprep.mubr.f32.mxu1 %v877_v56  ;;  %5950 = vmatprep.subr.mxu0 %v1168_v57  ;;  %v1138_v56 = vld [vmem:[%s8567_s0 + $0x1c] sm:$0xff] }
  0x7c   :  { %6011 = vmatpush3.msra.mxu1 %v1431_v54  ;;  %5951 = vmatpush3.msra.mxu0 %v1168_v57  ;;  %v1137_v54 = vld [vmem:[%s8567_s0 + $0x14] sm:$0xff] }
  0x7d   :  { %5921 = vmatmul.mubr.f32.gmra.mxu1 %v878_v58  ;;  %5952 = vmatprep.subr.mxu0 %v1167_v59  ;;  %v1399_v57 = vld [vmem:[%s8567_s0 + $0x15] sm:$0xff]  ;;  %v1400_v58 = vld [vmem:[%s8567_s0 + $0x1d] sm:$0xff] }
  0x7e   :  { %6012 = vmatprep.subr.mxu1 %v1430_v60  ;;  %5861 = vmatprep.mubr.f32.mxu0 %v617_v61  ;;  %v1139_v61 = vld [vmem:[%s8567_s0 + $0x24] sm:$0xff] }
  0x7f   :  { %5953 = vmatpush3.msra.mxu0 %v1167_v59  ;;  %6013 = vmatpush3.msra.mxu1 %v1430_v60  ;;  %v1693_v59 = vld [vmem:[#allocation4 + $0x368] sm:$0xff]  ;;  %v1956_v60 = vld [vmem:[#allocation4 + $0x3f0] sm:$0xff] }
  0x80   :  { %5862 = vmatmul.mubr.f32.gmra.mxu0 %v618_v62  ;;  %5923 = vmatprep.mubr.f32.mxu1 %v879_v63  ;;  %v1955_v62 = vld [vmem:[#allocation4 + $0x3e8] sm:$0xff] }
  0x81   :  { %6014 = vmatprep.subr.mxu1 %v1429_v0  ;;  %5924 = vmatmul.mubr.f32.gmra.mxu1 %v880_v1  ;;  %v1140_v63 = vld [vmem:[%s8567_s0 + $0x2c] sm:$0xff] }
  0x82   :  { %5954 = vmatprep.subr.mxu0 %v1166_v2  ;;  %6015 = vmatpush3.msra.mxu1 %v1429_v0  ;;  %v1401_v0 = vld [vmem:[%s8567_s0 + $0x25] sm:$0xff] }
  0x83   :  { %5955 = vmatpush3.msra.mxu0 %v1166_v2  ;;  %5864 = vmatprep.mubr.f32.mxu0 %v619_v3  ;;  %v1692_v1 = vld [vmem:[#allocation4 + $0x360] sm:$0xff]  ;;  %v1691_v3 = vld [vmem:[#allocation4 + $0x358] sm:$0xff] }
  0x84   :  { %5956 = vmatprep.subr.mxu0 %v1165_v4  ;;  %6016 = vmatprep.subr.mxu1 %v1428_v5  ;;  %v1402_v2 = vld [vmem:[%s8567_s0 + $0x2d] sm:$0xff] }
  0x85   :  { %5865 = vmatmul.mubr.f32.gmra.mxu0 %v620_v6  ;;  %5926 = vmatprep.mubr.f32.mxu1 %v881_v7  ;;  %v1142_v6 = vld [vmem:[%s8567_s0 + $0x3c] sm:$0xff] }
  0x86   :  { %5957 = vmatpush3.msra.mxu0 %v1165_v4  ;;  %6017 = vmatpush3.msra.mxu1 %v1428_v5  ;;  %v1954_v4 = vld [vmem:[#allocation4 + $0x3e0] sm:$0xff]  ;;  %v1141_v5 = vld [vmem:[%s8567_s0 + $0x34] sm:$0xff] }
  0x87   :  { %5958 = vmatprep.subr.mxu0 %v1164_v8  ;;  %5927 = vmatmul.mubr.f32.gmra.mxu1 %v882_v9  ;;  %v1403_v7 = vld [vmem:[%s8567_s0 + $0x35] sm:$0xff]  ;;  %v1404_v9 = vld [vmem:[%s8567_s0 + $0x3d] sm:$0xff] }
  0x88   :  { %6018 = vmatprep.subr.mxu1 %v1427_v10  ;;  %5867 = vmatprep.mubr.f32.mxu0 %v621_v11  ;;  %v1143_v11 = vld [vmem:[%s8567_s0 + $0x44] sm:$0xff] }
  0x89   :  { %6019 = vmatpush3.msra.mxu1 %v1427_v10  ;;  %5959 = vmatpush3.msra.mxu0 %v1164_v8  ;;  %v1953_v8 = vld [vmem:[#allocation4 + $0x3d8] sm:$0xff]  ;;  %v1690_v10 = vld [vmem:[#allocation4 + $0x350] sm:$0xff] }
  0x8a   :  { %5929 = vmatprep.mubr.f32.mxu1 %v883_v12  ;;  %5868 = vmatmul.mubr.f32.gmra.mxu0 %v622_v13  ;;  %v1689_v12 = vld [vmem:[#allocation4 + $0x348] sm:$0xff]  ;;  %v1952_v13 = vld [vmem:[#allocation4 + $0x3d0] sm:$0xff] }
  0x8b   :  { %5960 = vmatprep.subr.mxu0 %v1163_v14  ;;  %6020 = vmatprep.subr.mxu1 %v1426_v15 }
  0x8c   :  { %5930 = vmatmul.mubr.f32.gmra.mxu1 %v884_v16  ;;  %5961 = vmatpush3.msra.mxu0 %v1163_v14  ;;  %v1144_v14 = vld [vmem:[%s8567_s0 + $0x4c] sm:$0xff] }
  0x8d   :  { %6021 = vmatpush3.msra.mxu1 %v1426_v15  ;;  %5870 = vmatprep.mubr.f32.mxu0 %v623_v18  ;;  %v1405_v15 = vld [vmem:[%s8567_s0 + $0x45] sm:$0xff]  ;;  %v1951_v18 = vld [vmem:[#allocation4 + $0x3c8] sm:$0xff] }
  0x8e   :  { %6022 = vmatprep.subr.mxu1 %v1425_v17  ;;  %5962 = vmatprep.subr.mxu0 %v1162_v19  ;;  %v1688_v16 = vld [vmem:[#allocation4 + $0x340] sm:$0xff] }
  0x8f   :  { %6023 = vmatpush3.msra.mxu1 %v1425_v17  ;;  %5871 = vmatmul.mubr.f32.gmra.mxu0 %v624_v20  ;;  %v1406_v17 = vld [vmem:[%s8567_s0 + $0x4d] sm:$0xff]  ;;  %v1407_v20 = vld [vmem:[%s8567_s0 + $0x55] sm:$0xff] }
  0x90   :  { %5932 = vmatprep.mubr.f32.mxu1 %v885_v21  ;;  %5963 = vmatpush3.msra.mxu0 %v1162_v19  ;;  %v1145_v19 = vld [vmem:[%s8567_s0 + $0x54] sm:$0xff]  ;;  %v1146_v21 = vld [vmem:[%s8567_s0 + $0x5c] sm:$0xff] }
  0x91   :  { %5933 = vmatmul.mubr.f32.gmra.mxu1 %v886_v22  ;;  %5964 = vmatprep.subr.mxu0 %v1161_v23  ;;  %v1687_v22 = vld [vmem:[#allocation4 + $0x338] sm:$0xff] }
  0x92   :  { %6024 = vmatprep.subr.mxu1 %v1424_v24  ;;  %5965 = vmatpush3.msra.mxu0 %v1161_v23  ;;  %v1950_v23 = vld [vmem:[#allocation4 + $0x3c0] sm:$0xff] }
  0x93   :  { %6025 = vmatpush3.msra.mxu1 %v1424_v24  ;;  %5873 = vmatprep.mubr.f32.mxu0 %v625_v25  ;;  %v1408_v24 = vld [vmem:[%s8567_s0 + $0x5d] sm:$0xff] }
  0x94   :  { %6026 = vmatprep.subr.mxu1 %v1423_v26  ;;  %5874 = vmatmul.mubr.f32.gmra.mxu0 %v626_v27  ;;  %v1949_v25 = vld [vmem:[#allocation4 + $0x3b8] sm:$0xff]  ;;  %v1686_v27 = vld [vmem:[#allocation4 + $0x330] sm:$0xff] }
  0x95   :  { %5935 = vmatprep.mubr.f32.mxu1 %v887_v28  ;;  %5966 = vmatprep.subr.mxu0 %v1160_v29  ;;  %v1148_v28 = vld [vmem:[%s8567_s0 + $0x6c] sm:$0xff] }
  0x96   :  { %6027 = vmatpush3.msra.mxu1 %v1423_v26  ;;  %5967 = vmatpush3.msra.mxu0 %v1160_v29  ;;  %v1147_v26 = vld [vmem:[%s8567_s0 + $0x64] sm:$0xff] }
  0x97   :  { %5936 = vmatmul.mubr.f32.gmra.mxu1 %v888_v30  ;;  %5968 = vmatprep.subr.mxu0 %v1159_v31  ;;  %v1409_v29 = vld [vmem:[%s8567_s0 + $0x65] sm:$0xff]  ;;  %v1410_v30 = vld [vmem:[%s8567_s0 + $0x6d] sm:$0xff] }
  0x98   :  { %6028 = vmatprep.subr.mxu1 %v1422_v32  ;;  %5876 = vmatprep.mubr.f32.mxu0 %v627_v33  ;;  %v1149_v33 = vld [vmem:[%s8567_s0 + $0x74] sm:$0xff] }
  0x99   :  { %5969 = vmatpush3.msra.mxu0 %v1159_v31  ;;  %6029 = vmatpush3.msra.mxu1 %v1422_v32  ;;  %v1685_v31 = vld [vmem:[#allocation4 + $0x328] sm:$0xff]  ;;  %v1948_v32 = vld [vmem:[#allocation4 + $0x3b0] sm:$0xff] }
  0x9a   :  { %5877 = vmatmul.mubr.f32.gmra.mxu0 %v628_v34  ;;  %5938 = vmatprep.mubr.f32.mxu1 %v889_v35  ;;  %v1947_v34 = vld [vmem:[#allocation4 + $0x3a8] sm:$0xff]  ;;  %v1150_v35 = vld [vmem:[%s8567_s0 + $0x7c] sm:$0xff] }
  0x9b   :  { %6030 = vmatprep.subr.mxu1 %v1421_v36  ;;  %5939 = vmatmul.mubr.f32.gmra.mxu1 %v890_v37  ;;  %v1684_v37 = vld [vmem:[#allocation4 + $0x320] sm:$0xff] }
  0x9c   :  { %5970 = vmatprep.subr.mxu0 %v1158_v38  ;;  %6031 = vmatpush3.msra.mxu1 %v1421_v36  ;;  %v1411_v36 = vld [vmem:[%s8567_s0 + $0x75] sm:$0xff] }
  0x9d   :  { %5971 = vmatpush3.msra.mxu0 %v1158_v38  ;;  %5879 = vmatprep.mubr.f32.mxu0 %v629_v39  ;;  %v1412_v38 = vld [vmem:[%s8567_s0 + $0x7d] sm:$0xff] }
  0x9e   :  { %5972 = vmatprep.subr.mxu0 %v1157_v40  ;;  %6032 = vmatprep.subr.mxu1 %v1420_v41  ;;  %v1683_v39 = vld [vmem:[#allocation4 + $0x318] sm:$0xff] }
  0x9f   :  { %5880 = vmatmul.mubr.f32.gmra.mxu0 %v630_v42  ;;  %5941 = vmatprep.mubr.f32.mxu1 %v891_v43  ;;  %v1152_v42 = vld [vmem:[%s8567_s0 + $0x8c] sm:$0xff] }
  0xa0   :  { %5973 = vmatpush3.msra.mxu0 %v1157_v40  ;;  %6033 = vmatpush3.msra.mxu1 %v1420_v41  ;;  %v1946_v40 = vld [vmem:[#allocation4 + $0x3a0] sm:$0xff] }
  0xa1   :  { %5974 = vmatprep.subr.mxu0 %v1156_v44  ;;  %5942 = vmatmul.mubr.f32.gmra.mxu1 %v892_v45  ;;  %v1151_v41 = vld [vmem:[%s8567_s0 + $0x84] sm:$0xff]  ;;  %v1414_v45 = vld [vmem:[%s8567_s0 + $0x8d] sm:$0xff] }
  0xa2   :  { %6034 = vmatprep.subr.mxu1 %v1419_v46  ;;  %5975 = vmatpush3.msra.mxu0 %v1156_v44  ;;  %v1413_v43 = vld [vmem:[%s8567_s0 + $0x85] sm:$0xff] }
  0xa3   :  { %6035 = vmatpush3.msra.mxu1 %v1419_v46  ;;  %5976 = vmatprep.mubr.f32.mxu0 %v1135_v47  ;;  %v1945_v44 = vld [vmem:[#allocation4 + $0x398] sm:$0xff]  ;;  %v1682_v46 = vld [vmem:[#allocation4 + $0x310] sm:$0xff] }
  0xa4   :  { %6036 = vmatprep.subr.mxu1 %v1418_v48  ;;  %5977 = vmatmul.mubr.f32.vlgmr.msra.gmra.mxu0 %v1136_v49  ;;  %v1153_v47 = vld [vmem:[%s8567_s0 + $0x94] sm:$0xff] }
  0xa5   :  { %6037 = vmatpush3.msra.mxu1 %v1418_v48  ;;  %6038 = vmatprep.mubr.f32.mxu1 %v1397_v50  ;;  %v1681_v48 = vld [vmem:[#allocation4 + $0x308] sm:$0xff]  ;;  %v1944_v49 = vld [vmem:[#allocation4 + $0x390] sm:$0xff] }
  0xa6   :  { %6068 = vmatprep.subr.mxu0 %v1695_v51  ;;  %6039 = vmatmul.mubr.f32.vlgmr.msra.gmra.mxu1 %v1398_v52  ;;  %v1154_v50 = vld [vmem:[%s8567_s0 + $0x9c] sm:$0xff]  ;;  %v1680_v52 = vld [vmem:[#allocation4 + $0x300] sm:$0xff] }
  0xa7   :  { %6069 = vmatpush3.msra.mxu0 %v1695_v51  ;;  %6130 = vmatprep.subr.mxu1 %v1957_v53  ;;  %v1415_v51 = vld [vmem:[%s8567_s0 + $0x95] sm:$0xff] }
  0xa8   :  { %5979 = vmatprep.mubr.f32.mxu0 %v1137_v54  ;;  %6070 = vmatprep.subr.mxu0 %v1694_v55  ;;  %v1943_v54 = vld [vmem:[#allocation4 + $0x388] sm:$0xff] }
  0xa9   :  { %6131 = vmatpush3.msra.mxu1 %v1957_v53  ;;  %5980 = vmatmul.mubr.f32.gmra.mxu0 %v1138_v56  ;;  %v1416_v53 = vld [vmem:[%s8567_s0 + $0x9d] sm:$0xff]  ;;  %v1942_v56 = vld [vmem:[#allocation4 + $0x380] sm:$0xff] }
  0xaa   :  { %6041 = vmatprep.mubr.f32.mxu1 %v1399_v57  ;;  %6071 = vmatpush3.msra.mxu0 %v1694_v55  ;;  %v1659_v55 = vld [vmem:[%s8567_s0 + $0x6] sm:$0xff]  ;;  %v1660_v57 = vld [vmem:[%s8567_s0 + $0xe] sm:$0xff] }
  0xab   :  { %6042 = vmatmul.mubr.f32.gmra.mxu1 %v1400_v58  ;;  %6072 = vmatprep.subr.mxu0 %v1693_v59  ;;  %v1921_v58 = vld [vmem:[%s8567_s0 + $0x7] sm:$0xff] }
  0xac   :  { %6132 = vmatprep.subr.mxu1 %v1956_v60  ;;  %6073 = vmatpush3.msra.mxu0 %v1693_v59  ;;  %v2219_v59 = vld [vmem:[#allocation4 + $0x478] sm:$0xff] }
  0xad   :  { %6133 = vmatpush3.msra.mxu1 %v1956_v60  ;;  %5982 = vmatprep.mubr.f32.mxu0 %v1139_v61  ;;  %v1922_v60 = vld [vmem:[%s8567_s0 + $0xf] sm:$0xff]  ;;  %v2481_v61 = vld [vmem:[#allocation4 + $0x4f8] sm:$0xff] }
  0xae   :  { %6134 = vmatprep.subr.mxu1 %v1955_v62  ;;  %5983 = vmatmul.mubr.f32.gmra.mxu0 %v1140_v63  ;;  %v2218_v63 = vld [vmem:[#allocation4 + $0x470] sm:$0xff] }
  0xaf   :  { %6044 = vmatprep.mubr.f32.mxu1 %v1401_v0  ;;  %6074 = vmatprep.subr.mxu0 %v1692_v1  ;;  %v1662_v0 = vld [vmem:[%s8567_s0 + $0x1e] sm:$0xff] }
  0xb0   :  { %6135 = vmatpush3.msra.mxu1 %v1955_v62  ;;  %6075 = vmatpush3.msra.mxu0 %v1692_v1  ;;  %v1661_v62 = vld [vmem:[%s8567_s0 + $0x16] sm:$0xff] }
  0xb1   :  { %6045 = vmatmul.mubr.f32.gmra.mxu1 %v1402_v2  ;;  %6076 = vmatprep.subr.mxu0 %v1691_v3  ;;  %v1923_v1 = vld [vmem:[%s8567_s0 + $0x17] sm:$0xff]  ;;  %v1924_v2 = vld [vmem:[%s8567_s0 + $0x1f] sm:$0xff] }
  0xb2   :  { %6136 = vmatprep.subr.mxu1 %v1954_v4  ;;  %5985 = vmatprep.mubr.f32.mxu0 %v1141_v5  ;;  %v1663_v5 = vld [vmem:[%s8567_s0 + $0x26] sm:$0xff] }
  0xb3   :  { %6077 = vmatpush3.msra.mxu0 %v1691_v3  ;;  %6137 = vmatpush3.msra.mxu1 %v1954_v4  ;;  %v2217_v3 = vld [vmem:[#allocation4 + $0x468] sm:$0xff]  ;;  %v2480_v4 = vld [vmem:[#allocation4 + $0x4f0] sm:$0xff] }
  0xb4   :  { %5986 = vmatmul.mubr.f32.gmra.mxu0 %v1142_v6  ;;  %6047 = vmatprep.mubr.f32.mxu1 %v1403_v7  ;;  %v2479_v6 = vld [vmem:[#allocation4 + $0x4e8] sm:$0xff] }
  0xb5   :  { %6138 = vmatprep.subr.mxu1 %v1953_v8  ;;  %6048 = vmatmul.mubr.f32.gmra.mxu1 %v1404_v9  ;;  %v1664_v7 = vld [vmem:[%s8567_s0 + $0x2e] sm:$0xff] }
  0xb6   :  { %6078 = vmatprep.subr.mxu0 %v1690_v10  ;;  %6139 = vmatpush3.msra.mxu1 %v1953_v8  ;;  %v1925_v8 = vld [vmem:[%s8567_s0 + $0x27] sm:$0xff] }
  0xb7   :  { %6079 = vmatpush3.msra.mxu0 %v1690_v10  ;;  %5988 = vmatprep.mubr.f32.mxu0 %v1143_v11  ;;  %v2216_v9 = vld [vmem:[#allocation4 + $0x460] sm:$0xff]  ;;  %v2215_v11 = vld [vmem:[#allocation4 + $0x458] sm:$0xff] }
  0xb8   :  { %6080 = vmatprep.subr.mxu0 %v1689_v12  ;;  %6140 = vmatprep.subr.mxu1 %v1952_v13  ;;  %v1926_v10 = vld [vmem:[%s8567_s0 + $0x2f] sm:$0xff] }
  0xb9   :  { %5989 = vmatmul.mubr.f32.gmra.mxu0 %v1144_v14  ;;  %6050 = vmatprep.mubr.f32.mxu1 %v1405_v15  ;;  %v1666_v14 = vld [vmem:[%s8567_s0 + $0x3e] sm:$0xff] }
  0xba   :  { %6081 = vmatpush3.msra.mxu0 %v1689_v12  ;;  %6141 = vmatpush3.msra.mxu1 %v1952_v13  ;;  %v2478_v12 = vld [vmem:[#allocation4 + $0x4e0] sm:$0xff]  ;;  %v1665_v13 = vld [vmem:[%s8567_s0 + $0x36] sm:$0xff] }
  0xbb   :  { %6082 = vmatprep.subr.mxu0 %v1688_v16  ;;  %6051 = vmatmul.mubr.f32.gmra.mxu1 %v1406_v17  ;;  %v1927_v15 = vld [vmem:[%s8567_s0 + $0x37] sm:$0xff]  ;;  %v1928_v17 = vld [vmem:[%s8567_s0 + $0x3f] sm:$0xff] }
  0xbc   :  { %6142 = vmatprep.subr.mxu1 %v1951_v18  ;;  %5991 = vmatprep.mubr.f32.mxu0 %v1145_v19  ;;  %v1667_v19 = vld [vmem:[%s8567_s0 + $0x46] sm:$0xff] }
  0xbd   :  { %6143 = vmatpush3.msra.mxu1 %v1951_v18  ;;  %6083 = vmatpush3.msra.mxu0 %v1688_v16  ;;  %v2477_v16 = vld [vmem:[#allocation4 + $0x4d8] sm:$0xff]  ;;  %v2214_v18 = vld [vmem:[#allocation4 + $0x450] sm:$0xff] }
  0xbe   :  { %6053 = vmatprep.mubr.f32.mxu1 %v1407_v20  ;;  %5992 = vmatmul.mubr.f32.gmra.mxu0 %v1146_v21  ;;  %v2213_v20 = vld [vmem:[#allocation4 + $0x448] sm:$0xff]  ;;  %v2476_v21 = vld [vmem:[#allocation4 + $0x4d0] sm:$0xff] }
  0xbf   :  { %6084 = vmatprep.subr.mxu0 %v1687_v22  ;;  %6144 = vmatprep.subr.mxu1 %v1950_v23 }
  0xc0   :  { %6054 = vmatmul.mubr.f32.gmra.mxu1 %v1408_v24  ;;  %6085 = vmatpush3.msra.mxu0 %v1687_v22  ;;  %v1668_v22 = vld [vmem:[%s8567_s0 + $0x4e] sm:$0xff] }
  0xc1   :  { %6145 = vmatpush3.msra.mxu1 %v1950_v23  ;;  %5994 = vmatprep.mubr.f32.mxu0 %v1147_v26  ;;  %v1929_v23 = vld [vmem:[%s8567_s0 + $0x47] sm:$0xff]  ;;  %v2475_v26 = vld [vmem:[#allocation4 + $0x4c8] sm:$0xff] }
  0xc2   :  { %6146 = vmatprep.subr.mxu1 %v1949_v25  ;;  %6086 = vmatprep.subr.mxu0 %v1686_v27  ;;  %v2212_v24 = vld [vmem:[#allocation4 + $0x440] sm:$0xff] }
  0xc3   :  { %6147 = vmatpush3.msra.mxu1 %v1949_v25  ;;  %5995 = vmatmul.mubr.f32.gmra.mxu0 %v1148_v28  ;;  %v1930_v25 = vld [vmem:[%s8567_s0 + $0x4f] sm:$0xff]  ;;  %v1931_v28 = vld [vmem:[%s8567_s0 + $0x57] sm:$0xff] }
  0xc4   :  { %6056 = vmatprep.mubr.f32.mxu1 %v1409_v29  ;;  %6087 = vmatpush3.msra.mxu0 %v1686_v27  ;;  %v1669_v27 = vld [vmem:[%s8567_s0 + $0x56] sm:$0xff]  ;;  %v1670_v29 = vld [vmem:[%s8567_s0 + $0x5e] sm:$0xff] }
  0xc5   :  { %6057 = vmatmul.mubr.f32.gmra.mxu1 %v1410_v30  ;;  %6088 = vmatprep.subr.mxu0 %v1685_v31  ;;  %v2211_v30 = vld [vmem:[#allocation4 + $0x438] sm:$0xff] }
  0xc6   :  { %6148 = vmatprep.subr.mxu1 %v1948_v32  ;;  %6089 = vmatpush3.msra.mxu0 %v1685_v31  ;;  %v2474_v31 = vld [vmem:[#allocation4 + $0x4c0] sm:$0xff] }
  0xc7   :  { %6149 = vmatpush3.msra.mxu1 %v1948_v32  ;;  %5997 = vmatprep.mubr.f32.mxu0 %v1149_v33  ;;  %v1932_v32 = vld [vmem:[%s8567_s0 + $0x5f] sm:$0xff] }
  0xc8   :  { %6150 = vmatprep.subr.mxu1 %v1947_v34  ;;  %5998 = vmatmul.mubr.f32.gmra.mxu0 %v1150_v35  ;;  %v2473_v33 = vld [vmem:[#allocation4 + $0x4b8] sm:$0xff]  ;;  %v2210_v35 = vld [vmem:[#allocation4 + $0x430] sm:$0xff] }
  0xc9   :  { %6059 = vmatprep.mubr.f32.mxu1 %v1411_v36  ;;  %6090 = vmatprep.subr.mxu0 %v1684_v37  ;;  %v1672_v36 = vld [vmem:[%s8567_s0 + $0x6e] sm:$0xff] }
  0xca   :  { %6151 = vmatpush3.msra.mxu1 %v1947_v34  ;;  %6091 = vmatpush3.msra.mxu0 %v1684_v37  ;;  %v1671_v34 = vld [vmem:[%s8567_s0 + $0x66] sm:$0xff] }
  0xcb   :  { %6060 = vmatmul.mubr.f32.gmra.mxu1 %v1412_v38  ;;  %6092 = vmatprep.subr.mxu0 %v1683_v39  ;;  %v1933_v37 = vld [vmem:[%s8567_s0 + $0x67] sm:$0xff]  ;;  %v1934_v38 = vld [vmem:[%s8567_s0 + $0x6f] sm:$0xff] }
  0xcc   :  { %6152 = vmatprep.subr.mxu1 %v1946_v40  ;;  %6000 = vmatprep.mubr.f32.mxu0 %v1151_v41  ;;  %v1673_v41 = vld [vmem:[%s8567_s0 + $0x76] sm:$0xff] }
  0xcd   :  { %6093 = vmatpush3.msra.mxu0 %v1683_v39  ;;  %6153 = vmatpush3.msra.mxu1 %v1946_v40  ;;  %v2209_v39 = vld [vmem:[#allocation4 + $0x428] sm:$0xff]  ;;  %v2472_v40 = vld [vmem:[#allocation4 + $0x4b0] sm:$0xff] }
  0xce   :  { %6001 = vmatmul.mubr.f32.gmra.mxu0 %v1152_v42  ;;  %6062 = vmatprep.mubr.f32.mxu1 %v1413_v43  ;;  %v2471_v42 = vld [vmem:[#allocation4 + $0x4a8] sm:$0xff]  ;;  %v1674_v43 = vld [vmem:[%s8567_s0 + $0x7e] sm:$0xff] }
  0xcf   :  { %6154 = vmatprep.subr.mxu1 %v1945_v44  ;;  %6063 = vmatmul.mubr.f32.gmra.mxu1 %v1414_v45  ;;  %v2208_v45 = vld [vmem:[#allocation4 + $0x420] sm:$0xff] }
  0xd0   :  { %6094 = vmatprep.subr.mxu0 %v1682_v46  ;;  %6155 = vmatpush3.msra.mxu1 %v1945_v44  ;;  %v1935_v44 = vld [vmem:[%s8567_s0 + $0x77] sm:$0xff] }
  0xd1   :  { %6095 = vmatpush3.msra.mxu0 %v1682_v46  ;;  %6003 = vmatprep.mubr.f32.mxu0 %v1153_v47  ;;  %v1936_v46 = vld [vmem:[%s8567_s0 + $0x7f] sm:$0xff] }
  0xd2   :  { %6096 = vmatprep.subr.mxu0 %v1681_v48  ;;  %6156 = vmatprep.subr.mxu1 %v1944_v49  ;;  %v2207_v47 = vld [vmem:[#allocation4 + $0x418] sm:$0xff] }
  0xd3   :  { %6004 = vmatmul.mubr.f32.gmra.mxu0 %v1154_v50  ;;  %6065 = vmatprep.mubr.f32.mxu1 %v1415_v51 }
  0xd4   :  { %6097 = vmatpush3.msra.mxu0 %v1681_v48  ;;  %6157 = vmatpush3.msra.mxu1 %v1944_v49  ;;  %v2470_v48 = vld [vmem:[#allocation4 + $0x4a0] sm:$0xff] }
  0xd5   :  { %6098 = vmatprep.subr.mxu0 %v1680_v52  ;;  %6066 = vmatmul.mubr.f32.gmra.mxu1 %v1416_v53  ;;  %v1675_v49 = vld [vmem:[%s8567_s0 + $0x86] sm:$0xff] }
  0xd6   :  { %6158 = vmatprep.subr.mxu1 %v1943_v54  ;;  %6099 = vmatpush3.msra.mxu0 %v1680_v52  ;;  %v1676_v52 = vld [vmem:[%s8567_s0 + $0x8e] sm:$0xff] }
  0xd7   :  { %6159 = vmatpush3.msra.mxu1 %v1943_v54  ;;  %6100 = vmatprep.mubr.f32.mxu0 %v1659_v55  ;;  %v1937_v54 = vld [vmem:[%s8567_s0 + $0x87] sm:$0xff] }
  0xd8   :  { %6160 = vmatprep.subr.mxu1 %v1942_v56  ;;  %6101 = vmatmul.mubr.f32.vlgmr.msra.gmra.mxu0 %v1660_v57  ;;  %v2469_v55 = vld [vmem:[#allocation4 + $0x498] sm:$0xff] }
  0xd9   :  { %6161 = vmatpush3.msra.mxu1 %v1942_v56  ;;  %6162 = vmatprep.mubr.f32.mxu1 %v1921_v58  ;;  %v1938_v58 = vld [vmem:[%s8567_s0 + $0x8f] sm:$0xff] }
  0xda   :  { %6192 = vmatprep.subr.mxu0 %v2219_v59  ;;  %6163 = vmatmul.mubr.f32.vlgmr.msra.gmra.mxu1 %v1922_v60 }
  0xdb   :  { %6193 = vmatpush3.msra.mxu0 %v2219_v59  ;;  %6254 = vmatprep.subr.mxu1 %v2481_v61  ;;  %v2206_v59 = vld [vmem:[#allocation4 + $0x410] sm:$0xff] }
  0xdc   :  { %6103 = vmatprep.mubr.f32.mxu0 %v1661_v62  ;;  %6194 = vmatprep.subr.mxu0 %v2218_v63  ;;  %v2205_v62 = vld [vmem:[#allocation4 + $0x408] sm:$0xff] }
  0xdd   :  { %6255 = vmatpush3.msra.mxu1 %v2481_v61  ;;  %6104 = vmatmul.mubr.f32.gmra.mxu0 %v1662_v0  ;;  %v1677_v61 = vld [vmem:[%s8567_s0 + $0x96] sm:$0xff] }
  0xde   :  { %6165 = vmatprep.mubr.f32.mxu1 %v1923_v1  ;;  %6195 = vmatpush3.msra.mxu0 %v2218_v63  ;;  %v2468_v0 = vld [vmem:[#allocation4 + $0x490] sm:$0xff] }
  0xdf   :  { %6166 = vmatmul.mubr.f32.gmra.mxu1 %v1924_v2  ;;  %6196 = vmatprep.subr.mxu0 %v2217_v3  ;;  %v1678_v1 = vld [vmem:[%s8567_s0 + $0x9e] sm:$0xff] }
  0xe0   :  { %6256 = vmatprep.subr.mxu1 %v2480_v4  ;;  %6197 = vmatpush3.msra.mxu0 %v2217_v3 }
  0xe1   :  { %6257 = vmatpush3.msra.mxu1 %v2480_v4  ;;  %6106 = vmatprep.mubr.f32.mxu0 %v1663_v5  ;;  %v1939_v4 = vld [vmem:[%s8567_s0 + $0x97] sm:$0xff] }
  0xe2   :  { %6258 = vmatprep.subr.mxu1 %v2479_v6  ;;  %6107 = vmatmul.mubr.f32.gmra.mxu0 %v1664_v7  ;;  %v1940_v7 = vld [vmem:[%s8567_s0 + $0x9f] sm:$0xff] }
  0xe3   :  { %6168 = vmatprep.mubr.f32.mxu1 %v1925_v8  ;;  %6198 = vmatprep.subr.mxu0 %v2216_v9  ;;  %v2467_v8 = vld [vmem:[#allocation4 + $0x488] sm:$0xff] }
  0xe4   :  { %6259 = vmatpush3.msra.mxu1 %v2479_v6  ;;  %6199 = vmatpush3.msra.mxu0 %v2216_v9  ;;  %v2204_v6 = vld [vmem:[#allocation4 + $0x400] sm:$0xff] }
  0xe5   :  { %6169 = vmatmul.mubr.f32.gmra.mxu1 %v1926_v10  ;;  %6200 = vmatprep.subr.mxu0 %v2215_v11 }
  0xe6   :  { %6260 = vmatprep.subr.mxu1 %v2478_v12  ;;  %6109 = vmatprep.mubr.f32.mxu0 %v1665_v13 }
  0xe7   :  { %6201 = vmatpush3.msra.mxu0 %v2215_v11  ;;  %6261 = vmatpush3.msra.mxu1 %v2478_v12  ;;  %v2183_v11 = vld [vmem:[%s8567_s0 + $0x8] sm:$0xff] }
  0xe8   :  { %6110 = vmatmul.mubr.f32.gmra.mxu0 %v1666_v14  ;;  %6171 = vmatprep.mubr.f32.mxu1 %v1927_v15  ;;  %v2466_v12 = vld [vmem:[#allocation4 + $0x480] sm:$0xff]  ;;  %v2184_v15 = vld [vmem:[%s8567_s0 + $0x10] sm:$0xff] }
  0xe9   :  { %6262 = vmatprep.subr.mxu1 %v2477_v16  ;;  %6172 = vmatmul.mubr.f32.gmra.mxu1 %v1928_v17  ;;  %v2445_v17 = vld [vmem:[%s8567_s0 + $0x9] sm:$0xff] }
  0xea   :  { %6202 = vmatprep.subr.mxu0 %v2214_v18  ;;  %6263 = vmatpush3.msra.mxu1 %v2477_v16 }
  0xeb   :  { %6203 = vmatpush3.msra.mxu0 %v2214_v18  ;;  %6112 = vmatprep.mubr.f32.mxu0 %v1667_v19  ;;  %v2185_v18 = vld [vmem:[%s8567_s0 + $0x18] sm:$0xff] }
  0xec   :  { %6204 = vmatprep.subr.mxu0 %v2213_v20  ;;  %6264 = vmatprep.subr.mxu1 %v2476_v21  ;;  %v2446_v19 = vld [vmem:[%s8567_s0 + $0x11] sm:$0xff] }
  0xed   :  { %6113 = vmatmul.mubr.f32.gmra.mxu0 %v1668_v22  ;;  %6174 = vmatprep.mubr.f32.mxu1 %v1929_v23  ;;  %v2186_v23 = vld [vmem:[%s8567_s0 + $0x20] sm:$0xff] }
  0xee   :  { %6205 = vmatpush3.msra.mxu0 %v2213_v20  ;;  %6265 = vmatpush3.msra.mxu1 %v2476_v21  ;;  %v2447_v20 = vld [vmem:[%s8567_s0 + $0x19] sm:$0xff] }
  0xef   :  { %6206 = vmatprep.subr.mxu0 %v2212_v24  ;;  %6175 = vmatmul.mubr.f32.gmra.mxu1 %v1930_v25  ;;  %v2187_v25 = vld [vmem:[%s8567_s0 + $0x28] sm:$0xff] }
  0xf0   :  { %6266 = vmatprep.subr.mxu1 %v2475_v26  ;;  %6115 = vmatprep.mubr.f32.mxu0 %v1669_v27 }
  0xf1   :  { %6267 = vmatpush3.msra.mxu1 %v2475_v26  ;;  %6207 = vmatpush3.msra.mxu0 %v2212_v24 }
  0xf2   :  { %6177 = vmatprep.mubr.f32.mxu1 %v1931_v28  ;;  %6116 = vmatmul.mubr.f32.gmra.mxu0 %v1670_v29  ;;  %v2448_v28 = vld [vmem:[%s8567_s0 + $0x21] sm:$0xff]  ;;  %v2449_v29 = vld [vmem:[%s8567_s0 + $0x29] sm:$0xff] }
  0xf3   :  { %6208 = vmatprep.subr.mxu0 %v2211_v30  ;;  %6268 = vmatprep.subr.mxu1 %v2474_v31 }
  0xf4   :  { %6178 = vmatmul.mubr.f32.gmra.mxu1 %v1932_v32  ;;  %6209 = vmatpush3.msra.mxu0 %v2211_v30  ;;  %v2188_v30 = vld [vmem:[%s8567_s0 + $0x30] sm:$0xff] }
  0xf5   :  { %6269 = vmatpush3.msra.mxu1 %v2474_v31  ;;  %6118 = vmatprep.mubr.f32.mxu0 %v1671_v34 }
  0xf6   :  { %6270 = vmatprep.subr.mxu1 %v2473_v33  ;;  %6210 = vmatprep.subr.mxu0 %v2210_v35 }
  0xf7   :  { %6271 = vmatpush3.msra.mxu1 %v2473_v33  ;;  %6119 = vmatmul.mubr.f32.gmra.mxu0 %v1672_v36  ;;  %v2189_v33 = vld [vmem:[%s8567_s0 + $0x38] sm:$0xff] }
  0xf8   :  { %6180 = vmatprep.mubr.f32.mxu1 %v1933_v37  ;;  %6211 = vmatpush3.msra.mxu0 %v2210_v35  ;;  %v2450_v35 = vld [vmem:[%s8567_s0 + $0x31] sm:$0xff] }
  0xf9   :  { %6181 = vmatmul.mubr.f32.gmra.mxu1 %v1934_v38  ;;  %6212 = vmatprep.subr.mxu0 %v2209_v39  ;;  %v2451_v38 = vld [vmem:[%s8567_s0 + $0x39] sm:$0xff] }
  0xfa   :  { %6272 = vmatprep.subr.mxu1 %v2472_v40  ;;  %6213 = vmatpush3.msra.mxu0 %v2209_v39  ;;  %v2190_v39 = vld [vmem:[%s8567_s0 + $0x40] sm:$0xff] }
  0xfb   :  { %6273 = vmatpush3.msra.mxu1 %v2472_v40  ;;  %6121 = vmatprep.mubr.f32.mxu0 %v1673_v41  ;;  %v2191_v40 = vld [vmem:[%s8567_s0 + $0x48] sm:$0xff] }
  0xfc   :  { %6274 = vmatprep.subr.mxu1 %v2471_v42  ;;  %6122 = vmatmul.mubr.f32.gmra.mxu0 %v1674_v43  ;;  %v2452_v43 = vld [vmem:[%s8567_s0 + $0x41] sm:$0xff] }
  0xfd   :  { %6183 = vmatprep.mubr.f32.mxu1 %v1935_v44  ;;  %6214 = vmatprep.subr.mxu0 %v2208_v45  ;;  %v5730_v50 = vpop.f32.mrf.mxu0 }
  0xfe   :  { %6275 = vmatpush3.msra.mxu1 %v2471_v42  ;;  %v5792_v51 = vpop.f32.mrf.mxu1  ;;  %6215 = vmatpush3.msra.mxu0 %v2208_v45  ;;  %v2453_v45 = vld [vmem:[%s8567_s0 + $0x49] sm:$0xff] }
  0xff   :  { %6184 = vmatmul.mubr.f32.gmra.mxu1 %v1936_v46  ;;  %v7415_v53 = vadd.f32 %v5792_v51, %v5730_v50  ;;  %6216 = vmatprep.subr.mxu0 %v2207_v47  ;;  %v7420_v56 = vpop.f32.mrf.mxu0  ;;  %v2454_v50 = vld [vmem:[%s8567_s0 + $0x51] sm:$0xff] }
 0x100   :  { %6276 = vmatprep.subr.mxu1 %v2470_v48  ;;  %v7422_v57 = vpop.f32.mrf.mxu1  ;;  %6124 = vmatprep.mubr.f32.mxu0 %v1675_v49  ;;  %v2193_v49 = vld [vmem:[%s8567_s0 + $0x58] sm:$0xff] }
 0x101   :  { %6217 = vmatpush3.msra.mxu0 %v2207_v47  ;;  %6277 = vmatpush3.msra.mxu1 %v2470_v48  ;;  %v2192_v48 = vld [vmem:[%s8567_s0 + $0x50] sm:$0xff] }
 0x102   :  { %6125 = vmatmul.mubr.f32.gmra.mxu0 %v1676_v52  ;;  %v5733_v60 = vpop.f32.mrf.mxu0  ;;  %6186 = vmatprep.mubr.f32.mxu1 %v1937_v54  ;;  %v5795_v63 = vpop.f32.mrf.mxu1  ;;  %v2455_v52 = vld [vmem:[%s8567_s0 + $0x59] sm:$0xff] }
 0x103   :  { %6278 = vmatprep.subr.mxu1 %v2469_v55  ;;  %6187 = vmatmul.mubr.f32.gmra.mxu1 %v1938_v58  ;;  %v7433_v2 = vadd.f32 %v5795_v63, %v5733_v60  ;;  %v2195_v60 = vld [vmem:[%s8567_s0 + $0x68] sm:$0xff] }
 0x104   :  { %6218 = vmatprep.subr.mxu0 %v2206_v59  ;;  %v7435_v3 = vpop.f32.mrf.mxu0  ;;  %6279 = vmatpush3.msra.mxu1 %v2469_v55  ;;  %v7440_v5 = vpop.f32.mrf.mxu1  ;;  %v2194_v55 = vld [vmem:[%s8567_s0 + $0x60] sm:$0xff]  ;;  %v2457_v63 = vld [vmem:[%s8567_s0 + $0x69] sm:$0xff] }
 0x105   :  { %6219 = vmatpush3.msra.mxu0 %v2206_v59  ;;  %6127 = vmatprep.mubr.f32.mxu0 %v1677_v61 }
 0x106   :  { %6220 = vmatprep.subr.mxu0 %v2205_v62  ;;  %6280 = vmatprep.subr.mxu1 %v2468_v0 }
 0x107   :  { %6128 = vmatmul.mubr.f32.gmra.mxu0 %v1678_v1  ;;  %v5736_v9 = vpop.f32.mrf.mxu0  ;;  %6189 = vmatprep.mubr.f32.mxu1 %v1939_v4  ;;  %v5798_v10 = vpop.f32.mrf.mxu1  ;;  %v2196_v1 = vld [vmem:[%s8567_s0 + $0x70] sm:$0xff] }
 0x108   :  { %6221 = vmatpush3.msra.mxu0 %v2205_v62  ;;  %6281 = vmatpush3.msra.mxu1 %v2468_v0  ;;  %v7448_v13 = vadd.f32 %v5798_v10, %v5736_v9  ;;  %v2456_v62 = vld [vmem:[%s8567_s0 + $0x61] sm:$0xff]  ;;  %v2458_v9 = vld [vmem:[%s8567_s0 + $0x71] sm:$0xff] }
 0x109   :  { %6222 = vmatprep.subr.mxu0 %v2204_v6  ;;  %v7450_v14 = vpop.f32.mrf.mxu0  ;;  %6190 = vmatmul.mubr.f32.gmra.mxu1 %v1940_v7  ;;  %v7455_v16 = vpop.f32.mrf.mxu1 }
 0x10a   :  { %6282 = vmatprep.subr.mxu1 %v2467_v8  ;;  %6223 = vmatpush3.msra.mxu0 %v2204_v6  ;;  %v2197_v6 = vld [vmem:[%s8567_s0 + $0x78] sm:$0xff] }
 0x10b   :  { %6283 = vmatpush3.msra.mxu1 %v2467_v8  ;;  %6224 = vmatprep.mubr.f32.mxu0 %v2183_v11  ;;  %v2459_v11 = vld [vmem:[%s8567_s0 + $0x79] sm:$0xff] }
 0x10c   :  { %6284 = vmatprep.subr.mxu1 %v2466_v12  ;;  %6225 = vmatmul.mubr.f32.vlgmr.msra.gmra.mxu0 %v2184_v15  ;;  %v5739_v21 = vpop.f32.mrf.mxu0  ;;  %v2199_v15 = vld [vmem:[%s8567_s0 + $0x88] sm:$0xff] }
 0x10d   :  { %6285 = vmatpush3.msra.mxu1 %v2466_v12  ;;  %v5801_v22 = vpop.f32.mrf.mxu1  ;;  %6286 = vmatprep.mubr.f32.mxu1 %v2445_v17  ;;  %v2198_v12 = vld [vmem:[%s8567_s0 + $0x80] sm:$0xff] }
 0x10e   :  { %6227 = vmatprep.mubr.f32.mxu0 %v2185_v18  ;;  %v7472_v24 = vadd.f32 %v5801_v22, %v5739_v21  ;;  %6287 = vmatmul.mubr.f32.vlgmr.msra.gmra.mxu1 %v2446_v19  ;;  %v7477_v26 = vpop.f32.mrf.mxu0  ;;  %v2460_v19 = vld [vmem:[%s8567_s0 + $0x81] sm:$0xff]  ;;  %v2461_v21 = vld [vmem:[%s8567_s0 + $0x89] sm:$0xff] }
 0x10f   :  { %v7479_v27 = vpop.f32.mrf.mxu1  ;;  %6289 = vmatprep.mubr.f32.mxu1 %v2447_v20 }
 0x110   :  { %6228 = vmatmul.mubr.f32.gmra.mxu0 %v2186_v23 }
 0x111   :  { %6230 = vmatprep.mubr.f32.mxu0 %v2187_v25  ;;  %v5742_v31 = vpop.f32.mrf.mxu0  ;;  %v2200_v25 = vld [vmem:[%s8567_s0 + $0x90] sm:$0xff] }
 0x112   :  { %v5804_v32 = vpop.f32.mrf.mxu1  ;;  %6290 = vmatmul.mubr.f32.gmra.mxu1 %v2448_v28  ;;  %v2201_v28 = vld [vmem:[%s8567_s0 + $0x98] sm:$0xff] }
 0x113   :  { %v7493_v34 = vadd.f32 %v5804_v32, %v5742_v31  ;;  %6292 = vmatprep.mubr.f32.mxu1 %v2449_v29  ;;  %v7498_v36 = vpop.f32.mrf.mxu0  ;;  %v2462_v29 = vld [vmem:[%s8567_s0 + $0x91] sm:$0xff]  ;;  %v2463_v32 = vld [vmem:[%s8567_s0 + $0x99] sm:$0xff] }
 0x114   :  { %v7500_v37 = vpop.f32.mrf.mxu1  ;;  %6231 = vmatmul.mubr.f32.gmra.mxu0 %v2188_v30 }
 0x115   :  { %6233 = vmatprep.mubr.f32.mxu0 %v2189_v33 }
 0x116   :  { %6293 = vmatmul.mubr.f32.gmra.mxu1 %v2450_v35  ;;  %v5807_v42 = vpop.f32.mrf.mxu1  ;;  %v2202_v35 = vld [vmem:[%s8567_s0 + $0xa0] sm:$0xff] }
 0x117   :  { %v5745_v41 = vpop.f32.mrf.mxu0  ;;  %6295 = vmatprep.mubr.f32.mxu1 %v2451_v38 }
 0x118   :  { %v7514_v44 = vadd.f32 %v5807_v42, %v5745_v41  ;;  %6234 = vmatmul.mubr.f32.gmra.mxu0 %v2190_v39  ;;  %v7521_v47 = vpop.f32.mrf.mxu1 }
 0x119   :  { %v7519_v46 = vpop.f32.mrf.mxu0  ;;  %6236 = vmatprep.mubr.f32.mxu0 %v2191_v40  ;;  %v2464_v40 = vld [vmem:[%s8567_s0 + $0xa1] sm:$0xff] }
 0x11a   :  { %6296 = vmatmul.mubr.f32.gmra.mxu1 %v2452_v43 }
 0x11b   :  { %6298 = vmatprep.mubr.f32.mxu1 %v2453_v45 }
 0x11c   :  { %v5748_v51 = vpop.f32.mrf.mxu0  ;;  %6237 = vmatmul.mubr.f32.gmra.mxu0 %v2192_v48  ;;  %v5810_v54 = vpop.f32.mrf.mxu1 }
 0x11d   :  { %6239 = vmatprep.mubr.f32.mxu0 %v2193_v49  ;;  %v7538_v58 = vadd.f32 %v5810_v54, %v5748_v51 }
 0x11e   :  { %v7540_v59 = vpop.f32.mrf.mxu0  ;;  %6299 = vmatmul.mubr.f32.gmra.mxu1 %v2454_v50  ;;  %v7545_v61 = vpop.f32.mrf.mxu1 }
 0x11f   :  { %6301 = vmatprep.mubr.f32.mxu1 %v2455_v52 }
 0x120   :  { %6240 = vmatmul.mubr.f32.gmra.mxu0 %v2194_v55 }
 0x121   :  { %v5751_v0 = vpop.f32.mrf.mxu0  ;;  %6242 = vmatprep.mubr.f32.mxu0 %v2195_v60  ;;  %v5813_v4 = vpop.f32.mrf.mxu1 }
 0x122   :  { %6302 = vmatmul.mubr.f32.gmra.mxu1 %v2456_v62  ;;  %v7559_v7 = vadd.f32 %v5813_v4, %v5751_v0 }
 0x123   :  { %v7561_v8 = vpop.f32.mrf.mxu0  ;;  %6304 = vmatprep.mubr.f32.mxu1 %v2457_v63  ;;  %v7566_v10 = vpop.f32.mrf.mxu1 }
 0x124   :  { %6243 = vmatmul.mubr.f32.gmra.mxu0 %v2196_v1 }
 0x125   :  { %6245 = vmatprep.mubr.f32.mxu0 %v2197_v6 }
 0x126   :  { %6305 = vmatmul.mubr.f32.gmra.mxu1 %v2458_v9  ;;  %v5754_v17 = vpop.f32.mrf.mxu0 }
 0x127   :  { %v5816_v18 = vpop.f32.mrf.mxu1  ;;  %6307 = vmatprep.mubr.f32.mxu1 %v2459_v11 }
 0x128   :  { %v7580_v20 = vadd.f32 %v5816_v18, %v5754_v17  ;;  %6246 = vmatmul.mubr.f32.gmra.mxu0 %v2198_v12  ;;  %v7585_v22 = vpop.f32.mrf.mxu0 }
 0x129   :  { %v7587_v23 = vpop.f32.mrf.mxu1  ;;  %6248 = vmatprep.mubr.f32.mxu0 %v2199_v15 }
 0x12a   :  { %6308 = vmatmul.mubr.f32.gmra.mxu1 %v2460_v19 }
 0x12b   :  { %6310 = vmatprep.mubr.f32.mxu1 %v2461_v21  ;;  %v5757_v30 = vpop.f32.mrf.mxu0 }
 0x12c   :  { %v5819_v31 = vpop.f32.mrf.mxu1  ;;  %6249 = vmatmul.mubr.f32.gmra.mxu0 %v2200_v25 }
 0x12d   :  { %v7601_v33 = vadd.f32 %v5819_v31, %v5757_v30  ;;  %6251 = vmatprep.mubr.f32.mxu0 %v2201_v28  ;;  %v7606_v38 = vpop.f32.mrf.mxu0 }
 0x12e   :  { %6311 = vmatmul.mubr.f32.gmra.mxu1 %v2462_v29  ;;  %v7608_v39 = vpop.f32.mrf.mxu1 }
 0x12f   :  { %6313 = vmatprep.mubr.f32.mxu1 %v2463_v32 }
 0x130   :  { %6252 = vmatmul.mubr.f32.gmra.mxu0 %v2202_v35  ;;  %v5854_v41 = vpop.f32.mrf.mxu0 }
 0x131   :  { %v814_v42 = vadd.f32 %v5854_v41, %v7415_v53 }
 0x132   :  { %6314 = vmatmul.mubr.f32.gmra.mxu1 %v2464_v40  ;;  %v5916_v43 = vpop.f32.mrf.mxu1  ;;  %v7614_v45 = vpop.f32.mrf.mxu0 }
 0x133   :  { %v7616_v48 = vadd.f32 %v5916_v43, %v814_v42 }
 0x134   :  { %v7618_v49 = vpop.f32.mrf.mxu1 }
 0x135   :  { %v5857_v50 = vpop.f32.mrf.mxu0 }
 0x136   :  { %v816_v51 = vadd.f32 %v5857_v50, %v7433_v2 }
 0x137   :  { %v5919_v52 = vpop.f32.mrf.mxu1  ;;  %v7621_v54 = vpop.f32.mrf.mxu0 }
 0x138   :  { %v7623_v55 = vadd.f32 %v5919_v52, %v816_v51 }
 0x139   :  { %v7625_v60 = vpop.f32.mrf.mxu1 }
 0x13a   :  { %v5860_v62 = vpop.f32.mrf.mxu0 }
 0x13b   :  { %v818_v53 = vadd.f32 %v5860_v62, %v7448_v13  ;;  %v3051_v62 = vld [vmem:[#allocation6 + $0x78] sm:$0xff] }
 0x13c   :  { %v7628_v0 = vpop.f32.mrf.mxu0  ;;  %6316 = vmatprep.subr.mxu0 %v3051_v62 }
 0x13d   :  { %v5922_v63 = vpop.f32.mrf.mxu1  ;;  %6317 = vmatpush3.msra.mxu0 %v3051_v62  ;;  %v3046_v62 = vld [vmem:[#allocation6 + $0x50] sm:$0xff] }
 0x13e   :  { %v7630_v1 = vadd.f32 %v5922_v63, %v818_v53  ;;  %v3313_v53 = vld [vmem:[#allocation6 + $0xf8] sm:$0xff] }
 0x13f   :  { %v7632_v4 = vpop.f32.mrf.mxu1  ;;  %6378 = vmatprep.subr.mxu1 %v3313_v53 }
 0x140   :  { %v5863_v6 = vpop.f32.mrf.mxu0  ;;  %6379 = vmatpush3.msra.mxu1 %v3313_v53  ;;  %v3308_v53 = vld [vmem:[#allocation6 + $0xd0] sm:$0xff] }
 0x141   :  { %v820_v2 = vadd.f32 %v5863_v6, %v7472_v24  ;;  %v5925_v9 = vpop.f32.mrf.mxu1  ;;  %v3050_v6 = vld [vmem:[#allocation6 + $0x70] sm:$0xff] }
 0x142   :  { %v7635_v11 = vpop.f32.mrf.mxu0  ;;  %6318 = vmatprep.subr.mxu0 %v3050_v6 }
 0x143   :  { %v7637_v12 = vadd.f32 %v5925_v9, %v820_v2  ;;  %v7639_v15 = vpop.f32.mrf.mxu1  ;;  %v3312_v2 = vld [vmem:[#allocation6 + $0xf0] sm:$0xff]  ;;  %6319 = vmatpush3.msra.mxu0 %v3050_v6 }
 0x144   :  { %6380 = vmatprep.subr.mxu1 %v3312_v2 }
 0x145   :  { %v5866_v17 = vpop.f32.mrf.mxu0  ;;  %6381 = vmatpush3.msra.mxu1 %v3312_v2 }
 0x146   :  { %v822_v13 = vadd.f32 %v5866_v17, %v7493_v34  ;;  %v3049_v17 = vld [vmem:[#allocation6 + $0x68] sm:$0xff] }
 0x147   :  { %v7642_v18 = vpop.f32.mrf.mxu0  ;;  %v5928_v19 = vpop.f32.mrf.mxu1  ;;  %6320 = vmatprep.subr.mxu0 %v3049_v17 }
 0x148   :  { %v7644_v21 = vadd.f32 %v5928_v19, %v822_v13  ;;  %v3311_v13 = vld [vmem:[#allocation6 + $0xe8] sm:$0xff]  ;;  %6321 = vmatpush3.msra.mxu0 %v3049_v17 }
 0x149   :  { %v7646_v25 = vpop.f32.mrf.mxu1  ;;  %6382 = vmatprep.subr.mxu1 %v3311_v13 }
 0x14a   :  { %v5869_v28 = vpop.f32.mrf.mxu0  ;;  %6383 = vmatpush3.msra.mxu1 %v3311_v13  ;;  %v3044_v13 = vld [vmem:[#allocation6 + $0x40] sm:$0xff] }
 0x14b   :  { %v824_v24 = vadd.f32 %v5869_v28, %v7514_v44 }
 0x14c   :  { %v5931_v29 = vpop.f32.mrf.mxu1  ;;  %v7649_v30 = vpop.f32.mrf.mxu0 }
 0x14d   :  { %v7651_v31 = vadd.f32 %v5931_v29, %v824_v24  ;;  %v3048_v29 = vld [vmem:[#allocation6 + $0x60] sm:$0xff] }
 0x14e   :  { %v7653_v32 = vpop.f32.mrf.mxu1  ;;  %6322 = vmatprep.subr.mxu0 %v3048_v29 }
 0x14f   :  { %v5872_v35 = vpop.f32.mrf.mxu0  ;;  %6323 = vmatpush3.msra.mxu0 %v3048_v29 }
 0x150   :  { %v826_v34 = vadd.f32 %v5872_v35, %v7538_v58  ;;  %v3310_v35 = vld [vmem:[#allocation6 + $0xe0] sm:$0xff] }
 0x151   :  { %v5934_v40 = vpop.f32.mrf.mxu1  ;;  %v7656_v41 = vpop.f32.mrf.mxu0  ;;  %6384 = vmatprep.subr.mxu1 %v3310_v35 }
 0x152   :  { %v7658_v42 = vadd.f32 %v5934_v40, %v826_v34  ;;  %6385 = vmatpush3.msra.mxu1 %v3310_v35  ;;  %v3047_v40 = vld [vmem:[#allocation6 + $0x58] sm:$0xff] }
 0x153   :  { %v7660_v43 = vpop.f32.mrf.mxu1  ;;  %6324 = vmatprep.subr.mxu0 %v3047_v40 }
 0x154   :  { %v5875_v50 = vpop.f32.mrf.mxu0  ;;  %6325 = vmatpush3.msra.mxu0 %v3047_v40  ;;  %v3043_v40 = vld [vmem:[#allocation6 + $0x38] sm:$0xff] }
 0x155   :  { %v828_v44 = vadd.f32 %v5875_v50, %v7559_v7  ;;  %v3309_v50 = vld [vmem:[#allocation6 + $0xd8] sm:$0xff]  ;;  %6326 = vmatprep.subr.mxu0 %v3046_v62 }
 0x156   :  { %v7663_v52 = vpop.f32.mrf.mxu0  ;;  %6386 = vmatprep.subr.mxu1 %v3309_v50  ;;  %6327 = vmatpush3.msra.mxu0 %v3046_v62 }
 0x157   :  { %v5937_v51 = vpop.f32.mrf.mxu1  ;;  %6387 = vmatpush3.msra.mxu1 %v3309_v50  ;;  %v3305_v50 = vld [vmem:[#allocation6 + $0xb8] sm:$0xff] }
 0x158   :  { %v7665_v63 = vadd.f32 %v5937_v51, %v828_v44  ;;  %6388 = vmatprep.subr.mxu1 %v3308_v53 }
 0x159   :  { %v7667_v58 = vpop.f32.mrf.mxu1  ;;  %6389 = vmatpush3.msra.mxu1 %v3308_v53  ;;  %v3042_v53 = vld [vmem:[#allocation6 + $0x30] sm:$0xff] }
 0x15a   :  { %8575 = vst [vmem:[#allocation10_spill] sm:$0xff] %v7667_v58  ;;  %v5878_v9 = vpop.f32.mrf.mxu0 }
 0x15b   :  { %v830_v7 = vadd.f32 %v5878_v9, %v7580_v20  ;;  %v5940_v19 = vpop.f32.mrf.mxu1  ;;  %v3045_v9 = vld [vmem:[#allocation6 + $0x48] sm:$0xff] }
 0x15c   :  { %v7670_v28 = vpop.f32.mrf.mxu0  ;;  %6328 = vmatprep.subr.mxu0 %v3045_v9 }
 0x15d   :  { %v7672_v24 = vadd.f32 %v5940_v19, %v830_v7  ;;  %v7674_v34 = vpop.f32.mrf.mxu1  ;;  %v3307_v7 = vld [vmem:[#allocation6 + $0xc8] sm:$0xff]  ;;  %6329 = vmatpush3.msra.mxu0 %v3045_v9  ;;  %v3306_v19 = vld [vmem:[#allocation6 + $0xc0] sm:$0xff]  ;;  %v6916_v9 = vmov 0.0  }
 0x15e   :  { %8576 = vst [vmem:[#allocation11_spill] sm:$0xff] %v7674_v34  ;;  %6390 = vmatprep.subr.mxu1 %v3307_v7  ;;  %6330 = vmatprep.subr.mxu0 %v3044_v13  ;;  %2936 = vst [vmem:[#allocation3 + $0x8] sm:$0xff] %v6916_v9 }
 0x15f   :  { %v5881_v20 = vpop.f32.mrf.mxu0  ;;  %6391 = vmatpush3.msra.mxu1 %v3307_v7  ;;  %6331 = vmatpush3.msra.mxu0 %v3044_v13  ;;  %2937 = vst [vmem:[#allocation3 + $0x10] sm:$0xff] %v6916_v9  ;;  %2935 = vst [vmem:[#allocation3] sm:$0xff] %v6916_v9  ;;  %v3041_v13 = vld [vmem:[#allocation6 + $0x28] sm:$0xff] }
 0x160   :  { %v832_v44 = vadd.f32 %v5881_v20, %v7601_v33  ;;  %6392 = vmatprep.subr.mxu1 %v3306_v19  ;;  %6332 = vmatprep.subr.mxu0 %v3043_v40  ;;  %2938 = vst [vmem:[#allocation3 + $0x18] sm:$0xff] %v6916_v9  ;;  %2939 = vst [vmem:[#allocation3 + $0x20] sm:$0xff] %v6916_v9 }
 0x161   :  { %v7677_v51 = vpop.f32.mrf.mxu0  ;;  %v5943_v6 = vpop.f32.mrf.mxu1  ;;  %6393 = vmatpush3.msra.mxu1 %v3306_v19  ;;  %6333 = vmatpush3.msra.mxu0 %v3043_v40  ;;  %2940 = vst [vmem:[#allocation3 + $0x28] sm:$0xff] %v6916_v9  ;;  %2941 = vst [vmem:[#allocation3 + $0x30] sm:$0xff] %v6916_v9  ;;  %v3303_v19 = vld [vmem:[#allocation6 + $0xa8] sm:$0xff] }
 0x162   :  { %v7679_v2 = vadd.f32 %v5943_v6, %v832_v44  ;;  %6394 = vmatprep.subr.mxu1 %v3305_v50  ;;  %v3304_v6 = vld [vmem:[#allocation6 + $0xb0] sm:$0xff]  ;;  %2942 = vst [vmem:[#allocation3 + $0x38] sm:$0xff] %v6916_v9  ;;  %2943 = vst [vmem:[#allocation3 + $0x40] sm:$0xff] %v6916_v9  ;;  %6334 = vmatprep.subr.mxu0 %v3042_v53 }
 0x163   :  { %v7681_v17 = vpop.f32.mrf.mxu1  ;;  %6395 = vmatpush3.msra.mxu1 %v3305_v50  ;;  %2944 = vst [vmem:[#allocation3 + $0x48] sm:$0xff] %v6916_v9  ;;  %2945 = vst [vmem:[#allocation3 + $0x50] sm:$0xff] %v6916_v9  ;;  %6335 = vmatpush3.msra.mxu0 %v3042_v53  ;;  %v3040_v50 = vld [vmem:[#allocation6 + $0x20] sm:$0xff] }
 0x164   :  { %v5978_v33 = vpop.f32.mrf.mxu0  ;;  %2946 = vst [vmem:[#allocation3 + $0x58] sm:$0xff] %v6916_v9  ;;  %2947 = vst [vmem:[#allocation3 + $0x60] sm:$0xff] %v6916_v9  ;;  %6396 = vmatprep.subr.mxu1 %v3304_v6  ;;  %6336 = vmatprep.subr.mxu0 %v3041_v13 }
 0x165   :  { %v1338_v29 = vadd.f32 %v5978_v33, %v7616_v48  ;;  %2948 = vst [vmem:[#allocation3 + $0x68] sm:$0xff] %v6916_v9  ;;  %2949 = vst [vmem:[#allocation3 + $0x70] sm:$0xff] %v6916_v9  ;;  %6397 = vmatpush3.msra.mxu1 %v3304_v6  ;;  %6337 = vmatpush3.msra.mxu0 %v3041_v13 }
 0x166   :  { %v6040_v35 = vpop.f32.mrf.mxu1  ;;  %v7684_v20 = vpop.f32.mrf.mxu0  ;;  %2950 = vst [vmem:[#allocation3 + $0x78] sm:$0xff] %v6916_v9  ;;  %2951 = vst [vmem:[#allocation3 + $0x80] sm:$0xff] %v6916_v9  ;;  %6398 = vmatprep.subr.mxu1 %v3303_v19  ;;  %6338 = vmatprep.subr.mxu0 %v3040_v50 }
 0x167   :  { %v7686_v44 = vadd.f32 %v6040_v35, %v1338_v29  ;;  %2952 = vst [vmem:[#allocation3 + $0x88] sm:$0xff] %v6916_v9  ;;  %2953 = vst [vmem:[#allocation3 + $0x90] sm:$0xff] %v6916_v9  ;;  %6399 = vmatpush3.msra.mxu1 %v3303_v19  ;;  %6339 = vmatpush3.msra.mxu0 %v3040_v50  ;;  %v3039_v19 = vld [vmem:[#allocation6 + $0x18] sm:$0xff]  ;;  %v3300_v50 = vld [vmem:[#allocation6 + $0x90] sm:$0xff] }
 0x168   :  { %v7688_v62 = vpop.f32.mrf.mxu1  ;;  %2954 = vst [vmem:[#allocation3 + $0x98] sm:$0xff] %v6916_v9  ;;  %2955 = vst [vmem:[#allocation3 + $0xa0] sm:$0xff] %v6916_v9  ;;  %v3302_v9 = vld [vmem:[#allocation6 + $0xa0] sm:$0xff]  ;;  %6340 = vmatprep.subr.mxu0 %v3039_v19 }
 0x169   :  { %v5981_v48 = vpop.f32.mrf.mxu0  ;;  %6400 = vmatprep.subr.mxu1 %v3302_v9  ;;  %6341 = vmatpush3.msra.mxu0 %v3039_v19 }
 0x16a   :  { %v1340_v7 = vadd.f32 %v5981_v48, %v7623_v55  ;;  %6401 = vmatpush3.msra.mxu1 %v3302_v9 }
 0x16b   :  { %v6043_v33 = vpop.f32.mrf.mxu1  ;;  %v7691_v29 = vpop.f32.mrf.mxu0 }
 0x16c   :  { %v7693_v35 = vadd.f32 %v6043_v33, %v1340_v7 }
 0x16d   :  { %v7695_v40 = vpop.f32.mrf.mxu1 }
 0x16e   :  { %8577 = vst [vmem:[#allocation12_spill] sm:$0xff] %v7693_v35  ;;  %8578 = vst [vmem:[#allocation13_spill] sm:$0xff] %v7695_v40  ;;  %v5984_v34 = vpop.f32.mrf.mxu0  ;;  %v3301_v35 = vld [vmem:[#allocation6 + $0x98] sm:$0xff] }
 0x16f   :  { %v1342_v55 = vadd.f32 %v5984_v34, %v7630_v1  ;;  %6402 = vmatprep.subr.mxu1 %v3301_v35  ;;  %v3038_v34 = vld [vmem:[#allocation6 + $0x10] sm:$0xff] }
 0x170   :  { %v7698_v6 = vpop.f32.mrf.mxu0  ;;  %6403 = vmatpush3.msra.mxu1 %v3301_v35  ;;  %6342 = vmatprep.subr.mxu0 %v3038_v34  ;;  %v3036_v35 = vld [vmem:[#allocation6] sm:$0xff] }
 0x171   :  { %v6046_v53 = vpop.f32.mrf.mxu1  ;;  %6404 = vmatprep.subr.mxu1 %v3300_v50  ;;  %6343 = vmatpush3.msra.mxu0 %v3038_v34 }
 0x172   :  { %v7700_v48 = vadd.f32 %v6046_v53, %v1342_v55  ;;  %6405 = vmatpush3.msra.mxu1 %v3300_v50  ;;  %v3299_v53 = vld [vmem:[#allocation6 + $0x88] sm:$0xff] }
 0x173   :  { %v7702_v7 = vpop.f32.mrf.mxu1  ;;  %6406 = vmatprep.subr.mxu1 %v3299_v53 }
 0x174   :  { %8579 = vst [vmem:[#allocation14_spill] sm:$0xff] %v7700_v48  ;;  %8580 = vst [vmem:[#allocation15_spill] sm:$0xff] %v7702_v7  ;;  %v5987_v33 = vpop.f32.mrf.mxu0  ;;  %6407 = vmatpush3.msra.mxu1 %v3299_v53 }
 0x175   :  { %v1344_v13 = vadd.f32 %v5987_v33, %v7637_v12  ;;  %v6049_v40 = vpop.f32.mrf.mxu1  ;;  %v3037_v12 = vld [vmem:[#allocation6 + $0x8] sm:$0xff] }
 0x176   :  { %v7705_v58 = vpop.f32.mrf.mxu0  ;;  %6344 = vmatprep.subr.mxu0 %v3037_v12 }
 0x177   :  { %v7707_v1 = vadd.f32 %v6049_v40, %v1344_v13  ;;  %v7709_v9 = vpop.f32.mrf.mxu1  ;;  %6345 = vmatpush3.msra.mxu0 %v3037_v12  ;;  %v3298_v40 = vld [vmem:[#allocation6 + $0x80] sm:$0xff] }
 0x178   :  { %8582 = vst [vmem:[#allocation17_spill] sm:$0xff] %v7709_v9  ;;  %6346 = vmatprep.subr.mxu0 %v3036_v35  ;;  %6408 = vmatprep.subr.mxu1 %v3298_v40 }
 0x179   :  { %8581 = vst [vmem:[#allocation16_spill] sm:$0xff] %v7707_v1  ;;  %v5990_v55 = vpop.f32.mrf.mxu0  ;;  %6347 = vmatpush3.msra.mxu0 %v3036_v35  ;;  %6409 = vmatpush3.msra.mxu1 %v3298_v40  ;;  %v7728_v35 = vld [vmem:[#allocation6 + $0x1f8] sm:$0xff] }
 0x17a   :  { %v1346_v33 = vadd.f32 %v5990_v55, %v7644_v21  ;;  %8588 = vst [vmem:[#allocation23_spill] sm:$0xff] %v7728_v35  ;;  %6502 = vmatprep.subr.mxu1 %v7728_v35 }
 0x17b   :  { %v7712_v48 = vpop.f32.mrf.mxu0  ;;  %v6052_v13 = vpop.f32.mrf.mxu1 }
 0x17c   :  { %8583 = vst [vmem:[#allocation18_spill] sm:$0xff] %v7712_v48  ;;  %v7714_v19 = vadd.f32 %v6052_v13, %v1346_v33  ;;  %v7726_v33 = vld [vmem:[#allocation6 + $0x178] sm:$0xff] }
 0x17d   :  { %v7716_v34 = vpop.f32.mrf.mxu1  ;;  %8587 = vst [vmem:[#allocation22_spill] sm:$0xff] %v7726_v33  ;;  %6440 = vmatprep.subr.mxu0 %v7726_v33 }
 0x17e   :  { %8584 = vst [vmem:[#allocation19_spill] sm:$0xff] %v7714_v19  ;;  %v5993_v50 = vpop.f32.mrf.mxu0  ;;  %v569_v19 = vadd.f32 %v7608_v39, %v7606_v38 }
 0x17f   :  { %v1348_v21 = vadd.f32 %v5993_v50, %v7651_v31 }
 0x180   :  { %v6055_v55 = vpop.f32.mrf.mxu1  ;;  %v7719_v1 = vpop.f32.mrf.mxu0 }
 0x181   :  { %v7721_v9 = vadd.f32 %v6055_v55, %v1348_v21 }
 0x182   :  { %v7723_v12 = vpop.f32.mrf.mxu1 }
 0x183   :  { %8585 = vst [vmem:[#allocation20_spill] sm:$0xff] %v7721_v9  ;;  %8586 = vst [vmem:[#allocation21_spill] sm:$0xff] %v7723_v12  ;;  %v5996_v53 = vpop.f32.mrf.mxu0 }
 0x184   :  { %v1350_v7 = vadd.f32 %v5996_v53, %v7658_v42 }
 0x185   :  { %v6058_v48 = vpop.f32.mrf.mxu1  ;;  %v7730_v40 = vpop.f32.mrf.mxu0 }
 0x186   :  { %v7734_v31 = vadd.f32 %v6058_v48, %v1350_v7  ;;  %v831_v48 = vadd.f32 %v7677_v51, %v569_v19 }
 0x187   :  { %v7736_v13 = vpop.f32.mrf.mxu1 }
 0x188   :  { %8589 = vst [vmem:[#allocation24_spill] sm:$0xff] %v7734_v31  ;;  %8590 = vst [vmem:[#allocation25_spill] sm:$0xff] %v7736_v13  ;;  %v5999_v50 = vpop.f32.mrf.mxu0 }
 0x189   :  { %v1352_v21 = vadd.f32 %v5999_v50, %v7665_v63 }
 0x18a   :  { %v7739_v42 = vpop.f32.mrf.mxu0 }
 0x18b   :  { %v6061_v55 = vpop.f32.mrf.mxu1 }
 0x18c   :  { %v7741_v53 = vadd.f32 %v6061_v55, %v1352_v21  ;;  %v1093_v21 = vadd.f32 %v7681_v17, %v831_v48 }
 0x18d   :  { %v7743_v9 = vpop.f32.mrf.mxu1 }
 0x18e   :  { %8591 = vst [vmem:[#allocation26_spill] sm:$0xff] %v7741_v53  ;;  %8592 = vst [vmem:[#allocation27_spill] sm:$0xff] %v7743_v9  ;;  %v6002_v33 = vpop.f32.mrf.mxu0 }
 0x18f   :  { %v1354_v35 = vadd.f32 %v6002_v33, %v7672_v24  ;;  %v6064_v7 = vpop.f32.mrf.mxu1 }
 0x190   :  { %v7749_v31 = vpop.f32.mrf.mxu0 }
 0x191   :  { %v7751_v13 = vadd.f32 %v6064_v7, %v1354_v35  ;;  %v7753_v63 = vpop.f32.mrf.mxu1 }
 0x192   :  { %8594 = vst [vmem:[#allocation29_spill] sm:$0xff] %v7753_v63 }
 0x193   :  { %8593 = vst [vmem:[#allocation28_spill] sm:$0xff] %v7751_v13  ;;  %v6005_v50 = vpop.f32.mrf.mxu0 }
 0x194   :  { %v1356_v55 = vadd.f32 %v6005_v50, %v7679_v2 }
 0x195   :  { %v1328_v53 = vpop.f32.mrf.mxu0  ;;  %v6067_v9 = vpop.f32.mrf.mxu1 }
 0x196   :  { %v1355_v38 = vadd.f32 %v1328_v53, %v1093_v21  ;;  %v7757_v39 = vadd.f32 %v6067_v9, %v1356_v55 }
 0x197   :  { %v1590_v24 = vpop.f32.mrf.mxu1 }
 0x198   :  { %8595 = vst [vmem:[#allocation30_spill] sm:$0xff] %v7757_v39  ;;  %v7759_v33 = vadd.f32 %v1590_v24, %v1355_v38  ;;  %v6102_v51 = vpop.f32.mrf.mxu0 }
 0x19a   :  { %8596 = vst [vmem:[#allocation31_spill] sm:$0xff] %v7759_v33  ;;  %v7761_v19 = vpop.f32.mrf.mxu1  ;;  %v7763_v35 = vpop.f32.mrf.mxu0 }
 0x19c   :  { %v7765_v7 = vpop.f32.mrf.mxu1 }
 0x19d   :  { %v7767_v13 = vpop.f32.mrf.mxu0 }
 0x19f   :  { %v7769_v17 = vpop.f32.mrf.mxu1  ;;  %v7771_v2 = vpop.f32.mrf.mxu0 }
 0x1a0   :  { %8597 = vst [vmem:[#allocation32_spill] sm:$0xff] %v7769_v17 }
 0x1a1   :  { %v7773_v48 = vpop.f32.mrf.mxu1 }
 0x1a2   :  { %8598 = vst [vmem:[#allocation33_spill] sm:$0xff] %v7773_v48  ;;  %v7775_v9 = vpop.f32.mrf.mxu0 }
 0x1a4   :  { %v7779_v50 = vpop.f32.mrf.mxu0 }
 0x1a5   :  { %v7777_v53 = vpop.f32.mrf.mxu1 }
 0x1a6   :  { %8599 = vst [vmem:[#allocation34_spill] sm:$0xff] %v7777_v53 }
 0x1a7   :  { %v7781_v21 = vpop.f32.mrf.mxu1 }
 0x1a8   :  { %8600 = vst [vmem:[#allocation35_spill] sm:$0xff] %v7781_v21  ;;  %v7783_v55 = vpop.f32.mrf.mxu0 }
 0x1a9   :  { %8601 = vst [vmem:[#allocation36_spill] sm:$0xff] %v7783_v55  ;;  %v7785_v38 = vpop.f32.mrf.mxu1 }
 0x1aa   :  { %8602 = vst [vmem:[#allocation37_spill] sm:$0xff] %v7785_v38  ;;  %v7787_v24 = vpop.f32.mrf.mxu0 }
 0x1ab   :  { %8603 = vst [vmem:[#allocation38_spill] sm:$0xff] %v7787_v24  ;;  %v7789_v33 = vpop.f32.mrf.mxu1 }
 0x1ac   :  { %8604 = vst [vmem:[#allocation39_spill] sm:$0xff] %v7789_v33 }
 0x1ad   :  { %v7791_v39 = vpop.f32.mrf.mxu0 }
 0x1ae   :  { %8605 = vst [vmem:[#allocation40_spill] sm:$0xff] %v7791_v39 }
 0x1af   :  { %v7793_v63 = vpop.f32.mrf.mxu0  ;;  %v7795_v48 = vpop.f32.mrf.mxu1 }
 0x1b0   :  { %8606 = vst [vmem:[#allocation41_spill] sm:$0xff] %v7795_v48  ;;  %v551_v48 = vadd.f32 %v7422_v57, %v7420_v56 }
 0x1b1   :  { %v7797_v17 = vpop.f32.mrf.mxu1 }
 0x1b2   :  { %8607 = vst [vmem:[#allocation42_spill] sm:$0xff] %v7797_v17  ;;  %v7799_v53 = vpop.f32.mrf.mxu0 }
 0x1b3   :  { %8608 = vst [vmem:[#allocation43_spill] sm:$0xff] %v7799_v53  ;;  %v813_v53 = vadd.f32 %v7614_v45, %v551_v48  ;;  %v559_v48 = vadd.f32 %v7500_v37, %v7498_v36  ;;  %v567_v36 = vadd.f32 %v7587_v23, %v7585_v22 }
 0x1b4   :  { %v7801_v12 = vpop.f32.mrf.mxu1  ;;  %v7803_v21 = vpop.f32.mrf.mxu0 }
 0x1b5   :  { %8609 = vst [vmem:[#allocation44_spill] sm:$0xff] %v7801_v12  ;;  %8610 = vst [vmem:[#allocation45_spill] sm:$0xff] %v7803_v21  ;;  %v1075_v56 = vadd.f32 %v7618_v49, %v813_v53  ;;  %v565_v49 = vadd.f32 %v7566_v10, %v7561_v8  ;;  %v821_v37 = vadd.f32 %v7642_v18, %v559_v48 }
 0x1b6   :  { %v7805_v55 = vpop.f32.mrf.mxu1 }
 0x1b7   :  { %8611 = vst [vmem:[#allocation46_spill] sm:$0xff] %v7805_v55  ;;  %v7807_v38 = vpop.f32.mrf.mxu0  ;;  %v553_v55 = vadd.f32 %v7440_v5, %v7435_v3  ;;  %v561_v3 = vadd.f32 %v7521_v47, %v7519_v46  ;;  %v1083_v18 = vadd.f32 %v7646_v25, %v821_v37 }
 0x1b9   :  { %v7809_v24 = vpop.f32.mrf.mxu1  ;;  %v7811_v33 = vpop.f32.mrf.mxu0  ;;  %v815_v57 = vadd.f32 %v7621_v54, %v553_v55  ;;  %v823_v47 = vadd.f32 %v7649_v30, %v561_v3  ;;  %v8620_v55 = vld [vmem:[#allocation12_spill] sm:$0xff] }
 0x1ba   :  { %8612 = vst [vmem:[#allocation47_spill] sm:$0xff] %v7809_v24  ;;  %8613 = vst [vmem:[#allocation48_spill] sm:$0xff] %v7811_v33  ;;  %v555_v24 = vadd.f32 %v7455_v16, %v7450_v14  ;;  %v1337_v14 = vadd.f32 %v7684_v20, %v1075_v56 }
 0x1bb   :  { %v7813_v39 = vpop.f32.mrf.mxu1  ;;  %v1077_v46 = vadd.f32 %v7625_v60, %v815_v57  ;;  %v1862_v60 = vadd.f32 %v6102_v51, %v7686_v44  ;;  %v8619_v51 = vld [vmem:[#allocation13_spill] sm:$0xff] }
 0x1bc   :  { %8614 = vst [vmem:[#allocation49_spill] sm:$0xff] %v7813_v39  ;;  %v7817_v17 = vpop.f32.mrf.mxu0  ;;  %v557_v39 = vadd.f32 %v7479_v27, %v7477_v26  ;;  %v563_v27 = vadd.f32 %v7545_v61, %v7540_v59  ;;  %v827_v59 = vadd.f32 %v7663_v52, %v565_v49  ;;  %v829_v61 = vadd.f32 %v7670_v28, %v567_v36  ;;  %v8623_v49 = vld [vmem:[#allocation14_spill] sm:$0xff] }
 0x1bd   :  { %v1599_v22 = vadd.f32 %v7688_v62, %v1337_v14  ;;  %v1339_v23 = vadd.f32 %v7691_v29, %v1077_v46  ;;  %v8616_v62 = vld [vmem:[#allocation10_spill] sm:$0xff]  ;;  %v1866_v36 = vadd.f32 %v7775_v9, %v8623_v49  ;;  %v8625_v46 = vld [vmem:[#allocation36_spill] sm:$0xff]  ;;  %v8641_v49 = vld [vmem:[#allocation45_spill] sm:$0xff] }
 0x1be   :  { %v7822_v21 = vpop.f32.mrf.mxu0  ;;  %v819_v5 = vadd.f32 %v7635_v11, %v557_v39  ;;  %v825_v11 = vadd.f32 %v7656_v41, %v563_v27  ;;  %v1085_v41 = vadd.f32 %v7653_v32, %v823_v47  ;;  %v1089_v29 = vadd.f32 %v8616_v62, %v827_v59  ;;  %v8618_v39 = vld [vmem:[#allocation18_spill] sm:$0xff] }
 0x1bf   :  { %v7820_v12 = vpop.f32.mrf.mxu1  ;;  %v1861_v28 = vadd.f32 %v7763_v35, %v1599_v22  ;;  %v1345_v25 = vadd.f32 %v8618_v39, %v1083_v18  ;;  %v2124_v32 = vadd.f32 %v7761_v19, %v1862_v60  ;;  %v8629_v22 = vld [vmem:[#allocation27_spill] sm:$0xff]  ;;  %v8631_v18 = vld [vmem:[#allocation38_spill] sm:$0xff] }
 0x1c0   :  { %8615 = vst [vmem:[#allocation50_spill] sm:$0xff] %v7820_v12  ;;  %v817_v12 = vadd.f32 %v7628_v0, %v555_v24  ;;  %v1081_v10 = vadd.f32 %v7639_v15, %v819_v5  ;;  %v1087_v15 = vadd.f32 %v7660_v43, %v825_v11  ;;  %v1347_v53 = vadd.f32 %v7719_v1, %v1085_v41  ;;  %v8621_v24 = vld [vmem:[#allocation15_spill] sm:$0xff]  ;;  %v8622_v5 = vld [vmem:[#allocation17_spill] sm:$0xff]  ;;  %v8627_v11 = vld [vmem:[#allocation32_spill] sm:$0xff] }
 0x1c1   :  { %v7828_v33 = vpop.f32.mrf.mxu1  ;;  %v1351_v57 = vadd.f32 %v7739_v42, %v1089_v29  ;;  %v2123_v1 = vadd.f32 %v7765_v7, %v1861_v28  ;;  %v8632_v28 = vld [vmem:[#allocation33_spill] sm:$0xff] }
 0x1c2   :  { %v7834_v45 = vpop.f32.mrf.mxu0  ;;  %v1079_v0 = vadd.f32 %v7632_v4, %v817_v12  ;;  %v1343_v52 = vadd.f32 %v7705_v58, %v1081_v10  ;;  %v8617_v12 = vld [vmem:[#allocation11_spill] sm:$0xff]  ;;  %v1864_v58 = vadd.f32 %v7767_v13, %v8620_v55  ;;  %v1349_v43 = vadd.f32 %v7730_v40, %v1087_v15  ;;  %v8624_v40 = vld [vmem:[#allocation16_spill] sm:$0xff]  ;;  %v8628_v10 = vld [vmem:[#allocation25_spill] sm:$0xff] }
 0x1c3   :  { %v7843_v16 = vpop.f32.mrf.mxu1  ;;  %v1091_v44 = vadd.f32 %v8617_v12, %v829_v61  ;;  %v1607_v13 = vadd.f32 %v7716_v34, %v1345_v25  ;;  %v1868_v42 = vadd.f32 %v8625_v46, %v8624_v40  ;;  %v8634_v25 = vld [vmem:[#allocation35_spill] sm:$0xff]  ;;  %v8637_v55 = vld [vmem:[#allocation40_spill] sm:$0xff] }
 0x1c4   :  { %v7845_v26 = vpop.f32.mrf.mxu0  ;;  %v1341_v4 = vadd.f32 %v7698_v6, %v1079_v0  ;;  %v1601_v6 = vadd.f32 %v8619_v51, %v1339_v23  ;;  %v1605_v14 = vadd.f32 %v8622_v5, %v1343_v52  ;;  %v8626_v0 = vld [vmem:[#allocation21_spill] sm:$0xff]  ;;  %v2126_v59 = vadd.f32 %v8627_v11, %v1864_v58  ;;  %v8638_v5 = vld [vmem:[#allocation39_spill] sm:$0xff]  ;;  %v8644_v11 = vld [vmem:[#allocation48_spill] sm:$0xff] }
 0x1c5   :  { %v7856_v54 = vpop.f32.mrf.mxu1  ;;  %v1353_v48 = vadd.f32 %v7749_v31, %v1091_v44  ;;  %v7904_v31 = vld [vmem:[%s8569_s2] ss:$0 sm:$0xff]  ;;  %v1611_v9 = vadd.f32 %v8628_v10, %v1349_v43  ;;  %v8633_v44 = vld [vmem:[#allocation34_spill] sm:$0xff]  ;;  %v1869_v43 = vadd.f32 %v7793_v63, %v1607_v13 }
 0x1c6   :  { %v1603_v56 = vadd.f32 %v8621_v24, %v1341_v4  ;;  %v1863_v19 = vadd.f32 %v7771_v2, %v1601_v6  ;;  %v1609_v2 = vadd.f32 %v8626_v0, %v1347_v53  ;;  %v8630_v23 = vld [vmem:[#allocation29_spill] sm:$0xff]  ;;  %v1867_v4 = vadd.f32 %v8631_v18, %v1605_v14 }
 0x1c7   :  { %v7862_v8 = vpop.f32.mrf.mxu0  ;;  %v1615_v60 = vadd.f32 %v8630_v23, %v1353_v48  ;;  %v2128_v39 = vadd.f32 %v8633_v44, %v1866_v36  ;;  %v8635_v6 = vld [vmem:[#allocation37_spill] sm:$0xff]  ;;  %v8648_v44 = vld [vmem:[#allocation47_spill] sm:$0xff] }
 0x1c8   :  { %v1865_v37 = vadd.f32 %v7779_v50, %v1603_v56  ;;  %v1613_v50 = vadd.f32 %v8629_v22, %v1351_v57  ;;  %v2125_v15 = vadd.f32 %v8632_v28, %v1863_v19  ;;  %v2130_v53 = vadd.f32 %v8635_v6, %v1868_v42  ;;  %v8640_v19 = vld [vmem:[#allocation43_spill] sm:$0xff]  ;;  %v8642_v42 = vld [vmem:[#allocation24_spill] sm:$0xff]  ;;  %v8645_v22 = vld [vmem:[#allocation42_spill] sm:$0xff] }
 0x1c9   :  { %v7870_v30 = vpop.f32.mrf.mxu0  ;;  %v7875_v20 = vpop.f32.mrf.mxu1  ;;  %v2129_v14 = vadd.f32 %v8638_v5, %v1867_v4  ;;  %v1871_v36 = vadd.f32 %v8641_v49, %v1609_v2  ;;  %v2131_v23 = vadd.f32 %v8645_v22, %v1869_v43  ;;  %v8646_v4 = vld [vmem:[#allocation44_spill] sm:$0xff]  ;;  %v1877_v49 = vadd.f32 %v7845_v26, %v1615_v60 }
 0x1ca   :  { %v2127_v51 = vadd.f32 %v8634_v25, %v1865_v37 }
 0x1cb   :  { %v7886_v35 = vpop.f32.mrf.mxu1 }
 0x1cc   :  { %v6226_v3 = vpop.f32.mrf.mxu0 }
 0x1cd   :  { %v2386_v27 = vadd.f32 %v6226_v3, %v2124_v32  ;;  %v8636_v32 = vld [vmem:[#allocation19_spill] sm:$0xff] }
 0x1ce   :  { %v6288_v47 = vpop.f32.mrf.mxu1  ;;  %v2286_v7 = vpop.f32.mrf.mxu0  ;;  %v1870_v58 = vadd.f32 %v8637_v55, %v8636_v32  ;;  %v8649_v32 = vld [vmem:[#allocation49_spill] sm:$0xff] }
 0x1cf   :  { %v2648_v34 = vadd.f32 %v6288_v47, %v2386_v27  ;;  %v2385_v61 = vadd.f32 %v2286_v7, %v2123_v1  ;;  %v8639_v1 = vld [vmem:[#allocation20_spill] sm:$0xff]  ;;  %v1874_v47 = vadd.f32 %v7807_v38, %v8642_v42  ;;  %v8643_v7 = vld [vmem:[#allocation41_spill] sm:$0xff] }
 0x1d0   :  { %v2548_v41 = vpop.f32.mrf.mxu1  ;;  %v6229_v52 = vpop.f32.mrf.mxu0  ;;  %v1872_v27 = vadd.f32 %v8640_v19, %v8639_v1  ;;  %v2132_v0 = vadd.f32 %v8643_v7, %v1870_v58  ;;  %v8651_v19 = vld [vmem:[#allocation28_spill] sm:$0xff] }
 0x1d1   :  { %v7914_v62 = vadd.f32 %v7904_v31, %v2648_v34  ;;  %v2647_v29 = vadd.f32 %v2548_v41, %v2385_v61  ;;  %v2388_v12 = vadd.f32 %v6229_v52, %v2126_v59  ;;  %v1873_v59 = vadd.f32 %v8644_v11, %v1611_v9  ;;  %v8647_v52 = vld [vmem:[#allocation46_spill] sm:$0xff] }
 0x1d2   :  { %v6291_v24 = vpop.f32.mrf.mxu1  ;;  %v2296_v56 = vpop.f32.mrf.mxu0  ;;  %v2134_v41 = vadd.f32 %v8646_v4, %v1872_v27  ;;  %v2133_v28 = vadd.f32 %v8647_v52, %v1871_v36  ;;  %v1878_v27 = vadd.f32 %v7834_v45, %v8651_v19  ;;  %v8654_v45 = vld [vmem:[#allocation31_spill] sm:$0xff] }
 0x1d3   :  { %v2756_v57 = vmul.f32 1.442695, %v7914_v62  ;;  %v7924_v48 = vadd.f32 %v7904_v31, %v2647_v29  ;;  %v2650_v3 = vadd.f32 %v6291_v24, %v2388_v12  ;;  %v2387_v37 = vadd.f32 %v2296_v56, %v2125_v15 }
 0x1d4   :  { %v2558_v40 = vpop.f32.mrf.mxu1  ;;  %v6232_v46 = vpop.f32.mrf.mxu0  ;;  %v7949_v55 = vadd.f32 %v8649_v32, %v1873_v59  ;;  %v1879_v26 = vadd.f32 %v7870_v30, %v8654_v45  ;;  %vm2735_vm0 = vcmp.gt.f32.partialorder %v7914_v62, 0.0 }
 0x1d5   :  { %6787 = vpow2.f32 %v2756_v57  ;;  %v2754_v63 = vmul.f32 1.442695, %v7924_v48  ;;  %v7934_v13 = vadd.f32 %v7904_v31, %v2650_v3  ;;  %v2649_v34 = vadd.f32 %v2558_v40, %v2387_v37  ;;  %v8652_v40 = vld [vmem:[#allocation30_spill] sm:$0xff] }
 0x1d6   :  { %v2390_v61 = vadd.f32 %v6232_v46, %v2128_v39  ;;  %v6294_v10 = vpop.f32.mrf.mxu1  ;;  %v2306_v2 = vpop.f32.mrf.mxu0  ;;  %v7946_v39 = vadd.f32 %v8648_v44, %v1874_v47  ;;  %v1875_v3 = vadd.f32 %v7822_v21, %v1613_v50  ;;  %v1880_v46 = vadd.f32 %v7862_v8, %v8652_v40 }
 0x1d7   :  { %6789 = vpow2.f32 %v2754_v63  ;;  %v2760_v18 = vmul.f32 1.442695, %v7934_v13  ;;  %v2389_v38 = vadd.f32 %v2306_v2, %v2127_v51  ;;  %v7943_v15 = vadd.f32 %v7904_v31, %v2649_v34  ;;  %v8650_v51 = vld [vmem:[#allocation26_spill] sm:$0xff] }
 0x1d8   :  { %v2652_v29 = vadd.f32 %v6294_v10, %v2390_v61  ;;  %v2568_v12 = vpop.f32.mrf.mxu1  ;;  %v6235_v9 = vpop.f32.mrf.mxu0  ;;  %v1876_v58 = vadd.f32 %v7817_v17, %v8650_v51  ;;  %v7977_v11 = vadd.f32 %v7828_v33, %v1875_v3  ;;  %v7984_v34 = vadd.f32 %v7843_v16, %v1878_v27 }
 0x1d9   :  { %6791 = vpow2.f32 %v2760_v18  ;;  %v2651_v25 = vadd.f32 %v2568_v12, %v2389_v38  ;;  %v2392_v6 = vadd.f32 %v6235_v9, %v2130_v53  ;;  %v2758_v24 = vmul.f32 1.442695, %v7943_v15 }
 0x1da   :  { %v7955_v56 = vadd.f32 %v7904_v31, %v2652_v29  ;;  %v6297_v43 = vpop.f32.mrf.mxu1  ;;  %v2316_v57 = vpop.f32.mrf.mxu0  ;;  %v7987_v61 = vadd.f32 %v7856_v54, %v1877_v49  ;;  %v7990_v22 = vadd.f32 %v7875_v20, %v1880_v46  ;;  %v7994_v4 = vadd.f32 %v7886_v35, %v1879_v26 }
 0x1db   :  { %v7959_v5 = vadd.f32 %v7904_v31, %v2651_v25  ;;  %v2654_v1 = vadd.f32 %v6297_v43, %v2392_v6  ;;  %v2391_v53 = vadd.f32 %v2316_v57, %v2129_v14  ;;  %6793 = vpow2.f32 %v2758_v24  ;;  %v8653_v14 = vld [vmem:[#allocation50_spill] sm:$0xff] }
 0x1dc   :  { %v2764_v17 = vmul.f32 1.442695, %v7955_v56  ;;  %v2578_v36 = vpop.f32.mrf.mxu1  ;;  %v6238_v37 = vpop.f32.mrf.mxu0  ;;  %v7972_v47 = vadd.f32 %v8653_v14, %v1876_v58  ;;  %vm2734_vm1 = vcmp.gt.f32.partialorder %v7924_v48, 0.0  ;;  %vm2737_vm2 = vcmp.gt.f32.partialorder %v7934_v13, 0.0 }
 0x1dd   :  { %v2762_v21 = vmul.f32 1.442695, %v7959_v5  ;;  %v7969_v50 = vadd.f32 %v7904_v31, %v2654_v1  ;;  %v2653_v42 = vadd.f32 %v2578_v36, %v2391_v53  ;;  %v2394_v60 = vadd.f32 %v6238_v37, %v2132_v0 }
 0x1de   :  { %6795 = vpow2.f32 %v2764_v17  ;;  %v6300_v63 = vpop.f32.mrf.mxu1  ;;  %v2326_v7 = vpop.f32.mrf.mxu0  ;;  %vm2736_vm3 = vcmp.gt.f32.partialorder %v7943_v15, 0.0  ;;  %vm2739_vm4 = vcmp.gt.f32.partialorder %v7955_v56, 0.0  ;;  %vm2738_vm5 = vcmp.gt.f32.partialorder %v7959_v5, 0.0 }
 0x1df   :  { %6797 = vpow2.f32 %v2762_v21  ;;  %v2768_v8 = vmul.f32 1.442695, %v7969_v50  ;;  %v7981_v59 = vadd.f32 %v7904_v31, %v2653_v42  ;;  %v2656_v30 = vadd.f32 %v6300_v63, %v2394_v60 }
 0x1e0   :  { %v2393_v10 = vadd.f32 %v2326_v7, %v2131_v23  ;;  %v2588_v0 = vpop.f32.mrf.mxu1  ;;  %v6241_v2 = vpop.f32.mrf.mxu0  ;;  %vm2741_vm6 = vcmp.gt.f32.partialorder %v7969_v50, 0.0 }
 0x1e1   :  { %6799 = vpow2.f32 %v2768_v8  ;;  %v2766_v33 = vmul.f32 1.442695, %v7981_v59  ;;  %v2396_v18 = vadd.f32 %v6241_v2, %v2134_v41  ;;  %v7998_v16 = vadd.f32 %v7904_v31, %v2656_v30 }
 0x1e2   :  { %v6788_v38 = vpop.eup %6787  ;;  %v2655_v54 = vadd.f32 %v2588_v0, %v2393_v10  ;;  %v6303_v23 = vpop.f32.mrf.mxu1  ;;  %vm2740_vm7 = vcmp.gt.f32.partialorder %v7981_v59, 0.0 }
 0x1e3   :  { %v2336_v52 = vpop.f32.mrf.mxu0  ;;  %v5044_v29 = vadd.f32 -1.0, %v6788_v38  ;;  %6801 = vpow2.f32 %v2766_v33  ;;  %v2658_v20 = vadd.f32 %v6303_v23, %v2396_v18  ;;  %v2772_v35 = vmul.f32 1.442695, %v7998_v16 }
 0x1e4   :  { %v2395_v12 = vadd.f32 %v2336_v52, %v2133_v28  ;;  %v6790_v9 = vpop.eup %6789  ;;  %v8004_v41 = vadd.f32 %v7904_v31, %v2655_v54  ;;  %v2598_v44 = vpop.f32.mrf.mxu1  ;;  %vm2743_vm8 = vcmp.gt.f32.partialorder %v7998_v16, 0.0 }
 0x1e5   :  { %v6244_v25 = vpop.f32.mrf.mxu0  ;;  %v2815_v6 = vmul.f32 1.6732632, %v5044_v29  ;;  %v5043_v32 = vadd.f32 -1.0, %v6790_v9  ;;  %v8007_v51 = vadd.f32 %v7904_v31, %v2658_v20  ;;  %6803 = vpow2.f32 %v2772_v35 }
 0x1e6   :  { %v2657_v58 = vadd.f32 %v2598_v44, %v2395_v12  ;;  %v6792_v24 = vpop.eup %6791  ;;  %v2770_v28 = vmul.f32 1.442695, %v8004_v41  ;;  %v2398_v43 = vadd.f32 %v6244_v25, %v7946_v39  ;;  %v6306_v57 = vpop.f32.mrf.mxu1  ;;  %vm2742_vm9 = vcmp.gt.f32.partialorder %v8004_v41, 0.0 }
 0x1e7   :  { %v2346_v3 = vpop.f32.mrf.mxu0  ;;  %v2835_v1 = vsel %vm2735_vm0, %v7914_v62, %v2815_v6  ;;  %v2814_v53 = vmul.f32 1.6732632, %v5043_v32  ;;  %v5046_v19 = vadd.f32 -1.0, %v6792_v24  ;;  %v2776_v49 = vmul.f32 1.442695, %v8007_v51 }
 0x1e8   :  { %v2855_v27 = vmul.f32 1.050701, %v2835_v1  ;;  %6805 = vpow2.f32 %v2770_v28  ;;  %v8018_v17 = vadd.f32 %v7904_v31, %v2657_v58  ;;  %v2608_v36 = vpop.f32.mrf.mxu1  ;;  %v6794_v39 = vpop.eup %6793  ;;  %v2660_v62 = vadd.f32 %v6306_v57, %v2398_v43 }
 0x1e9   :  { %v6247_v37 = vpop.f32.mrf.mxu0  ;;  %v2834_v40 = vsel %vm2734_vm1, %v7924_v48, %v2814_v53  ;;  %v2817_v46 = vmul.f32 1.6732632, %v5046_v19  ;;  %v2397_v21 = vadd.f32 %v2346_v3, %v7949_v55  ;;  %v5045_v14 = vadd.f32 -1.0, %v6794_v39 }
 0x1ea   :  { %2957 = vst [vmem:[#allocation3 + $0xb] sm:$0xff] %v2855_v27  ;;  %v8024_v42 = vmul.f32 1.050701, %v2834_v40  ;;  %6807 = vpow2.f32 %v2776_v49  ;;  %v6309_v45 = vpop.f32.mrf.mxu1  ;;  %v2774_v48 = vmul.f32 1.442695, %v8018_v17  ;;  %v8032_v7 = vadd.f32 %v7904_v31, %v2660_v62 }
 0x1eb   :  { %v2356_v26 = vpop.f32.mrf.mxu0  ;;  %v6796_v60 = vpop.eup %6795  ;;  %v2837_v63 = vsel %vm2737_vm2, %v7934_v13, %v2817_v46  ;;  %v2659_v55 = vadd.f32 %v2608_v36, %v2397_v21  ;;  %v2816_v10 = vmul.f32 1.6732632, %v5045_v14  ;;  %v2400_v2 = vadd.f32 %v6247_v37, %v7972_v47 }
 0x1ec   :  { %v6798_v8 = vpop.eup %6797  ;;  %2956 = vst [vmem:[#allocation3 + $0x3] sm:$0xff] %v8024_v42  ;;  %v2857_v30 = vmul.f32 1.050701, %v2837_v63  ;;  %v5048_v0 = vadd.f32 -1.0, %v6796_v60  ;;  %v2618_v33 = vpop.f32.mrf.mxu1  ;;  %6809 = vpow2.f32 %v2774_v48  ;;  %v2780_v13 = vmul.f32 1.442695, %v8032_v7 }
 0x1ed   :  { %v6250_v18 = vpop.f32.mrf.mxu0  ;;  %v5047_v38 = vadd.f32 -1.0, %v6798_v8  ;;  %v2836_v23 = vsel %vm2736_vm3, %v7943_v15, %v2816_v10  ;;  %v8042_v29 = vadd.f32 %v7904_v31, %v2659_v55  ;;  %v2662_v20 = vadd.f32 %v6309_v45, %v2400_v2  ;;  %v3574_v60 = vld [vmem:[#allocation6 + $0x170] sm:$0xff]  ;;  %v8655_v10 = vld [vmem:[#allocation22_spill] sm:$0xff] }
 0x1ee   :  { %v6800_v54 = vpop.eup %6799  ;;  %2959 = vst [vmem:[#allocation3 + $0x1b] sm:$0xff] %v2857_v30  ;;  %v2819_v52 = vmul.f32 1.6732632, %v5048_v0  ;;  %v6312_v47 = vpop.f32.mrf.mxu1  ;;  %v8044_v9 = vmul.f32 1.050701, %v2836_v23  ;;  %6811 = vpow2.f32 %v2780_v13  ;;  %v2402_v49 = vadd.f32 %v6250_v18, %v7984_v34  ;;  %v3836_v63 = vld [vmem:[#allocation6 + $0x1f0] sm:$0xff] }
 0x1ef   :  { %v2366_v12 = vpop.f32.mrf.mxu0  ;;  %v2818_v35 = vmul.f32 1.6732632, %v5047_v38  ;;  %v5050_v44 = vadd.f32 -1.0, %v6800_v54  ;;  %v2778_v15 = vmul.f32 1.442695, %v8042_v29  ;;  %v8052_v32 = vadd.f32 %v7904_v31, %v2662_v20  ;;  %v8656_v18 = vld [vmem:[#allocation23_spill] sm:$0xff] }
 0x1f0   :  { %v6802_v25 = vpop.eup %6801  ;;  %v2839_v6 = vsel %vm2739_vm4, %v7955_v56, %v2819_v52  ;;  %2958 = vst [vmem:[#allocation3 + $0x13] sm:$0xff] %v8044_v9  ;;  %v2628_v1 = vpop.f32.mrf.mxu1  ;;  %v2401_v62 = vadd.f32 %v2366_v12, %v7987_v61  ;;  %v2664_v45 = vadd.f32 %v6312_v47, %v2402_v49  ;;  %v3573_v38 = vld [vmem:[#allocation6 + $0x168] sm:$0xff]  ;;  %vm2745_vm10 = vcmp.gt.f32.partialorder %v8007_v51, 0.0 }
 0x1f1   :  { %v6253_v58 = vpop.f32.mrf.mxu0  ;;  %v8055_v24 = vmul.f32 1.050701, %v2839_v6  ;;  %v2838_v28 = vsel %vm2738_vm5, %v7959_v5, %v2818_v35  ;;  %v2821_v43 = vmul.f32 1.6732632, %v5050_v44  ;;  %v5049_v57 = vadd.f32 -1.0, %v6802_v25  ;;  %v3835_v44 = vld [vmem:[#allocation6 + $0x1e8] sm:$0xff] }
 0x1f2   :  { %v8060_v3 = vmul.f32 1.050701, %v2838_v28  ;;  %6813 = vpow2.f32 %v2778_v15  ;;  %v2784_v56 = vmul.f32 1.442695, %v8052_v32  ;;  %v6804_v53 = vpop.eup %6803  ;;  %v2399_v5 = vadd.f32 %v2356_v26, %v7977_v11  ;;  %v6315_v30 = vpop.f32.mrf.mxu1 }
 0x1f3   :  { %2961 = vst [vmem:[#allocation3 + $0x2b] sm:$0xff] %v8055_v24  ;;  %v2841_v19 = vsel %vm2741_vm6, %v7969_v50, %v2821_v43  ;;  %v2820_v27 = vmul.f32 1.6732632, %v5049_v57  ;;  %v3016_v36 = vld [vmem:[#allocation3] sm:$0xff]  ;;  %v3017_v39 = vld [vmem:[#allocation3 + $0x8] sm:$0xff]  ;;  %v5052_v46 = vadd.f32 -1.0, %v6804_v53  ;;  %v2376_v21 = vpop.f32.mrf.mxu0  ;;  %v2404_v26 = vadd.f32 %v6253_v58, %v7990_v22 }
 0x1f4   :  { %v3277_v37 = vld [vmem:[#allocation3 + $0x1] sm:$0xff]  ;;  %2960 = vst [vmem:[#allocation3 + $0x23] sm:$0xff] %v8060_v3  ;;  %v8071_v40 = vmul.f32 1.050701, %v2841_v19  ;;  %6815 = vpow2.f32 %v2784_v56  ;;  %6348 = vmatprep.mubr.f32.mxu0 %v3016_v36  ;;  %v3278_v50 = vld [vmem:[#allocation3 + $0x9] sm:$0xff]  ;;  %v2661_v34 = vadd.f32 %v2618_v33, %v2399_v5  ;;  %v2663_v8 = vadd.f32 %v2628_v1, %v2401_v62  ;;  %v2638_v56 = vpop.f32.mrf.mxu1 }
 0x1f5   :  { %6410 = vmatprep.mubr.f32.mxu1 %v3277_v37  ;;  %v6806_v14 = vpop.eup %6805  ;;  %v2840_v11 = vsel %vm2740_vm7, %v7981_v59, %v2820_v27  ;;  %6349 = vmatmul.mubr.f32.vlgmr.msra.gmra.mxu0 %v3017_v39  ;;  %v2823_v61 = vmul.f32 1.6732632, %v5052_v46  ;;  %v8086_v22 = vadd.f32 %v7904_v31, %v2664_v45  ;;  %v2666_v2 = vadd.f32 %v6315_v30, %v2404_v26  ;;  %v3572_v1 = vld [vmem:[#allocation6 + $0x160] sm:$0xff]  ;;  %v3571_v45 = vld [vmem:[#allocation6 + $0x158] sm:$0xff] }
 0x1f6   :  { %2963 = vst [vmem:[#allocation3 + $0x3b] sm:$0xff] %v8071_v40  ;;  %v8079_v48 = vmul.f32 1.050701, %v2840_v11  ;;  %v5051_v55 = vadd.f32 -1.0, %v6806_v14  ;;  %6411 = vmatmul.mubr.f32.vlgmr.msra.gmra.mxu1 %v3278_v50  ;;  %6441 = vmatpush3.msra.mxu0 %v8655_v10  ;;  %v8083_v59 = vadd.f32 %v7904_v31, %v2661_v34  ;;  %v2403_v33 = vadd.f32 %v2376_v21, %v7994_v4  ;;  %v3833_v26 = vld [vmem:[#allocation6 + $0x1d8] sm:$0xff] }
 0x1f7   :  { %v6808_v0 = vpop.eup %6807  ;;  %6503 = vmatpush3.msra.mxu1 %v8656_v18  ;;  %v2843_v13 = vsel %vm2743_vm8, %v7998_v16, %v2823_v61  ;;  %v8095_v52 = vadd.f32 %v7904_v31, %v2663_v8  ;;  %v3018_v20 = vld [vmem:[#allocation3 + $0x10] sm:$0xff]  ;;  %6442 = vmatprep.subr.mxu0 %v3574_v60  ;;  %v3019_v12 = vld [vmem:[#allocation3 + $0x18] sm:$0xff]  ;;  %v2788_v15 = vmul.f32 1.442695, %v8086_v22  ;;  %v8112_v27 = vadd.f32 %v7904_v31, %v2666_v2 }
 0x1f8   :  { %2962 = vst [vmem:[#allocation3 + $0x33] sm:$0xff] %v8079_v48  ;;  %v2822_v54 = vmul.f32 1.6732632, %v5051_v55  ;;  %v5054_v23 = vadd.f32 -1.0, %v6808_v0  ;;  %v3279_v47 = vld [vmem:[#allocation3 + $0x11] sm:$0xff]  ;;  %6504 = vmatprep.subr.mxu1 %v3836_v63  ;;  %6351 = vmatprep.mubr.f32.mxu0 %v3018_v20  ;;  %v3280_v58 = vld [vmem:[#allocation3 + $0x19] sm:$0xff]  ;;  %v2665_v5 = vadd.f32 %v2638_v56, %v2403_v33 }
 0x1f9   :  { %v8097_v4 = vmul.f32 1.050701, %v2843_v13  ;;  %v2782_v35 = vmul.f32 1.442695, %v8083_v59  ;;  %6413 = vmatprep.mubr.f32.mxu1 %v3279_v47  ;;  %v6810_v16 = vpop.eup %6809  ;;  %6352 = vmatmul.mubr.f32.gmra.mxu0 %v3019_v12  ;;  %v2786_v57 = vmul.f32 1.442695, %v8095_v52 }
 0x1fa   :  { %v2842_v25 = vsel %vm2742_vm9, %v8004_v41, %v2822_v54  ;;  %v2825_v6 = vmul.f32 1.6732632, %v5054_v23  ;;  %6505 = vmatpush3.msra.mxu1 %v3836_v63  ;;  %v5053_v43 = vadd.f32 -1.0, %v6810_v16  ;;  %6443 = vmatpush3.msra.mxu0 %v3574_v60  ;;  %vm2744_vm11 = vcmp.gt.f32.partialorder %v8018_v17, 0.0  ;;  %v3832_v18 = vld [vmem:[#allocation6 + $0x1d0] sm:$0xff] }
 0x1fb   :  { %2965 = vst [vmem:[#allocation3 + $0x4b] sm:$0xff] %v8097_v4  ;;  %v8105_v28 = vmul.f32 1.050701, %v2842_v25  ;;  %6817 = vpow2.f32 %v2782_v35  ;;  %6414 = vmatmul.mubr.f32.gmra.mxu1 %v3280_v58  ;;  %v3020_v41 = vld [vmem:[#allocation3 + $0x20] sm:$0xff]  ;;  %v6812_v53 = vpop.eup %6811  ;;  %6444 = vmatprep.subr.mxu0 %v3573_v38  ;;  %v3021_v36 = vld [vmem:[#allocation3 + $0x28] sm:$0xff]  ;;  %v8120_v50 = vadd.f32 %v7904_v31, %v2665_v5  ;;  %vm2747_vm12 = vcmp.gt.f32.partialorder %v8032_v7, 0.0 }
 0x1fc   :  { %v2845_v19 = vsel %vm2745_vm10, %v8007_v51, %v2825_v6  ;;  %6819 = vpow2.f32 %v2788_v15  ;;  %6506 = vmatprep.subr.mxu1 %v3835_v44  ;;  %v3281_v49 = vld [vmem:[#allocation3 + $0x21] sm:$0xff]  ;;  %v3282_v37 = vld [vmem:[#allocation3 + $0x29] sm:$0xff]  ;;  %v2824_v46 = vmul.f32 1.6732632, %v5053_v43  ;;  %v5056_v62 = vadd.f32 -1.0, %v6812_v53  ;;  %6445 = vmatpush3.msra.mxu0 %v3573_v38 }
 0x1fd   :  { %2964 = vst [vmem:[#allocation3 + $0x43] sm:$0xff] %v8105_v28  ;;  %v8115_v39 = vmul.f32 1.050701, %v2845_v19  ;;  %6821 = vpow2.f32 %v2786_v57  ;;  %6507 = vmatpush3.msra.mxu1 %v3835_v44  ;;  %v3834_v51 = vld [vmem:[#allocation6 + $0x1e0] sm:$0xff]  ;;  %v2792_v21 = vmul.f32 1.442695, %v8112_v27  ;;  %6354 = vmatprep.mubr.f32.mxu0 %v3020_v41  ;;  %v2874_v23 = vlaneseq }
 0x1fe   :  { %6416 = vmatprep.mubr.f32.mxu1 %v3281_v49  ;;  %v2844_v11 = vsel %vm2744_vm11, %v8018_v17, %v2824_v46  ;;  %v2827_v34 = vmul.f32 1.6732632, %v5056_v62  ;;  %6355 = vmatmul.mubr.f32.gmra.mxu0 %v3021_v36  ;;  %v2790_v17 = vmul.f32 1.442695, %v8120_v50  ;;  %vm2746_vm13 = vcmp.gt.f32.partialorder %v8042_v29, 0.0  ;;  %v3569_v35 = vld [vmem:[#allocation6 + $0x148] sm:$0xff] }
 0x1ff   :  { %v6814_v14 = vpop.eup %6813  ;;  %2967 = vst [vmem:[#allocation3 + $0x5b] sm:$0xff] %v8115_v39  ;;  %6417 = vmatmul.mubr.f32.gmra.mxu1 %v3282_v37  ;;  %v8124_v60 = vmul.f32 1.050701, %v2844_v11  ;;  %6823 = vpow2.f32 %v2792_v21  ;;  %6446 = vmatprep.subr.mxu0 %v3572_v1  ;;  %v3022_v31 = vld [vmem:[#allocation3 + $0x30] sm:$0xff]  ;;  %v3023_v30 = vld [vmem:[#allocation3 + $0x38] sm:$0xff]  ;;  %vm2749_vm14 = vcmp.gt.f32.partialorder %v8052_v32, 0.0 }
 0x200   :  { %v5055_v63 = vadd.f32 -1.0, %v6814_v14  ;;  %6508 = vmatprep.subr.mxu1 %v3834_v51  ;;  %v3283_v61 = vld [vmem:[#allocation3 + $0x31] sm:$0xff]  ;;  %v2847_v8 = vsel %vm2747_vm12, %v8032_v7, %v2827_v34  ;;  %6447 = vmatpush3.msra.mxu0 %v3572_v1  ;;  %v3284_v33 = vld [vmem:[#allocation3 + $0x39] sm:$0xff]  ;;  %6825 = vpow2.f32 %v2790_v17  ;;  %v3568_v43 = vld [vmem:[#allocation6 + $0x140] sm:$0xff]  ;;  %vm2748_vm15 = vcmp.gt.f32.partialorder %v8083_v59, 0.0 }
 0x201   :  { %v6816_v55 = vpop.eup %6815  ;;  %6509 = vmatpush3.msra.mxu1 %v3834_v51  ;;  %2966 = vst [vmem:[#allocation3 + $0x53] sm:$0xff] %v8124_v60  ;;  %v8130_v10 = vmul.f32 1.050701, %v2847_v8  ;;  %6448 = vmatprep.subr.mxu0 %v3571_v45  ;;  %v3570_v7 = vld [vmem:[#allocation6 + $0x150] sm:$0xff]  ;;  %v3831_v44 = vld [vmem:[#allocation6 + $0x1c8] sm:$0xff]  ;;  %v3830_v57 = vld [vmem:[#allocation6 + $0x1c0] sm:$0xff] }
 0x202   :  { %v2826_v0 = vmul.f32 1.6732632, %v5055_v63  ;;  %v5058_v2 = vadd.f32 -1.0, %v6816_v55  ;;  %6510 = vmatprep.subr.mxu1 %v3833_v26  ;;  %6357 = vmatprep.mubr.f32.mxu0 %v3022_v31  ;;  %vm2751_vm0 = vcmp.gt.f32.partialorder %v8086_v22, 0.0  ;;  %v3567_v14 = vld [vmem:[#allocation6 + $0x138] sm:$0xff]  ;;  %vm2750_vm1 = vcmp.gt.f32.partialorder %v8095_v52, 0.0 }
 0x203   :  { %6419 = vmatprep.mubr.f32.mxu1 %v3283_v61  ;;  %2969 = vst [vmem:[#allocation3 + $0x6b] sm:$0xff] %v8130_v10  ;;  %6449 = vmatpush3.msra.mxu0 %v3571_v45  ;;  %v3829_v11 = vld [vmem:[#allocation6 + $0x1b8] sm:$0xff]  ;;  %vm2753_vm2 = vcmp.gt.f32.partialorder %v8112_v27, 0.0  ;;  %vm2752_vm4 = vcmp.gt.f32.partialorder %v8120_v50, 0.0 }
 0x204   :  { %v2846_v38 = vsel %vm2746_vm13, %v8042_v29, %v2826_v0  ;;  %v2829_v13 = vmul.f32 1.6732632, %v5058_v2  ;;  %6511 = vmatpush3.msra.mxu1 %v3833_v26  ;;  %6358 = vmatmul.mubr.f32.gmra.mxu0 %v3023_v30  ;;  %v3024_v20 = vld [vmem:[#allocation3 + $0x40] sm:$0xff]  ;;  %v3025_v16 = vld [vmem:[#allocation3 + $0x48] sm:$0xff]  ;;  %v3828_v30 = vld [vmem:[#allocation6 + $0x1b0] sm:$0xff] }
 0x205   :  { %v8135_v54 = vmul.f32 1.050701, %v2846_v38  ;;  %6420 = vmatmul.mubr.f32.gmra.mxu1 %v3284_v33  ;;  %v3285_v47 = vld [vmem:[#allocation3 + $0x41] sm:$0xff]  ;;  %6450 = vmatprep.subr.mxu0 %v3570_v7  ;;  %v3286_v25 = vld [vmem:[#allocation3 + $0x49] sm:$0xff] }
 0x206   :  { %v2849_v12 = vsel %vm2749_vm14, %v8052_v32, %v2829_v13  ;;  %6512 = vmatprep.subr.mxu1 %v3832_v18  ;;  %6451 = vmatpush3.msra.mxu0 %v3570_v7  ;;  %v2875_v32 = vshrl.u32 %v2874_v23, 7  ;;  %v3565_v38 = vld [vmem:[#allocation6 + $0x128] sm:$0xff] }
 0x207   :  { %2968 = vst [vmem:[#allocation3 + $0x63] sm:$0xff] %v8135_v54  ;;  %v8140_v29 = vmul.f32 1.050701, %v2849_v12  ;;  %6513 = vmatpush3.msra.mxu1 %v3832_v18  ;;  %6360 = vmatprep.mubr.f32.mxu0 %v3024_v20  ;;  %v3827_v13 = vld [vmem:[#allocation6 + $0x1a8] sm:$0xff]  ;;  %v3826_v12 = vld [vmem:[#allocation6 + $0x1a0] sm:$0xff] }
 0x208   :  { %v6818_v6 = vpop.eup %6817  ;;  %6422 = vmatprep.mubr.f32.mxu1 %v3285_v47  ;;  %6452 = vmatprep.subr.mxu0 %v3569_v35  ;;  %v3026_v1 = vld [vmem:[#allocation3 + $0x50] sm:$0xff]  ;;  %v3027_v36 = vld [vmem:[#allocation3 + $0x58] sm:$0xff]  ;;  %v8146_v21 = vadd.s32 152, %v2875_v32  ;;  %v3564_v47 = vld [vmem:[#allocation6 + $0x120] sm:$0xff] }
 0x209   :  { %v6820_v15 = vpop.eup %6819  ;;  %2971 = vst [vmem:[#allocation3 + $0x7b] sm:$0xff] %v8140_v29  ;;  %v5057_v58 = vadd.f32 -1.0, %v6818_v6  ;;  %6514 = vmatprep.subr.mxu1 %v3831_v44  ;;  %6361 = vmatmul.mubr.f32.gmra.mxu0 %v3025_v16  ;;  %v3287_v53 = vld [vmem:[#allocation3 + $0x51] sm:$0xff]  ;;  %v3288_v37 = vld [vmem:[#allocation3 + $0x59] sm:$0xff] }
 0x20a   :  { %v6822_v56 = vpop.eup %6821  ;;  %v5060_v41 = vadd.f32 -1.0, %v6820_v15  ;;  %6423 = vmatmul.mubr.f32.gmra.mxu1 %v3286_v25  ;;  %6453 = vmatpush3.msra.mxu0 %v3569_v35  ;;  %vm2914_vm3 = vcmp.lt.s32.totalorder %v8146_v21, 158  ;;  %v3825_v6 = vld [vmem:[#allocation6 + $0x198] sm:$0xff]  ;;  %v4065_v21 = vld [vmem:[#allocation3 + $0x14] sm:$0xff] }
 0x20b   :  { %v2828_v19 = vmul.f32 1.6732632, %v5057_v58  ;;  %v5059_v5 = vadd.f32 -1.0, %v6822_v56  ;;  %6515 = vmatpush3.msra.mxu1 %v3831_v44  ;;  %6454 = vmatprep.subr.mxu0 %v3568_v43  ;;  %v3824_v56 = vld [vmem:[#allocation6 + $0x190] sm:$0xff] }
 0x20c   :  { %v2831_v49 = vmul.f32 1.6732632, %v5060_v41  ;;  %6516 = vmatprep.subr.mxu1 %v3830_v57  ;;  %v6824_v46 = vpop.eup %6823  ;;  %6363 = vmatprep.mubr.f32.mxu0 %v3026_v1 }
 0x20d   :  { %v2848_v62 = vsel %vm2748_vm15, %v8083_v59, %v2828_v19  ;;  %v2830_v51 = vmul.f32 1.6732632, %v5059_v5  ;;  %6425 = vmatprep.mubr.f32.mxu1 %v3287_v53  ;;  %v5062_v26 = vadd.f32 -1.0, %v6824_v46  ;;  %6455 = vmatpush3.msra.mxu0 %v3568_v43  ;;  %v6826_v55 = vpop.eup %6825  ;;  %v3561_v53 = vld [vmem:[#allocation6 + $0x108] sm:$0xff]  ;;  %v3539_v46 = vld [vmem:[#allocation3 + $0x2] sm:$0xff] }
 0x20e   :  { %v8148_v34 = vmul.f32 1.050701, %v2848_v62  ;;  %v2851_v45 = vsel %vm2751_vm0, %v8086_v22, %v2831_v49  ;;  %6517 = vmatpush3.msra.mxu1 %v3830_v57  ;;  %6364 = vmatmul.mubr.f32.gmra.mxu0 %v3027_v36  ;;  %v3028_v31 = vld [vmem:[#allocation3 + $0x60] sm:$0xff]  ;;  %v3566_v22 = vld [vmem:[#allocation6 + $0x130] sm:$0xff]  ;;  %v5061_v0 = vadd.f32 -1.0, %v6826_v55  ;;  %v3290_v2 = vld [vmem:[#allocation3 + $0x69] sm:$0xff] }
 0x20f   :  { %v8152_v63 = vmul.f32 1.050701, %v2851_v45  ;;  %v2850_v59 = vsel %vm2750_vm1, %v8095_v52, %v2830_v51  ;;  %6426 = vmatmul.mubr.f32.gmra.mxu1 %v3288_v37  ;;  %v3289_v61 = vld [vmem:[#allocation3 + $0x61] sm:$0xff]  ;;  %v2833_v17 = vmul.f32 1.6732632, %v5062_v26  ;;  %6456 = vmatprep.subr.mxu0 %v3567_v14  ;;  %v3562_v57 = vld [vmem:[#allocation6 + $0x110] sm:$0xff] }
 0x210   :  { %2970 = vst [vmem:[#allocation3 + $0x73] sm:$0xff] %v8148_v34  ;;  %v8156_v8 = vmul.f32 1.050701, %v2850_v59  ;;  %6518 = vmatprep.subr.mxu1 %v3829_v11  ;;  %6457 = vmatpush3.msra.mxu0 %v3567_v14  ;;  %v3029_v52 = vld [vmem:[#allocation3 + $0x68] sm:$0xff]  ;;  %v2832_v18 = vmul.f32 1.6732632, %v5061_v0 }
 0x211   :  { %2973 = vst [vmem:[#allocation3 + $0x8b] sm:$0xff] %v8152_v63  ;;  %6519 = vmatpush3.msra.mxu1 %v3829_v11  ;;  %v2853_v33 = vsel %vm2753_vm2, %v8112_v27, %v2833_v17  ;;  %6366 = vmatprep.mubr.f32.mxu0 %v3028_v31  ;;  %v3823_v19 = vld [vmem:[#allocation6 + $0x188] sm:$0xff]  ;;  %v3560_v36 = vld [vmem:[#allocation6 + $0x100] sm:$0xff]  ;;  %v4099_v62 = vld [vmem:[#allocation6 + $0x278] sm:$0xff] }
 0x212   :  { %2972 = vst [vmem:[#allocation3 + $0x83] sm:$0xff] %v8156_v8  ;;  %6428 = vmatprep.mubr.f32.mxu1 %v3289_v61  ;;  %v8163_v7 = vmul.f32 1.050701, %v2853_v33  ;;  %6458 = vmatprep.subr.mxu0 %v3566_v22  ;;  %v2852_v27 = vsel %vm2752_vm4, %v8120_v50, %v2832_v18  ;;  %v3563_v50 = vld [vmem:[#allocation6 + $0x118] sm:$0xff]  ;;  %v3822_v37 = vld [vmem:[#allocation6 + $0x180] sm:$0xff]  ;;  %v3541_v45 = vld [vmem:[#allocation3 + $0x12] sm:$0xff] }
 0x213   :  { %6520 = vmatprep.subr.mxu1 %v3828_v30  ;;  %6367 = vmatmul.mubr.f32.gmra.mxu0 %v3029_v52  ;;  %v8170_v20 = vmul.f32 1.050701, %v2852_v27  ;;  %v4361_v51 = vld [vmem:[#allocation6 + $0x2f8] sm:$0xff]  ;;  %v3540_v14 = vld [vmem:[#allocation3 + $0xa] sm:$0xff]  ;;  %v4098_v26 = vld [vmem:[#allocation6 + $0x270] sm:$0xff] }
 0x214   :  { %6429 = vmatmul.mubr.f32.gmra.mxu1 %v3290_v2  ;;  %v2934_v23 = vsel %vm2914_vm3, %v8163_v7, 0.0  ;;  %6459 = vmatpush3.msra.mxu0 %v3566_v22  ;;  %v3802_v11 = vld [vmem:[#allocation3 + $0xb] sm:$0xff]  ;;  %v4360_v59 = vld [vmem:[#allocation6 + $0x2f0] sm:$0xff]  ;;  %v3543_v17 = vld [vmem:[#allocation3 + $0x22] sm:$0xff] }
 0x215   :  { %6521 = vmatpush3.msra.mxu1 %v3828_v30  ;;  %2975 = vst [vmem:[#allocation3 + $0x9b] sm:$0xff] %v2934_v23  ;;  %6460 = vmatprep.subr.mxu0 %v3565_v38  ;;  %2974 = vst [vmem:[#allocation3 + $0x93] sm:$0xff] %v8170_v20  ;;  %v3804_v31 = vld [vmem:[#allocation3 + $0x1b] sm:$0xff]  ;;  %v4097_v61 = vld [vmem:[#allocation6 + $0x268] sm:$0xff] }
 0x216   :  { %6522 = vmatprep.subr.mxu1 %v3827_v13  ;;  %6461 = vmatpush3.msra.mxu0 %v3565_v38  ;;  %v4359_v55 = vld [vmem:[#allocation6 + $0x2e8] sm:$0xff]  ;;  %v4096_v22 = vld [vmem:[#allocation6 + $0x260] sm:$0xff]  ;;  %v4095_v52 = vld [vmem:[#allocation6 + $0x258] sm:$0xff] }
 0x217   :  { %6523 = vmatpush3.msra.mxu1 %v3827_v13  ;;  %v3030_v35 = vld [vmem:[#allocation3 + $0x70] sm:$0xff]  ;;  %v3031_v16 = vld [vmem:[#allocation3 + $0x78] sm:$0xff]  ;;  %6462 = vmatprep.subr.mxu0 %v3564_v47  ;;  %v4357_v2 = vld [vmem:[#allocation6 + $0x2d8] sm:$0xff] }
 0x218   :  { %v3291_v44 = vld [vmem:[#allocation3 + $0x71] sm:$0xff]  ;;  %6369 = vmatprep.mubr.f32.mxu0 %v3030_v35  ;;  %v3292_v25 = vld [vmem:[#allocation3 + $0x79] sm:$0xff]  ;;  %6524 = vmatprep.subr.mxu1 %v3826_v12  ;;  %v4092_v23 = vld [vmem:[#allocation6 + $0x240] sm:$0xff] }
 0x219   :  { %6431 = vmatprep.mubr.f32.mxu1 %v3291_v44  ;;  %6370 = vmatmul.mubr.f32.gmra.mxu0 %v3031_v16  ;;  %v3032_v15 = vld [vmem:[#allocation3 + $0x80] sm:$0xff]  ;;  %v3033_v32 = vld [vmem:[#allocation3 + $0x88] sm:$0xff]  ;;  %v3545_v0 = vld [vmem:[#allocation3 + $0x32] sm:$0xff] }
 0x21a   :  { %6432 = vmatmul.mubr.f32.gmra.mxu1 %v3292_v25  ;;  %v3293_v58 = vld [vmem:[#allocation3 + $0x81] sm:$0xff]  ;;  %6463 = vmatpush3.msra.mxu0 %v3564_v47  ;;  %v3294_v43 = vld [vmem:[#allocation3 + $0x89] sm:$0xff]  ;;  %v4094_v33 = vld [vmem:[#allocation6 + $0x250] sm:$0xff] }
 0x21b   :  { %6525 = vmatpush3.msra.mxu1 %v3826_v12  ;;  %6464 = vmatprep.subr.mxu0 %v3563_v50  ;;  %v3544_v30 = vld [vmem:[#allocation3 + $0x2a] sm:$0xff]  ;;  %v4356_v18 = vld [vmem:[#allocation6 + $0x2d0] sm:$0xff]  ;;  %v4353_v47 = vld [vmem:[#allocation6 + $0x2b8] sm:$0xff] }
 0x21c   :  { %6526 = vmatprep.subr.mxu1 %v3825_v6  ;;  %6372 = vmatprep.mubr.f32.mxu0 %v3032_v15  ;;  %v3034_v41 = vld [vmem:[#allocation3 + $0x90] sm:$0xff]  ;;  %v3035_v5 = vld [vmem:[#allocation3 + $0x98] sm:$0xff]  ;;  %v4354_v27 = vld [vmem:[#allocation6 + $0x2c0] sm:$0xff] }
 0x21d   :  { %6434 = vmatprep.mubr.f32.mxu1 %v3293_v58  ;;  %6465 = vmatpush3.msra.mxu0 %v3563_v50  ;;  %v3295_v1 = vld [vmem:[#allocation3 + $0x91] sm:$0xff]  ;;  %v3296_v49 = vld [vmem:[#allocation3 + $0x99] sm:$0xff]  ;;  %v4088_v50 = vld [vmem:[#allocation6 + $0x220] sm:$0xff] }
 0x21e   :  { %6527 = vmatpush3.msra.mxu1 %v3825_v6  ;;  %6373 = vmatmul.mubr.f32.gmra.mxu0 %v3033_v32  ;;  %v4093_v38 = vld [vmem:[#allocation6 + $0x248] sm:$0xff]  ;;  %v3550_v12 = vld [vmem:[#allocation3 + $0x5a] sm:$0xff] }
 0x21f   :  { %6435 = vmatmul.mubr.f32.gmra.mxu1 %v3294_v43  ;;  %6466 = vmatprep.subr.mxu0 %v3562_v57  ;;  %v4355_v13 = vld [vmem:[#allocation6 + $0x2c8] sm:$0xff]  ;;  %v4090_v35 = vld [vmem:[#allocation6 + $0x230] sm:$0xff]  ;;  %v4087_v15 = vld [vmem:[#allocation6 + $0x218] sm:$0xff] }
 0x220   :  { %6528 = vmatprep.subr.mxu1 %v3824_v56  ;;  %6467 = vmatpush3.msra.mxu0 %v3562_v57  ;;  %v4352_v44 = vld [vmem:[#allocation6 + $0x2b0] sm:$0xff]  ;;  %v4089_v16 = vld [vmem:[#allocation6 + $0x228] sm:$0xff]  ;;  %v4349_v58 = vld [vmem:[#allocation6 + $0x298] sm:$0xff] }
 0x221   :  { %6529 = vmatpush3.msra.mxu1 %v3824_v56  ;;  %6375 = vmatprep.mubr.f32.mxu0 %v3034_v41  ;;  %v4351_v25 = vld [vmem:[#allocation6 + $0x2a8] sm:$0xff]  ;;  %v3554_v6 = vld [vmem:[#allocation3 + $0x7a] sm:$0xff]  ;;  %v4084_v41 = vld [vmem:[#allocation6 + $0x200] sm:$0xff] }
 0x222   :  { %6437 = vmatprep.mubr.f32.mxu1 %v3295_v1  ;;  %6468 = vmatprep.subr.mxu0 %v3561_v53  ;;  %v4086_v32 = vld [vmem:[#allocation6 + $0x210] sm:$0xff]  ;;  %v4085_v57 = vld [vmem:[#allocation6 + $0x208] sm:$0xff]  ;;  %v4063_v1 = vld [vmem:[#allocation3 + $0x4] sm:$0xff] }
 0x223   :  { %6530 = vmatprep.subr.mxu1 %v3823_v19  ;;  %6376 = vmatmul.mubr.f32.gmra.mxu0 %v3035_v5  ;;  %v4348_v43 = vld [vmem:[#allocation6 + $0x290] sm:$0xff]  ;;  %v4347_v56 = vld [vmem:[#allocation6 + $0x288] sm:$0xff] }
 0x224   :  { %6438 = vmatmul.mubr.f32.gmra.mxu1 %v3296_v49  ;;  %6469 = vmatpush3.msra.mxu0 %v3561_v53  ;;  %v4623_v53 = vld [vmem:[#allocation6 + $0x378] sm:$0xff]  ;;  %v4326_v5 = vld [vmem:[#allocation3 + $0xd] sm:$0xff]  ;;  %v4622_v49 = vld [vmem:[#allocation6 + $0x370] sm:$0xff] }
 0x225   :  { %6531 = vmatpush3.msra.mxu1 %v3823_v19  ;;  %6472 = vmatprep.mubr.f32.mxu0 %v3539_v46  ;;  %v4064_v19 = vld [vmem:[#allocation3 + $0xc] sm:$0xff] }
 0x226   :  { %6534 = vmatprep.mubr.f32.mxu1 %v8024_v42  ;;  %6470 = vmatprep.subr.mxu0 %v3560_v36  ;;  %v3542_v42 = vld [vmem:[#allocation3 + $0x1a] sm:$0xff]  ;;  %v4621_v46 = vld [vmem:[#allocation6 + $0x368] sm:$0xff] }
 0x227   :  { %6532 = vmatprep.subr.mxu1 %v3822_v37  ;;  %6471 = vmatpush3.msra.mxu0 %v3560_v36  ;;  %v4066_v36 = vld [vmem:[#allocation3 + $0x1c] sm:$0xff] }
 0x228   :  { %6533 = vmatpush3.msra.mxu1 %v3822_v37  ;;  %6473 = vmatmul.mubr.f32.vlgmr.msra.gmra.mxu0 %v3540_v14  ;;  %v4328_v37 = vld [vmem:[#allocation3 + $0x1d] sm:$0xff]  ;;  %v4620_v14 = vld [vmem:[#allocation6 + $0x360] sm:$0xff] }
 0x229   :  { %6535 = vmatmul.mubr.f32.vlgmr.msra.gmra.mxu1 %v3802_v11  ;;  %6564 = vmatprep.subr.mxu0 %v4099_v62  ;;  %v4068_v11 = vld [vmem:[#allocation3 + $0x2c] sm:$0xff] }
 0x22a   :  { %6626 = vmatprep.subr.mxu1 %v4361_v51  ;;  %6475 = vmatprep.mubr.f32.mxu0 %v3541_v45  ;;  %v4330_v45 = vld [vmem:[#allocation3 + $0x2d] sm:$0xff] }
 0x22b   :  { %6537 = vmatprep.mubr.f32.mxu1 %v8044_v9  ;;  %6565 = vmatpush3.msra.mxu0 %v4099_v62  ;;  %v4358_v9 = vld [vmem:[#allocation6 + $0x2e0] sm:$0xff] }
 0x22c   :  { %6627 = vmatpush3.msra.mxu1 %v4361_v51  ;;  %6566 = vmatprep.subr.mxu0 %v4098_v26  ;;  %v4067_v62 = vld [vmem:[#allocation3 + $0x24] sm:$0xff] }
 0x22d   :  { %6628 = vmatprep.subr.mxu1 %v4360_v59  ;;  %6476 = vmatmul.mubr.f32.gmra.mxu0 %v3542_v42  ;;  %v4329_v51 = vld [vmem:[#allocation3 + $0x25] sm:$0xff] }
 0x22e   :  { %6538 = vmatmul.mubr.f32.gmra.mxu1 %v3804_v31  ;;  %6567 = vmatpush3.msra.mxu0 %v4098_v26  ;;  %v4069_v26 = vld [vmem:[#allocation3 + $0x34] sm:$0xff]  ;;  %v4619_v42 = vld [vmem:[#allocation6 + $0x358] sm:$0xff] }
 0x22f   :  { %6629 = vmatpush3.msra.mxu1 %v4360_v59  ;;  %6478 = vmatprep.mubr.f32.mxu0 %v3543_v17  ;;  %v4331_v59 = vld [vmem:[#allocation3 + $0x35] sm:$0xff]  ;;  %v4071_v17 = vld [vmem:[#allocation3 + $0x44] sm:$0xff] }
 0x230   :  { %6540 = vmatprep.mubr.f32.mxu1 %v8060_v3  ;;  %6568 = vmatprep.subr.mxu0 %v4097_v61  ;;  %v3546_v3 = vld [vmem:[#allocation3 + $0x3a] sm:$0xff] }
 0x231   :  { %6630 = vmatprep.subr.mxu1 %v4359_v55  ;;  %6569 = vmatpush3.msra.mxu0 %v4097_v61  ;;  %v4070_v31 = vld [vmem:[#allocation3 + $0x3c] sm:$0xff] }
 0x232   :  { %6631 = vmatpush3.msra.mxu1 %v4359_v55  ;;  %6479 = vmatmul.mubr.f32.gmra.mxu0 %v3544_v30  ;;  %v4332_v61 = vld [vmem:[#allocation3 + $0x3d] sm:$0xff]  ;;  %v4072_v30 = vld [vmem:[#allocation3 + $0x4c] sm:$0xff] }
 0x233   :  { %6541 = vmatmul.mubr.f32.gmra.mxu1 %v8055_v24  ;;  %6570 = vmatprep.subr.mxu0 %v4096_v22  ;;  %v3547_v24 = vld [vmem:[#allocation3 + $0x42] sm:$0xff]  ;;  %v4618_v55 = vld [vmem:[#allocation6 + $0x350] sm:$0xff] }
 0x234   :  { %6632 = vmatprep.subr.mxu1 %v4358_v9  ;;  %6481 = vmatprep.mubr.f32.mxu0 %v3545_v0  ;;  %v4334_v0 = vld [vmem:[#allocation3 + $0x4d] sm:$0xff] }
 0x235   :  { %6543 = vmatprep.mubr.f32.mxu1 %v8079_v48  ;;  %6571 = vmatpush3.msra.mxu0 %v4096_v22  ;;  %v3548_v48 = vld [vmem:[#allocation3 + $0x4a] sm:$0xff] }
 0x236   :  { %6633 = vmatpush3.msra.mxu1 %v4358_v9  ;;  %6572 = vmatprep.subr.mxu0 %v4095_v52  ;;  %v4333_v22 = vld [vmem:[#allocation3 + $0x45] sm:$0xff]  ;;  %v4617_v9 = vld [vmem:[#allocation6 + $0x348] sm:$0xff] }
 0x237   :  { %6634 = vmatprep.subr.mxu1 %v4357_v2  ;;  %6573 = vmatpush3.msra.mxu0 %v4095_v52  ;;  %v4616_v52 = vld [vmem:[#allocation6 + $0x340] sm:$0xff] }
 0x238   :  { %6635 = vmatpush3.msra.mxu1 %v4357_v2  ;;  %6482 = vmatmul.mubr.f32.gmra.mxu0 %v3546_v3  ;;  %v4073_v2 = vld [vmem:[#allocation3 + $0x54] sm:$0xff] }
 0x239   :  { %6544 = vmatmul.mubr.f32.gmra.mxu1 %v8071_v40  ;;  %6484 = vmatprep.mubr.f32.mxu0 %v3547_v24  ;;  %v3549_v40 = vld [vmem:[#allocation3 + $0x52] sm:$0xff]  ;;  %v4336_v24 = vld [vmem:[#allocation3 + $0x5d] sm:$0xff] }
 0x23a   :  { %6546 = vmatprep.mubr.f32.mxu1 %v8105_v28  ;;  %6574 = vmatprep.subr.mxu0 %v4094_v33  ;;  %v4091_v28 = vld [vmem:[#allocation6 + $0x238] sm:$0xff]  ;;  %v4335_v3 = vld [vmem:[#allocation3 + $0x55] sm:$0xff] }
 0x23b   :  { %6636 = vmatprep.subr.mxu1 %v4356_v18  ;;  %6575 = vmatpush3.msra.mxu0 %v4094_v33  ;;  %v4615_v33 = vld [vmem:[#allocation6 + $0x338] sm:$0xff] }
 0x23c   :  { %6637 = vmatpush3.msra.mxu1 %v4356_v18  ;;  %6576 = vmatprep.subr.mxu0 %v4093_v38  ;;  %v4074_v18 = vld [vmem:[#allocation3 + $0x5c] sm:$0xff] }
 0x23d   :  { %6638 = vmatprep.subr.mxu1 %v4355_v13  ;;  %6485 = vmatmul.mubr.f32.gmra.mxu0 %v3548_v48  ;;  %v4614_v48 = vld [vmem:[#allocation6 + $0x330] sm:$0xff] }
 0x23e   :  { %6547 = vmatmul.mubr.f32.gmra.mxu1 %v8097_v4  ;;  %6577 = vmatpush3.msra.mxu0 %v4093_v38  ;;  %v3551_v4 = vld [vmem:[#allocation3 + $0x62] sm:$0xff] }
 0x23f   :  { %6639 = vmatpush3.msra.mxu1 %v4355_v13  ;;  %6487 = vmatprep.mubr.f32.mxu0 %v3549_v40  ;;  %v4075_v38 = vld [vmem:[#allocation3 + $0x64] sm:$0xff]  ;;  %v4613_v40 = vld [vmem:[#allocation6 + $0x328] sm:$0xff] }
 0x240   :  { %6549 = vmatprep.mubr.f32.mxu1 %v8124_v60  ;;  %6578 = vmatprep.subr.mxu0 %v4092_v23  ;;  %v3552_v60 = vld [vmem:[#allocation3 + $0x6a] sm:$0xff] }
 0x241   :  { %6640 = vmatprep.subr.mxu1 %v4354_v27  ;;  %6579 = vmatpush3.msra.mxu0 %v4092_v23  ;;  %v4337_v13 = vld [vmem:[#allocation3 + $0x65] sm:$0xff] }
 0x242   :  { %6641 = vmatpush3.msra.mxu1 %v4354_v27  ;;  %6488 = vmatmul.mubr.f32.gmra.mxu0 %v3550_v12  ;;  %v4076_v23 = vld [vmem:[#allocation3 + $0x6c] sm:$0xff] }
 0x243   :  { %6550 = vmatmul.mubr.f32.gmra.mxu1 %v8115_v39  ;;  %6580 = vmatprep.subr.mxu0 %v4091_v28  ;;  %v3553_v39 = vld [vmem:[#allocation3 + $0x72] sm:$0xff]  ;;  %v4612_v12 = vld [vmem:[#allocation6 + $0x320] sm:$0xff] }
 0x244   :  { %6642 = vmatprep.subr.mxu1 %v4353_v47  ;;  %6490 = vmatprep.mubr.f32.mxu0 %v3551_v4  ;;  %v4338_v27 = vld [vmem:[#allocation3 + $0x6d] sm:$0xff]  ;;  %v4078_v4 = vld [vmem:[#allocation3 + $0x7c] sm:$0xff] }
 0x245   :  { %6552 = vmatprep.mubr.f32.mxu1 %v8135_v54  ;;  %6581 = vmatpush3.msra.mxu0 %v4091_v28  ;;  %v4350_v54 = vld [vmem:[#allocation6 + $0x2a0] sm:$0xff]  ;;  %v4077_v28 = vld [vmem:[#allocation3 + $0x74] sm:$0xff] }
 0x246   :  { %6643 = vmatpush3.msra.mxu1 %v4353_v47  ;;  %6582 = vmatprep.subr.mxu0 %v4090_v35  ;;  %v4339_v47 = vld [vmem:[#allocation3 + $0x75] sm:$0xff] }
 0x247   :  { %6644 = vmatprep.subr.mxu1 %v4352_v44  ;;  %6491 = vmatmul.mubr.f32.gmra.mxu0 %v3552_v60  ;;  %v4341_v60 = vld [vmem:[#allocation3 + $0x85] sm:$0xff] }
 0x248   :  { %6553 = vmatmul.mubr.f32.gmra.mxu1 %v8130_v10  ;;  %6583 = vmatpush3.msra.mxu0 %v4090_v35  ;;  %v3555_v10 = vld [vmem:[#allocation3 + $0x82] sm:$0xff] }
 0x249   :  { %6645 = vmatpush3.msra.mxu1 %v4352_v44  ;;  %6493 = vmatprep.mubr.f32.mxu0 %v3553_v39  ;;  %v4340_v35 = vld [vmem:[#allocation3 + $0x7d] sm:$0xff]  ;;  %v4342_v39 = vld [vmem:[#allocation3 + $0x8d] sm:$0xff] }
 0x24a   :  { %6555 = vmatprep.mubr.f32.mxu1 %v8148_v34  ;;  %6584 = vmatprep.subr.mxu0 %v4089_v16  ;;  %v3556_v34 = vld [vmem:[#allocation3 + $0x8a] sm:$0xff] }
 0x24b   :  { %6646 = vmatprep.subr.mxu1 %v4351_v25  ;;  %6585 = vmatpush3.msra.mxu0 %v4089_v16  ;;  %v4079_v44 = vld [vmem:[#allocation3 + $0x84] sm:$0xff] }
 0x24c   :  { %6647 = vmatpush3.msra.mxu1 %v4351_v25  ;;  %6494 = vmatmul.mubr.f32.gmra.mxu0 %v3554_v6  ;;  %v4611_v16 = vld [vmem:[#allocation6 + $0x318] sm:$0xff]  ;;  %v4080_v25 = vld [vmem:[#allocation3 + $0x8c] sm:$0xff]  ;;  %v4343_v6 = vld [vmem:[#allocation3 + $0x95] sm:$0xff] }
 0x24d   :  { %6556 = vmatmul.mubr.f32.gmra.mxu1 %v8140_v29  ;;  %6586 = vmatprep.subr.mxu0 %v4088_v50  ;;  %v3557_v29 = vld [vmem:[#allocation3 + $0x92] sm:$0xff] }
 0x24e   :  { %6648 = vmatprep.subr.mxu1 %v4350_v54  ;;  %6496 = vmatprep.mubr.f32.mxu0 %v3555_v10  ;;  %v4609_v10 = vld [vmem:[#allocation6 + $0x308] sm:$0xff] }
 0x24f   :  { %6558 = vmatprep.mubr.f32.mxu1 %v8156_v8  ;;  %6587 = vmatpush3.msra.mxu0 %v4088_v50  ;;  %v3558_v8 = vld [vmem:[#allocation3 + $0x9a] sm:$0xff] }
 0x250   :  { %6649 = vmatpush3.msra.mxu1 %v4350_v54  ;;  %6588 = vmatprep.subr.mxu0 %v4087_v15  ;;  %v4610_v50 = vld [vmem:[#allocation6 + $0x310] sm:$0xff] }
 0x251   :  { %6650 = vmatprep.subr.mxu1 %v4349_v58  ;;  %6589 = vmatpush3.msra.mxu0 %v4087_v15  ;;  %v4081_v54 = vld [vmem:[#allocation3 + $0x94] sm:$0xff]  ;;  %v4082_v15 = vld [vmem:[#allocation3 + $0x9c] sm:$0xff] }
 0x252   :  { %6651 = vmatpush3.msra.mxu1 %v4349_v58  ;;  %6497 = vmatmul.mubr.f32.gmra.mxu0 %v3556_v34  ;;  %v4344_v58 = vld [vmem:[#allocation3 + $0x9d] sm:$0xff]  ;;  %v4608_v34 = vld [vmem:[#allocation6 + $0x300] sm:$0xff] }
 0x253   :  { %6559 = vmatmul.mubr.f32.gmra.mxu1 %v8152_v63  ;;  %6499 = vmatprep.mubr.f32.mxu0 %v3557_v29  ;;  %v4346_v63 = vld [vmem:[#allocation6 + $0x280] sm:$0xff] }
 0x254   :  { %6561 = vmatprep.mubr.f32.mxu1 %v8170_v20  ;;  %6590 = vmatprep.subr.mxu0 %v4086_v32  ;;  %v4325_v20 = vld [vmem:[#allocation3 + $0x5] sm:$0xff]  ;;  %v4588_v29 = vld [vmem:[#allocation3 + $0xe] sm:$0xff] }
 0x255   :  { %6652 = vmatprep.subr.mxu1 %v4348_v43  ;;  %6591 = vmatpush3.msra.mxu0 %v4086_v32  ;;  %v4587_v32 = vld [vmem:[#allocation3 + $0x6] sm:$0xff] }
 0x256   :  { %6653 = vmatpush3.msra.mxu1 %v4348_v43  ;;  %6592 = vmatprep.subr.mxu0 %v4085_v57  ;;  %v4597_v43 = vld [vmem:[#allocation3 + $0x56] sm:$0xff] }
 0x257   :  { %6654 = vmatprep.subr.mxu1 %v4347_v56  ;;  %6500 = vmatmul.mubr.f32.gmra.mxu0 %v3558_v8  ;;  %v4599_v8 = vld [vmem:[#allocation3 + $0x66] sm:$0xff] }
 0x258   :  { %6867 = vmatmul.mubr.msk.f32.gmra.mxu1 %vm2914_vm3, %v8163_v7  ;;  %6593 = vmatpush3.msra.mxu0 %v4085_v57  ;;  %v4327_v7 = vld [vmem:[#allocation3 + $0x15] sm:$0xff]  ;;  %v4598_v57 = vld [vmem:[#allocation3 + $0x5e] sm:$0xff] }
 0x259   :  { %6655 = vmatpush3.msra.mxu1 %v4347_v56  ;;  %6596 = vmatprep.mubr.f32.mxu0 %v4063_v1  ;;  %v4589_v56 = vld [vmem:[#allocation3 + $0x16] sm:$0xff]  ;;  %v4591_v1 = vld [vmem:[#allocation3 + $0x26] sm:$0xff] }
 0x25a   :  { %6658 = vmatprep.mubr.f32.mxu1 %v4325_v20  ;;  %6594 = vmatprep.subr.mxu0 %v4084_v41  ;;  %v4601_v20 = vld [vmem:[#allocation3 + $0x76] sm:$0xff] }
 0x25b   :  { %6656 = vmatprep.subr.mxu1 %v4346_v63  ;;  %6595 = vmatpush3.msra.mxu0 %v4084_v41  ;;  %v4590_v41 = vld [vmem:[#allocation3 + $0x1e] sm:$0xff] }
 0x25c   :  { %6657 = vmatpush3.msra.mxu1 %v4346_v63  ;;  %6597 = vmatmul.mubr.f32.vlgmr.msra.gmra.mxu0 %v4064_v19  ;;  %v4600_v63 = vld [vmem:[#allocation3 + $0x6e] sm:$0xff]  ;;  %v4602_v19 = vld [vmem:[#allocation3 + $0x7e] sm:$0xff] }
 0x25d   :  { %6659 = vmatmul.mubr.f32.vlgmr.msra.gmra.mxu1 %v4326_v5  ;;  %6688 = vmatprep.subr.mxu0 %v4623_v53  ;;  %v4593_v5 = vld [vmem:[#allocation3 + $0x36] sm:$0xff] }
 0x25e   :  { %6750 = vmatprep.subr.mxu1 %v4623_v53  ;;  %6599 = vmatprep.mubr.f32.mxu0 %v4065_v21  ;;  %v4603_v21 = vld [vmem:[#allocation3 + $0x86] sm:$0xff] }
 0x25f   :  { %6661 = vmatprep.mubr.f32.mxu1 %v4327_v7  ;;  %6689 = vmatpush3.msra.mxu0 %v4623_v53  ;;  %v4594_v7 = vld [vmem:[#allocation3 + $0x3e] sm:$0xff] }
 0x260   :  { %6766 = vmatpush3.msra.mxu1 %v4623_v53  ;;  %6690 = vmatprep.subr.mxu0 %v4622_v49  ;;  %v4592_v53 = vld [vmem:[#allocation3 + $0x2e] sm:$0xff] }
 0x261   :  { %6751 = vmatprep.subr.mxu1 %v4622_v49  ;;  %6600 = vmatmul.mubr.f32.gmra.mxu0 %v4066_v36  ;;  %v4595_v36 = vld [vmem:[#allocation3 + $0x46] sm:$0xff] }
 0x262   :  { %6662 = vmatmul.mubr.f32.gmra.mxu1 %v4328_v37  ;;  %6691 = vmatpush3.msra.mxu0 %v4622_v49  ;;  %v4605_v37 = vld [vmem:[#allocation3 + $0x96] sm:$0xff] }
 0x263   :  { %6767 = vmatpush3.msra.mxu1 %v4622_v49  ;;  %6602 = vmatprep.mubr.f32.mxu0 %v4067_v62  ;;  %v4604_v49 = vld [vmem:[#allocation3 + $0x8e] sm:$0xff]  ;;  %v4606_v62 = vld [vmem:[#allocation3 + $0x9e] sm:$0xff] }
 0x264   :  { %6664 = vmatprep.mubr.f32.mxu1 %v4329_v51  ;;  %6692 = vmatprep.subr.mxu0 %v4621_v46 }
 0x265   :  { %6752 = vmatprep.subr.mxu1 %v4621_v46  ;;  %6693 = vmatpush3.msra.mxu0 %v4621_v46 }
 0x266   :  { %6768 = vmatpush3.msra.mxu1 %v4621_v46  ;;  %6603 = vmatmul.mubr.f32.gmra.mxu0 %v4068_v11  ;;  %v4596_v46 = vld [vmem:[#allocation3 + $0x4e] sm:$0xff] }
 0x267   :  { %6665 = vmatmul.mubr.f32.gmra.mxu1 %v4330_v45  ;;  %6694 = vmatprep.subr.mxu0 %v4620_v14 }
 0x268   :  { %6753 = vmatprep.subr.mxu1 %v4620_v14  ;;  %6605 = vmatprep.mubr.f32.mxu0 %v4069_v26 }
 0x269   :  { %6667 = vmatprep.mubr.f32.mxu1 %v4331_v59  ;;  %6695 = vmatpush3.msra.mxu0 %v4620_v14 }
 0x26a   :  { %6769 = vmatpush3.msra.mxu1 %v4620_v14  ;;  %6696 = vmatprep.subr.mxu0 %v4619_v42 }
 0x26b   :  { %6754 = vmatprep.subr.mxu1 %v4619_v42  ;;  %6697 = vmatpush3.msra.mxu0 %v4619_v42 }
 0x26c   :  { %6770 = vmatpush3.msra.mxu1 %v4619_v42  ;;  %6606 = vmatmul.mubr.f32.gmra.mxu0 %v4070_v31 }
 0x26d   :  { %6668 = vmatmul.mubr.f32.gmra.mxu1 %v4332_v61  ;;  %6608 = vmatprep.mubr.f32.mxu0 %v4071_v17 }
 0x26e   :  { %6670 = vmatprep.mubr.f32.mxu1 %v4333_v22  ;;  %6698 = vmatprep.subr.mxu0 %v4618_v55 }
 0x26f   :  { %6755 = vmatprep.subr.mxu1 %v4618_v55  ;;  %6699 = vmatpush3.msra.mxu0 %v4618_v55 }
 0x270   :  { %6771 = vmatpush3.msra.mxu1 %v4618_v55  ;;  %6700 = vmatprep.subr.mxu0 %v4617_v9 }
 0x271   :  { %6756 = vmatprep.subr.mxu1 %v4617_v9  ;;  %6609 = vmatmul.mubr.f32.gmra.mxu0 %v4072_v30 }
 0x272   :  { %6671 = vmatmul.mubr.f32.gmra.mxu1 %v4334_v0  ;;  %6701 = vmatpush3.msra.mxu0 %v4617_v9 }
 0x273   :  { %6772 = vmatpush3.msra.mxu1 %v4617_v9  ;;  %6611 = vmatprep.mubr.f32.mxu0 %v4073_v2 }
 0x274   :  { %6673 = vmatprep.mubr.f32.mxu1 %v4335_v3  ;;  %6702 = vmatprep.subr.mxu0 %v4616_v52 }
 0x275   :  { %6757 = vmatprep.subr.mxu1 %v4616_v52  ;;  %6703 = vmatpush3.msra.mxu0 %v4616_v52 }
 0x276   :  { %6773 = vmatpush3.msra.mxu1 %v4616_v52  ;;  %6612 = vmatmul.mubr.f32.gmra.mxu0 %v4074_v18 }
 0x277   :  { %6674 = vmatmul.mubr.f32.gmra.mxu1 %v4336_v24  ;;  %6704 = vmatprep.subr.mxu0 %v4615_v33 }
 0x278   :  { %6758 = vmatprep.subr.mxu1 %v4615_v33  ;;  %6614 = vmatprep.mubr.f32.mxu0 %v4075_v38 }
 0x279   :  { %6676 = vmatprep.mubr.f32.mxu1 %v4337_v13  ;;  %6705 = vmatpush3.msra.mxu0 %v4615_v33 }
 0x27a   :  { %6774 = vmatpush3.msra.mxu1 %v4615_v33  ;;  %6706 = vmatprep.subr.mxu0 %v4614_v48 }
 0x27b   :  { %6759 = vmatprep.subr.mxu1 %v4614_v48  ;;  %6615 = vmatmul.mubr.f32.gmra.mxu0 %v4076_v23 }
 0x27c   :  { %6677 = vmatmul.mubr.f32.gmra.mxu1 %v4338_v27  ;;  %6707 = vmatpush3.msra.mxu0 %v4614_v48 }
 0x27d   :  { %6775 = vmatpush3.msra.mxu1 %v4614_v48  ;;  %6617 = vmatprep.mubr.f32.mxu0 %v4077_v28 }
 0x27e   :  { %6679 = vmatprep.mubr.f32.mxu1 %v4339_v47  ;;  %6708 = vmatprep.subr.mxu0 %v4613_v40 }
 0x27f   :  { %6760 = vmatprep.subr.mxu1 %v4613_v40  ;;  %6709 = vmatpush3.msra.mxu0 %v4613_v40 }
 0x280   :  { %6776 = vmatpush3.msra.mxu1 %v4613_v40  ;;  %6618 = vmatmul.mubr.f32.gmra.mxu0 %v4078_v4 }
 0x281   :  { %6680 = vmatmul.mubr.f32.gmra.mxu1 %v4340_v35  ;;  %6710 = vmatprep.subr.mxu0 %v4612_v12 }
 0x282   :  { %6761 = vmatprep.subr.mxu1 %v4612_v12  ;;  %6620 = vmatprep.mubr.f32.mxu0 %v4079_v44 }
 0x283   :  { %6682 = vmatprep.mubr.f32.mxu1 %v4341_v60  ;;  %6711 = vmatpush3.msra.mxu0 %v4612_v12 }
 0x284   :  { %6777 = vmatpush3.msra.mxu1 %v4612_v12  ;;  %6712 = vmatprep.subr.mxu0 %v4611_v16 }
 0x285   :  { %6762 = vmatprep.subr.mxu1 %v4611_v16  ;;  %6713 = vmatpush3.msra.mxu0 %v4611_v16 }
 0x286   :  { %6778 = vmatpush3.msra.mxu1 %v4611_v16  ;;  %6621 = vmatmul.mubr.f32.gmra.mxu0 %v4080_v25 }
 0x287   :  { %6683 = vmatmul.mubr.f32.gmra.mxu1 %v4342_v39  ;;  %6623 = vmatprep.mubr.f32.mxu0 %v4081_v54 }
 0x288   :  { %6685 = vmatprep.mubr.f32.mxu1 %v4343_v6  ;;  %6714 = vmatprep.subr.mxu0 %v4610_v50 }
 0x289   :  { %6763 = vmatprep.subr.mxu1 %v4610_v50  ;;  %6715 = vmatpush3.msra.mxu0 %v4610_v50 }
 0x28a   :  { %6779 = vmatpush3.msra.mxu1 %v4610_v50  ;;  %6716 = vmatprep.subr.mxu0 %v4609_v10 }
 0x28b   :  { %6764 = vmatprep.subr.mxu1 %v4609_v10  ;;  %6624 = vmatmul.mubr.f32.gmra.mxu0 %v4082_v15 }
 0x28c   :  { %6686 = vmatmul.mubr.f32.gmra.mxu1 %v4344_v58  ;;  %6717 = vmatpush3.msra.mxu0 %v4609_v10 }
 0x28d   :  { %6780 = vmatpush3.msra.mxu1 %v4609_v10  ;;  %6720 = vmatprep.mubr.f32.mxu0 %v4587_v32 }
 0x28e   :  { %6735 = vmatprep.mubr.f32.mxu1 %v4597_v43  ;;  %6718 = vmatprep.subr.mxu0 %v4608_v34 }
 0x28f   :  { %6765 = vmatprep.subr.mxu1 %v4608_v34  ;;  %6719 = vmatpush3.msra.mxu0 %v4608_v34 }
 0x290   :  { %6781 = vmatpush3.msra.mxu1 %v4608_v34  ;;  %6721 = vmatmul.mubr.f32.vlgmr.msra.gmra.mxu0 %v4588_v29 }
 0x291   :  { %6736 = vmatmul.mubr.f32.vlgmr.msra.gmra.mxu1 %v4598_v57  ;;  %6723 = vmatprep.mubr.f32.mxu0 %v4589_v56 }
 0x292   :  { %6738 = vmatprep.mubr.f32.mxu1 %v4599_v8 }
 0x294   :  { %6724 = vmatmul.mubr.f32.gmra.mxu0 %v4590_v41 }
 0x295   :  { %6739 = vmatmul.mubr.f32.gmra.mxu1 %v4600_v63  ;;  %6726 = vmatprep.mubr.f32.mxu0 %v4591_v1 }
 0x296   :  { %6741 = vmatprep.mubr.f32.mxu1 %v4601_v20 }
 0x298   :  { %6727 = vmatmul.mubr.f32.gmra.mxu0 %v4592_v53 }
 0x299   :  { %6742 = vmatmul.mubr.f32.gmra.mxu1 %v4602_v19  ;;  %6729 = vmatprep.mubr.f32.mxu0 %v4593_v5 }
 0x29a   :  { %6744 = vmatprep.mubr.f32.mxu1 %v4603_v21 }
 0x29c   :  { %6730 = vmatmul.mubr.f32.gmra.mxu0 %v4594_v7 }
 0x29d   :  { %6745 = vmatmul.mubr.f32.gmra.mxu1 %v4604_v49  ;;  %6732 = vmatprep.mubr.f32.mxu0 %v4595_v36 }
 0x29e   :  { %6747 = vmatprep.mubr.f32.mxu1 %v4605_v37 }
 0x2a0   :  { %6733 = vmatmul.mubr.f32.gmra.mxu0 %v4596_v46 }
 0x2a1   :  { %6748 = vmatmul.mubr.f32.gmra.mxu1 %v4606_v62 }
 0x2b5   :  { %v6350_v51 = vpop.f32.mrf.mxu0 }
 0x2b6   :  { %v6412_v14 = vpop.f32.mrf.mxu1 }
 0x2b7   :  { %v3480_v11 = vadd.f32 %v6412_v14, %v6350_v51  ;;  %v3118_v45 = vpop.f32.mrf.mxu0 }
 0x2b8   :  { %v3380_v26 = vpop.f32.mrf.mxu1 }
 0x2b9   :  { %v3479_v59 = vadd.f32 %v3380_v26, %v3118_v45  ;;  %v6353_v42 = vpop.f32.mrf.mxu0 }
 0x2bb   :  { %v6415_v31 = vpop.f32.mrf.mxu1  ;;  %v3128_v55 = vpop.f32.mrf.mxu0 }
 0x2bc   :  { %v3482_v61 = vadd.f32 %v6415_v31, %v6353_v42 }
 0x2bd   :  { %v3390_v17 = vpop.f32.mrf.mxu1 }
 0x2be   :  { %v8193_v22 = vadd.f32 %v3390_v17, %v3128_v55  ;;  %v6356_v9 = vpop.f32.mrf.mxu0 }
 0x2bf   :  { %v6418_v30 = vpop.f32.mrf.mxu1 }
 0x2c0   :  { %v8195_v0 = vadd.f32 %v6418_v30, %v6356_v9  ;;  %v3138_v52 = vpop.f32.mrf.mxu0 }
 0x2c1   :  { %v3400_v2 = vpop.f32.mrf.mxu1 }
 0x2c2   :  { %v8197_v3 = vadd.f32 %v3400_v2, %v3138_v52 }
 0x2c4   :  { %v6359_v33 = vpop.f32.mrf.mxu0 }
 0x2c5   :  { %v6421_v18 = vpop.f32.mrf.mxu1 }
 0x2c6   :  { %v8199_v24 = vadd.f32 %v6421_v18, %v6359_v33  ;;  %v3148_v38 = vpop.f32.mrf.mxu0 }
 0x2c7   :  { %v3410_v13 = vpop.f32.mrf.mxu1 }
 0x2c8   :  { %v8201_v48 = vadd.f32 %v3410_v13, %v3148_v38 }
 0x2c9   :  { %v6362_v23 = vpop.f32.mrf.mxu0 }
 0x2ca   :  { %v6424_v27 = vpop.f32.mrf.mxu1 }
 0x2cb   :  { %v8203_v40 = vadd.f32 %v6424_v27, %v6362_v23  ;;  %v3158_v28 = vpop.f32.mrf.mxu0 }
 0x2cc   :  { %v3420_v47 = vpop.f32.mrf.mxu1 }
 0x2cd   :  { %v8205_v12 = vadd.f32 %v3420_v47, %v3158_v28 }
 0x2ce   :  { %v6365_v4 = vpop.f32.mrf.mxu0 }
 0x2cf   :  { %v6427_v35 = vpop.f32.mrf.mxu1 }
 0x2d0   :  { %v8207_v44 = vadd.f32 %v6427_v35, %v6365_v4  ;;  %v3168_v60 = vpop.f32.mrf.mxu0 }
 0x2d1   :  { %v3430_v16 = vpop.f32.mrf.mxu1 }
 0x2d2   :  { %v8209_v25 = vadd.f32 %v3430_v16, %v3168_v60 }
 0x2d3   :  { %v6368_v39 = vpop.f32.mrf.mxu0 }
 0x2d4   :  { %v6430_v50 = vpop.f32.mrf.mxu1 }
 0x2d5   :  { %v8211_v54 = vadd.f32 %v6430_v50, %v6368_v39  ;;  %v3178_v6 = vpop.f32.mrf.mxu0 }
 0x2d6   :  { %v3440_v10 = vpop.f32.mrf.mxu1 }
 0x2d7   :  { %v8213_v15 = vadd.f32 %v3440_v10, %v3178_v6 }
 0x2d9   :  { %v6371_v58 = vpop.f32.mrf.mxu0 }
 0x2da   :  { %v6433_v34 = vpop.f32.mrf.mxu1 }
 0x2db   :  { %v8215_v32 = vadd.f32 %v6433_v34, %v6371_v58  ;;  %v3188_v43 = vpop.f32.mrf.mxu0 }
 0x2dc   :  { %v3450_v29 = vpop.f32.mrf.mxu1 }
 0x2dd   :  { %v8217_v57 = vadd.f32 %v3450_v29, %v3188_v43 }
 0x2de   :  { %v6374_v56 = vpop.f32.mrf.mxu0 }
 0x2df   :  { %v6436_v8 = vpop.f32.mrf.mxu1 }
 0x2e0   :  { %v8219_v41 = vadd.f32 %v6436_v8, %v6374_v56  ;;  %v3198_v63 = vpop.f32.mrf.mxu0 }
 0x2e1   :  { %v3460_v1 = vpop.f32.mrf.mxu1 }
 0x2e2   :  { %v8221_v20 = vadd.f32 %v3460_v1, %v3198_v63 }
 0x2e3   :  { %v6377_v53 = vpop.f32.mrf.mxu0 }
 0x2e4   :  { %v6439_v19 = vpop.f32.mrf.mxu1 }
 0x2e5   :  { %v3498_v5 = vadd.f32 %v6439_v19, %v6377_v53  ;;  %v3208_v21 = vpop.f32.mrf.mxu0 }
 0x2e6   :  { %v3470_v7 = vpop.f32.mrf.mxu1 }
 0x2e7   :  { %v8223_v49 = vadd.f32 %v3470_v7, %v3208_v21 }
 0x2e8   :  { %v6474_v36 = vpop.f32.mrf.mxu0 }
 0x2e9   :  { %v6536_v37 = vpop.f32.mrf.mxu1  ;;  %v3742_v46 = vadd.f32 %v6474_v36, %v3480_v11 }
 0x2ea   :  { %v3642_v62 = vpop.f32.mrf.mxu0 }
 0x2eb   :  { %v3904_v51 = vpop.f32.mrf.mxu1  ;;  %v8225_v14 = vadd.f32 %v6536_v37, %v3742_v46  ;;  %v3741_v45 = vadd.f32 %v3642_v62, %v3479_v59 }
 0x2ed   :  { %v8227_v26 = vadd.f32 %v3904_v51, %v3741_v45  ;;  %v6477_v42 = vpop.f32.mrf.mxu0 }
 0x2ee   :  { %v6539_v31 = vpop.f32.mrf.mxu1  ;;  %v3744_v55 = vadd.f32 %v6477_v42, %v3482_v61 }
 0x2ef   :  { %v3652_v17 = vpop.f32.mrf.mxu0 }
 0x2f0   :  { %v3914_v9 = vpop.f32.mrf.mxu1  ;;  %v8229_v30 = vadd.f32 %v6539_v31, %v3744_v55  ;;  %v3743_v52 = vadd.f32 %v3652_v17, %v8193_v22 }
 0x2f2   :  { %v8232_v2 = vadd.f32 %v3914_v9, %v3743_v52  ;;  %v6480_v33 = vpop.f32.mrf.mxu0 }
 0x2f3   :  { %v6542_v11 = vpop.f32.mrf.mxu1  ;;  %v3746_v18 = vadd.f32 %v6480_v33, %v8195_v0 }
 0x2f4   :  { %v3662_v38 = vpop.f32.mrf.mxu0 }
 0x2f5   :  { %v3924_v13 = vpop.f32.mrf.mxu1  ;;  %v8235_v59 = vadd.f32 %v6542_v11, %v3746_v18  ;;  %v3745_v23 = vadd.f32 %v3662_v38, %v8197_v3 }
 0x2f7   :  { %v8238_v27 = vadd.f32 %v3924_v13, %v3745_v23 }
 0x2f8   :  { %v6483_v61 = vpop.f32.mrf.mxu0 }
 0x2f9   :  { %v6545_v28 = vpop.f32.mrf.mxu1  ;;  %v3748_v47 = vadd.f32 %v6483_v61, %v8199_v24 }
 0x2fa   :  { %v3672_v4 = vpop.f32.mrf.mxu0 }
 0x2fb   :  { %v3934_v22 = vpop.f32.mrf.mxu1  ;;  %v8241_v35 = vadd.f32 %v6545_v28, %v3748_v47  ;;  %v3747_v60 = vadd.f32 %v3672_v4, %v8201_v48 }
 0x2fd   :  { %v8244_v16 = vadd.f32 %v3934_v22, %v3747_v60  ;;  %v6486_v0 = vpop.f32.mrf.mxu0 }
 0x2fe   :  { %v6548_v39 = vpop.f32.mrf.mxu1  ;;  %v3750_v50 = vadd.f32 %v6486_v0, %v8203_v40 }
 0x2ff   :  { %8657 = vst [vmem:[#allocation10_spill] sm:$0xff] %v8244_v16  ;;  %v3682_v6 = vpop.f32.mrf.mxu0 }
 0x300   :  { %v3944_v3 = vpop.f32.mrf.mxu1  ;;  %v8247_v10 = vadd.f32 %v6548_v39, %v3750_v50  ;;  %v3749_v58 = vadd.f32 %v3682_v6, %v8205_v12 }
 0x302   :  { %8658 = vst [vmem:[#allocation11_spill] sm:$0xff] %v8247_v10  ;;  %v8250_v34 = vadd.f32 %v3944_v3, %v3749_v58  ;;  %v6489_v24 = vpop.f32.mrf.mxu0 }
 0x303   :  { %v6551_v43 = vpop.f32.mrf.mxu1 }
 0x304   :  { %8659 = vst [vmem:[#allocation18_spill] sm:$0xff] %v8250_v34  ;;  %v3692_v29 = vpop.f32.mrf.mxu0 }
 0x305   :  { %v8252_v56 = vpop.f32.mrf.mxu1 }
 0x307   :  { %v6492_v48 = vpop.f32.mrf.mxu0 }
 0x308   :  { %v8254_v8 = vpop.f32.mrf.mxu1 }
 0x309   :  { %v3702_v63 = vpop.f32.mrf.mxu0 }
 0x30a   :  { %v8256_v1 = vpop.f32.mrf.mxu1  ;;  %v3753_v10 = vadd.f32 %v3702_v63, %v8213_v15 }
 0x30c   :  { %v6495_v40 = vpop.f32.mrf.mxu0 }
 0x30d   :  { %v8258_v53 = vpop.f32.mrf.mxu1 }
 0x30e   :  { %v3712_v19 = vpop.f32.mrf.mxu0 }
 0x30f   :  { %v8260_v21 = vpop.f32.mrf.mxu1 }
 0x312   :  { %v6498_v12 = vpop.f32.mrf.mxu0 }
 0x313   :  { %v8262_v7 = vpop.f32.mrf.mxu1 }
 0x314   :  { %v3722_v36 = vpop.f32.mrf.mxu0 }
 0x315   :  { %v8264_v37 = vpop.f32.mrf.mxu1 }
 0x317   :  { %v6501_v46 = vpop.f32.mrf.mxu0 }
 0x318   :  { %v6563_v62 = vpop.f32.mrf.mxu1  ;;  %v3760_v51 = vadd.f32 %v6501_v46, %v3498_v5 }
 0x319   :  { %v3732_v45 = vpop.f32.mrf.mxu0 }
 0x31a   :  { %v3994_v42 = vpop.f32.mrf.mxu1  ;;  %v8266_v31 = vadd.f32 %v6563_v62, %v3760_v51  ;;  %v3759_v55 = vadd.f32 %v3732_v45, %v8223_v49 }
 0x31c   :  { %8660 = vst [vmem:[#allocation13_spill] sm:$0xff] %v8266_v31  ;;  %v8269_v17 = vadd.f32 %v3994_v42, %v3759_v55  ;;  %v6598_v9 = vpop.f32.mrf.mxu0 }
 0x31d   :  { %v6660_v52 = vpop.f32.mrf.mxu1 }
 0x31e   :  { %8661 = vst [vmem:[#allocation12_spill] sm:$0xff] %v8269_v17  ;;  %v4166_v33 = vpop.f32.mrf.mxu0 }
 0x31f   :  { %v4428_v11 = vpop.f32.mrf.mxu1 }
 0x321   :  { %v6601_v18 = vpop.f32.mrf.mxu0 }
 0x322   :  { %v6663_v38 = vpop.f32.mrf.mxu1  ;;  %v4268_v15 = vadd.f32 %v6601_v18, %v8229_v30 }
 0x323   :  { %v4176_v13 = vpop.f32.mrf.mxu0 }
 0x324   :  { %v4438_v23 = vpop.f32.mrf.mxu1 }
 0x326   :  { %v6604_v61 = vpop.f32.mrf.mxu0 }
 0x327   :  { %v8271_v28 = vpop.f32.mrf.mxu1 }
 0x328   :  { %8662 = vst [vmem:[#allocation15_spill] sm:$0xff] %v8271_v28  ;;  %v4186_v5 = vpop.f32.mrf.mxu0 }
 0x329   :  { %v8273_v47 = vpop.f32.mrf.mxu1 }
 0x32a   :  { %8663 = vst [vmem:[#allocation17_spill] sm:$0xff] %v8273_v47 }
 0x32c   :  { %v6607_v4 = vpop.f32.mrf.mxu0 }
 0x32d   :  { %v8275_v22 = vpop.f32.mrf.mxu1 }
 0x32e   :  { %8664 = vst [vmem:[#allocation14_spill] sm:$0xff] %v8275_v22  ;;  %v4196_v49 = vpop.f32.mrf.mxu0 }
 0x32f   :  { %v8277_v60 = vpop.f32.mrf.mxu1 }
 0x330   :  { %8665 = vst [vmem:[#allocation16_spill] sm:$0xff] %v8277_v60 }
 0x331   :  { %v6610_v0 = vpop.f32.mrf.mxu0 }
 0x332   :  { %v8279_v39 = vpop.f32.mrf.mxu1 }
 0x333   :  { %8666 = vst [vmem:[#allocation36_spill] sm:$0xff] %v8279_v39  ;;  %v4206_v50 = vpop.f32.mrf.mxu0  ;;  %v3752_v39 = vadd.f32 %v6489_v24, %v8207_v44  ;;  %v3758_v44 = vadd.f32 %v6498_v12, %v8219_v41  ;;  %v4266_v24 = vadd.f32 %v6598_v9, %v8225_v14  ;;  %v4015_v41 = vadd.f32 %v8256_v1, %v3753_v10 }
 0x334   :  { %v8281_v6 = vpop.f32.mrf.mxu1  ;;  %v4270_v12 = vadd.f32 %v6604_v61, %v8235_v59  ;;  %v4272_v10 = vadd.f32 %v6607_v4, %v8241_v35  ;;  %v4530_v1 = vadd.f32 %v6663_v38, %v4268_v15  ;;  %v8335_v59 = vld [vmem:[%s8571_s4] ss:$0 sm:$0xff]  ;;  %v8675_v61 = vld [vmem:[#allocation15_spill] sm:$0xff] }
 0x335   :  { %8667 = vst [vmem:[#allocation21_spill] sm:$0xff] %v8281_v6  ;;  %v3751_v6 = vadd.f32 %v3692_v29, %v8209_v25  ;;  %v4014_v34 = vadd.f32 %v6551_v43, %v3752_v39  ;;  %v3757_v25 = vadd.f32 %v3722_v36, %v8221_v20  ;;  %v8672_v36 = vld [vmem:[#allocation10_spill] sm:$0xff]  ;;  %v8676_v4 = vld [vmem:[#allocation17_spill] sm:$0xff] }
 0x336   :  { %v6613_v3 = vpop.f32.mrf.mxu0 }
 0x337   :  { %v6675_v58 = vpop.f32.mrf.mxu1  ;;  %v4013_v43 = vadd.f32 %v8252_v56, %v3751_v6  ;;  %v4276_v29 = vadd.f32 %v6613_v3, %v4014_v34  ;;  %v4019_v30 = vadd.f32 %v8264_v37, %v3757_v25  ;;  %v8674_v37 = vld [vmem:[#allocation18_spill] sm:$0xff] }
 0x338   :  { %v4216_v46 = vpop.f32.mrf.mxu0 }
 0x339   :  { %v4478_v62 = vpop.f32.mrf.mxu1  ;;  %v4275_v14 = vadd.f32 %v4216_v46, %v4013_v43  ;;  %v4538_v9 = vadd.f32 %v6675_v58, %v4276_v29 }
 0x33b   :  { %v6616_v51 = vpop.f32.mrf.mxu0  ;;  %v4537_v18 = vadd.f32 %v4478_v62, %v4275_v14 }
 0x33c   :  { %v8283_v45 = vpop.f32.mrf.mxu1 }
 0x33d   :  { %8668 = vst [vmem:[#allocation32_spill] sm:$0xff] %v8283_v45  ;;  %v4226_v42 = vpop.f32.mrf.mxu0  ;;  %v3754_v45 = vadd.f32 %v6492_v48, %v8211_v54  ;;  %v4265_v54 = vadd.f32 %v4166_v33, %v8227_v26  ;;  %v4020_v26 = vadd.f32 %v8262_v7, %v3758_v44  ;;  %v8673_v7 = vld [vmem:[#allocation11_spill] sm:$0xff]  ;;  %v8680_v44 = vld [vmem:[#allocation21_spill] sm:$0xff] }
 0x33e   :  { %v8285_v55 = vpop.f32.mrf.mxu1  ;;  %v4274_v33 = vadd.f32 %v6610_v0, %v8673_v7  ;;  %v8677_v0 = vld [vmem:[#allocation14_spill] sm:$0xff] }
 0x33f   :  { %8669 = vst [vmem:[#allocation25_spill] sm:$0xff] %v8285_v55  ;;  %v3756_v55 = vadd.f32 %v6495_v40, %v8215_v32  ;;  %v4267_v32 = vadd.f32 %v4176_v13, %v8232_v2  ;;  %v4528_v40 = vadd.f32 %v6660_v52, %v4266_v24  ;;  %v4273_v52 = vadd.f32 %v4206_v50, %v8674_v37 }
 0x340   :  { %v6619_v17 = vpop.f32.mrf.mxu0  ;;  %v4534_v39 = vadd.f32 %v8677_v0, %v4272_v10 }
 0x341   :  { %v8287_v31 = vpop.f32.mrf.mxu1  ;;  %v4018_v20 = vadd.f32 %v8258_v53, %v3756_v55  ;;  %v4529_v53 = vadd.f32 %v4438_v23, %v4267_v32  ;;  %v8353_v25 = vadd.f32 %v8680_v44, %v4273_v52 }
 0x342   :  { %8670 = vst [vmem:[#allocation27_spill] sm:$0xff] %v8287_v31  ;;  %v4236_v60 = vpop.f32.mrf.mxu0 }
 0x343   :  { %v8289_v22 = vpop.f32.mrf.mxu1  ;;  %v4280_v35 = vadd.f32 %v6619_v17, %v4018_v20  ;;  %v8678_v17 = vld [vmem:[#allocation16_spill] sm:$0xff] }
 0x344   :  { %8671 = vst [vmem:[#allocation29_spill] sm:$0xff] %v8289_v22  ;;  %v3755_v22 = vadd.f32 %v3712_v19, %v8217_v57  ;;  %v4016_v57 = vadd.f32 %v8254_v8, %v3754_v45  ;;  %v4527_v19 = vadd.f32 %v4428_v11, %v4265_v54  ;;  %v4269_v8 = vadd.f32 %v4186_v5, %v8238_v27 }
 0x345   :  { %v4277_v11 = vadd.f32 %v4226_v42, %v4015_v41  ;;  %v4532_v5 = vadd.f32 %v8675_v61, %v4270_v12  ;;  %v8679_v42 = vld [vmem:[#allocation36_spill] sm:$0xff] }
 0x346   :  { %v8293_v47 = vpop.f32.mrf.mxu0  ;;  %v4017_v56 = vadd.f32 %v8260_v21, %v3755_v22  ;;  %v4271_v21 = vadd.f32 %v4196_v49, %v8672_v36  ;;  %v4278_v13 = vadd.f32 %v6616_v51, %v4016_v57  ;;  %v4531_v49 = vadd.f32 %v8676_v4, %v4269_v8  ;;  %v8682_v15 = vld [vmem:[#allocation25_spill] sm:$0xff] }
 0x347   :  { %v8295_v28 = vpop.f32.mrf.mxu1  ;;  %v8350_v55 = vadd.f32 %v8679_v42, %v4274_v33  ;;  %v4539_v32 = vadd.f32 %v8682_v15, %v4277_v11  ;;  %v4282_v7 = vadd.f32 %v8293_v47, %v4020_v26  ;;  %v8685_v11 = vld [vmem:[#allocation13_spill] sm:$0xff] }
 0x348   :  { %v8300_v16 = vpop.f32.mrf.mxu0  ;;  %v4279_v50 = vadd.f32 %v4236_v60, %v4017_v56  ;;  %v8347_v45 = vadd.f32 %v8678_v17, %v4271_v21  ;;  %v8681_v60 = vld [vmem:[#allocation32_spill] sm:$0xff] }
 0x349   :  { %v8302_v31 = vpop.f32.mrf.mxu1  ;;  %v4540_v24 = vadd.f32 %v8681_v60, %v4278_v13  ;;  %v8683_v29 = vld [vmem:[#allocation27_spill] sm:$0xff]  ;;  %v4281_v33 = vadd.f32 %v8300_v16, %v4019_v30  ;;  %v4544_v4 = vadd.f32 %v8295_v28, %v4282_v7 }
 0x34a   :  { %v4542_v57 = vadd.f32 %v8683_v29, %v4280_v35 }
 0x34b   :  { %v8312_v48 = vpop.f32.mrf.mxu0  ;;  %v8684_v10 = vld [vmem:[#allocation29_spill] sm:$0xff]  ;;  %v4543_v0 = vadd.f32 %v8302_v31, %v4281_v33 }
 0x34c   :  { %v8314_v63 = vpop.f32.mrf.mxu1  ;;  %v4541_v36 = vadd.f32 %v8684_v10, %v4279_v50  ;;  %v4284_v35 = vadd.f32 %v8312_v48, %v8685_v11 }
 0x34d   :  { %v8322_v2 = vpop.f32.mrf.mxu0 }
 0x34e   :  { %v8324_v34 = vpop.f32.mrf.mxu1  ;;  %v4546_v42 = vadd.f32 %v8314_v63, %v4284_v35 }
 0x350   :  { %v6722_v22 = vpop.f32.mrf.mxu0 }
 0x351   :  { %v6737_v27 = vpop.f32.mrf.mxu1  ;;  %v4790_v38 = vadd.f32 %v6722_v22, %v4528_v40 }
 0x352   :  { %v4800_v23 = vadd.f32 %v6737_v27, %v4538_v9  ;;  %v4690_v6 = vpop.f32.mrf.mxu0 }
 0x353   :  { %v4740_v3 = vpop.f32.mrf.mxu1  ;;  %v8341_v58 = vadd.f32 %v8335_v59, %v4790_v38  ;;  %v4789_v62 = vadd.f32 %v4690_v6, %v4527_v19  ;;  %v8686_v38 = vld [vmem:[#allocation12_spill] sm:$0xff] }
 0x354   :  { %v8344_v46 = vadd.f32 %v8335_v59, %v4800_v23  ;;  %v4799_v51 = vadd.f32 %v4740_v3, %v4537_v18  ;;  %v6725_v43 = vpop.f32.mrf.mxu0  ;;  %v4283_v23 = vadd.f32 %v8322_v2, %v8686_v38 }
 0x355   :  { %v6740_v54 = vpop.f32.mrf.mxu1  ;;  %v4898_v41 = vmul.f32 1.442695, %v8341_v58  ;;  %v8361_v14 = vadd.f32 %v8335_v59, %v4789_v62  ;;  %v4792_v40 = vadd.f32 %v6725_v43, %v4530_v1  ;;  %vm4877_vm5 = vcmp.gt.f32.partialorder %v8341_v58, 0.0 }
 0x356   :  { %v4918_v20 = vmul.f32 1.442695, %v8344_v46  ;;  %v8364_v56 = vadd.f32 %v8335_v59, %v4799_v51  ;;  %v4802_v19 = vadd.f32 %v6740_v54, %v4540_v24  ;;  %v4700_v12 = vpop.f32.mrf.mxu0  ;;  %v8401_v44 = vadd.f32 %v8324_v34, %v4283_v23 }
 0x357   :  { %v4750_v8 = vpop.f32.mrf.mxu1  ;;  %6827 = vpow2.f32 %v4898_v41  ;;  %v4791_v21 = vadd.f32 %v4700_v12, %v4529_v53  ;;  %v4896_v37 = vmul.f32 1.442695, %v8361_v14  ;;  %v8372_v1 = vadd.f32 %v8335_v59, %v4792_v40 }
 0x358   :  { %v4801_v9 = vadd.f32 %v4750_v8, %v4539_v32  ;;  %6829 = vpow2.f32 %v4918_v20  ;;  %v6728_v52 = vpop.f32.mrf.mxu0  ;;  %v4916_v13 = vmul.f32 1.442695, %v8364_v56  ;;  %v8375_v22 = vadd.f32 %v8335_v59, %v4802_v19 }
 0x359   :  { %v6743_v18 = vpop.f32.mrf.mxu1  ;;  %v8378_v53 = vadd.f32 %v8335_v59, %v4791_v21  ;;  %6831 = vpow2.f32 %v4896_v37  ;;  %v4794_v16 = vadd.f32 %v6728_v52, %v4532_v5  ;;  %v4902_v61 = vmul.f32 1.442695, %v8372_v1 }
 0x35a   :  { %v8381_v47 = vadd.f32 %v8335_v59, %v4801_v9  ;;  %v4804_v26 = vadd.f32 %v6743_v18, %v4542_v57  ;;  %v4710_v30 = vpop.f32.mrf.mxu0  ;;  %6833 = vpow2.f32 %v4916_v13  ;;  %v4922_v50 = vmul.f32 1.442695, %v8375_v22 }
 0x35b   :  { %v4760_v27 = vpop.f32.mrf.mxu1  ;;  %v4900_v5 = vmul.f32 1.442695, %v8378_v53  ;;  %6835 = vpow2.f32 %v4902_v61  ;;  %v8394_v48 = vadd.f32 %v8335_v59, %v4794_v16  ;;  %v4793_v51 = vadd.f32 %v4710_v30, %v4531_v49 }
 0x35c   :  { %v6731_v6 = vpop.f32.mrf.mxu0  ;;  %v4920_v3 = vmul.f32 1.442695, %v8381_v47  ;;  %v8397_v2 = vadd.f32 %v8335_v59, %v4804_v26  ;;  %6837 = vpow2.f32 %v4922_v50  ;;  %v4803_v28 = vadd.f32 %v4760_v27, %v4541_v36 }
 0x35d   :  { %v6746_v62 = vpop.f32.mrf.mxu1  ;;  %v4796_v17 = vadd.f32 %v6731_v6, %v4534_v39  ;;  %6839 = vpow2.f32 %v4900_v5  ;;  %v4906_v60 = vmul.f32 1.442695, %v8394_v48  ;;  %v8406_v43 = vadd.f32 %v8335_v59, %v4793_v51 }
 0x35e   :  { %v4720_v31 = vpop.f32.mrf.mxu0  ;;  %6841 = vpow2.f32 %v4920_v3  ;;  %v4926_v24 = vmul.f32 1.442695, %v8397_v2  ;;  %v8409_v54 = vadd.f32 %v8335_v59, %v4803_v28  ;;  %v4806_v63 = vadd.f32 %v6746_v62, %v4544_v4 }
 0x35f   :  { %6843 = vpow2.f32 %v4906_v60  ;;  %v8412_v49 = vadd.f32 %v8335_v59, %v4796_v17  ;;  %v4795_v34 = vadd.f32 %v4720_v31, %v8347_v45  ;;  %v4770_v39 = vpop.f32.mrf.mxu1  ;;  %vm4887_vm6 = vcmp.gt.f32.partialorder %v8344_v46, 0.0 }
 0x360   :  { %v6734_v15 = vpop.f32.mrf.mxu0  ;;  %6845 = vpow2.f32 %v4926_v24  ;;  %v4904_v32 = vmul.f32 1.442695, %v8406_v43  ;;  %vm4876_vm7 = vcmp.gt.f32.partialorder %v8361_v14, 0.0  ;;  %v4924_v29 = vmul.f32 1.442695, %v8409_v54 }
 0x361   :  { %v4910_v57 = vmul.f32 1.442695, %v8412_v49  ;;  %v8422_v41 = vadd.f32 %v8335_v59, %v4806_v63  ;;  %v8425_v45 = vadd.f32 %v8335_v59, %v4795_v34  ;;  %v4805_v40 = vadd.f32 %v4770_v39, %v4543_v0  ;;  %v6749_v36 = vpop.f32.mrf.mxu1 }
 0x362   :  { %6847 = vpow2.f32 %v4904_v32  ;;  %v4798_v19 = vadd.f32 %v6734_v15, %v8350_v55  ;;  %vm4886_vm8 = vcmp.gt.f32.partialorder %v8364_v56, 0.0  ;;  %vm4879_vm9 = vcmp.gt.f32.partialorder %v8372_v1, 0.0 }
 0x363   :  { %6849 = vpow2.f32 %v4924_v29  ;;  %v4930_v10 = vmul.f32 1.442695, %v8422_v41  ;;  %v4908_v9 = vmul.f32 1.442695, %v8425_v45  ;;  %vm4889_vm10 = vcmp.gt.f32.partialorder %v8375_v22, 0.0 }
 0x364   :  { %v6828_v20 = vpop.eup %6827  ;;  %6851 = vpow2.f32 %v4910_v57  ;;  %v8434_v55 = vadd.f32 %v8335_v59, %v4805_v40  ;;  %v8437_v37 = vadd.f32 %v8335_v59, %v4798_v19  ;;  %vm4878_vm11 = vcmp.gt.f32.partialorder %v8378_v53, 0.0 }
 0x365   :  { %v6830_v12 = vpop.eup %6829  ;;  %v5065_v8 = vadd.f32 -1.0, %v6828_v20  ;;  %6853 = vpow2.f32 %v4930_v10  ;;  %v4808_v16 = vadd.f32 %v6749_v36, %v4546_v42  ;;  %vm4888_vm12 = vcmp.gt.f32.partialorder %v8381_v47, 0.0 }
 0x366   :  { %v5075_v21 = vadd.f32 -1.0, %v6830_v12  ;;  %v6832_v7 = vpop.eup %6831  ;;  %6855 = vpow2.f32 %v4908_v9  ;;  %v4928_v27 = vmul.f32 1.442695, %v8434_v55  ;;  %vm4881_vm13 = vcmp.gt.f32.partialorder %v8394_v48, 0.0  ;;  %v4730_v9 = vpop.f32.mrf.mxu0 }
 0x367   :  { %v4957_v33 = vmul.f32 1.6732632, %v5065_v8  ;;  %v6834_v52 = vpop.eup %6833  ;;  %v5064_v13 = vadd.f32 -1.0, %v6832_v7  ;;  %vm4891_vm14 = vcmp.gt.f32.partialorder %v8397_v2, 0.0  ;;  %v4914_v6 = vmul.f32 1.442695, %v8437_v37 }
 0x368   :  { %v4967_v18 = vmul.f32 1.6732632, %v5075_v21  ;;  %v5074_v30 = vadd.f32 -1.0, %v6834_v52  ;;  %v6836_v11 = vpop.eup %6835  ;;  %6857 = vpow2.f32 %v4928_v27  ;;  %v8458_v3 = vadd.f32 %v8335_v59, %v4808_v16 }
 0x369   :  { %v4977_v26 = vsel %vm4877_vm5, %v8341_v58, %v4957_v33  ;;  %v4956_v23 = vmul.f32 1.6732632, %v5064_v13  ;;  %v6838_v61 = vpop.eup %6837  ;;  %v5067_v50 = vadd.f32 -1.0, %v6836_v11  ;;  %vm4880_vm15 = vcmp.gt.f32.partialorder %v8406_v43, 0.0 }
 0x36a   :  { %v4997_v35 = vmul.f32 1.050701, %v4977_v26  ;;  %v4987_v38 = vsel %vm4887_vm6, %v8344_v46, %v4967_v18  ;;  %v4966_v0 = vmul.f32 1.6732632, %v5074_v30  ;;  %v6840_v58 = vpop.eup %6839  ;;  %v5077_v46 = vadd.f32 -1.0, %v6838_v61  ;;  %v4780_v18 = vpop.f32.mrf.mxu1 }
 0x36b   :  { %v5007_v4 = vmul.f32 1.050701, %v4987_v38  ;;  %v4976_v5 = vsel %vm4876_vm7, %v8361_v14, %v4956_v23  ;;  %v6842_v62 = vpop.eup %6841  ;;  %v4959_v17 = vmul.f32 1.6732632, %v5067_v50  ;;  %v5066_v31 = vadd.f32 -1.0, %v6840_v58 }
 0x36c   :  { %5017 = vst [vmem:[%s8572_s5 + $0x8] sm:$0xff] %v4997_v35  ;;  %v4996_v51 = vmul.f32 1.050701, %v4976_v5  ;;  %v4986_v28 = vsel %vm4886_vm8, %v8364_v56, %v4966_v0  ;;  %v6844_v14 = vpop.eup %6843  ;;  %v4969_v60 = vmul.f32 1.6732632, %v5077_v46  ;;  %v5076_v24 = vadd.f32 -1.0, %v6842_v62 }
 0x36d   :  { %5027 = vst [vmem:[%s8572_s5 + $0x58] sm:$0xff] %v5007_v4  ;;  %v5006_v42 = vmul.f32 1.050701, %v4986_v28  ;;  %vm4890_vm0 = vcmp.gt.f32.partialorder %v8409_v54, 0.0  ;;  %6859 = vpow2.f32 %v4914_v6  ;;  %v6846_v63 = vpop.eup %6845  ;;  %v4979_v56 = vsel %vm4879_vm9, %v8372_v1, %v4959_v17 }
 0x36e   :  { %5016 = vst [vmem:[%s8572_s5] sm:$0xff] %v4996_v51  ;;  %v4958_v34 = vmul.f32 1.6732632, %v5066_v31  ;;  %v5069_v39 = vadd.f32 -1.0, %v6844_v14  ;;  %vm4883_vm1 = vcmp.gt.f32.partialorder %v8412_v49, 0.0  ;;  %v4999_v15 = vmul.f32 1.050701, %v4979_v56 }
 0x36f   :  { %5026 = vst [vmem:[%s8572_s5 + $0x50] sm:$0xff] %v5006_v42  ;;  %v4989_v32 = vsel %vm4889_vm10, %v8375_v22, %v4969_v60  ;;  %v4968_v29 = vmul.f32 1.6732632, %v5076_v24  ;;  %v5079_v57 = vadd.f32 -1.0, %v6846_v63  ;;  %vm4893_vm2 = vcmp.gt.f32.partialorder %v8422_v41, 0.0  ;;  %v6848_v20 = vpop.eup %6847 }
 0x370   :  { %v5009_v40 = vmul.f32 1.050701, %v4989_v32  ;;  %v4978_v1 = vsel %vm4878_vm11, %v8378_v53, %v4958_v34  ;;  %v4961_v19 = vmul.f32 1.6732632, %v5069_v39  ;;  %v4934_v12 = vmul.f32 1.442695, %v8458_v3  ;;  %v6850_v8 = vpop.eup %6849 }
 0x371   :  { %5019 = vst [vmem:[%s8572_s5 + $0x18] sm:$0xff] %v4999_v15  ;;  %v4998_v10 = vmul.f32 1.050701, %v4978_v1  ;;  %v4988_v22 = vsel %vm4888_vm12, %v8381_v47, %v4968_v29  ;;  %v4971_v36 = vmul.f32 1.6732632, %v5079_v57  ;;  %v5068_v21 = vadd.f32 -1.0, %v6848_v20  ;;  %v6852_v7 = vpop.eup %6851 }
 0x372   :  { %5029 = vst [vmem:[%s8572_s5 + $0x68] sm:$0xff] %v5009_v40  ;;  %v5008_v53 = vmul.f32 1.050701, %v4988_v22  ;;  %v4981_v33 = vsel %vm4881_vm13, %v8394_v48, %v4961_v19  ;;  %v5078_v52 = vadd.f32 -1.0, %v6850_v8  ;;  %6861 = vpow2.f32 %v4934_v12  ;;  %v6854_v13 = vpop.eup %6853 }
 0x373   :  { %5018 = vst [vmem:[%s8572_s5 + $0x10] sm:$0xff] %v4998_v10  ;;  %v5001_v47 = vmul.f32 1.050701, %v4981_v33  ;;  %v4991_v16 = vsel %vm4891_vm14, %v8397_v2, %v4971_v36  ;;  %v4960_v26 = vmul.f32 1.6732632, %v5068_v21  ;;  %v5071_v30 = vadd.f32 -1.0, %v6852_v7  ;;  %v6856_v27 = vpop.eup %6855 }
 0x374   :  { %5028 = vst [vmem:[%s8572_s5 + $0x60] sm:$0xff] %v5008_v53  ;;  %v5011_v48 = vmul.f32 1.050701, %v4991_v16  ;;  %v4970_v11 = vmul.f32 1.6732632, %v5078_v52  ;;  %v5081_v35 = vadd.f32 -1.0, %v6854_v13  ;;  %v4797_v38 = vadd.f32 %v4730_v9, %v8353_v25 }
 0x375   :  { %5021 = vst [vmem:[%s8572_s5 + $0x28] sm:$0xff] %v5001_v47  ;;  %v4980_v2 = vsel %vm4880_vm15, %v8406_v43, %v4960_v26  ;;  %v4963_v23 = vmul.f32 1.6732632, %v5071_v30  ;;  %v5070_v61 = vadd.f32 -1.0, %v6856_v27  ;;  %v4807_v4 = vadd.f32 %v4780_v18, %v8401_v44  ;;  %v6858_v5 = vpop.eup %6857 }
 0x376   :  { %5031 = vst [vmem:[%s8572_s5 + $0x78] sm:$0xff] %v5011_v48  ;;  %v5000_v0 = vmul.f32 1.050701, %v4980_v2  ;;  %v4990_v25 = vsel %vm4890_vm0, %v8409_v54, %v4970_v11  ;;  %v4973_v50 = vmul.f32 1.6732632, %v5081_v35  ;;  %v4864_v58 = vadd.f32 %v8335_v59, %v4797_v38 }
 0x377   :  { %v5010_v46 = vmul.f32 1.050701, %v4990_v25  ;;  %v4983_v43 = vsel %vm4883_vm1, %v8412_v49, %v4963_v23  ;;  %v4962_v6 = vmul.f32 1.6732632, %v5070_v61  ;;  %v4874_v44 = vadd.f32 %v8335_v59, %v4807_v4 }
 0x378   :  { %5020 = vst [vmem:[%s8572_s5 + $0x20] sm:$0xff] %v5000_v0  ;;  %v5003_v62 = vmul.f32 1.050701, %v4983_v43  ;;  %v4993_v54 = vsel %vm4893_vm2, %v8422_v41, %v4973_v50  ;;  %vm4882_vm3 = vcmp.gt.f32.partialorder %v8425_v45, 0.0  ;;  %v5080_v51 = vadd.f32 -1.0, %v6858_v5 }
 0x379   :  { %5030 = vst [vmem:[%s8572_s5 + $0x70] sm:$0xff] %v5010_v46  ;;  %v5013_v49 = vmul.f32 1.050701, %v4993_v54  ;;  %v4982_v28 = vsel %vm4882_vm3, %v8425_v45, %v4962_v6  ;;  %v4912_v59 = vmul.f32 1.442695, %v4864_v58  ;;  %vm4892_vm4 = vcmp.gt.f32.partialorder %v8434_v55, 0.0 }
 0x37a   :  { %v6860_v17 = vpop.eup %6859  ;;  %5023 = vst [vmem:[%s8572_s5 + $0x38] sm:$0xff] %v5003_v62  ;;  %v5002_v31 = vmul.f32 1.050701, %v4982_v28  ;;  %v4972_v14 = vmul.f32 1.6732632, %v5080_v51  ;;  %vm4885_vm5 = vcmp.gt.f32.partialorder %v8437_v37, 0.0 }
 0x37b   :  { %v4932_v42 = vmul.f32 1.442695, %v4874_v44  ;;  %5033 = vst [vmem:[%s8572_s5 + $0x88] sm:$0xff] %v5013_v49  ;;  %v5073_v41 = vadd.f32 -1.0, %v6860_v17  ;;  %6863 = vpow2.f32 %v4912_v59  ;;  %vm4895_vm6 = vcmp.gt.f32.partialorder %v8458_v3, 0.0 }
 0x37c   :  { %5022 = vst [vmem:[%s8572_s5 + $0x30] sm:$0xff] %v5002_v31  ;;  %v4992_v45 = vsel %vm4892_vm4, %v8434_v55, %v4972_v14  ;;  %vm4884_vm7 = vcmp.gt.f32.partialorder %v4864_v58, 0.0  ;;  %vm4894_vm8 = vcmp.gt.f32.partialorder %v4874_v44, 0.0 }
 0x37d   :  { %6865 = vpow2.f32 %v4932_v42  ;;  %v5012_v60 = vmul.f32 1.050701, %v4992_v45  ;;  %v4965_v24 = vmul.f32 1.6732632, %v5073_v41 }
 0x37f   :  { %v6862_v63 = vpop.eup %6861  ;;  %5032 = vst [vmem:[%s8572_s5 + $0x80] sm:$0xff] %v5012_v60  ;;  %v4985_v56 = vsel %vm4885_vm5, %v8437_v37, %v4965_v24 }
 0x380   :  { %v5005_v34 = vmul.f32 1.050701, %v4985_v56  ;;  %v5083_v39 = vadd.f32 -1.0, %v6862_v63 }
 0x382   :  { %5025 = vst [vmem:[%s8572_s5 + $0x48] sm:$0xff] %v5005_v34  ;;  %v4975_v15 = vmul.f32 1.6732632, %v5083_v39 }
 0x384   :  { %v4995_v55 = vsel %vm4895_vm6, %v8458_v3, %v4975_v15 }
 0x385   :  { %v5015_v32 = vmul.f32 1.050701, %v4995_v55 }
 0x387   :  { %5035 = vst [vmem:[%s8572_s5 + $0x98] sm:$0xff] %v5015_v32 }
 0x388   :  { %v6864_v29 = vpop.eup %6863 }
 0x389   :  { %v5072_v20 = vadd.f32 -1.0, %v6864_v29 }
 0x38a   :  { %v6866_v57 = vpop.eup %6865 }
 0x38b   :  { %v5082_v37 = vadd.f32 -1.0, %v6866_v57  ;;  %v4964_v40 = vmul.f32 1.6732632, %v5072_v20 }
 0x38d   :  { %v4974_v1 = vmul.f32 1.6732632, %v5082_v37  ;;  %v4984_v19 = vsel %vm4884_vm7, %v4864_v58, %v4964_v40 }
 0x38e   :  { %v5004_v12 = vmul.f32 1.050701, %v4984_v19 }
 0x38f   :  { %v4994_v8 = vsel %vm4894_vm8, %v4874_v44, %v4974_v1 }
 0x390   :  { %v5014_v10 = vmul.f32 1.050701, %v4994_v8  ;;  %5024 = vst [vmem:[%s8572_s5 + $0x40] sm:$0xff] %v5004_v12 }
 0x392   :  { %5034 = vst [vmem:[%s8572_s5 + $0x90] sm:$0xff] %v5014_v10 }
 0x393   :  { %5040 = vsyncpa [#allocation5], 1 }
 0x394   :  { %5041 = vsyncpa [#allocation7], 1 }

</bundles_post_ra>
